<compile_context>
chip_gen: v6e
topology: v6e:2x2x1
jax: 0.10.0
libtpu: 0.0.40
codegen_flags: <defaults>
</compile_context>

<pallas_src>
import jax
import jax.numpy as jnp
from jax.experimental import pallas as pl
from jax.experimental.pallas import tpu as pltpu


def _round_up(x, m):
    return (x + m - 1) // m * m


def _pick_cout_tile(c):
    """Largest 'nice' output-channel tile: lane-dense (multiple of 128) when
    the channel count allows, otherwise the full (small) channel count."""
    for t in (256, 128):
        if c % t == 0:
            return t
    return c


def _make_fused_bottleneck_kernel(H, W, C1, C_, TC2, WP, M, MA, add_residual):
    """Build the fused cv1 + cv2 (+residual) kernel body."""

    def conv3x3(src_ref, w_at, acc_ref, cin, cout):
        # 3x3 "same" conv on the zero-padded VMEM buffer `src_ref`
        # (shape (H+3, WP, cin), bf16) as 3 MXU matmuls; kw folded into N.
        for kh in range(3):
            # Leading-axis slice; the (rows, WP) merge is layout-free because
            # WP is a multiple of 16 (bf16 sublane tile).
            lhs = src_ref[kh:kh + H + 1].reshape((H + 1) * WP, cin)[:MA]
            p = jnp.dot(lhs, w_at(kh), preferred_element_type=jnp.float32)
            if kh == 0:
                acc_ref[...] = p          # no explicit zero-init needed
            else:
                acc_ref[...] += p
        # Combine the three kw taps: only 2 sublane-shifted adds in total.
        return (acc_ref[0:M, 0:cout]
                + acc_ref[1:1 + M, cout:2 * cout]
                + acc_ref[2:2 + M, 2 * cout:3 * cout])

    def kernel(*refs):
        if add_residual:
            (x_ref, w1_ref, s1_ref, b1_ref, w2_ref, s2_ref, b2_ref, res_ref,
             o_ref, xpad, hbuf, acc1, acc2) = refs
        else:
            (x_ref, w1_ref, s1_ref, b1_ref, w2_ref, s2_ref, b2_ref,
             o_ref, xpad, hbuf, acc1, acc2) = refs

        j = pl.program_id(1)

        # ---- cv1: run once per batch element; result stays resident in VMEM.
        @pl.when(j == 0)
        def _cv1():
            xpad[...] = jnp.zeros_like(xpad)            # VMEM-only halo
            hbuf[...] = jnp.zeros_like(hbuf)
            xpad[1:1 + H, 1:1 + W, :] = x_ref[0].astype(jnp.bfloat16)

            y = conv3x3(xpad, lambda kh: w1_ref[kh], acc1, C1, C_)
            y = y * s1_ref[...] + b1_ref[...]           # folded BatchNorm
            y = y * jax.nn.sigmoid(y)                   # SiLU
            y = y.reshape(H, WP, C_)[:, :W, :]
            hbuf[1:1 + H, 1:1 + W, :] = y.astype(jnp.bfloat16)

        # ---- cv2 on the resident intermediate, for this output-channel tile.
        y = conv3x3(hbuf, lambda kh: w2_ref[0, kh], acc2, C_, TC2)
        y = y * s2_ref[...] + b2_ref[...]               # folded BatchNorm
        y = y * jax.nn.sigmoid(y)                       # SiLU
        y = y.reshape(H, WP, TC2)[:, :W, :]
        if add_residual:
            y = y + res_ref[0].astype(jnp.float32)      # exact f32 shortcut
        o_ref[0] = y.astype(o_ref.dtype)

    return kernel


def fused_bottleneck_nhwc(x, w1, s1, b1, w2, s2, b2, add):
    """x: (N,H,W,C1) NHWC.  w1: (3,3,C1,C_), w2: (3,3,C_,C2) in HWIO.
    s*/b*: folded-BN scale/bias.  Returns (N,H,W,C2) in x.dtype."""
    N, H, W, C1 = x.shape
    C_ = w1.shape[-1]
    C2 = w2.shape[-1]
    if add:
        assert C1 == C2, "shortcut requires c1 == c2"

    TC2 = _pick_cout_tile(C2)          # cv2 output-channel tile
    NJ = C2 // TC2
    WP = _round_up(W + 2, 16)          # padded width, bf16-sublane aligned
    HP = H + 3                         # top+bottom halo + one spare zero row
    M = H * WP                         # rows of the padded-width output slab
    MA = M + 8                         # accumulator rows (room for kw shifts)

    # Pack weights: kw folded into the output (lane) axis, kw-major inside each
    # output-channel tile, pre-cast to bf16 (MXU fast path, half the DMA bytes).
    w1k = jnp.transpose(w1, (0, 2, 1, 3)).reshape(3, C1, 3 * C_)
    w1k = w1k.astype(jnp.bfloat16)
    w2k = jnp.transpose(w2.reshape(3, 3, C_, NJ, TC2), (3, 0, 2, 1, 4))
    w2k = w2k.reshape(NJ, 3, C_, 3 * TC2).astype(jnp.bfloat16)

    s1r = s1.reshape(1, C_).astype(jnp.float32)
    b1r = b1.reshape(1, C_).astype(jnp.float32)
    s2r = s2.reshape(1, C2).astype(jnp.float32)
    b2r = b2.reshape(1, C2).astype(jnp.float32)

    kernel = _make_fused_bottleneck_kernel(H, W, C1, C_, TC2, WP, M, MA, add)

    in_specs = [
        pl.BlockSpec((1, H, W, C1), lambda n, j: (n, 0, 0, 0)),         # x
        pl.BlockSpec((3, C1, 3 * C_), lambda n, j: (0, 0, 0)),          # w1 packed
        pl.BlockSpec((1, C_), lambda n, j: (0, 0)),                     # s1
        pl.BlockSpec((1, C_), lambda n, j: (0, 0)),                     # b1
        pl.BlockSpec((1, 3, C_, 3 * TC2), lambda n, j: (j, 0, 0, 0)),   # w2 tile
        pl.BlockSpec((1, TC2), lambda n, j: (0, j)),                    # s2 tile
        pl.BlockSpec((1, TC2), lambda n, j: (0, j)),                    # b2 tile
    ]
    args = [x, w1k, s1r, b1r, w2k, s2r, b2r]
    if add:
        # Residual read per output-channel tile (exact f32 shortcut add).
        in_specs.append(pl.BlockSpec((1, H, W, TC2), lambda n, j: (n, 0, 0, j)))
        args.append(x)

    return pl.pallas_call(
        kernel,
        out_shape=jax.ShapeDtypeStruct((N, H, W, C2), x.dtype),
        grid=(N, NJ),
        in_specs=in_specs,
        out_specs=pl.BlockSpec((1, H, W, TC2), lambda n, j: (n, 0, 0, j)),
        scratch_shapes=[
            pltpu.VMEM((HP, WP, C1), jnp.bfloat16),     # zero-padded x
            pltpu.VMEM((HP, WP, C_), jnp.bfloat16),     # zero-padded cv1 output
            pltpu.VMEM((MA, 3 * C_), jnp.float32),      # cv1 f32 accumulator
            pltpu.VMEM((MA, 3 * TC2), jnp.float32),     # cv2 f32 accumulator
        ],
        compiler_params=pltpu.CompilerParams(
            # batch axis shards across TensorCores on v7x; the channel-tile
            # axis must stay sequential (it reuses the resident cv1 buffer).
            dimension_semantics=("parallel", "arbitrary"),
            vmem_limit_bytes=64 * 1024 * 1024,
        ),
    )(*args)


def init_bottleneck_params(key, c1, c2, shortcut=True, e=0.5, eps=1e-3):
    """Deterministic synthetic params. Conv weights OIHW (PyTorch), BN folded."""
    c_ = int(c2 * e)
    ks = jax.random.split(key, 10)

    def conv_bn(kw_idx, cin, cout):
        w_oihw = jax.random.normal(ks[kw_idx], (cout, cin, 3, 3), jnp.float32) * 0.1
        gamma = 1.0 + 0.1 * jax.random.normal(ks[kw_idx + 1], (cout,), jnp.float32)
        beta = 0.1 * jax.random.normal(ks[kw_idx + 2], (cout,), jnp.float32)
        mean = 0.1 * jax.random.normal(ks[kw_idx + 3], (cout,), jnp.float32)
        var = jnp.abs(jax.random.normal(ks[kw_idx + 4], (cout,), jnp.float32)) + 0.5
        scale = gamma / jnp.sqrt(var + eps)
        bias = beta - mean * scale
        w_hwio = jnp.transpose(w_oihw, (2, 3, 1, 0))  # OIHW -> HWIO
        return w_hwio, scale, bias

    w1, s1, b1 = conv_bn(0, c1, c_)
    w2, s2, b2 = conv_bn(5, c_, c2)
    return {
        "w1": w1, "s1": s1, "b1": b1,
        "w2": w2, "s2": s2, "b2": b2,
        "add": bool(shortcut and c1 == c2),
    }


def bottleneck_forward(x_nchw, params):
    """Matches Bottleneck.forward on an NCHW input.  In a full network keep
    activations NHWC and call fused_bottleneck_nhwc directly so these
    transposes are paid once per model, not once per layer."""
    x = jnp.transpose(x_nchw, (0, 2, 3, 1))  # NCHW -> NHWC
    y = fused_bottleneck_nhwc(x, params["w1"], params["s1"], params["b1"],
                              params["w2"], params["s2"], params["b2"],
                              params["add"])
    return jnp.transpose(y, (0, 3, 1, 2))    # NHWC -> NCHW


# ------------------------- pure-JAX reference ---------------------------------
def _ref_bottleneck(x_nchw, params, matmul_dtype=jnp.bfloat16):
    """Reference with the same precision policy as the kernel when
    matmul_dtype=bf16 (bf16 products, f32 accumulation, f32 epilogue)."""

    def conv_bn_silu(x, w, s, b):
        y = jax.lax.conv_general_dilated(
            x.astype(matmul_dtype), w.astype(matmul_dtype), (1, 1), "SAME",
            dimension_numbers=("NHWC", "HWIO", "NHWC"),
            preferred_element_type=jnp.float32)
        y = y * s + b
        return y * jax.nn.sigmoid(y)

    x = jnp.transpose(x_nchw, (0, 2, 3, 1))
    h = conv_bn_silu(x, params["w1"], params["s1"], params["b1"])
    y = conv_bn_silu(h, params["w2"], params["s2"], params["b2"])
    if params["add"]:
        y = y + x
    return jnp.transpose(y, (0, 3, 1, 2))


if __name__ == "__main__":
    key = jax.random.PRNGKey(0)
    k_x, k_p = jax.random.split(key)

    # Small shapes, NCHW like the PyTorch module: batch=2, c1=c2=4, 16x16.
    c1 = c2 = 4
    x = jax.random.normal(k_x, (2, c1, 16, 16), jnp.float32)
    params = init_bottleneck_params(k_p, c1, c2, shortcut=True, e=0.5)

    fwd = jax.jit(lambda xx: bottleneck_forward(xx, params))
    out = jax.block_until_ready(fwd(x))
    assert out.shape == (2, c2, 16, 16)

    # Bit-comparable reference (same bf16-matmul / f32-accumulate policy).
    ref_bf16 = _ref_bottleneck(x, params, matmul_dtype=jnp.bfloat16)
    err = float(jnp.max(jnp.abs(out - ref_bf16)))
    assert err < 2e-3, f"mismatch vs bf16-matmul reference: {err}"

    # Loose sanity check against exact-f32 module semantics.
    ref_f32 = _ref_bottleneck(x, params, matmul_dtype=jnp.float32)
    err32 = float(jnp.max(jnp.abs(out - ref_f32)))
    assert err32 < 0.25, f"mismatch vs f32 reference: {err32}"

    print("KERNEL_OK")
</pallas_src>

<mosaic_0001>
module attributes {stable_mosaic.version = 11 : i64} {
  func.func @kernel(%arg0: i32, %arg1: i32, %arg2: memref<1x16x16x4xf32, #tpu.memory_space<vmem>>, %arg3: memref<3x4x6xbf16, #tpu.memory_space<vmem>>, %arg4: memref<1x2xf32, #tpu.memory_space<vmem>>, %arg5: memref<1x2xf32, #tpu.memory_space<vmem>>, %arg6: memref<1x3x2x12xbf16, #tpu.memory_space<vmem>>, %arg7: memref<1x4xf32, #tpu.memory_space<vmem>>, %arg8: memref<1x4xf32, #tpu.memory_space<vmem>>, %arg9: memref<1x16x16x4xf32, #tpu.memory_space<vmem>>, %arg10: memref<1x16x16x4xf32, #tpu.memory_space<vmem>>, %arg11: memref<19x32x4xbf16, #tpu.memory_space<vmem>>, %arg12: memref<19x32x2xbf16, #tpu.memory_space<vmem>>, %arg13: memref<520x6xf32, #tpu.memory_space<vmem>>, %arg14: memref<520x12xf32, #tpu.memory_space<vmem>>) attributes {dimension_semantics = [#tpu.dimension_semantics<parallel>, #tpu.dimension_semantics<arbitrary>], iteration_bounds = array<i64: 2, 1>, scalar_prefetch = 0 : i64, scratch_operands = 4 : i64, tpu.core_type = #tpu.core_type<tc>, window_params = [{transform_indices = @transform_0, window_bounds = array<i64: 1, 16, 16, 4>}, {pipeline_mode = #tpu.pipeline_mode<synchronous>, transform_indices = @transform_1, window_bounds = array<i64: 3, 4, 6>}, {pipeline_mode = #tpu.pipeline_mode<synchronous>, transform_indices = @transform_2, window_bounds = array<i64: 1, 2>}, {pipeline_mode = #tpu.pipeline_mode<synchronous>, transform_indices = @transform_3, window_bounds = array<i64: 1, 2>}, {transform_indices = @transform_4, window_bounds = array<i64: 1, 3, 2, 12>}, {transform_indices = @transform_5, window_bounds = array<i64: 1, 4>}, {transform_indices = @transform_6, window_bounds = array<i64: 1, 4>}, {transform_indices = @transform_7, window_bounds = array<i64: 1, 16, 16, 4>}, {transform_indices = @transform_8, window_bounds = array<i64: 1, 16, 16, 4>}]} {
    %c0_i32 = arith.constant 0 : i32
    %0 = arith.cmpi eq, %arg1, %c0_i32 : i32
    %1 = arith.extui %0 : i1 to i32
    %c0_i32_0 = arith.constant 0 : i32
    %2 = arith.cmpi ne, %1, %c0_i32_0 : i32
    scf.if %2 {
      %cst_48 = arith.constant 0.000000e+00 : bf16
      %53 = vector.broadcast %cst_48 : bf16 to vector<19x32x4xbf16>
      %c0_49 = arith.constant 0 : index
      %c0_50 = arith.constant 0 : index
      %c0_51 = arith.constant 0 : index
      %54 = vector.load %arg11[%c0_49, %c0_50, %c0_51] : memref<19x32x4xbf16, #tpu.memory_space<vmem>>, vector<19x32x4xbf16>
      tpu.vector_store %arg11[%c0_49, %c0_50, %c0_51], %53 {strides = array<i32>} : memref<19x32x4xbf16, #tpu.memory_space<vmem>>, vector<19x32x4xbf16>,
      %cst_52 = arith.constant 0.000000e+00 : bf16
      %55 = vector.broadcast %cst_52 : bf16 to vector<19x32x2xbf16>
      %c0_53 = arith.constant 0 : index
      %c0_54 = arith.constant 0 : index
      %c0_55 = arith.constant 0 : index
      %56 = vector.load %arg12[%c0_53, %c0_54, %c0_55] : memref<19x32x2xbf16, #tpu.memory_space<vmem>>, vector<19x32x2xbf16>
      tpu.vector_store %arg12[%c0_53, %c0_54, %c0_55], %55 {strides = array<i32>} : memref<19x32x2xbf16, #tpu.memory_space<vmem>>, vector<19x32x2xbf16>,
      %c0_56 = arith.constant 0 : index
      %c0_57 = arith.constant 0 : index
      %c0_58 = arith.constant 0 : index
      %c0_59 = arith.constant 0 : index
      %57 = vector.load %arg2[%c0_56, %c0_57, %c0_58, %c0_59] : memref<1x16x16x4xf32, #tpu.memory_space<vmem>>, vector<1x16x16x4xf32>
      %58 = vector.shape_cast %57 : vector<1x16x16x4xf32> to vector<16x16x4xf32>
      %59 = arith.truncf %58 : vector<16x16x4xf32> to vector<16x16x4xbf16>
      %c1_60 = arith.constant 1 : index
      %c1_61 = arith.constant 1 : index
      %c0_62 = arith.constant 0 : index
      %60 = vector.load %arg11[%c1_60, %c1_61, %c0_62] : memref<19x32x4xbf16, #tpu.memory_space<vmem>>, vector<16x16x4xbf16>
      tpu.vector_store %arg11[%c1_60, %c1_61, %c0_62], %59 {strides = array<i32>} : memref<19x32x4xbf16, #tpu.memory_space<vmem>>, vector<16x16x4xbf16>,
      %c0_63 = arith.constant 0 : index
      %c0_64 = arith.constant 0 : index
      %c0_65 = arith.constant 0 : index
      %61 = vector.load %arg11[%c0_63, %c0_64, %c0_65] : memref<19x32x4xbf16, #tpu.memory_space<vmem>>, vector<17x32x4xbf16>
      %62 = vector.shape_cast %61 : vector<17x32x4xbf16> to vector<544x4xbf16>
      %63 = vector.extract_strided_slice %62 {offsets = [0, 0], sizes = [520, 4], strides = [1, 1]} : vector<544x4xbf16> to vector<520x4xbf16>
      %c0_66 = arith.constant 0 : index
      %c0_67 = arith.constant 0 : index
      %c0_68 = arith.constant 0 : index
      %64 = vector.load %arg3[%c0_66, %c0_67, %c0_68] : memref<3x4x6xbf16, #tpu.memory_space<vmem>>, vector<1x4x6xbf16>
      %65 = vector.shape_cast %64 : vector<1x4x6xbf16> to vector<4x6xbf16>
      %cst_69 = arith.constant dense<0.000000e+00> : vector<520x6xf32>
      %66 = tpu.matmul %63, %65, %cst_69 {dimension_numbers = #tpu.dot_dimension_numbers<[1], [0], [0], [1], [0, 0, 1, 1], [], []>} : vector<520x4xbf16>, vector<4x6xbf16>, vector<520x6xf32> -> vector<520x6xf32>
      %c0_70 = arith.constant 0 : index
      %c0_71 = arith.constant 0 : index
      %67 = vector.load %arg13[%c0_70, %c0_71] : memref<520x6xf32, #tpu.memory_space<vmem>>, vector<520x6xf32>
      tpu.vector_store %arg13[%c0_70, %c0_71], %66 {strides = array<i32>} : memref<520x6xf32, #tpu.memory_space<vmem>>, vector<520x6xf32>,
      %c1_72 = arith.constant 1 : index
      %c0_73 = arith.constant 0 : index
      %c0_74 = arith.constant 0 : index
      %68 = vector.load %arg11[%c1_72, %c0_73, %c0_74] : memref<19x32x4xbf16, #tpu.memory_space<vmem>>, vector<17x32x4xbf16>
      %69 = vector.shape_cast %68 : vector<17x32x4xbf16> to vector<544x4xbf16>
      %70 = vector.extract_strided_slice %69 {offsets = [0, 0], sizes = [520, 4], strides = [1, 1]} : vector<544x4xbf16> to vector<520x4xbf16>
      %c1_75 = arith.constant 1 : index
      %c0_76 = arith.constant 0 : index
      %c0_77 = arith.constant 0 : index
      %71 = vector.load %arg3[%c1_75, %c0_76, %c0_77] : memref<3x4x6xbf16, #tpu.memory_space<vmem>>, vector<1x4x6xbf16>
      %72 = vector.shape_cast %71 : vector<1x4x6xbf16> to vector<4x6xbf16>
      %cst_78 = arith.constant dense<0.000000e+00> : vector<520x6xf32>
      %73 = tpu.matmul %70, %72, %cst_78 {dimension_numbers = #tpu.dot_dimension_numbers<[1], [0], [0], [1], [0, 0, 1, 1], [], []>} : vector<520x4xbf16>, vector<4x6xbf16>, vector<520x6xf32> -> vector<520x6xf32>
      %c0_79 = arith.constant 0 : index
      %c0_80 = arith.constant 0 : index
      %74 = vector.load %arg13[%c0_79, %c0_80] : memref<520x6xf32, #tpu.memory_space<vmem>>, vector<520x6xf32>
      %75 = arith.addf %74, %73 : vector<520x6xf32>
      %c0_81 = arith.constant 0 : index
      %c0_82 = arith.constant 0 : index
      %76 = vector.load %arg13[%c0_81, %c0_82] : memref<520x6xf32, #tpu.memory_space<vmem>>, vector<520x6xf32>
      tpu.vector_store %arg13[%c0_81, %c0_82], %75 {strides = array<i32>} : memref<520x6xf32, #tpu.memory_space<vmem>>, vector<520x6xf32>,
      %c2_83 = arith.constant 2 : index
      %c0_84 = arith.constant 0 : index
      %c0_85 = arith.constant 0 : index
      %77 = vector.load %arg11[%c2_83, %c0_84, %c0_85] : memref<19x32x4xbf16, #tpu.memory_space<vmem>>, vector<17x32x4xbf16>
      %78 = vector.shape_cast %77 : vector<17x32x4xbf16> to vector<544x4xbf16>
      %79 = vector.extract_strided_slice %78 {offsets = [0, 0], sizes = [520, 4], strides = [1, 1]} : vector<544x4xbf16> to vector<520x4xbf16>
      %c2_86 = arith.constant 2 : index
      %c0_87 = arith.constant 0 : index
      %c0_88 = arith.constant 0 : index
      %80 = vector.load %arg3[%c2_86, %c0_87, %c0_88] : memref<3x4x6xbf16, #tpu.memory_space<vmem>>, vector<1x4x6xbf16>
      %81 = vector.shape_cast %80 : vector<1x4x6xbf16> to vector<4x6xbf16>
      %cst_89 = arith.constant dense<0.000000e+00> : vector<520x6xf32>
      %82 = tpu.matmul %79, %81, %cst_89 {dimension_numbers = #tpu.dot_dimension_numbers<[1], [0], [0], [1], [0, 0, 1, 1], [], []>} : vector<520x4xbf16>, vector<4x6xbf16>, vector<520x6xf32> -> vector<520x6xf32>
      %c0_90 = arith.constant 0 : index
      %c0_91 = arith.constant 0 : index
      %83 = vector.load %arg13[%c0_90, %c0_91] : memref<520x6xf32, #tpu.memory_space<vmem>>, vector<520x6xf32>
      %84 = arith.addf %83, %82 : vector<520x6xf32>
      %c0_92 = arith.constant 0 : index
      %c0_93 = arith.constant 0 : index
      %85 = vector.load %arg13[%c0_92, %c0_93] : memref<520x6xf32, #tpu.memory_space<vmem>>, vector<520x6xf32>
      tpu.vector_store %arg13[%c0_92, %c0_93], %84 {strides = array<i32>} : memref<520x6xf32, #tpu.memory_space<vmem>>, vector<520x6xf32>,
      %c0_94 = arith.constant 0 : index
      %c0_95 = arith.constant 0 : index
      %86 = vector.load %arg13[%c0_94, %c0_95] : memref<520x6xf32, #tpu.memory_space<vmem>>, vector<512x2xf32>
      %c1_96 = arith.constant 1 : index
      %c2_97 = arith.constant 2 : index
      %87 = vector.load %arg13[%c1_96, %c2_97] : memref<520x6xf32, #tpu.memory_space<vmem>>, vector<512x2xf32>
      %88 = arith.addf %86, %87 : vector<512x2xf32>
      %c2_98 = arith.constant 2 : index
      %c4_99 = arith.constant 4 : index
      %89 = vector.load %arg13[%c2_98, %c4_99] : memref<520x6xf32, #tpu.memory_space<vmem>>, vector<512x2xf32>
      %90 = arith.addf %88, %89 : vector<512x2xf32>
      %c0_100 = arith.constant 0 : index
      %c0_101 = arith.constant 0 : index
      %91 = vector.load %arg4[%c0_100, %c0_101] : memref<1x2xf32, #tpu.memory_space<vmem>>, vector<1x2xf32>
      %92 = vector.broadcast %91 : vector<1x2xf32> to vector<512x2xf32>
      %93 = arith.mulf %90, %92 : vector<512x2xf32>
      %c0_102 = arith.constant 0 : index
      %c0_103 = arith.constant 0 : index
      %94 = vector.load %arg5[%c0_102, %c0_103] : memref<1x2xf32, #tpu.memory_space<vmem>>, vector<1x2xf32>
      %95 = vector.broadcast %94 : vector<1x2xf32> to vector<512x2xf32>
      %96 = arith.addf %93, %95 : vector<512x2xf32>
      %97 = arith.negf %96 : vector<512x2xf32>
      %98 = math.exp %97 : vector<512x2xf32>
      %cst_104 = arith.constant 1.000000e+00 : f32
      %99 = vector.broadcast %cst_104 : f32 to vector<512x2xf32>
      %100 = arith.addf %99, %98 : vector<512x2xf32>
      %101 = arith.divf %99, %100 : vector<512x2xf32>
      %102 = arith.mulf %96, %101 : vector<512x2xf32>
      %103 = vector.shape_cast %102 : vector<512x2xf32> to vector<16x32x2xf32>
      %104 = vector.extract_strided_slice %103 {offsets = [0, 0, 0], sizes = [16, 16, 2], strides = [1, 1, 1]} : vector<16x32x2xf32> to vector<16x16x2xf32>
      %105 = arith.truncf %104 : vector<16x16x2xf32> to vector<16x16x2xbf16>
      %c1_105 = arith.constant 1 : index
      %c1_106 = arith.constant 1 : index
      %c0_107 = arith.constant 0 : index
      %106 = vector.load %arg12[%c1_105, %c1_106, %c0_107] : memref<19x32x2xbf16, #tpu.memory_space<vmem>>, vector<16x16x2xbf16>
      tpu.vector_store %arg12[%c1_105, %c1_106, %c0_107], %105 {strides = array<i32>} : memref<19x32x2xbf16, #tpu.memory_space<vmem>>, vector<16x16x2xbf16>,
    } else {
    }
    %c0 = arith.constant 0 : index
    %c0_1 = arith.constant 0 : index
    %c0_2 = arith.constant 0 : index
    %3 = vector.load %arg12[%c0, %c0_1, %c0_2] : memref<19x32x2xbf16, #tpu.memory_space<vmem>>, vector<17x32x2xbf16>
    %4 = vector.shape_cast %3 : vector<17x32x2xbf16> to vector<544x2xbf16>
    %5 = vector.extract_strided_slice %4 {offsets = [0, 0], sizes = [520, 2], strides = [1, 1]} : vector<544x2xbf16> to vector<520x2xbf16>
    %c0_3 = arith.constant 0 : index
    %c0_4 = arith.constant 0 : index
    %c0_5 = arith.constant 0 : index
    %c0_6 = arith.constant 0 : index
    %6 = vector.load %arg6[%c0_3, %c0_4, %c0_5, %c0_6] : memref<1x3x2x12xbf16, #tpu.memory_space<vmem>>, vector<1x1x2x12xbf16>
    %7 = vector.shape_cast %6 : vector<1x1x2x12xbf16> to vector<2x12xbf16>
    %cst = arith.constant dense<0.000000e+00> : vector<520x12xf32>
    %8 = tpu.matmul %5, %7, %cst {dimension_numbers = #tpu.dot_dimension_numbers<[1], [0], [0], [1], [0, 0, 1, 1], [], []>} : vector<520x2xbf16>, vector<2x12xbf16>, vector<520x12xf32> -> vector<520x12xf32>
    %c0_7 = arith.constant 0 : index
    %c0_8 = arith.constant 0 : index
    %9 = vector.load %arg14[%c0_7, %c0_8] : memref<520x12xf32, #tpu.memory_space<vmem>>, vector<520x12xf32>
    tpu.vector_store %arg14[%c0_7, %c0_8], %8 {strides = array<i32>} : memref<520x12xf32, #tpu.memory_space<vmem>>, vector<520x12xf32>,
    %c1 = arith.constant 1 : index
    %c0_9 = arith.constant 0 : index
    %c0_10 = arith.constant 0 : index
    %10 = vector.load %arg12[%c1, %c0_9, %c0_10] : memref<19x32x2xbf16, #tpu.memory_space<vmem>>, vector<17x32x2xbf16>
    %11 = vector.shape_cast %10 : vector<17x32x2xbf16> to vector<544x2xbf16>
    %12 = vector.extract_strided_slice %11 {offsets = [0, 0], sizes = [520, 2], strides = [1, 1]} : vector<544x2xbf16> to vector<520x2xbf16>
    %c0_11 = arith.constant 0 : index
    %c1_12 = arith.constant 1 : index
    %c0_13 = arith.constant 0 : index
    %c0_14 = arith.constant 0 : index
    %13 = vector.load %arg6[%c0_11, %c1_12, %c0_13, %c0_14] : memref<1x3x2x12xbf16, #tpu.memory_space<vmem>>, vector<1x1x2x12xbf16>
    %14 = vector.shape_cast %13 : vector<1x1x2x12xbf16> to vector<2x12xbf16>
    %cst_15 = arith.constant dense<0.000000e+00> : vector<520x12xf32>
    %15 = tpu.matmul %12, %14, %cst_15 {dimension_numbers = #tpu.dot_dimension_numbers<[1], [0], [0], [1], [0, 0, 1, 1], [], []>} : vector<520x2xbf16>, vector<2x12xbf16>, vector<520x12xf32> -> vector<520x12xf32>
    %c0_16 = arith.constant 0 : index
    %c0_17 = arith.constant 0 : index
    %16 = vector.load %arg14[%c0_16, %c0_17] : memref<520x12xf32, #tpu.memory_space<vmem>>, vector<520x12xf32>
    %17 = arith.addf %16, %15 : vector<520x12xf32>
    %c0_18 = arith.constant 0 : index
    %c0_19 = arith.constant 0 : index
    %18 = vector.load %arg14[%c0_18, %c0_19] : memref<520x12xf32, #tpu.memory_space<vmem>>, vector<520x12xf32>
    tpu.vector_store %arg14[%c0_18, %c0_19], %17 {strides = array<i32>} : memref<520x12xf32, #tpu.memory_space<vmem>>, vector<520x12xf32>,
    %c2 = arith.constant 2 : index
    %c0_20 = arith.constant 0 : index
    %c0_21 = arith.constant 0 : index
    %19 = vector.load %arg12[%c2, %c0_20, %c0_21] : memref<19x32x2xbf16, #tpu.memory_space<vmem>>, vector<17x32x2xbf16>
    %20 = vector.shape_cast %19 : vector<17x32x2xbf16> to vector<544x2xbf16>
    %21 = vector.extract_strided_slice %20 {offsets = [0, 0], sizes = [520, 2], strides = [1, 1]} : vector<544x2xbf16> to vector<520x2xbf16>
    %c0_22 = arith.constant 0 : index
    %c2_23 = arith.constant 2 : index
    %c0_24 = arith.constant 0 : index
    %c0_25 = arith.constant 0 : index
    %22 = vector.load %arg6[%c0_22, %c2_23, %c0_24, %c0_25] : memref<1x3x2x12xbf16, #tpu.memory_space<vmem>>, vector<1x1x2x12xbf16>
    %23 = vector.shape_cast %22 : vector<1x1x2x12xbf16> to vector<2x12xbf16>
    %cst_26 = arith.constant dense<0.000000e+00> : vector<520x12xf32>
    %24 = tpu.matmul %21, %23, %cst_26 {dimension_numbers = #tpu.dot_dimension_numbers<[1], [0], [0], [1], [0, 0, 1, 1], [], []>} : vector<520x2xbf16>, vector<2x12xbf16>, vector<520x12xf32> -> vector<520x12xf32>
    %c0_27 = arith.constant 0 : index
    %c0_28 = arith.constant 0 : index
    %25 = vector.load %arg14[%c0_27, %c0_28] : memref<520x12xf32, #tpu.memory_space<vmem>>, vector<520x12xf32>
    %26 = arith.addf %25, %24 : vector<520x12xf32>
    %c0_29 = arith.constant 0 : index
    %c0_30 = arith.constant 0 : index
    %27 = vector.load %arg14[%c0_29, %c0_30] : memref<520x12xf32, #tpu.memory_space<vmem>>, vector<520x12xf32>
    tpu.vector_store %arg14[%c0_29, %c0_30], %26 {strides = array<i32>} : memref<520x12xf32, #tpu.memory_space<vmem>>, vector<520x12xf32>,
    %c0_31 = arith.constant 0 : index
    %c0_32 = arith.constant 0 : index
    %28 = vector.load %arg14[%c0_31, %c0_32] : memref<520x12xf32, #tpu.memory_space<vmem>>, vector<512x4xf32>
    %c1_33 = arith.constant 1 : index
    %c4 = arith.constant 4 : index
    %29 = vector.load %arg14[%c1_33, %c4] : memref<520x12xf32, #tpu.memory_space<vmem>>, vector<512x4xf32>
    %30 = arith.addf %28, %29 : vector<512x4xf32>
    %c2_34 = arith.constant 2 : index
    %c8 = arith.constant 8 : index
    %31 = vector.load %arg14[%c2_34, %c8] : memref<520x12xf32, #tpu.memory_space<vmem>>, vector<512x4xf32>
    %32 = arith.addf %30, %31 : vector<512x4xf32>
    %c0_35 = arith.constant 0 : index
    %c0_36 = arith.constant 0 : index
    %33 = vector.load %arg7[%c0_35, %c0_36] : memref<1x4xf32, #tpu.memory_space<vmem>>, vector<1x4xf32>
    %34 = vector.broadcast %33 : vector<1x4xf32> to vector<512x4xf32>
    %35 = arith.mulf %32, %34 : vector<512x4xf32>
    %c0_37 = arith.constant 0 : index
    %c0_38 = arith.constant 0 : index
    %36 = vector.load %arg8[%c0_37, %c0_38] : memref<1x4xf32, #tpu.memory_space<vmem>>, vector<1x4xf32>
    %37 = vector.broadcast %36 : vector<1x4xf32> to vector<512x4xf32>
    %38 = arith.addf %35, %37 : vector<512x4xf32>
    %39 = arith.negf %38 : vector<512x4xf32>
    %40 = math.exp %39 : vector<512x4xf32>
    %cst_39 = arith.constant 1.000000e+00 : f32
    %41 = vector.broadcast %cst_39 : f32 to vector<512x4xf32>
    %42 = arith.addf %41, %40 : vector<512x4xf32>
    %43 = arith.divf %41, %42 : vector<512x4xf32>
    %44 = arith.mulf %38, %43 : vector<512x4xf32>
    %45 = vector.shape_cast %44 : vector<512x4xf32> to vector<16x32x4xf32>
    %46 = vector.extract_strided_slice %45 {offsets = [0, 0, 0], sizes = [16, 16, 4], strides = [1, 1, 1]} : vector<16x32x4xf32> to vector<16x16x4xf32>
    %c0_40 = arith.constant 0 : index
    %c0_41 = arith.constant 0 : index
    %c0_42 = arith.constant 0 : index
    %c0_43 = arith.constant 0 : index
    %47 = vector.load %arg9[%c0_40, %c0_41, %c0_42, %c0_43] : memref<1x16x16x4xf32, #tpu.memory_space<vmem>>, vector<1x16x16x4xf32>
    %48 = vector.shape_cast %47 : vector<1x16x16x4xf32> to vector<16x16x4xf32>
    %49 = arith.addf %46, %48 : vector<16x16x4xf32>
    %c0_44 = arith.constant 0 : index
    %c0_45 = arith.constant 0 : index
    %c0_46 = arith.constant 0 : index
    %c0_47 = arith.constant 0 : index
    %50 = vector.load %arg10[%c0_44, %c0_45, %c0_46, %c0_47] : memref<1x16x16x4xf32, #tpu.memory_space<vmem>>, vector<1x16x16x4xf32>
    %51 = vector.shape_cast %50 : vector<1x16x16x4xf32> to vector<16x16x4xf32>
    %52 = vector.shape_cast %49 : vector<16x16x4xf32> to vector<1x16x16x4xf32>
    tpu.vector_store %arg10[%c0_44, %c0_45, %c0_46, %c0_47], %52 {strides = array<i32>} : memref<1x16x16x4xf32, #tpu.memory_space<vmem>>, vector<1x16x16x4xf32>,
    return
  }
  func.func @transform_0(%arg0: i32, %arg1: i32) -> (i32, i32, i32, i32) {
    %c0_i32 = arith.constant 0 : i32
    %c0_i32_0 = arith.constant 0 : i32
    %c0_i32_1 = arith.constant 0 : i32
    %c0_i32_2 = arith.constant 0 : i32
    return %arg0, %c0_i32, %c0_i32_0, %c0_i32_1 : i32, i32, i32, i32
  }
  func.func @transform_1(%arg0: i32, %arg1: i32) -> (i32, i32, i32) {
    %c0_i32 = arith.constant 0 : i32
    %c0_i32_0 = arith.constant 0 : i32
    %c0_i32_1 = arith.constant 0 : i32
    %c0_i32_2 = arith.constant 0 : i32
    return %c0_i32, %c0_i32_0, %c0_i32_1 : i32, i32, i32
  }
  func.func @transform_2(%arg0: i32, %arg1: i32) -> (i32, i32) {
    %c0_i32 = arith.constant 0 : i32
    %c0_i32_0 = arith.constant 0 : i32
    %c0_i32_1 = arith.constant 0 : i32
    return %c0_i32, %c0_i32_0 : i32, i32
  }
  func.func @transform_3(%arg0: i32, %arg1: i32) -> (i32, i32) {
    %c0_i32 = arith.constant 0 : i32
    %c0_i32_0 = arith.constant 0 : i32
    %c0_i32_1 = arith.constant 0 : i32
    return %c0_i32, %c0_i32_0 : i32, i32
  }
  func.func @transform_4(%arg0: i32, %arg1: i32) -> (i32, i32, i32, i32) {
    %c0_i32 = arith.constant 0 : i32
    %c0_i32_0 = arith.constant 0 : i32
    %c0_i32_1 = arith.constant 0 : i32
    %c0_i32_2 = arith.constant 0 : i32
    return %arg1, %c0_i32, %c0_i32_0, %c0_i32_1 : i32, i32, i32, i32
  }
  func.func @transform_5(%arg0: i32, %arg1: i32) -> (i32, i32) {
    %c0_i32 = arith.constant 0 : i32
    %c0_i32_0 = arith.constant 0 : i32
    return %c0_i32, %arg1 : i32, i32
  }
  func.func @transform_6(%arg0: i32, %arg1: i32) -> (i32, i32) {
    %c0_i32 = arith.constant 0 : i32
    %c0_i32_0 = arith.constant 0 : i32
    return %c0_i32, %arg1 : i32, i32
  }
  func.func @transform_7(%arg0: i32, %arg1: i32) -> (i32, i32, i32, i32) {
    %c0_i32 = arith.constant 0 : i32
    %c0_i32_0 = arith.constant 0 : i32
    %c0_i32_1 = arith.constant 0 : i32
    return %arg0, %c0_i32, %c0_i32_0, %arg1 : i32, i32, i32, i32
  }
  func.func @transform_8(%arg0: i32, %arg1: i32) -> (i32, i32, i32, i32) {
    %c0_i32 = arith.constant 0 : i32
    %c0_i32_0 = arith.constant 0 : i32
    %c0_i32_1 = arith.constant 0 : i32
    return %arg0, %c0_i32, %c0_i32_0, %arg1 : i32, i32, i32, i32
  }
}

</mosaic_0001>

<bundles_post_ra>
// kernel: _lambda_.1
= control target key start
LH: loop header
LB: loop body
LE: loop exit
PB: predicated region body
PF: predicated region fallthrough
CT: control target
= control target key end

     0   :  { %s10204_s27 = smov 0   ;;  %s10206_s28 = smov 0   ;;  %s12497_s0 = inlined_call_operand.vmem [shape: f32[2,16,16,4], index: 0, kind: input, shape index: {}, may-alias: {0,7}]   ;;  %s12498_s1 = inlined_call_operand.vmem [shape: bf16[3,4,6], index: 1, kind: input, shape index: {}]   ;;  %s12499_s2 = inlined_call_operand.vmem [shape: f32[1,2], index: 2, kind: input, shape index: {}]   ;;  %s12500_s3 = inlined_call_operand.vmem [shape: f32[1,2], index: 3, kind: input, shape index: {}]   ;;  %s12501_s4 = inlined_call_operand.vmem [shape: bf16[1,3,2,12], index: 4, kind: input, shape index: {}]   ;;  %s12502_s5 = inlined_call_operand.vmem [shape: f32[1,4], index: 5, kind: input, shape index: {}]   ;;  %s12503_s6 = inlined_call_operand.vmem [shape: f32[1,4], index: 6, kind: input, shape index: {}]   ;;  %s12504_s7 = inlined_call_operand.vmem [shape: f32[2,16,16,4], index: 7, kind: input, shape index: {}, may-alias: {0,7}]   ;;  %s12505_s8 = inlined_call_operand.vmem [shape: f32[2,16,16,4], index: 8, kind: output, shape index: {}]  }
   0x1   :  { %s10208_s29 = smov 0  }
   0x2 LB: > { %s30_s30 = sadd.s32 1, %s10147_s28  ;;  %p8023_p0 = scmp.ge.s32.totalorder %s10151_s29, 1  ;;  %s10151_s29 = sphi %s10208_s29, %s18_s29   ;;  %s10147_s28 = sphi %s10206_s28, %s12517_s28   ;;  %s10143_s27 = sphi %s10204_s27, %s12516_s27  }
   0x3   : > { %p32_p1 = scmp.ge.s32.totalorder %s30_s30, 2  ;;  %p316_p2 = scmp.lt.s32.totalorder %s10151_s29, 3 }
   0x5   : > { %s12519_s30 = smov (%p32_p1, %s30_s30), 0  ;;  %p317_p3 = pnand %p8023_p0, %p316_p2 }
   0x6   : > { %p371_p4 = scmp.lt.s32.totalorder (!%p317_p3), %s10143_s27, 1  ;;  %s10156_s21 = smov (!%p317_p3), 124  }
   0x7   : > { %320 = sbr.rel (%p317_p3) target bundleno = 1563 (0x61b), region = 52  ;;  %s10157_s22 = smov (!%p317_p3), 126  }
   0xc   : > { %v1195_v0 = vld [vmem:[%s12498_s1] sm:$0x3]  ;;  %vm1459_vm0 = vcmask 1041408   ;;  %vm407_vm1 = vcmask 27648   ;;  %v10153_v1 = vmov 0.0   ;;  %vm10154_vm2 = vmmov 0  }
   0xd   : > { %8835 = vmatprep.subr.bf16.mxu0 %v10153_v1  ;;  %v1461_v2 = vsel %vm1459_vm0, %v1195_v0, 0  ;;  %8837 = vmatprep.mubr.msk.bf16.mxu0 %vm10154_vm2, %v10153_v1  ;;  %v10155_v3 = vmov 0   ;;  %v8128_v4 = vld [vmem:[%s12498_s1 + $0x2] sm:$0x3]  ;;  %s12521_s27 = smov (!%p371_p4, %s10143_s27), 1  ;;  %vm1359_vm3 = vcmask 31744  }
   0xe   : > { %8836 = vmatpush3.bf16.msra.mxu0 %v1461_v2  ;;  %408 = vst.msk [vmem:[#allocation2] sm:$0xf] %vm407_vm1, %v10155_v3  ;;  %409 = vst.msk [vmem:[#allocation2 + $0x4] sm:$0xf] %vm407_vm1, %v10155_v3  ;;  %8969 = vmatprep.subr.bf16.mxu1 %v10153_v1  ;;  %v2155_v5 = vsel %vm1459_vm0, %v8128_v4, 0  ;;  %s10392_s15 = sshll.u32 %s12521_s27, 8 }
   0xf   : > { %410 = vst.msk [vmem:[#allocation2 + $0x8] sm:$0xf] %vm407_vm1, %v10155_v3  ;;  %411 = vst.msk [vmem:[#allocation2 + $0xc] sm:$0xf] %vm407_vm1, %v10155_v3  ;;  %9103 = vmatprep.subr.bf16.mxu0 %v10153_v1  ;;  %8971 = vmatprep.mubr.msk.bf16.mxu1 %vm10154_vm2, %v10153_v1  ;;  %v8195_v6 = vld [vmem:[%s12498_s1 + $0x4] sm:$0x3]  ;;  %s10399_s18 = scalar_lea.vmem %s12497_s0, %s10392_s15  ;;  %s12171_s10 = scalar_lea.vmem %s12504_s7, %s10392_s15 }
  0x10   : > { %412 = vst.msk [vmem:[#allocation2 + $0x10] sm:$0xf] %vm407_vm1, %v10155_v3  ;;  %413 = vst.msk [vmem:[#allocation2 + $0x14] sm:$0xf] %vm407_vm1, %v10155_v3  ;;  %8970 = vmatpush3.bf16.msra.mxu1 %v2155_v5  ;;  %vm689_vm4 = vsmask.f32 256  ;;  %s12186_s13 = scalar_lea.vmem %s12505_s8, %s10392_s15 }
  0x11   : > { %414 = vst.msk [vmem:[#allocation2 + $0x18] sm:$0xf] %vm407_vm1, %v10155_v3  ;;  %415 = vst.msk [vmem:[#allocation2 + $0x1c] sm:$0xf] %vm407_vm1, %v10155_v3  ;;  %9237 = vmatprep.subr.bf16.mxu1 %v10153_v1  ;;  %v2979_v7 = vsel %vm1459_vm0, %v8195_v6, 0  ;;  %v561_v8 = vld [vmem:[%s10399_s18] sm:$0xff] }
  0x12   : > { %416 = vst.msk [vmem:[#allocation2 + $0x20] sm:$0xf] %vm407_vm1, %v10155_v3  ;;  %417 = vst.msk [vmem:[#allocation2 + $0x24] sm:$0xf] %vm407_vm1, %v10155_v3  ;;  %v562_v9 = vld [vmem:[%s10399_s18 + $0x8] sm:$0xff]  ;;  %v563_v10 = vld [vmem:[%s10399_s18 + $0x10] sm:$0xff]  ;;  %v8567_v11 = vpack.c.bf16 %v561_v8, %v561_v8 }
  0x13   : > { %418 = vst.msk [vmem:[#allocation2 + $0x28] sm:$0xf] %vm407_vm1, %v10155_v3  ;;  %419 = vst.msk [vmem:[#allocation2 + $0x2c] sm:$0xf] %vm407_vm1, %v10155_v3  ;;  %vm690_vm5 = vsmask.f32 4368  ;;  %v8568_v12 = vpack.c.bf16 %v562_v9, %v562_v9  ;;  %v8569_v14 = vpack.c.bf16 %v563_v10, %v563_v10 }
  0x14   : > { %420 = vst.msk [vmem:[#allocation2 + $0x30] sm:$0xf] %vm407_vm1, %v10155_v3  ;;  %421 = vst.msk [vmem:[#allocation2 + $0x34] sm:$0xf] %vm407_vm1, %v10155_v3  ;;  %vm1014_vm6 = vsmask.f32 7938 }
  0x15   : > { %422 = vst.msk [vmem:[#allocation2 + $0x38] sm:$0xf] %vm407_vm1, %v10155_v3  ;;  %423 = vst.msk [vmem:[#allocation2 + $0x3c] sm:$0xf] %vm407_vm1, %v10155_v3  ;;  %v564_v13 = vld [vmem:[%s10399_s18 + $0x18] sm:$0xff]  ;;  %v565_v15 = vld [vmem:[%s10399_s18 + $0x20] sm:$0xff] }
  0x16   : > { %424 = vst.msk [vmem:[#allocation2 + $0x40] sm:$0xf] %vm407_vm1, %v10155_v3  ;;  %425 = vst.msk [vmem:[#allocation2 + $0x44] sm:$0xf] %vm407_vm1, %v10155_v3  ;;  %v9669_v16 = vld [vmem:[#allocation2] sm:$0xff]   ;;  %vm1020_vm7 = vcmask 24576   ;;  %v8570_v17 = vpack.c.bf16 %v564_v13, %v564_v13  ;;  %v8571_v20 = vpack.c.bf16 %v565_v15, %v565_v15 }
  0x17   : > { %426 = vst.msk [vmem:[#allocation2 + $0x48] sm:$0xf] %vm407_vm1, %v10155_v3  ;;  %427 = vst.msk [vmem:[#allocation2 + $0x4c] sm:$0xf] %vm407_vm1, %v10155_v3  ;;  %v693_v18 = vshrl.u32 %v8567_v11, 16  ;;  %v566_v19 = vld [vmem:[%s10399_s18 + $0x28] sm:$0xff]  ;;  %8838 = vmatmul.mubr.msk.bf16.vlgmr.msra.gmra.mxu0 %vm1359_vm3, %v9669_v16 }
  0x18   : > { %428 = vst.msk [vmem:[#allocation2 + $0x50] sm:$0xf] %vm407_vm1, %v10155_v3  ;;  %429 = vst.msk [vmem:[#allocation2 + $0x54] sm:$0xf] %vm407_vm1, %v10155_v3  ;;  %v696_v21 = vshll.u32 %v8567_v11, 16  ;;  %v701_v22 = vshrl.u32 %v8568_v12, 16  ;;  %9104 = vmatpush3.bf16.msra.mxu0 %v2979_v7  ;;  %8841 = vmatprep.mubr.msk.bf16.mxu0 %vm10154_vm2, %v10153_v1  ;;  %v8572_v34 = vpack.c.bf16 %v566_v19, %v566_v19 }
  0x19   : > { %430 = vst.msk [vmem:[#allocation2 + $0x58] sm:$0xf] %vm407_vm1, %v10155_v3  ;;  %431 = vst.msk [vmem:[#allocation2 + $0x5c] sm:$0xf] %vm407_vm1, %v10155_v3  ;;  %v704_v23 = vshll.u32 %v8568_v12, 16  ;;  %v710_v25 = vshrl.u32 %v8569_v14, 16  ;;  %9371 = vmatprep.subr.bf16.mxu0 %v10153_v1 }
  0x1a   : > { %432 = vst.msk [vmem:[#allocation2 + $0x60] sm:$0xf] %vm407_vm1, %v10155_v3  ;;  %433 = vst.msk [vmem:[#allocation2 + $0x64] sm:$0xf] %vm407_vm1, %v10155_v3  ;;  %v1016_v24 = vld [vmem:[#allocation2 + $0x10] sm:$0xf] }
  0x1b   : > { %434 = vst.msk [vmem:[#allocation2 + $0x68] sm:$0xf] %vm407_vm1, %v10155_v3  ;;  %435 = vst.msk [vmem:[#allocation2 + $0x6c] sm:$0xf] %vm407_vm1, %v10155_v3  ;;  %v695_v26 = vrot.slane %v693_v18, 7  ;;  %v713_v29 = vshll.u32 %v8569_v14, 16 }
  0x1c   : > { %436 = vst.msk [vmem:[#allocation2 + $0x70] sm:$0xf] %vm407_vm1, %v10155_v3  ;;  %437 = vst.msk [vmem:[#allocation2 + $0x74] sm:$0xf] %vm407_vm1, %v10155_v3  ;;  %v1022_v28 = vld [vmem:[#allocation2 + $0x18] sm:$0x1] }
  0x1d   : > { %438 = vst.msk [vmem:[#allocation2 + $0x78] sm:$0xf] %vm407_vm1, %v10155_v3  ;;  %439 = vst.msk [vmem:[#allocation2 + $0x7c] sm:$0xf] %vm407_vm1, %v10155_v3  ;;  %v703_v30 = vrot.slane %v701_v22, 7  ;;  %v712_v32 = vrot.slane %v710_v25, 7  ;;  %v698_v37 = vor.u32 %v696_v21, %v695_v26 }
  0x1e   : > { %440 = vst.msk [vmem:[#allocation2 + $0x80] sm:$0xf] %vm407_vm1, %v10155_v3  ;;  %441 = vst.msk [vmem:[#allocation2 + $0x84] sm:$0xf] %vm407_vm1, %v10155_v3  ;;  %v718_v33 = vshrl.u32 %v8570_v17, 16  ;;  %v9670_v35 = vld [vmem:[#allocation2 + $0x8] sm:$0xff]  }
  0x1f   : > { %442 = vst.msk [vmem:[#allocation2 + $0x88] sm:$0xf] %vm407_vm1, %v10155_v3  ;;  %443 = vst.msk [vmem:[#allocation2 + $0x8c] sm:$0xf] %vm407_vm1, %v10155_v3  ;;  %v699_v38 = vrot.slane %v695_v26, 4  ;;  %v721_v39 = vshll.u32 %v8570_v17, 16  ;;  %v706_v42 = vor.u32 %v704_v23, %v703_v30  ;;  %v715_v44 = vor.u32 %v713_v29, %v712_v32  ;;  %8842 = vmatmul.mubr.msk.bf16.gmra.mxu0 %vm1359_vm3, %v9670_v35 }
  0x20   : > { %444 = vst.msk [vmem:[#allocation2 + $0x90] sm:$0xf] %vm407_vm1, %v10155_v3  ;;  %445 = vst.msk [vmem:[#allocation2 + $0x94] sm:$0xf] %vm407_vm1, %v10155_v3  ;;  %v1025_v40 = vld [vmem:[#allocation2 + $0x20] sm:$0xf]  ;;  %8845 = vmatprep.mubr.msk.bf16.mxu0 %vm10154_vm2, %v10153_v1 }
  0x21   : > { %446 = vst.msk [vmem:[#allocation2 + $0x98] sm:$0xf] %vm407_vm1, %v10155_v3  ;;  %447 = vst.msk [vmem:[#allocation2 + $0x9c] sm:$0xf] %vm407_vm1, %v10155_v3  ;;  %v727_v41 = vshrl.u32 %v8571_v20, 16  ;;  %v708_v43 = vrot.slane %v703_v30, 4 }
  0x22   : > { %448 = vst.msk [vmem:[#allocation2 + $0xa0] sm:$0xf] %vm407_vm1, %v10155_v3  ;;  %449 = vst.msk [vmem:[#allocation2 + $0xa4] sm:$0xf] %vm407_vm1, %v10155_v3  ;;  %v716_v45 = vrot.slane %v712_v32, 4  ;;  %v720_v47 = vrot.slane %v718_v33, 7 }
  0x23   : > { %450 = vst.msk [vmem:[#allocation2 + $0xa8] sm:$0xf] %vm407_vm1, %v10155_v3  ;;  %451 = vst.msk [vmem:[#allocation2 + $0xac] sm:$0xf] %vm407_vm1, %v10155_v3  ;;  %v1029_v48 = vld [vmem:[#allocation2 + $0x28] sm:$0x1] }
  0x24   : > { %452 = vst.msk [vmem:[#allocation2 + $0xb0] sm:$0xf] %vm407_vm1, %v10155_v3  ;;  %453 = vst.msk [vmem:[#allocation2 + $0xb4] sm:$0xf] %vm407_vm1, %v10155_v3  ;;  %v729_v49 = vrot.slane %v727_v41, 7  ;;  %v730_v50 = vshll.u32 %v8571_v20, 16  ;;  %v723_v58 = vor.u32 %v721_v39, %v720_v47 }
  0x25   : > { %454 = vst.msk [vmem:[#allocation2 + $0xb8] sm:$0xf] %vm407_vm1, %v10155_v3  ;;  %455 = vst.msk [vmem:[#allocation2 + $0xbc] sm:$0xf] %vm407_vm1, %v10155_v3  ;;  %v567_v51 = vld [vmem:[%s10399_s18 + $0x30] sm:$0xff]  ;;  %v735_v55 = vshrl.u32 %v8572_v34, 16 }
  0x26   : > { %456 = vst.msk [vmem:[#allocation2 + $0xc0] sm:$0xf] %vm407_vm1, %v10155_v3  ;;  %457 = vst.msk [vmem:[#allocation2 + $0xc4] sm:$0xf] %vm407_vm1, %v10155_v3  ;;  %v1032_v56 = vld [vmem:[#allocation2 + $0x30] sm:$0xf]  ;;  %v732_v60 = vor.u32 %v730_v50, %v729_v49  ;;  %v8573_v0 = vpack.c.bf16 %v567_v51, %v567_v51 }
  0x27   : > { %458 = vst.msk [vmem:[#allocation2 + $0xc8] sm:$0xf] %vm407_vm1, %v10155_v3  ;;  %459 = vst.msk [vmem:[#allocation2 + $0xcc] sm:$0xf] %vm407_vm1, %v10155_v3  ;;  %v568_v57 = vld [vmem:[%s10399_s18 + $0x38] sm:$0xff]  ;;  %v725_v59 = vrot.slane %v720_v47, 4 }
  0x28   : > { %460 = vst.msk [vmem:[#allocation2 + $0xd0] sm:$0xf] %vm407_vm1, %v10155_v3  ;;  %461 = vst.msk [vmem:[#allocation2 + $0xd4] sm:$0xf] %vm407_vm1, %v10155_v3  ;;  %v733_v61 = vrot.slane %v729_v49, 4  ;;  %v737_v62 = vrot.slane %v735_v55, 7  ;;  %v8574_v2 = vpack.c.bf16 %v568_v57, %v568_v57 }
  0x29   : > { %462 = vst.msk [vmem:[#allocation2 + $0xd8] sm:$0xf] %vm407_vm1, %v10155_v3  ;;  %463 = vst.msk [vmem:[#allocation2 + $0xdc] sm:$0xf] %vm407_vm1, %v10155_v3  ;;  %v738_v63 = vshll.u32 %v8572_v34, 16  ;;  %v569_v8 = vld [vmem:[%s10399_s18 + $0x40] sm:$0xff] }
  0x2a   : > { %464 = vst.msk [vmem:[#allocation2 + $0xe0] sm:$0xf] %vm407_vm1, %v10155_v3  ;;  %465 = vst.msk [vmem:[#allocation2 + $0xe4] sm:$0xf] %vm407_vm1, %v10155_v3  ;;  %v1036_v7 = vld [vmem:[#allocation2 + $0x38] sm:$0x1]  ;;  %v8575_v17 = vpack.c.bf16 %v569_v8, %v569_v8 }
  0x2b   : > { %466 = vst.msk [vmem:[#allocation2 + $0xe8] sm:$0xf] %vm407_vm1, %v10155_v3  ;;  %467 = vst.msk [vmem:[#allocation2 + $0xec] sm:$0xf] %vm407_vm1, %v10155_v3  ;;  %v740_v9 = vor.u32 %v738_v63, %v737_v62  ;;  %v742_v10 = vrot.slane %v737_v62, 4  ;;  %v744_v11 = vshrl.u32 %v8573_v0, 16 }
  0x2c   : > { %468 = vst.msk [vmem:[#allocation2 + $0xf0] sm:$0xf] %vm407_vm1, %v10155_v3  ;;  %469 = vst.msk [vmem:[#allocation2 + $0xf4] sm:$0xf] %vm407_vm1, %v10155_v3  ;;  %v747_v12 = vshll.u32 %v8573_v0, 16  ;;  %v752_v13 = vshrl.u32 %v8574_v2, 16 }
  0x2d   : > { %470 = vst.msk [vmem:[#allocation2 + $0xf8] sm:$0xf] %vm407_vm1, %v10155_v3  ;;  %471 = vst.msk [vmem:[#allocation2 + $0xfc] sm:$0xf] %vm407_vm1, %v10155_v3  ;;  %v755_v14 = vshll.u32 %v8574_v2, 16  ;;  %v570_v16 = vld [vmem:[%s10399_s18 + $0x48] sm:$0xff] }
  0x2e   : > { %472 = vst.msk [vmem:[#allocation2 + $0x100] sm:$0xf] %vm407_vm1, %v10155_v3  ;;  %473 = vst.msk [vmem:[#allocation2 + $0x104] sm:$0xf] %vm407_vm1, %v10155_v3  ;;  %v1039_v15 = vld [vmem:[#allocation2 + $0x40] sm:$0xf]  ;;  %v8576_v29 = vpack.c.bf16 %v570_v16, %v570_v16 }
  0x2f   : > { %474 = vst.msk [vmem:[#allocation2 + $0x108] sm:$0xf] %vm407_vm1, %v10155_v3  ;;  %475 = vst.msk [vmem:[#allocation2 + $0x10c] sm:$0xf] %vm407_vm1, %v10155_v3  ;;  %v746_v20 = vrot.slane %v744_v11, 7  ;;  %v571_v22 = vld [vmem:[%s10399_s18 + $0x50] sm:$0xff] }
  0x30   : > { %476 = vst.msk [vmem:[#allocation2 + $0x110] sm:$0xf] %vm407_vm1, %v10155_v3  ;;  %477 = vst.msk [vmem:[#allocation2 + $0x114] sm:$0xf] %vm407_vm1, %v10155_v3  ;;  %v1043_v21 = vld [vmem:[#allocation2 + $0x48] sm:$0x1]  ;;  %v8577_v35 = vpack.c.bf16 %v571_v22, %v571_v22 }
  0x31   : > { %478 = vst.msk [vmem:[#allocation2 + $0x118] sm:$0xf] %vm407_vm1, %v10155_v3  ;;  %479 = vst.msk [vmem:[#allocation2 + $0x11c] sm:$0xf] %vm407_vm1, %v10155_v3  ;;  %v754_v23 = vrot.slane %v752_v13, 7  ;;  %v749_v26 = vor.u32 %v747_v12, %v746_v20  ;;  %v572_v39 = vld [vmem:[%s10399_s18 + $0x58] sm:$0xff] }
  0x32   : > { %480 = vst.msk [vmem:[#allocation2 + $0x120] sm:$0xf] %vm407_vm1, %v10155_v3  ;;  %vm10412_vm8 = vmand %vm1020_vm7, %vm689_vm4  ;;  %v1050_v47 = vld [vmem:[#allocation2 + $0x58] sm:$0x1]  ;;  %v778_v49 = vshrl.u32 %v8577_v35, 16  ;;  %v781_v57 = vshll.u32 %v8577_v35, 16 }
  0x33   : > { %vm10418_vm9 = vmand %vm407_vm1, %vm1014_vm6  ;;  %v1023_v53 = vsel %vm10412_vm8, %v708_v43, %v1022_v28  ;;  %v1030_v5 = vsel %vm10412_vm8, %v725_v59, %v1029_v48  ;;  %v1037_v19 = vsel %vm10412_vm8, %v742_v10, %v1036_v7  ;;  %v750_v28 = vrot.slane %v746_v20, 4  ;;  %v1053_v63 = vld [vmem:[#allocation2 + $0x60] sm:$0xf]  ;;  %v1057_v7 = vld [vmem:[#allocation2 + $0x68] sm:$0x1] }
  0x34   : > { %vm10425_vm10 = vmor %vm689_vm4, %vm690_vm5  ;;  %v1017_v46 = vsel %vm10418_vm9, %v698_v37, %v1016_v24  ;;  %v1026_v54 = vsel %vm10418_vm9, %v715_v44, %v1025_v40  ;;  %1024 = vst [vmem:[#allocation2 + $0x18] sm:$0x1] %v1023_v53  ;;  %v1033_v6 = vsel %vm10418_vm9, %v732_v60, %v1032_v56  ;;  %v761_v24 = vshrl.u32 %v8575_v17, 16  ;;  %v573_v60 = vld [vmem:[%s10399_s18 + $0x60] sm:$0xff]  ;;  %v574_v16 = vld [vmem:[%s10399_s18 + $0x68] sm:$0xff] }
  0x35   : > { %v707_v52 = vsel %vm10425_vm10, %v699_v38, %v706_v42  ;;  %1018 = vst [vmem:[#allocation2 + $0x10] sm:$0xf] %v1017_v46  ;;  %1027 = vst [vmem:[#allocation2 + $0x20] sm:$0xf] %v1026_v54  ;;  %v724_v4 = vsel %vm10425_vm10, %v716_v45, %v723_v58  ;;  %v741_v18 = vsel %vm10425_vm10, %v733_v61, %v740_v9  ;;  %v759_v33 = vrot.slane %v754_v23, 4  ;;  %v575_v20 = vld [vmem:[%s10399_s18 + $0x70] sm:$0xff] }
  0x36   : > { %1019 = vst.msk [vmem:[#allocation2 + $0x14] sm:$0xf] %vm407_vm1, %v707_v52  ;;  %1028 = vst.msk [vmem:[#allocation2 + $0x24] sm:$0xf] %vm407_vm1, %v724_v4  ;;  %v757_v32 = vor.u32 %v755_v14, %v754_v23  ;;  %v763_v34 = vrot.slane %v761_v24, 7  ;;  %v1040_v37 = vsel %vm10418_vm9, %v749_v26, %v1039_v15  ;;  %v764_v38 = vshll.u32 %v8575_v17, 16 }
  0x37   : > { %1031 = vst [vmem:[#allocation2 + $0x28] sm:$0x1] %v1030_v5  ;;  %1034 = vst [vmem:[#allocation2 + $0x30] sm:$0xf] %v1033_v6  ;;  %v1044_v41 = vsel %vm10412_vm8, %v759_v33, %v1043_v21  ;;  %v1046_v42 = vld [vmem:[#allocation2 + $0x50] sm:$0xf]  ;;  %v8578_v48 = vpack.c.bf16 %v572_v39, %v572_v39  ;;  %v8579_v0 = vpack.c.bf16 %v573_v60, %v573_v60 }
  0x38   : > { %1035 = vst.msk [vmem:[#allocation2 + $0x34] sm:$0xf] %vm407_vm1, %v741_v18  ;;  %1038 = vst [vmem:[#allocation2 + $0x38] sm:$0x1] %v1037_v19  ;;  %v758_v40 = vsel %vm10425_vm10, %v750_v28, %v757_v32  ;;  %v766_v43 = vor.u32 %v764_v38, %v763_v34  ;;  %v769_v44 = vshrl.u32 %v8576_v29, 16  ;;  %v772_v46 = vshll.u32 %v8576_v29, 16 }
  0x39   : > { %1041 = vst [vmem:[#allocation2 + $0x40] sm:$0xf] %v1040_v37  ;;  %1042 = vst.msk [vmem:[#allocation2 + $0x44] sm:$0xf] %vm407_vm1, %v758_v40  ;;  %v767_v50 = vrot.slane %v763_v34, 4  ;;  %v780_v54 = vrot.slane %v778_v49, 7  ;;  %v8580_v19 = vpack.c.bf16 %v574_v16, %v574_v16  ;;  %v8581_v23 = vpack.c.bf16 %v575_v20, %v575_v20 }
  0x3a   : > { %1045 = vst [vmem:[#allocation2 + $0x48] sm:$0x1] %v1044_v41  ;;  %v771_v51 = vrot.slane %v769_v44, 7  ;;  %v1047_v52 = vsel %vm10418_vm9, %v766_v43, %v1046_v42  ;;  %v786_v58 = vshrl.u32 %v8578_v48, 16  ;;  %v789_v59 = vshll.u32 %v8578_v48, 16  ;;  %v576_v22 = vld [vmem:[%s10399_s18 + $0x78] sm:$0xff] }
  0x3b   : > { %v9673_v45 = vld [vmem:[#allocation2 + $0x18] sm:$0xff]   ;;  %1048 = vst [vmem:[#allocation2 + $0x50] sm:$0xf] %v1047_v52  ;;  %v783_v2 = vor.u32 %v781_v57, %v780_v54  ;;  %v784_v4 = vrot.slane %v780_v54, 4  ;;  %v795_v8 = vshrl.u32 %v8579_v0, 16  ;;  %v798_v12 = vshll.u32 %v8579_v0, 16 }
  0x3c   : > { %v9674_v53 = vld [vmem:[#allocation2 + $0x18] sm:$0xff]   ;;  %v774_v55 = vor.u32 %v772_v46, %v771_v51  ;;  %v776_v56 = vrot.slane %v771_v51, 4  ;;  %v788_v5 = vrot.slane %v786_v58, 7  ;;  %v1060_v18 = vld [vmem:[#allocation2 + $0x70] sm:$0xf]  ;;  %v803_v24 = vshrl.u32 %v8580_v19, 16 }
  0x3d   : > { %v9671_v25 = vld [vmem:[#allocation2 + $0x10] sm:$0xff]   ;;  %v9675_v6 = vld [vmem:[#allocation2 + $0x20] sm:$0xff]   ;;  %v1054_v10 = vsel %vm10418_vm9, %v783_v2, %v1053_v63  ;;  %v797_v17 = vrot.slane %v795_v8, 7  ;;  %v806_v26 = vshll.u32 %v8580_v19, 16  ;;  %v1064_v29 = vld [vmem:[#allocation2 + $0x78] sm:$0x1] }
  0x3e   : > { %v9672_v30 = vld [vmem:[#allocation2 + $0x10] sm:$0xff]   ;;  %8972 = vmatmul.mubr.msk.bf16.vlgmr.msra.gmra.mxu1 %vm1359_vm3, %v9671_v25  ;;  %v775_v61 = vsel %vm10425_vm10, %v767_v50, %v774_v55  ;;  %v1051_v62 = vsel %vm10412_vm8, %v776_v56, %v1050_v47  ;;  %v791_v9 = vor.u32 %v789_v59, %v788_v5  ;;  %v793_v11 = vrot.slane %v788_v5, 4  ;;  %1055 = vst [vmem:[#allocation2 + $0x60] sm:$0xf] %v1054_v10  ;;  %v9676_v13 = vld [vmem:[#allocation2 + $0x20] sm:$0xff]   ;;  %v9677_v32 = vld [vmem:[#allocation2 + $0x28] sm:$0xff]  }
  0x3f   : > { %8846 = vmatmul.mubr.msk.bf16.gmra.mxu0 %vm1359_vm3, %v9672_v30  ;;  %8975 = vmatprep.mubr.msk.bf16.mxu1 %vm10154_vm2, %v10153_v1  ;;  %1049 = vst.msk [vmem:[#allocation2 + $0x54] sm:$0xf] %vm407_vm1, %v775_v61  ;;  %1052 = vst [vmem:[#allocation2 + $0x58] sm:$0x1] %v1051_v62  ;;  %v800_v21 = vor.u32 %v798_v12, %v797_v17  ;;  %v8582_v25 = vpack.c.bf16 %v576_v22, %v576_v22  ;;  %v812_v30 = vshrl.u32 %v8581_v23, 16  ;;  %v578_v56 = vld [vmem:[%s10399_s18 + $0x88] sm:$0xff] }
  0x40   : > { %8849 = vmatprep.mubr.msk.bf16.mxu0 %vm10154_vm2, %v10153_v1  ;;  %v792_v14 = vsel %vm10425_vm10, %v784_v4, %v791_v9  ;;  %v1058_v15 = vsel %vm10412_vm8, %v793_v11, %v1057_v7  ;;  %v801_v33 = vrot.slane %v797_v17, 4  ;;  %v805_v34 = vrot.slane %v803_v24, 7  ;;  %v1067_v38 = vld [vmem:[#allocation2 + $0x80] sm:$0xf]  ;;  %v1071_v41 = vld [vmem:[#allocation2 + $0x88] sm:$0x1] }
  0x41   : > { %1056 = vst.msk [vmem:[#allocation2 + $0x64] sm:$0xf] %vm407_vm1, %v792_v14  ;;  %1059 = vst [vmem:[#allocation2 + $0x68] sm:$0x1] %v1058_v15  ;;  %v1061_v28 = vsel %vm10418_vm9, %v800_v21, %v1060_v18  ;;  %v815_v35 = vshll.u32 %v8581_v23, 16  ;;  %v820_v37 = vshrl.u32 %v8582_v25, 16  ;;  %v8584_v58 = vpack.c.bf16 %v578_v56, %v578_v56 }
  0x42   : > { %1062 = vst [vmem:[#allocation2 + $0x70] sm:$0xf] %v1061_v28  ;;  %v814_v39 = vrot.slane %v812_v30, 7  ;;  %v823_v40 = vshll.u32 %v8582_v25, 16  ;;  %v808_v42 = vor.u32 %v806_v26, %v805_v34  ;;  %v810_v43 = vrot.slane %v805_v34, 4  ;;  %v579_v61 = vld [vmem:[%s10399_s18 + $0x90] sm:$0xff] }
  0x43   : > { %v822_v44 = vrot.slane %v820_v37, 7  ;;  %v580_v62 = vld [vmem:[%s10399_s18 + $0x98] sm:$0xff]  ;;  %v9679_v63 = vld [vmem:[#allocation2 + $0x30] sm:$0xff]   ;;  %v837_v2 = vshrl.u32 %v8584_v58, 16  ;;  %v840_v4 = vshll.u32 %v8584_v58, 16  ;;  %v581_v10 = vld [vmem:[%s10399_s18 + $0xa0] sm:$0xff] }
  0x44   : > { %v817_v46 = vor.u32 %v815_v35, %v814_v39  ;;  %v818_v47 = vrot.slane %v814_v39, 4  ;;  %v809_v48 = vsel %vm10425_vm10, %v801_v33, %v808_v42  ;;  %v1065_v49 = vsel %vm10412_vm8, %v810_v43, %v1064_v29  ;;  %v9680_v0 = vld [vmem:[#allocation2 + $0x30] sm:$0xff]   ;;  %v1078_v9 = vld [vmem:[#allocation2 + $0x98] sm:$0x1]  ;;  %v582_v15 = vld [vmem:[%s10399_s18 + $0xa8] sm:$0xff] }
  0x45   : > { %v825_v50 = vor.u32 %v823_v40, %v822_v44  ;;  %v827_v51 = vrot.slane %v822_v44, 4  ;;  %1063 = vst.msk [vmem:[#allocation2 + $0x74] sm:$0xf] %vm407_vm1, %v809_v48  ;;  %1066 = vst [vmem:[#allocation2 + $0x78] sm:$0x1] %v1065_v49  ;;  %v8586_v7 = vpack.c.bf16 %v580_v62, %v580_v62  ;;  %v839_v11 = vrot.slane %v837_v2, 7 }
  0x46   : > { %8976 = vmatmul.mubr.msk.bf16.gmra.mxu1 %vm1359_vm3, %v9673_v45  ;;  %v9678_v45 = vld [vmem:[#allocation2 + $0x28] sm:$0xff]   ;;  %v1068_v52 = vsel %vm10418_vm9, %v817_v46, %v1067_v38  ;;  %v1074_v5 = vld [vmem:[#allocation2 + $0x90] sm:$0xf]  ;;  %v1081_v22 = vld [vmem:[#allocation2 + $0xa0] sm:$0xf]  ;;  %v8587_v23 = vpack.c.bf16 %v581_v10, %v581_v10  ;;  %v8588_v26 = vpack.c.bf16 %v582_v15, %v582_v15  ;;  %vm1759_vm11 = vcmask 48128  }
  0x47   : > { %8850 = vmatmul.mubr.msk.bf16.gmra.mxu0 %vm1359_vm3, %v9674_v53  ;;  %8979 = vmatprep.mubr.msk.bf16.mxu1 %vm10154_vm2, %v10153_v1  ;;  %v577_v53 = vld [vmem:[%s10399_s18 + $0x80] sm:$0xff]  ;;  %v826_v54 = vsel %vm10425_vm10, %v818_v47, %v825_v50  ;;  %1069 = vst [vmem:[#allocation2 + $0x80] sm:$0xf] %v1068_v52  ;;  %v1072_v55 = vsel %vm10412_vm8, %v827_v51, %v1071_v41  ;;  %v854_v14 = vshrl.u32 %v8586_v7, 16  ;;  %v583_v16 = vld [vmem:[%s10399_s18 + $0xb0] sm:$0xff]  ;;  %v844_v20 = vrot.slane %v839_v11, 4 }
  0x48   : > { %8853 = vmatprep.mubr.msk.bf16.mxu0 %vm10154_vm2, %v10153_v1  ;;  %v8583_v57 = vpack.c.bf16 %v577_v53, %v577_v53  ;;  %1070 = vst.msk [vmem:[#allocation2 + $0x84] sm:$0xf] %vm407_vm1, %v826_v54  ;;  %1073 = vst [vmem:[#allocation2 + $0x88] sm:$0x1] %v1072_v55  ;;  %v842_v19 = vor.u32 %v840_v4, %v839_v11  ;;  %v8589_v28 = vpack.c.bf16 %v583_v16, %v583_v16  ;;  %v1085_v33 = vld [vmem:[#allocation2 + $0xa8] sm:$0x1] }
  0x49   : > { %v856_v25 = vrot.slane %v854_v14, 7  ;;  %v1079_v30 = vsel %vm10412_vm8, %v844_v20, %v1078_v9  ;;  %v857_v35 = vshll.u32 %v8586_v7, 16  ;;  %v9681_v37 = vld [vmem:[#allocation2 + $0x38] sm:$0xff]   ;;  %v863_v41 = vshrl.u32 %v8587_v23, 16  ;;  %v1088_v46 = vld [vmem:[#allocation2 + $0xb0] sm:$0xf] }
  0x4a   : > { %v829_v59 = vshrl.u32 %v8583_v57, 16  ;;  %v832_v60 = vshll.u32 %v8583_v57, 16  ;;  %1080 = vst [vmem:[#allocation2 + $0x98] sm:$0x1] %v1079_v30  ;;  %v9682_v38 = vld [vmem:[#allocation2 + $0x38] sm:$0xff]   ;;  %v866_v43 = vshll.u32 %v8587_v23, 16 }
  0x4b   : > { %v861_v40 = vrot.slane %v856_v25, 4  ;;  %v859_v42 = vor.u32 %v857_v35, %v856_v25  ;;  %v871_v44 = vshrl.u32 %v8588_v26, 16  ;;  %v584_v47 = vld [vmem:[%s10399_s18 + $0xb8] sm:$0xff]  ;;  %v865_v49 = vrot.slane %v863_v41, 7  ;;  %v1095_v56 = vld [vmem:[#allocation2 + $0xc0] sm:$0xf] }
  0x4c   : > { %v831_v8 = vrot.slane %v829_v59, 7  ;;  %v1092_v50 = vld [vmem:[#allocation2 + $0xb8] sm:$0x1]  ;;  %v8590_v51 = vpack.c.bf16 %v584_v47, %v584_v47  ;;  %v880_v52 = vshrl.u32 %v8589_v28, 16  ;;  %v883_v55 = vshll.u32 %v8589_v28, 16  ;;  %v9683_v9 = vld [vmem:[#allocation2 + $0x40] sm:$0xff]  }
  0x4d   : > { %v1086_v48 = vsel %vm10412_vm8, %v861_v40, %v1085_v33  ;;  %v873_v54 = vrot.slane %v871_v44, 7  ;;  %v868_v57 = vor.u32 %v866_v43, %v865_v49  ;;  %v869_v58 = vrot.slane %v865_v49, 4  ;;  %v1099_v14 = vld [vmem:[#allocation2 + $0xc8] sm:$0x1]  ;;  %v585_v16 = vld [vmem:[%s10399_s18 + $0xc0] sm:$0xff]  ;;  %v9687_v35 = vld [vmem:[#allocation2 + $0x50] sm:$0xff]  }
  0x4e   : > { %8980 = vmatmul.mubr.msk.bf16.gmra.mxu1 %vm1359_vm3, %v9675_v6  ;;  %v8585_v6 = vpack.c.bf16 %v579_v61, %v579_v61  ;;  %v834_v17 = vor.u32 %v832_v60, %v831_v8  ;;  %v835_v18 = vrot.slane %v831_v8, 4  ;;  %1087 = vst [vmem:[#allocation2 + $0xa8] sm:$0x1] %v1086_v48  ;;  %v882_v59 = vrot.slane %v880_v52, 7  ;;  %v9685_v20 = vld [vmem:[#allocation2 + $0x48] sm:$0xff]   ;;  %v587_v41 = vld [vmem:[%s10399_s18 + $0xd0] sm:$0xff] }
  0x4f   : > { %8854 = vmatmul.mubr.msk.bf16.gmra.mxu0 %vm1359_vm3, %v9676_v13  ;;  %8983 = vmatprep.mubr.msk.bf16.mxu1 %vm10154_vm2, %v10153_v1  ;;  %v888_v60 = vshrl.u32 %v8590_v51, 16  ;;  %v878_v62 = vrot.slane %v873_v54, 4  ;;  %v9686_v23 = vld [vmem:[#allocation2 + $0x48] sm:$0xff]   ;;  %v1102_v28 = vld [vmem:[#allocation2 + $0xd0] sm:$0xf]  ;;  %v8593_v44 = vpack.c.bf16 %v587_v41, %v587_v41  ;;  %v9689_v49 = vld [vmem:[#allocation2 + $0x58] sm:$0xff]  }
  0x50   : > { %8857 = vmatprep.mubr.msk.bf16.mxu0 %vm10154_vm2, %v10153_v1  ;;  %v846_v12 = vshrl.u32 %v8585_v6, 16  ;;  %v849_v13 = vshll.u32 %v8585_v6, 16  ;;  %v1075_v24 = vsel %vm10418_vm9, %v834_v17, %v1074_v5  ;;  %v843_v29 = vsel %vm10425_vm10, %v835_v18, %v842_v19  ;;  %v586_v17 = vld [vmem:[%s10399_s18 + $0xc8] sm:$0xff]  ;;  %v1106_v40 = vld [vmem:[#allocation2 + $0xd8] sm:$0x1] }
  0x51   : > { %1076 = vst [vmem:[#allocation2 + $0x90] sm:$0xf] %v1075_v24  ;;  %1077 = vst.msk [vmem:[#allocation2 + $0x94] sm:$0xf] %vm407_vm1, %v843_v29  ;;  %v885_v2 = vor.u32 %v883_v55, %v882_v59  ;;  %v1093_v5 = vsel %vm10412_vm8, %v878_v62, %v1092_v50  ;;  %v886_v6 = vrot.slane %v882_v59, 4  ;;  %v890_v7 = vrot.slane %v888_v60, 7 }
  0x52   : > { %v848_v21 = vrot.slane %v846_v12, 7  ;;  %1094 = vst [vmem:[#allocation2 + $0xb8] sm:$0x1] %v1093_v5  ;;  %v9684_v12 = vld [vmem:[#allocation2 + $0x40] sm:$0xff]   ;;  %v8591_v18 = vpack.c.bf16 %v585_v16, %v585_v16  ;;  %v8592_v19 = vpack.c.bf16 %v586_v17, %v586_v17  ;;  %v917_v50 = vshll.u32 %v8593_v44, 16 }
  0x53   : > { %v1096_v8 = vsel %vm10418_vm9, %v885_v2, %v1095_v56  ;;  %v895_v11 = vrot.slane %v890_v7, 4  ;;  %v9691_v60 = vld [vmem:[#allocation2 + $0x60] sm:$0xff]   ;;  %v590_v2 = vld [vmem:[%s10399_s18 + $0xe8] sm:$0xff]  ;;  %vm5052_vm12 = vcmask 1040384   ;;  %vm484_vm13 = vcmask 11264  }
  0x54   : > { %v852_v34 = vrot.slane %v848_v21, 4  ;;  %1097 = vst [vmem:[#allocation2 + $0xc0] sm:$0xf] %v1096_v8  ;;  %v905_v24 = vshrl.u32 %v8592_v19, 16  ;;  %489 = vst.msk [vmem:[#allocation3 + $0x10] sm:$0xf] %vm484_vm13, %v10155_v3 }
  0x55   : > { %v1100_v15 = vsel %vm10412_vm8, %v895_v11, %v1099_v14  ;;  %v9694_v14 = vld [vmem:[#allocation2 + $0x68] sm:$0xff]   ;;  %485 = vst.msk [vmem:[#allocation3] sm:$0xf] %vm484_vm13, %v10155_v3  ;;  %486 = vst.msk [vmem:[#allocation3 + $0x4] sm:$0xf] %vm484_vm13, %v10155_v3  ;;  %vm4952_vm14 = vcmask 15360  }
  0x56   : > { %8984 = vmatmul.mubr.msk.bf16.gmra.mxu1 %vm1359_vm3, %v9677_v32  ;;  %v851_v32 = vor.u32 %v849_v13, %v848_v21  ;;  %v860_v53 = vsel %vm10425_vm10, %v852_v34, %v859_v42  ;;  %1101 = vst [vmem:[#allocation2 + $0xc8] sm:$0x1] %v1100_v15  ;;  %v897_v21 = vshrl.u32 %v8591_v18, 16  ;;  %v907_v29 = vrot.slane %v905_v24, 7  ;;  %v588_v42 = vld [vmem:[%s10399_s18 + $0xd8] sm:$0xff]  ;;  %vm11296_vm15 = vmand %vm484_vm13, %vm1014_vm6 }
  0x57   : > { %8858 = vmatmul.mubr.msk.bf16.gmra.mxu0 %vm1359_vm3, %v9678_v45  ;;  %8987 = vmatprep.mubr.msk.bf16.mxu1 %vm10154_vm2, %v10153_v1  ;;  %v874_v45 = vshll.u32 %v8588_v26, 16  ;;  %1084 = vst.msk [vmem:[#allocation2 + $0xa4] sm:$0xf] %vm407_vm1, %v860_v53  ;;  %v908_v26 = vshll.u32 %v8592_v19, 16  ;;  %v9690_v53 = vld [vmem:[#allocation2 + $0x58] sm:$0xff]   ;;  %vm4613_vm0 = vcmask 8192  }
  0x58   : > { %8861 = vmatprep.mubr.msk.bf16.mxu0 %vm10154_vm2, %v10153_v1  ;;  %v1082_v39 = vsel %vm10418_vm9, %v851_v32, %v1081_v22  ;;  %v900_v22 = vshll.u32 %v8591_v18, 16  ;;  %v899_v25 = vrot.slane %v897_v21, 7  ;;  %v1116_v18 = vld [vmem:[#allocation2 + $0xf0] sm:$0xf]  ;;  %v1120_v24 = vld [vmem:[#allocation2 + $0xf8] sm:$0x1] }
  0x59   : > { %1083 = vst [vmem:[#allocation2 + $0xa0] sm:$0xf] %v1082_v39  ;;  %v876_v61 = vor.u32 %v874_v45, %v873_v54  ;;  %v910_v33 = vor.u32 %v908_v26, %v907_v29  ;;  %v912_v39 = vrot.slane %v907_v29, 4  ;;  %v8594_v45 = vpack.c.bf16 %v588_v42, %v588_v42  ;;  %v9695_v21 = vld [vmem:[#allocation2 + $0x70] sm:$0xff]   ;;  %v592_v26 = vld [vmem:[%s10399_s18 + $0xf8] sm:$0xff] }
  0x5a   : > { %v902_v30 = vor.u32 %v900_v22, %v899_v25  ;;  %v903_v32 = vrot.slane %v899_v25, 4  ;;  %v9696_v22 = vld [vmem:[#allocation2 + $0x70] sm:$0xff]   ;;  %487 = vst.msk [vmem:[#allocation3 + $0x8] sm:$0xf] %vm484_vm13, %v10155_v3  ;;  %488 = vst.msk [vmem:[#allocation3 + $0xc] sm:$0xf] %vm484_vm13, %v10155_v3 }
  0x5b   : > { %v877_v4 = vsel %vm10425_vm10, %v869_v58, %v876_v61  ;;  %v1107_v43 = vsel %vm10412_vm8, %v912_v39, %v1106_v40  ;;  %v922_v47 = vshrl.u32 %v8594_v45, 16  ;;  %v925_v52 = vshll.u32 %v8594_v45, 16  ;;  %v9692_v61 = vld [vmem:[#allocation2 + $0x60] sm:$0xff]   ;;  %v591_v25 = vld [vmem:[%s10399_s18 + $0xf0] sm:$0xff]  ;;  %v9697_v39 = vld [vmem:[#allocation2 + $0x78] sm:$0xff]  }
  0x5c   : > { %1091 = vst.msk [vmem:[#allocation2 + $0xb4] sm:$0xf] %vm407_vm1, %v877_v4  ;;  %v1103_v34 = vsel %vm10418_vm9, %v902_v30, %v1102_v28  ;;  %1108 = vst [vmem:[#allocation2 + $0xd8] sm:$0x1] %v1107_v43  ;;  %v8597_v29 = vpack.c.bf16 %v591_v25, %v591_v25  ;;  %v8598_v30 = vpack.c.bf16 %v592_v26, %v592_v26  ;;  %v9698_v43 = vld [vmem:[#allocation2 + $0x78] sm:$0xff]   ;;  %v9703_v27 = vld [vmem:[#allocation2 + $0x90] sm:$0xff]  }
  0x5d   : > { %1104 = vst [vmem:[#allocation2 + $0xd0] sm:$0xf] %v1103_v34  ;;  %490 = vst.msk [vmem:[#allocation3 + $0x14] sm:$0xf] %vm484_vm13, %v10155_v3 }
  0x5e   : > { %8988 = vmatmul.mubr.msk.bf16.gmra.mxu1 %vm1359_vm3, %v9679_v63  ;;  %v891_v63 = vshll.u32 %v8590_v51, 16  ;;  %v924_v51 = vrot.slane %v922_v47, 7  ;;  %v9699_v47 = vld [vmem:[#allocation2 + $0x80] sm:$0xff]   ;;  %491 = vst.msk [vmem:[#allocation3 + $0x18] sm:$0xf] %vm484_vm13, %v10155_v3 }
  0x5f   : > { %8862 = vmatmul.mubr.msk.bf16.gmra.mxu0 %vm1359_vm3, %v9680_v0  ;;  %8991 = vmatprep.mubr.msk.bf16.mxu1 %vm10154_vm2, %v10153_v1  ;;  %v1089_v0 = vsel %vm10418_vm9, %v868_v57, %v1088_v46  ;;  %v914_v46 = vshrl.u32 %v8593_v44, 16  ;;  %v1109_v57 = vld [vmem:[#allocation2 + $0xe0] sm:$0xf]  ;;  %492 = vst.msk [vmem:[#allocation3 + $0x1c] sm:$0xf] %vm484_vm13, %v10155_v3 }
  0x60   : > { %8865 = vmatprep.mubr.msk.bf16.mxu0 %vm10154_vm2, %v10153_v1  ;;  %1090 = vst [vmem:[#allocation2 + $0xb0] sm:$0xf] %v1089_v0  ;;  %v893_v10 = vor.u32 %v891_v63, %v890_v7  ;;  %v927_v56 = vor.u32 %v925_v52, %v924_v51  ;;  %v929_v62 = vrot.slane %v924_v51, 4  ;;  %v1113_v63 = vld [vmem:[#allocation2 + $0xe8] sm:$0x1]  ;;  %v589_v0 = vld [vmem:[%s10399_s18 + $0xe0] sm:$0xff] }
  0x61   : > { %v916_v48 = vrot.slane %v914_v46, 7  ;;  %v8595_v5 = vpack.c.bf16 %v589_v0, %v589_v0  ;;  %v1123_v44 = vld [vmem:[#allocation2 + $0x100] sm:$0xf]  ;;  %v9701_v51 = vld [vmem:[#allocation2 + $0x88] sm:$0xff]   ;;  %493 = vst.msk [vmem:[#allocation3 + $0x20] sm:$0xf] %vm484_vm13, %v10155_v3 }
  0x62   : > { %v894_v13 = vsel %vm10425_vm10, %v886_v6, %v893_v10  ;;  %v1114_v4 = vsel %vm10412_vm8, %v929_v62, %v1113_v63  ;;  %v8596_v6 = vpack.c.bf16 %v590_v2, %v590_v2  ;;  %v9702_v52 = vld [vmem:[#allocation2 + $0x88] sm:$0xff]   ;;  %v9713_v62 = vld [vmem:[#allocation2 + $0xb8] sm:$0xff]   ;;  %494 = vst.msk [vmem:[#allocation3 + $0x24] sm:$0xf] %vm484_vm13, %v10155_v3  ;;  %495 = vst.msk [vmem:[#allocation3 + $0x28] sm:$0xf] %vm484_vm13, %v10155_v3 }
  0x63   : > { %1098 = vst.msk [vmem:[#allocation2 + $0xc4] sm:$0xf] %vm407_vm1, %v894_v13  ;;  %v920_v54 = vrot.slane %v916_v48, 4  ;;  %v919_v55 = vor.u32 %v917_v50, %v916_v48  ;;  %1115 = vst [vmem:[#allocation2 + $0xe8] sm:$0x1] %v1114_v4  ;;  %v931_v7 = vshrl.u32 %v8595_v5, 16 }
  0x64   : > { %v939_v8 = vshrl.u32 %v8596_v6, 16  ;;  %v934_v10 = vshll.u32 %v8595_v5, 16  ;;  %v942_v11 = vshll.u32 %v8596_v6, 16  ;;  %v1127_v50 = vld [vmem:[#allocation2 + $0x108] sm:$0x1]  ;;  %v9714_v63 = vld [vmem:[#allocation2 + $0xb8] sm:$0xff]  }
  0x65   : > { %v928_v58 = vsel %vm10425_vm10, %v920_v54, %v927_v56  ;;  %v1110_v59 = vsel %vm10418_vm9, %v919_v55, %v1109_v57  ;;  %v9705_v54 = vld [vmem:[#allocation2 + $0x98] sm:$0xff]   ;;  %v9707_v56 = vld [vmem:[#allocation2 + $0xa0] sm:$0xff]   ;;  %496 = vst.msk [vmem:[#allocation3 + $0x2c] sm:$0xf] %vm484_vm13, %v10155_v3  ;;  %497 = vst.msk [vmem:[#allocation3 + $0x30] sm:$0xf] %vm484_vm13, %v10155_v3 }
  0x66   : > { %8992 = vmatmul.mubr.msk.bf16.gmra.mxu1 %vm1359_vm3, %v9681_v37  ;;  %v911_v37 = vsel %vm10425_vm10, %v903_v32, %v910_v33  ;;  %1111 = vst [vmem:[#allocation2 + $0xe0] sm:$0xf] %v1110_v59  ;;  %1112 = vst.msk [vmem:[#allocation2 + $0xe4] sm:$0xf] %vm407_vm1, %v928_v58  ;;  %v941_v13 = vrot.slane %v939_v8, 7  ;;  %v948_v32 = vshrl.u32 %v8597_v29, 16 }
  0x67   : > { %8866 = vmatmul.mubr.msk.bf16.gmra.mxu0 %vm1359_vm3, %v9682_v38  ;;  %8995 = vmatprep.mubr.msk.bf16.mxu1 %vm10154_vm2, %v10153_v1  ;;  %1105 = vst.msk [vmem:[#allocation2 + $0xd4] sm:$0xf] %vm407_vm1, %v911_v37  ;;  %v9688_v38 = vld [vmem:[#allocation2 + $0x50] sm:$0xff]   ;;  %v956_v33 = vshrl.u32 %v8598_v30, 16  ;;  %v9706_v55 = vld [vmem:[#allocation2 + $0x98] sm:$0xff]   ;;  %v9708_v57 = vld [vmem:[#allocation2 + $0xa0] sm:$0xff]  }
  0x68   : > { %8869 = vmatprep.mubr.msk.bf16.mxu0 %vm10154_vm2, %v10153_v1  ;;  %v944_v17 = vor.u32 %v942_v11, %v941_v13  ;;  %v950_v34 = vrot.slane %v948_v32, 7  ;;  %v9709_v58 = vld [vmem:[#allocation2 + $0xa8] sm:$0xff]   ;;  %498 = vst.msk [vmem:[#allocation3 + $0x34] sm:$0xf] %vm484_vm13, %v10155_v3  ;;  %499 = vst.msk [vmem:[#allocation3 + $0x38] sm:$0xf] %vm484_vm13, %v10155_v3 }
  0x69   : > { %v958_v37 = vrot.slane %v956_v33, 7  ;;  %v9710_v59 = vld [vmem:[#allocation2 + $0xa8] sm:$0xff]   ;;  %500 = vst.msk [vmem:[#allocation3 + $0x3c] sm:$0xf] %vm484_vm13, %v10155_v3  ;;  %501 = vst.msk [vmem:[#allocation3 + $0x40] sm:$0xf] %vm484_vm13, %v10155_v3 }
  0x6a   : > { %v954_v41 = vrot.slane %v950_v34, 4  ;;  %v9715_v0 = vld [vmem:[#allocation2 + $0xc0] sm:$0xff]   ;;  %v9718_v8 = vld [vmem:[#allocation2 + $0xc8] sm:$0xff]   ;;  %502 = vst.msk [vmem:[#allocation3 + $0x44] sm:$0xf] %vm484_vm13, %v10155_v3 }
  0x6b   : > { %v963_v48 = vrot.slane %v958_v37, 4  ;;  %v9716_v2 = vld [vmem:[#allocation2 + $0xc0] sm:$0xff]   ;;  %503 = vst.msk [vmem:[#allocation3 + $0x48] sm:$0xf] %vm484_vm13, %v10155_v3  ;;  %504 = vst.msk [vmem:[#allocation3 + $0x4c] sm:$0xf] %vm484_vm13, %v10155_v3 }
  0x6c   : > { %505 = vst.msk [vmem:[#allocation3 + $0x50] sm:$0xf] %vm484_vm13, %v10155_v3  ;;  %506 = vst.msk [vmem:[#allocation3 + $0x54] sm:$0xf] %vm484_vm13, %v10155_v3 }
  0x6d   : > { %v1128_v31 = vsel %vm10412_vm8, %v963_v48, %v1127_v50  ;;  %507 = vst.msk [vmem:[#allocation3 + $0x58] sm:$0xf] %vm484_vm13, %v10155_v3  ;;  %508 = vst.msk [vmem:[#allocation3 + $0x5c] sm:$0xf] %vm484_vm13, %v10155_v3 }
  0x6e   : > { %8996 = vmatmul.mubr.msk.bf16.gmra.mxu1 %vm1359_vm3, %v9683_v9  ;;  %v933_v9 = vrot.slane %v931_v7, 7  ;;  %1129 = vst [vmem:[#allocation2 + $0x108] sm:$0x1] %v1128_v31  ;;  %v9717_v7 = vld [vmem:[#allocation2 + $0xc8] sm:$0xff]   ;;  %509 = vst.msk [vmem:[#allocation3 + $0x60] sm:$0xf] %vm484_vm13, %v10155_v3 }
  0x6f   : > { %8870 = vmatmul.mubr.msk.bf16.gmra.mxu0 %vm1359_vm3, %v9684_v12  ;;  %8999 = vmatprep.mubr.msk.bf16.mxu1 %vm10154_vm2, %v10153_v1  ;;  %v9693_v12 = vld [vmem:[#allocation2 + $0x68] sm:$0xff]   ;;  %510 = vst.msk [vmem:[#allocation3 + $0x64] sm:$0xf] %vm484_vm13, %v10155_v3  ;;  %511 = vst.msk [vmem:[#allocation3 + $0x68] sm:$0xf] %vm484_vm13, %v10155_v3 }
  0x70   : > { %8873 = vmatprep.mubr.msk.bf16.mxu0 %vm10154_vm2, %v10153_v1  ;;  %v936_v15 = vor.u32 %v934_v10, %v933_v9  ;;  %v937_v16 = vrot.slane %v933_v9, 4  ;;  %512 = vst.msk [vmem:[#allocation3 + $0x6c] sm:$0xf] %vm484_vm13, %v10155_v3  ;;  %513 = vst.msk [vmem:[#allocation3 + $0x70] sm:$0xf] %vm484_vm13, %v10155_v3 }
  0x71   : > { %514 = vst.msk [vmem:[#allocation3 + $0x74] sm:$0xf] %vm484_vm13, %v10155_v3  ;;  %515 = vst.msk [vmem:[#allocation3 + $0x78] sm:$0xf] %vm484_vm13, %v10155_v3 }
  0x72   : > { %v1117_v19 = vsel %vm10418_vm9, %v936_v15, %v1116_v18  ;;  %516 = vst.msk [vmem:[#allocation3 + $0x7c] sm:$0xf] %vm484_vm13, %v10155_v3  ;;  %517 = vst.msk [vmem:[#allocation3 + $0x80] sm:$0xf] %vm484_vm13, %v10155_v3 }
  0x73   : > { %1118 = vst [vmem:[#allocation2 + $0xf0] sm:$0xf] %v1117_v19  ;;  %518 = vst.msk [vmem:[#allocation3 + $0x84] sm:$0xf] %vm484_vm13, %v10155_v3 }
  0x74   : > { %519 = vst.msk [vmem:[#allocation3 + $0x88] sm:$0xf] %vm484_vm13, %v10155_v3  ;;  %520 = vst.msk [vmem:[#allocation3 + $0x8c] sm:$0xf] %vm484_vm13, %v10155_v3 }
  0x75   : > { %521 = vst.msk [vmem:[#allocation3 + $0x90] sm:$0xf] %vm484_vm13, %v10155_v3  ;;  %522 = vst.msk [vmem:[#allocation3 + $0x94] sm:$0xf] %vm484_vm13, %v10155_v3 }
  0x76   : > { %9000 = vmatmul.mubr.msk.bf16.gmra.mxu1 %vm1359_vm3, %v9685_v20  ;;  %v945_v20 = vsel %vm10425_vm10, %v937_v16, %v944_v17  ;;  %523 = vst.msk [vmem:[#allocation3 + $0x98] sm:$0xf] %vm484_vm13, %v10155_v3  ;;  %524 = vst.msk [vmem:[#allocation3 + $0x9c] sm:$0xf] %vm484_vm13, %v10155_v3 }
  0x77   : > { %8874 = vmatmul.mubr.msk.bf16.gmra.mxu0 %vm1359_vm3, %v9686_v23  ;;  %9003 = vmatprep.mubr.msk.bf16.mxu1 %vm10154_vm2, %v10153_v1  ;;  %1119 = vst.msk [vmem:[#allocation2 + $0xf4] sm:$0xf] %vm407_vm1, %v945_v20  ;;  %v946_v23 = vrot.slane %v941_v13, 4  ;;  %v9719_v13 = vld [vmem:[#allocation2 + $0xd0] sm:$0xff]  }
  0x78   : > { %8877 = vmatprep.mubr.msk.bf16.mxu0 %vm10154_vm2, %v10153_v1  ;;  %525 = vst.msk [vmem:[#allocation3 + $0xa0] sm:$0xf] %vm484_vm13, %v10155_v3  ;;  %526 = vst.msk [vmem:[#allocation3 + $0xa4] sm:$0xf] %vm484_vm13, %v10155_v3 }
  0x79   : > { %v1121_v28 = vsel %vm10412_vm8, %v946_v23, %v1120_v24  ;;  %v9721_v24 = vld [vmem:[#allocation2 + $0xd8] sm:$0xff]   ;;  %527 = vst.msk [vmem:[#allocation3 + $0xa8] sm:$0xf] %vm484_vm13, %v10155_v3  ;;  %528 = vst.msk [vmem:[#allocation3 + $0xac] sm:$0xf] %vm484_vm13, %v10155_v3 }
  0x7a   : > { %1122 = vst [vmem:[#allocation2 + $0xf8] sm:$0x1] %v1121_v28  ;;  %v9722_v28 = vld [vmem:[#allocation2 + $0xd8] sm:$0xff]   ;;  %529 = vst.msk [vmem:[#allocation3 + $0xb0] sm:$0xf] %vm484_vm13, %v10155_v3 }
  0x7b   : > { %530 = vst.msk [vmem:[#allocation3 + $0xb4] sm:$0xf] %vm484_vm13, %v10155_v3  ;;  %531 = vst.msk [vmem:[#allocation3 + $0xb8] sm:$0xf] %vm484_vm13, %v10155_v3 }
  0x7c   : > { %532 = vst.msk [vmem:[#allocation3 + $0xbc] sm:$0xf] %vm484_vm13, %v10155_v3  ;;  %533 = vst.msk [vmem:[#allocation3 + $0xc0] sm:$0xf] %vm484_vm13, %v10155_v3 }
  0x7d   : > { %534 = vst.msk [vmem:[#allocation3 + $0xc4] sm:$0xf] %vm484_vm13, %v10155_v3  ;;  %535 = vst.msk [vmem:[#allocation3 + $0xc8] sm:$0xf] %vm484_vm13, %v10155_v3 }
  0x7e   : > { %9004 = vmatmul.mubr.msk.bf16.gmra.mxu1 %vm1359_vm3, %v9687_v35  ;;  %v951_v35 = vshll.u32 %v8597_v29, 16  ;;  %536 = vst.msk [vmem:[#allocation3 + $0xcc] sm:$0xf] %vm484_vm13, %v10155_v3  ;;  %537 = vst.msk [vmem:[#allocation3 + $0xd0] sm:$0xf] %vm484_vm13, %v10155_v3 }
  0x7f   : > { %8878 = vmatmul.mubr.msk.bf16.gmra.mxu0 %vm1359_vm3, %v9688_v38  ;;  %9007 = vmatprep.mubr.msk.bf16.mxu1 %vm10154_vm2, %v10153_v1  ;;  %v959_v38 = vshll.u32 %v8598_v30, 16  ;;  %538 = vst.msk [vmem:[#allocation3 + $0xd4] sm:$0xf] %vm484_vm13, %v10155_v3  ;;  %539 = vst.msk [vmem:[#allocation3 + $0xd8] sm:$0xf] %vm484_vm13, %v10155_v3 }
  0x80   : > { %8881 = vmatprep.mubr.msk.bf16.mxu0 %vm10154_vm2, %v10153_v1  ;;  %v953_v40 = vor.u32 %v951_v35, %v950_v34  ;;  %540 = vst.msk [vmem:[#allocation3 + $0xdc] sm:$0xf] %vm484_vm13, %v10155_v3  ;;  %541 = vst.msk [vmem:[#allocation3 + $0xe0] sm:$0xf] %vm484_vm13, %v10155_v3 }
  0x81   : > { %v961_v42 = vor.u32 %v959_v38, %v958_v37  ;;  %542 = vst.msk [vmem:[#allocation3 + $0xe4] sm:$0xf] %vm484_vm13, %v10155_v3  ;;  %543 = vst.msk [vmem:[#allocation3 + $0xe8] sm:$0xf] %vm484_vm13, %v10155_v3 }
  0x82   : > { %v1124_v46 = vsel %vm10418_vm9, %v953_v40, %v1123_v44  ;;  %v9724_v44 = vld [vmem:[#allocation2 + $0xe0] sm:$0xff]   ;;  %544 = vst.msk [vmem:[#allocation3 + $0xec] sm:$0xf] %vm484_vm13, %v10155_v3  ;;  %545 = vst.msk [vmem:[#allocation3 + $0xf0] sm:$0xf] %vm484_vm13, %v10155_v3 }
  0x83   : > { %v962_v45 = vsel %vm10425_vm10, %v954_v41, %v961_v42  ;;  %1125 = vst [vmem:[#allocation2 + $0x100] sm:$0xf] %v1124_v46  ;;  %v9723_v41 = vld [vmem:[#allocation2 + $0xe0] sm:$0xff]   ;;  %546 = vst.msk [vmem:[#allocation3 + $0xf4] sm:$0xf] %vm484_vm13, %v10155_v3 }
  0x84   : > { %1126 = vst.msk [vmem:[#allocation2 + $0x104] sm:$0xf] %vm407_vm1, %v962_v45  ;;  %vm11308_vm1 = vmand %vm4613_vm0, %vm689_vm4  ;;  %vm5352_vm4 = vcmask 97280  }
  0x85   : > { %547 = vst.msk [vmem:[#allocation3 + $0xf8] sm:$0xf] %vm484_vm13, %v10155_v3  ;;  %548 = vst.msk [vmem:[#allocation3 + $0xfc] sm:$0xf] %vm484_vm13, %v10155_v3 }
  0x86   : > { %9008 = vmatmul.mubr.msk.bf16.gmra.mxu1 %vm1359_vm3, %v9689_v49  ;;  %v9700_v49 = vld [vmem:[#allocation2 + $0x80] sm:$0xff]   ;;  %549 = vst.msk [vmem:[#allocation3 + $0x100] sm:$0xf] %vm484_vm13, %v10155_v3  ;;  %550 = vst.msk [vmem:[#allocation3 + $0x104] sm:$0xf] %vm484_vm13, %v10155_v3 }
  0x87   : > { %8882 = vmatmul.mubr.msk.bf16.gmra.mxu0 %vm1359_vm3, %v9690_v53  ;;  %9011 = vmatprep.mubr.msk.bf16.mxu1 %vm10154_vm2, %v10153_v1  ;;  %v9704_v53 = vld [vmem:[#allocation2 + $0x90] sm:$0xff]   ;;  %551 = vst.msk [vmem:[#allocation3 + $0x108] sm:$0xf] %vm484_vm13, %v10155_v3  ;;  %552 = vst.msk [vmem:[#allocation3 + $0x10c] sm:$0xf] %vm484_vm13, %v10155_v3 }
  0x88   : > { %8885 = vmatprep.mubr.msk.bf16.mxu0 %vm10154_vm2, %v10153_v1  ;;  %553 = vst.msk [vmem:[#allocation3 + $0x110] sm:$0xf] %vm484_vm13, %v10155_v3  ;;  %554 = vst.msk [vmem:[#allocation3 + $0x114] sm:$0xf] %vm484_vm13, %v10155_v3 }
  0x89   : > { %555 = vst.msk [vmem:[#allocation3 + $0x118] sm:$0xf] %vm484_vm13, %v10155_v3  ;;  %556 = vst.msk [vmem:[#allocation3 + $0x11c] sm:$0xf] %vm484_vm13, %v10155_v3 }
  0x8a   : > { %557 = vst.msk [vmem:[#allocation3 + $0x120] sm:$0xf] %vm484_vm13, %v10155_v3 }
  0x8e   : > { %9012 = vmatmul.mubr.msk.bf16.gmra.mxu1 %vm1359_vm3, %v9691_v60  ;;  %v9711_v60 = vld [vmem:[#allocation2 + $0xb0] sm:$0xff]  }
  0x8f   : > { %8886 = vmatmul.mubr.msk.bf16.gmra.mxu0 %vm1359_vm3, %v9692_v61  ;;  %9015 = vmatprep.mubr.msk.bf16.mxu1 %vm10154_vm2, %v10153_v1  ;;  %v9712_v61 = vld [vmem:[#allocation2 + $0xb0] sm:$0xff]  }
  0x90   : > { %8889 = vmatprep.mubr.msk.bf16.mxu0 %vm10154_vm2, %v10153_v1 }
  0x96   : > { %9016 = vmatmul.mubr.msk.bf16.gmra.mxu1 %vm1359_vm3, %v9693_v12 }
  0x97   : > { %8890 = vmatmul.mubr.msk.bf16.gmra.mxu0 %vm1359_vm3, %v9694_v14  ;;  %9019 = vmatprep.mubr.msk.bf16.mxu1 %vm10154_vm2, %v10153_v1  ;;  %v9720_v14 = vld [vmem:[#allocation2 + $0xd0] sm:$0xff]  }
  0x98   : > { %8893 = vmatprep.mubr.msk.bf16.mxu0 %vm10154_vm2, %v10153_v1 }
  0x9e   : > { %9020 = vmatmul.mubr.msk.bf16.gmra.mxu1 %vm1359_vm3, %v9695_v21 }
  0x9f   : > { %8894 = vmatmul.mubr.msk.bf16.gmra.mxu0 %vm1359_vm3, %v9696_v22  ;;  %9023 = vmatprep.mubr.msk.bf16.mxu1 %vm10154_vm2, %v10153_v1 }
  0xa0   : > { %8897 = vmatprep.mubr.msk.bf16.mxu0 %vm10154_vm2, %v10153_v1 }
  0xa6   : > { %9024 = vmatmul.mubr.msk.bf16.gmra.mxu1 %vm1359_vm3, %v9697_v39 }
  0xa7   : > { %8898 = vmatmul.mubr.msk.bf16.gmra.mxu0 %vm1359_vm3, %v9698_v43  ;;  %9027 = vmatprep.mubr.msk.bf16.mxu1 %vm10154_vm2, %v10153_v1 }
  0xa8   : > { %8901 = vmatprep.mubr.msk.bf16.mxu0 %vm10154_vm2, %v10153_v1 }
  0xae   : > { %9028 = vmatmul.mubr.msk.bf16.gmra.mxu1 %vm1359_vm3, %v9699_v47 }
  0xaf   : > { %8902 = vmatmul.mubr.msk.bf16.gmra.mxu0 %vm1359_vm3, %v9700_v49  ;;  %9031 = vmatprep.mubr.msk.bf16.mxu1 %vm10154_vm2, %v10153_v1 }
  0xb0   : > { %8905 = vmatprep.mubr.msk.bf16.mxu0 %vm10154_vm2, %v10153_v1 }
  0xb6   : > { %9032 = vmatmul.mubr.msk.bf16.gmra.mxu1 %vm1359_vm3, %v9701_v51 }
  0xb7   : > { %8906 = vmatmul.mubr.msk.bf16.gmra.mxu0 %vm1359_vm3, %v9702_v52  ;;  %9035 = vmatprep.mubr.msk.bf16.mxu1 %vm10154_vm2, %v10153_v1 }
  0xb8   : > { %8909 = vmatprep.mubr.msk.bf16.mxu0 %vm10154_vm2, %v10153_v1 }
  0xbe   : > { %9036 = vmatmul.mubr.msk.bf16.gmra.mxu1 %vm1359_vm3, %v9703_v27 }
  0xbf   : > { %8910 = vmatmul.mubr.msk.bf16.gmra.mxu0 %vm1359_vm3, %v9704_v53  ;;  %9039 = vmatprep.mubr.msk.bf16.mxu1 %vm10154_vm2, %v10153_v1  ;;  %v9725_v53 = vld [vmem:[#allocation2 + $0xe8] sm:$0xff]  }
  0xc0   : > { %8913 = vmatprep.mubr.msk.bf16.mxu0 %vm10154_vm2, %v10153_v1 }
  0xc6   : > { %9040 = vmatmul.mubr.msk.bf16.gmra.mxu1 %vm1359_vm3, %v9705_v54 }
  0xc7   : > { %8914 = vmatmul.mubr.msk.bf16.gmra.mxu0 %vm1359_vm3, %v9706_v55  ;;  %9043 = vmatprep.mubr.msk.bf16.mxu1 %vm10154_vm2, %v10153_v1 }
  0xc8   : > { %8917 = vmatprep.mubr.msk.bf16.mxu0 %vm10154_vm2, %v10153_v1 }
  0xce   : > { %9044 = vmatmul.mubr.msk.bf16.gmra.mxu1 %vm1359_vm3, %v9707_v56  ;;  %v9726_v56 = vld [vmem:[#allocation2 + $0xe8] sm:$0xff]  }
  0xcf   : > { %8918 = vmatmul.mubr.msk.bf16.gmra.mxu0 %vm1359_vm3, %v9708_v57  ;;  %9047 = vmatprep.mubr.msk.bf16.mxu1 %vm10154_vm2, %v10153_v1 }
  0xd0   : > { %8921 = vmatprep.mubr.msk.bf16.mxu0 %vm10154_vm2, %v10153_v1 }
  0xd6   : > { %9048 = vmatmul.mubr.msk.bf16.gmra.mxu1 %vm1359_vm3, %v9709_v58 }
  0xd7   : > { %8922 = vmatmul.mubr.msk.bf16.gmra.mxu0 %vm1359_vm3, %v9710_v59  ;;  %9051 = vmatprep.mubr.msk.bf16.mxu1 %vm10154_vm2, %v10153_v1  ;;  %v1497_v4 = vpop.f32.mrf.mxu0 }
  0xd8   : > { %8925 = vmatprep.mubr.msk.bf16.mxu0 %vm10154_vm2, %v10153_v1  ;;  %1760 = vst.msk [vmem:[#allocation4] sm:$0xff] %vm1759_vm11, %v1497_v4 }
  0xd9   : > { %v8839_v5 = vpop.f32.mrf.mxu0 }
  0xda   : > { %v9727_v5 = vld [vmem:[#allocation2 + $0xf0] sm:$0xff]  }
  0xdb   : > { %v1500_v6 = vpop.f32.mrf.mxu0 }
  0xdc   : > { %1761 = vst.msk [vmem:[#allocation4 + $0x8] sm:$0xff] %vm1759_vm11, %v1500_v6 }
  0xdd   : > { %v8840_v9 = vpop.f32.mrf.mxu0 }
  0xde   : > { %9052 = vmatmul.mubr.msk.bf16.gmra.mxu1 %vm1359_vm3, %v9711_v60 }
  0xdf   : > { %8926 = vmatmul.mubr.msk.bf16.gmra.mxu0 %vm1359_vm3, %v9712_v61  ;;  %9055 = vmatprep.mubr.msk.bf16.mxu1 %vm10154_vm2, %v10153_v1  ;;  %v1505_v10 = vpop.f32.mrf.mxu0  ;;  %v2453_v17 = vld [vmem:[#allocation4] sm:$0xff] }
  0xe0   : > { %8929 = vmatprep.mubr.msk.bf16.mxu0 %vm10154_vm2, %v10153_v1  ;;  %1762 = vst.msk [vmem:[#allocation4 + $0x10] sm:$0xff] %vm1759_vm11, %v1505_v10 }
  0xe1   : > { %v8843_v11 = vpop.f32.mrf.mxu0 }
  0xe3   : > { %v1508_v12 = vpop.f32.mrf.mxu0  ;;  %v2454_v23 = vld [vmem:[#allocation4 + $0x8] sm:$0xff] }
  0xe4   : > { %1763 = vst.msk [vmem:[#allocation4 + $0x18] sm:$0xff] %vm1759_vm11, %v1508_v12 }
  0xe5   : > { %v8844_v15 = vpop.f32.mrf.mxu0 }
  0xe6   : > { %9056 = vmatmul.mubr.msk.bf16.gmra.mxu1 %vm1359_vm3, %v9713_v62 }
  0xe7   : > { %8930 = vmatmul.mubr.msk.bf16.gmra.mxu0 %vm1359_vm3, %v9714_v63  ;;  %9059 = vmatprep.mubr.msk.bf16.mxu1 %vm10154_vm2, %v10153_v1  ;;  %v2455_v33 = vld [vmem:[#allocation4 + $0x10] sm:$0xff] }
  0xe8   : > { %8933 = vmatprep.mubr.msk.bf16.mxu0 %vm10154_vm2, %v10153_v1 }
  0xeb   : > { %v2456_v40 = vld [vmem:[#allocation4 + $0x18] sm:$0xff] }
  0xee   : > { %9060 = vmatmul.mubr.msk.bf16.gmra.mxu1 %vm1359_vm3, %v9715_v0 }
  0xef   : > { %8934 = vmatmul.mubr.msk.bf16.gmra.mxu0 %vm1359_vm3, %v9716_v2  ;;  %9063 = vmatprep.mubr.msk.bf16.mxu1 %vm10154_vm2, %v10153_v1 }
  0xf0   : > { %8937 = vmatprep.mubr.msk.bf16.mxu0 %vm10154_vm2, %v10153_v1 }
  0xf6   : > { %9064 = vmatmul.mubr.msk.bf16.gmra.mxu1 %vm1359_vm3, %v9717_v7 }
  0xf7   : > { %8938 = vmatmul.mubr.msk.bf16.gmra.mxu0 %vm1359_vm3, %v9718_v8  ;;  %9067 = vmatprep.mubr.msk.bf16.mxu1 %vm10154_vm2, %v10153_v1  ;;  %v9728_v8 = vld [vmem:[#allocation2 + $0xf0] sm:$0xff]  }
  0xf8   : > { %8941 = vmatprep.mubr.msk.bf16.mxu0 %vm10154_vm2, %v10153_v1 }
  0xfe   : > { %v2191_v16 = vpop.f32.mrf.mxu1  ;;  %9068 = vmatmul.mubr.msk.bf16.gmra.mxu1 %vm1359_vm3, %v9719_v13 }
  0xff   : > { %v2518_v18 = vadd.f32 %v2453_v17, %v2191_v16  ;;  %v1513_v19 = vpop.f32.mrf.mxu0  ;;  %8942 = vmatmul.mubr.msk.bf16.gmra.mxu0 %vm1359_vm3, %v9720_v14  ;;  %9071 = vmatprep.mubr.msk.bf16.mxu1 %vm10154_vm2, %v10153_v1 }
 0x100   : > { %1764 = vst.msk [vmem:[#allocation4 + $0x20] sm:$0xff] %vm1759_vm11, %v1513_v19  ;;  %v8973_v20 = vpop.f32.mrf.mxu1  ;;  %8945 = vmatprep.mubr.msk.bf16.mxu0 %vm10154_vm2, %v10153_v1  ;;  %v9729_v19 = vld [vmem:[#allocation2 + $0xf8] sm:$0xff]  }
 0x101   : > { %2583 = vst.msk [vmem:[#allocation4] sm:$0xff] %vm1759_vm11, %v2518_v18  ;;  %v8847_v21 = vpop.f32.mrf.mxu0 }
 0x102   : > { %v2194_v22 = vpop.f32.mrf.mxu1 }
 0x103   : > { %v2519_v25 = vadd.f32 %v2454_v23, %v2194_v22  ;;  %v1516_v26 = vpop.f32.mrf.mxu0  ;;  %v9730_v22 = vld [vmem:[#allocation2 + $0xf8] sm:$0xff]  }
 0x104   : > { %1765 = vst.msk [vmem:[#allocation4 + $0x28] sm:$0xff] %vm1759_vm11, %v1516_v26  ;;  %v8974_v29 = vpop.f32.mrf.mxu1 }
 0x105   : > { %2584 = vst.msk [vmem:[#allocation4 + $0x8] sm:$0xff] %vm1759_vm11, %v2519_v25  ;;  %v8848_v30 = vpop.f32.mrf.mxu0  ;;  %v4788_v25 = vld [vmem:[%s12501_s4] sm:$0x1] }
 0x106   : > { %v2199_v32 = vpop.f32.mrf.mxu1  ;;  %9072 = vmatmul.mubr.msk.bf16.gmra.mxu1 %vm1359_vm3, %v9721_v24  ;;  %v5054_v29 = vsel %vm5052_vm12, %v4788_v25, 0 }
 0x107   : > { %v2520_v34 = vadd.f32 %v2455_v33, %v2199_v32  ;;  %v1521_v35 = vpop.f32.mrf.mxu0  ;;  %8946 = vmatmul.mubr.msk.bf16.gmra.mxu0 %vm1359_vm3, %v9722_v28  ;;  %9075 = vmatprep.mubr.msk.bf16.mxu1 %vm10154_vm2, %v10153_v1  ;;  %v2457_v48 = vld [vmem:[#allocation4 + $0x20] sm:$0xff] }
 0x108   : > { %1766 = vst.msk [vmem:[#allocation4 + $0x30] sm:$0xff] %vm1759_vm11, %v1521_v35  ;;  %v8977_v37 = vpop.f32.mrf.mxu1  ;;  %8949 = vmatprep.mubr.msk.bf16.mxu0 %vm10154_vm2, %v10153_v1  ;;  %9238 = vmatpush3.bf16.msra.mxu1 %v5054_v29 }
 0x109   : > { %2585 = vst.msk [vmem:[#allocation4 + $0x10] sm:$0xff] %vm1759_vm11, %v2520_v34  ;;  %v8851_v38 = vpop.f32.mrf.mxu0  ;;  %9505 = vmatprep.subr.bf16.mxu1 %v10153_v1 }
 0x10a   : > { %v2202_v39 = vpop.f32.mrf.mxu1  ;;  %v9731_v38 = vld [vmem:[#allocation2 + $0x100] sm:$0xff]  }
 0x10b   : > { %v2521_v42 = vadd.f32 %v2456_v40, %v2202_v39  ;;  %v1524_v43 = vpop.f32.mrf.mxu0  ;;  %v2458_v27 = vld [vmem:[#allocation4 + $0x28] sm:$0xff] }
 0x10c   : > { %1767 = vst.msk [vmem:[#allocation4 + $0x38] sm:$0xff] %vm1759_vm11, %v1524_v43  ;;  %v8978_v45 = vpop.f32.mrf.mxu1 }
 0x10d   : > { %2586 = vst.msk [vmem:[#allocation4 + $0x18] sm:$0xff] %vm1759_vm11, %v2521_v42  ;;  %v8852_v46 = vpop.f32.mrf.mxu0 }
 0x10e   : > { %v2207_v47 = vpop.f32.mrf.mxu1  ;;  %9076 = vmatmul.mubr.msk.bf16.gmra.mxu1 %vm1359_vm3, %v9723_v41  ;;  %v9732_v41 = vld [vmem:[#allocation2 + $0x100] ss:$0 sps:$4 sm:$0xff]  }
 0x10f   : > { %v2522_v49 = vadd.f32 %v2457_v48, %v2207_v47  ;;  %v1529_v50 = vpop.f32.mrf.mxu0  ;;  %8950 = vmatmul.mubr.msk.bf16.gmra.mxu0 %vm1359_vm3, %v9724_v44  ;;  %9079 = vmatprep.mubr.msk.bf16.mxu1 %vm10154_vm2, %v10153_v1  ;;  %v2459_v60 = vld [vmem:[#allocation4 + $0x30] sm:$0xff] }
 0x110   : > { %1768 = vst.msk [vmem:[#allocation4 + $0x40] sm:$0xff] %vm1759_vm11, %v1529_v50  ;;  %v8981_v31 = vpop.f32.mrf.mxu1  ;;  %8953 = vmatprep.mubr.msk.bf16.mxu0 %vm10154_vm2, %v10153_v1 }
 0x111   : > { %2587 = vst.msk [vmem:[#allocation4 + $0x20] sm:$0xff] %vm1759_vm11, %v2522_v49  ;;  %v8855_v51 = vpop.f32.mrf.mxu0 }
 0x112   : > { %v2210_v52 = vpop.f32.mrf.mxu1  ;;  %v9733_v51 = vld [vmem:[#allocation2 + $0x108] sm:$0xff]  }
 0x113   : > { %v2523_v54 = vadd.f32 %v2458_v27, %v2210_v52  ;;  %v1532_v55 = vpop.f32.mrf.mxu0  ;;  %v2460_v4 = vld [vmem:[#allocation4 + $0x38] sm:$0xff] }
 0x114   : > { %1769 = vst.msk [vmem:[#allocation4 + $0x48] sm:$0xff] %vm1759_vm11, %v1532_v55  ;;  %v8982_v57 = vpop.f32.mrf.mxu1 }
 0x115   : > { %2588 = vst.msk [vmem:[#allocation4 + $0x28] sm:$0xff] %vm1759_vm11, %v2523_v54  ;;  %v8856_v58 = vpop.f32.mrf.mxu0 }
 0x116   : > { %v2215_v59 = vpop.f32.mrf.mxu1  ;;  %9080 = vmatmul.mubr.msk.bf16.gmra.mxu1 %vm1359_vm3, %v9725_v53  ;;  %v9734_v53 = vld [vmem:[#allocation2 + $0x20] sm:$0xff]  }
 0x117   : > { %v2524_v61 = vadd.f32 %v2459_v60, %v2215_v59  ;;  %v1537_v62 = vpop.f32.mrf.mxu0  ;;  %8954 = vmatmul.mubr.msk.bf16.gmra.mxu0 %vm1359_vm3, %v9726_v56  ;;  %9083 = vmatprep.mubr.msk.bf16.mxu1 %vm10154_vm2, %v10153_v1  ;;  %v2461_v12 = vld [vmem:[#allocation4 + $0x40] sm:$0xff] }
 0x118   : > { %1770 = vst.msk [vmem:[#allocation4 + $0x50] sm:$0xff] %vm1759_vm11, %v1537_v62  ;;  %v8985_v63 = vpop.f32.mrf.mxu1  ;;  %8957 = vmatprep.mubr.msk.bf16.mxu0 %vm10154_vm2, %v10153_v1 }
 0x119   : > { %2589 = vst.msk [vmem:[#allocation4 + $0x30] sm:$0xff] %vm1759_vm11, %v2524_v61  ;;  %v8859_v0 = vpop.f32.mrf.mxu0 }
 0x11a   : > { %v2218_v2 = vpop.f32.mrf.mxu1  ;;  %v9735_v0 = vld [vmem:[#allocation2 + $0x110] ss:$0 sps:$4 sm:$0xff]  }
 0x11b   : > { %v2525_v6 = vadd.f32 %v2460_v4, %v2218_v2  ;;  %v1540_v7 = vpop.f32.mrf.mxu0  ;;  %v2462_v18 = vld [vmem:[#allocation4 + $0x48] sm:$0xff] }
 0x11c   : > { %1771 = vst.msk [vmem:[#allocation4 + $0x58] sm:$0xff] %vm1759_vm11, %v1540_v7  ;;  %v8986_v9 = vpop.f32.mrf.mxu1 }
 0x11d   : > { %2590 = vst.msk [vmem:[#allocation4 + $0x38] sm:$0xff] %vm1759_vm11, %v2525_v6  ;;  %v8860_v10 = vpop.f32.mrf.mxu0 }
 0x11e   : > { %v2223_v11 = vpop.f32.mrf.mxu1  ;;  %9084 = vmatmul.mubr.msk.bf16.gmra.mxu1 %vm1359_vm3, %v9727_v5  ;;  %v9736_v5 = vld [vmem:[#allocation2 + $0x28] sm:$0xff]  }
 0x11f   : > { %v2526_v13 = vadd.f32 %v2461_v12, %v2223_v11  ;;  %v1545_v14 = vpop.f32.mrf.mxu0  ;;  %8958 = vmatmul.mubr.msk.bf16.gmra.mxu0 %vm1359_vm3, %v9728_v8  ;;  %9087 = vmatprep.mubr.msk.bf16.mxu1 %vm10154_vm2, %v10153_v1  ;;  %v2463_v28 = vld [vmem:[#allocation4 + $0x50] sm:$0xff] }
 0x120   : > { %1772 = vst.msk [vmem:[#allocation4 + $0x60] sm:$0xff] %vm1759_vm11, %v1545_v14  ;;  %v8989_v15 = vpop.f32.mrf.mxu1  ;;  %8961 = vmatprep.mubr.msk.bf16.mxu0 %vm10154_vm2, %v10153_v1 }
 0x121   : > { %2591 = vst.msk [vmem:[#allocation4 + $0x40] sm:$0xff] %vm1759_vm11, %v2526_v13  ;;  %v8863_v16 = vpop.f32.mrf.mxu0 }
 0x122   : > { %v2226_v17 = vpop.f32.mrf.mxu1 }
 0x123   : > { %v2527_v20 = vadd.f32 %v2462_v18, %v2226_v17  ;;  %v1548_v21 = vpop.f32.mrf.mxu0  ;;  %v2464_v37 = vld [vmem:[#allocation4 + $0x58] sm:$0xff]  ;;  %v9737_v18 = vld [vmem:[#allocation2 + $0x30] sm:$0xff]  }
 0x124   : > { %1773 = vst.msk [vmem:[#allocation4 + $0x68] sm:$0xff] %vm1759_vm11, %v1548_v21  ;;  %v8990_v23 = vpop.f32.mrf.mxu1 }
 0x125   : > { %2592 = vst.msk [vmem:[#allocation4 + $0x48] sm:$0xff] %vm1759_vm11, %v2527_v20  ;;  %v8864_v24 = vpop.f32.mrf.mxu0 }
 0x126   : > { %v2231_v26 = vpop.f32.mrf.mxu1  ;;  %9088 = vmatmul.mubr.msk.bf16.gmra.mxu1 %vm1359_vm3, %v9729_v19 }
 0x127   : > { %v2528_v30 = vadd.f32 %v2463_v28, %v2231_v26  ;;  %v1553_v32 = vpop.f32.mrf.mxu0  ;;  %8962 = vmatmul.mubr.msk.bf16.gmra.mxu0 %vm1359_vm3, %v9730_v22  ;;  %9091 = vmatprep.mubr.msk.bf16.mxu1 %vm10154_vm2, %v10153_v1  ;;  %v2465_v45 = vld [vmem:[#allocation4 + $0x60] sm:$0xff] }
 0x128   : > { %1774 = vst.msk [vmem:[#allocation4 + $0x70] sm:$0xff] %vm1759_vm11, %v1553_v32  ;;  %v8993_v33 = vpop.f32.mrf.mxu1  ;;  %8965 = vmatprep.mubr.msk.bf16.mxu0 %vm10154_vm2, %v10153_v1 }
 0x129   : > { %2593 = vst.msk [vmem:[#allocation4 + $0x50] sm:$0xff] %vm1759_vm11, %v2528_v30  ;;  %v8867_v34 = vpop.f32.mrf.mxu0  ;;  %v9738_v33 = vld [vmem:[#allocation2 + $0x38] sm:$0xff]  }
 0x12a   : > { %v2234_v35 = vpop.f32.mrf.mxu1 }
 0x12b   : > { %v2529_v39 = vadd.f32 %v2464_v37, %v2234_v35  ;;  %v1556_v40 = vpop.f32.mrf.mxu0  ;;  %v2466_v31 = vld [vmem:[#allocation4 + $0x68] sm:$0xff] }
 0x12c   : > { %1775 = vst.msk [vmem:[#allocation4 + $0x78] sm:$0xff] %vm1759_vm11, %v1556_v40  ;;  %v8994_v42 = vpop.f32.mrf.mxu1 }
 0x12d   : > { %2594 = vst.msk [vmem:[#allocation4 + $0x58] sm:$0xff] %vm1759_vm11, %v2529_v39  ;;  %v8868_v43 = vpop.f32.mrf.mxu0 }
 0x12e   : > { %v2239_v44 = vpop.f32.mrf.mxu1  ;;  %9092 = vmatmul.mubr.msk.bf16.gmra.mxu1 %vm1359_vm3, %v9731_v38 }
 0x12f   : > { %v2530_v46 = vadd.f32 %v2465_v45, %v2239_v44  ;;  %v1561_v47 = vpop.f32.mrf.mxu0  ;;  %8966 = vmatmul.mubr.msk.bf16.gmra.mxu0 %vm1359_vm3, %v9732_v41  ;;  %9095 = vmatprep.mubr.msk.bf16.mxu1 %vm10154_vm2, %v10153_v1  ;;  %v2467_v57 = vld [vmem:[#allocation4 + $0x70] sm:$0xff] }
 0x130   : > { %1776 = vst.msk [vmem:[#allocation4 + $0x80] sm:$0xff] %vm1759_vm11, %v1561_v47  ;;  %v8997_v48 = vpop.f32.mrf.mxu1  ;;  %9105 = vmatprep.mubr.msk.bf16.mxu0 %vm10154_vm2, %v10153_v1  ;;  %v9739_v47 = vld [vmem:[#allocation2 + $0x40] sm:$0xff]  }
 0x131   : > { %2595 = vst.msk [vmem:[#allocation4 + $0x60] sm:$0xff] %vm1759_vm11, %v2530_v46  ;;  %v8871_v49 = vpop.f32.mrf.mxu0 }
 0x132   : > { %v2242_v50 = vpop.f32.mrf.mxu1 }
 0x133   : > { %v2531_v52 = vadd.f32 %v2466_v31, %v2242_v50  ;;  %v1564_v27 = vpop.f32.mrf.mxu0  ;;  %v2468_v63 = vld [vmem:[#allocation4 + $0x78] sm:$0xff] }
 0x134   : > { %1777 = vst.msk [vmem:[#allocation4 + $0x88] sm:$0xff] %vm1759_vm11, %v1564_v27  ;;  %v8998_v54 = vpop.f32.mrf.mxu1 }
 0x135   : > { %2596 = vst.msk [vmem:[#allocation4 + $0x68] sm:$0xff] %vm1759_vm11, %v2531_v52  ;;  %v8872_v55 = vpop.f32.mrf.mxu0 }
 0x136   : > { %v2247_v56 = vpop.f32.mrf.mxu1  ;;  %9096 = vmatmul.mubr.msk.bf16.gmra.mxu1 %vm1359_vm3, %v9733_v51 }
 0x137   : > { %v2532_v58 = vadd.f32 %v2467_v57, %v2247_v56  ;;  %v1569_v59 = vpop.f32.mrf.mxu0  ;;  %9106 = vmatmul.mubr.msk.bf16.vlgmr.msra.gmra.mxu0 %vm1359_vm3, %v9734_v53  ;;  %9099 = vmatprep.mubr.msk.bf16.mxu1 %vm10154_vm2, %v10153_v1  ;;  %v2469_v9 = vld [vmem:[#allocation4 + $0x80] sm:$0xff] }
 0x138   : > { %1778 = vst.msk [vmem:[#allocation4 + $0x90] sm:$0xff] %vm1759_vm11, %v1569_v59  ;;  %v9001_v60 = vpop.f32.mrf.mxu1  ;;  %9109 = vmatprep.mubr.msk.bf16.mxu0 %vm10154_vm2, %v10153_v1 }
 0x139   : > { %2597 = vst.msk [vmem:[#allocation4 + $0x70] sm:$0xff] %vm1759_vm11, %v2532_v58  ;;  %v8875_v61 = vpop.f32.mrf.mxu0  ;;  %v9740_v58 = vld [vmem:[#allocation2 + $0x48] sm:$0xff]  }
 0x13a   : > { %v2250_v62 = vpop.f32.mrf.mxu1 }
 0x13b   : > { %v2533_v2 = vadd.f32 %v2468_v63, %v2250_v62  ;;  %v1572_v4 = vpop.f32.mrf.mxu0  ;;  %v2470_v15 = vld [vmem:[#allocation4 + $0x88] sm:$0xff] }
 0x13c   : > { %1779 = vst.msk [vmem:[#allocation4 + $0x98] sm:$0xff] %vm1759_vm11, %v1572_v4  ;;  %v9002_v6 = vpop.f32.mrf.mxu1 }
 0x13d   : > { %2598 = vst.msk [vmem:[#allocation4 + $0x78] sm:$0xff] %vm1759_vm11, %v2533_v2  ;;  %v8876_v7 = vpop.f32.mrf.mxu0 }
 0x13e   : > { %v2255_v8 = vpop.f32.mrf.mxu1  ;;  %9100 = vmatmul.mubr.msk.bf16.gmra.mxu1 %vm1359_vm3, %v9735_v0 }
 0x13f   : > { %v2534_v10 = vadd.f32 %v2469_v9, %v2255_v8  ;;  %v1577_v11 = vpop.f32.mrf.mxu0  ;;  %9110 = vmatmul.mubr.msk.bf16.gmra.mxu0 %vm1359_vm3, %v9736_v5  ;;  %9239 = vmatprep.mubr.msk.bf16.mxu1 %vm10154_vm2, %v10153_v1  ;;  %v2471_v22 = vld [vmem:[#allocation4 + $0x90] sm:$0xff] }
 0x140   : > { %1780 = vst.msk [vmem:[#allocation4 + $0xa0] sm:$0xff] %vm1759_vm11, %v1577_v11  ;;  %v9005_v12 = vpop.f32.mrf.mxu1  ;;  %9113 = vmatprep.mubr.msk.bf16.mxu0 %vm10154_vm2, %v10153_v1  ;;  %v9741_v9 = vld [vmem:[#allocation2 + $0x50] sm:$0xff]  }
 0x141   : > { %2599 = vst.msk [vmem:[#allocation4 + $0x80] sm:$0xff] %vm1759_vm11, %v2534_v10  ;;  %v8879_v13 = vpop.f32.mrf.mxu0 }
 0x142   : > { %v2258_v14 = vpop.f32.mrf.mxu1 }
 0x143   : > { %v2535_v16 = vadd.f32 %v2470_v15, %v2258_v14  ;;  %v1580_v17 = vpop.f32.mrf.mxu0  ;;  %v2472_v29 = vld [vmem:[#allocation4 + $0x98] sm:$0xff] }
 0x144   : > { %1781 = vst.msk [vmem:[#allocation4 + $0xa8] sm:$0xff] %vm1759_vm11, %v1580_v17  ;;  %v9006_v19 = vpop.f32.mrf.mxu1 }
 0x145   : > { %2600 = vst.msk [vmem:[#allocation4 + $0x88] sm:$0xff] %vm1759_vm11, %v2535_v16  ;;  %v8880_v20 = vpop.f32.mrf.mxu0 }
 0x146   : > { %v2263_v21 = vpop.f32.mrf.mxu1 }
 0x147   : > { %v2536_v23 = vadd.f32 %v2471_v22, %v2263_v21  ;;  %v1585_v24 = vpop.f32.mrf.mxu0  ;;  %9114 = vmatmul.mubr.msk.bf16.gmra.mxu0 %vm1359_vm3, %v9737_v18  ;;  %v2473_v38 = vld [vmem:[#allocation4 + $0xa0] sm:$0xff]  ;;  %v9742_v22 = vld [vmem:[#allocation2 + $0x58] sm:$0xff]  }
 0x148   : > { %1782 = vst.msk [vmem:[#allocation4 + $0xb0] sm:$0xff] %vm1759_vm11, %v1585_v24  ;;  %v9009_v25 = vpop.f32.mrf.mxu1  ;;  %9117 = vmatprep.mubr.msk.bf16.mxu0 %vm10154_vm2, %v10153_v1 }
 0x149   : > { %2601 = vst.msk [vmem:[#allocation4 + $0x90] sm:$0xff] %vm1759_vm11, %v2536_v23  ;;  %v8883_v26 = vpop.f32.mrf.mxu0 }
 0x14a   : > { %v2266_v28 = vpop.f32.mrf.mxu1 }
 0x14b   : > { %v2537_v30 = vadd.f32 %v2472_v29, %v2266_v28  ;;  %v1588_v32 = vpop.f32.mrf.mxu0  ;;  %v2474_v44 = vld [vmem:[#allocation4 + $0xa8] sm:$0xff] }
 0x14c   : > { %1783 = vst.msk [vmem:[#allocation4 + $0xb8] sm:$0xff] %vm1759_vm11, %v1588_v32  ;;  %v9010_v34 = vpop.f32.mrf.mxu1 }
 0x14d   : > { %2602 = vst.msk [vmem:[#allocation4 + $0x98] sm:$0xff] %vm1759_vm11, %v2537_v30  ;;  %v8884_v35 = vpop.f32.mrf.mxu0 }
 0x14e   : > { %v2271_v37 = vpop.f32.mrf.mxu1 }
 0x14f   : > { %v2538_v39 = vadd.f32 %v2473_v38, %v2271_v37  ;;  %v1593_v40 = vpop.f32.mrf.mxu0  ;;  %9118 = vmatmul.mubr.msk.bf16.gmra.mxu0 %vm1359_vm3, %v9738_v33  ;;  %v2475_v31 = vld [vmem:[#allocation4 + $0xb0] sm:$0xff]  ;;  %v9743_v38 = vld [vmem:[#allocation2 + $0x60] sm:$0xff]  }
 0x150   : > { %1784 = vst.msk [vmem:[#allocation4 + $0xc0] sm:$0xff] %vm1759_vm11, %v1593_v40  ;;  %v9013_v41 = vpop.f32.mrf.mxu1  ;;  %9121 = vmatprep.mubr.msk.bf16.mxu0 %vm10154_vm2, %v10153_v1 }
 0x151   : > { %2603 = vst.msk [vmem:[#allocation4 + $0xa0] sm:$0xff] %vm1759_vm11, %v2538_v39  ;;  %v8887_v42 = vpop.f32.mrf.mxu0 }
 0x152   : > { %v2274_v43 = vpop.f32.mrf.mxu1 }
 0x153   : > { %v2539_v45 = vadd.f32 %v2474_v44, %v2274_v43  ;;  %v1596_v46 = vpop.f32.mrf.mxu0  ;;  %v2476_v55 = vld [vmem:[#allocation4 + $0xb8] sm:$0xff] }
 0x154   : > { %1785 = vst.msk [vmem:[#allocation4 + $0xc8] sm:$0xff] %vm1759_vm11, %v1596_v46  ;;  %v9014_v48 = vpop.f32.mrf.mxu1 }
 0x155   : > { %2604 = vst.msk [vmem:[#allocation4 + $0xa8] sm:$0xff] %vm1759_vm11, %v2539_v45  ;;  %v8888_v49 = vpop.f32.mrf.mxu0 }
 0x156   : > { %v2279_v50 = vpop.f32.mrf.mxu1 }
 0x157   : > { %v2540_v51 = vadd.f32 %v2475_v31, %v2279_v50  ;;  %v1601_v52 = vpop.f32.mrf.mxu0  ;;  %9122 = vmatmul.mubr.msk.bf16.gmra.mxu0 %vm1359_vm3, %v9739_v47  ;;  %v2477_v62 = vld [vmem:[#allocation4 + $0xc0] sm:$0xff]  ;;  %v9744_v31 = vld [vmem:[#allocation2 + $0x68] sm:$0xff]  }
 0x158   : > { %1786 = vst.msk [vmem:[#allocation4 + $0xd0] sm:$0xff] %vm1759_vm11, %v1601_v52  ;;  %v9017_v27 = vpop.f32.mrf.mxu1  ;;  %9125 = vmatprep.mubr.msk.bf16.mxu0 %vm10154_vm2, %v10153_v1 }
 0x159   : > { %2605 = vst.msk [vmem:[#allocation4 + $0xb0] sm:$0xff] %vm1759_vm11, %v2540_v51  ;;  %v8891_v53 = vpop.f32.mrf.mxu0 }
 0x15a   : > { %v2282_v54 = vpop.f32.mrf.mxu1 }
 0x15b   : > { %v2541_v56 = vadd.f32 %v2476_v55, %v2282_v54  ;;  %v1604_v57 = vpop.f32.mrf.mxu0  ;;  %v2478_v6 = vld [vmem:[#allocation4 + $0xc8] sm:$0xff] }
 0x15c   : > { %1787 = vst.msk [vmem:[#allocation4 + $0xd8] sm:$0xff] %vm1759_vm11, %v1604_v57  ;;  %v9018_v59 = vpop.f32.mrf.mxu1 }
 0x15d   : > { %2606 = vst.msk [vmem:[#allocation4 + $0xb8] sm:$0xff] %vm1759_vm11, %v2541_v56  ;;  %v8892_v60 = vpop.f32.mrf.mxu0 }
 0x15e   : > { %v2287_v61 = vpop.f32.mrf.mxu1 }
 0x15f   : > { %v2542_v63 = vadd.f32 %v2477_v62, %v2287_v61  ;;  %v1609_v0 = vpop.f32.mrf.mxu0  ;;  %9126 = vmatmul.mubr.msk.bf16.gmra.mxu0 %vm1359_vm3, %v9740_v58  ;;  %v2479_v13 = vld [vmem:[#allocation4 + $0xd0] sm:$0xff] }
 0x160   : > { %1788 = vst.msk [vmem:[#allocation4 + $0xe0] sm:$0xff] %vm1759_vm11, %v1609_v0  ;;  %v9021_v2 = vpop.f32.mrf.mxu1  ;;  %9129 = vmatprep.mubr.msk.bf16.mxu0 %vm10154_vm2, %v10153_v1  ;;  %v9745_v62 = vld [vmem:[#allocation2 + $0x70] sm:$0xff]  }
 0x161   : > { %2607 = vst.msk [vmem:[#allocation4 + $0xc0] sm:$0xff] %vm1759_vm11, %v2542_v63  ;;  %v8895_v4 = vpop.f32.mrf.mxu0 }
 0x162   : > { %v2290_v5 = vpop.f32.mrf.mxu1 }
 0x163   : > { %v2543_v7 = vadd.f32 %v2478_v6, %v2290_v5  ;;  %v1612_v8 = vpop.f32.mrf.mxu0  ;;  %v2480_v19 = vld [vmem:[#allocation4 + $0xd8] sm:$0xff] }
 0x164   : > { %1789 = vst.msk [vmem:[#allocation4 + $0xe8] sm:$0xff] %vm1759_vm11, %v1612_v8  ;;  %v9022_v10 = vpop.f32.mrf.mxu1 }
 0x165   : > { %2608 = vst.msk [vmem:[#allocation4 + $0xc8] sm:$0xff] %vm1759_vm11, %v2543_v7  ;;  %v8896_v11 = vpop.f32.mrf.mxu0 }
 0x166   : > { %v2295_v12 = vpop.f32.mrf.mxu1 }
 0x167   : > { %v2544_v14 = vadd.f32 %v2479_v13, %v2295_v12  ;;  %v1617_v15 = vpop.f32.mrf.mxu0  ;;  %9130 = vmatmul.mubr.msk.bf16.gmra.mxu0 %vm1359_vm3, %v9741_v9  ;;  %v2481_v26 = vld [vmem:[#allocation4 + $0xe0] sm:$0xff]  ;;  %v9746_v13 = vld [vmem:[#allocation2 + $0x78] sm:$0xff]  }
 0x168   : > { %1790 = vst.msk [vmem:[#allocation4 + $0xf0] sm:$0xff] %vm1759_vm11, %v1617_v15  ;;  %v9025_v16 = vpop.f32.mrf.mxu1  ;;  %9133 = vmatprep.mubr.msk.bf16.mxu0 %vm10154_vm2, %v10153_v1 }
 0x169   : > { %2609 = vst.msk [vmem:[#allocation4 + $0xd0] sm:$0xff] %vm1759_vm11, %v2544_v14  ;;  %v8899_v17 = vpop.f32.mrf.mxu0 }
 0x16a   : > { %v2298_v18 = vpop.f32.mrf.mxu1 }
 0x16b   : > { %v2545_v20 = vadd.f32 %v2480_v19, %v2298_v18  ;;  %v1620_v21 = vpop.f32.mrf.mxu0  ;;  %v2482_v34 = vld [vmem:[#allocation4 + $0xe8] sm:$0xff] }
 0x16c   : > { %1791 = vst.msk [vmem:[#allocation4 + $0xf8] sm:$0xff] %vm1759_vm11, %v1620_v21  ;;  %v9026_v23 = vpop.f32.mrf.mxu1 }
 0x16d   : > { %2610 = vst.msk [vmem:[#allocation4 + $0xd8] sm:$0xff] %vm1759_vm11, %v2545_v20  ;;  %v8900_v24 = vpop.f32.mrf.mxu0 }
 0x16e   : > { %v2303_v25 = vpop.f32.mrf.mxu1 }
 0x16f   : > { %v2546_v28 = vadd.f32 %v2481_v26, %v2303_v25  ;;  %v1625_v29 = vpop.f32.mrf.mxu0  ;;  %9134 = vmatmul.mubr.msk.bf16.gmra.mxu0 %vm1359_vm3, %v9742_v22  ;;  %v2483_v42 = vld [vmem:[#allocation4 + $0xf0] sm:$0xff]  ;;  %v9747_v26 = vld [vmem:[#allocation2 + $0x80] sm:$0xff]  }
 0x170   : > { %1792 = vst.msk [vmem:[#allocation4 + $0x100] sm:$0xff] %vm1759_vm11, %v1625_v29  ;;  %v9029_v30 = vpop.f32.mrf.mxu1  ;;  %9137 = vmatprep.mubr.msk.bf16.mxu0 %vm10154_vm2, %v10153_v1 }
 0x171   : > { %2611 = vst.msk [vmem:[#allocation4 + $0xe0] sm:$0xff] %vm1759_vm11, %v2546_v28  ;;  %v8903_v32 = vpop.f32.mrf.mxu0 }
 0x172   : > { %v2306_v33 = vpop.f32.mrf.mxu1 }
 0x173   : > { %v2547_v35 = vadd.f32 %v2482_v34, %v2306_v33  ;;  %v1628_v37 = vpop.f32.mrf.mxu0  ;;  %v2484_v48 = vld [vmem:[#allocation4 + $0xf8] sm:$0xff] }
 0x174   : > { %1793 = vst.msk [vmem:[#allocation4 + $0x108] sm:$0xff] %vm1759_vm11, %v1628_v37  ;;  %v9030_v39 = vpop.f32.mrf.mxu1 }
 0x175   : > { %2612 = vst.msk [vmem:[#allocation4 + $0xe8] sm:$0xff] %vm1759_vm11, %v2547_v35  ;;  %v8904_v40 = vpop.f32.mrf.mxu0 }
 0x176   : > { %v2311_v41 = vpop.f32.mrf.mxu1 }
 0x177   : > { %v2548_v43 = vadd.f32 %v2483_v42, %v2311_v41  ;;  %v1633_v44 = vpop.f32.mrf.mxu0  ;;  %9138 = vmatmul.mubr.msk.bf16.gmra.mxu0 %vm1359_vm3, %v9743_v38  ;;  %v2485_v53 = vld [vmem:[#allocation4 + $0x100] sm:$0xff]  ;;  %v9748_v42 = vld [vmem:[#allocation2 + $0x88] sm:$0xff]  }
 0x178   : > { %1794 = vst.msk [vmem:[#allocation4 + $0x110] sm:$0xff] %vm1759_vm11, %v1633_v44  ;;  %v9033_v45 = vpop.f32.mrf.mxu1  ;;  %9141 = vmatprep.mubr.msk.bf16.mxu0 %vm10154_vm2, %v10153_v1 }
 0x179   : > { %2613 = vst.msk [vmem:[#allocation4 + $0xf0] sm:$0xff] %vm1759_vm11, %v2548_v43  ;;  %v8907_v46 = vpop.f32.mrf.mxu0 }
 0x17a   : > { %v2314_v47 = vpop.f32.mrf.mxu1 }
 0x17b   : > { %v2549_v49 = vadd.f32 %v2484_v48, %v2314_v47  ;;  %v1636_v50 = vpop.f32.mrf.mxu0  ;;  %v2486_v59 = vld [vmem:[#allocation4 + $0x108] sm:$0xff] }
 0x17c   : > { %1795 = vst.msk [vmem:[#allocation4 + $0x118] sm:$0xff] %vm1759_vm11, %v1636_v50  ;;  %v9034_v51 = vpop.f32.mrf.mxu1 }
 0x17d   : > { %2614 = vst.msk [vmem:[#allocation4 + $0xf8] sm:$0xff] %vm1759_vm11, %v2549_v49  ;;  %v8908_v52 = vpop.f32.mrf.mxu0 }
 0x17e   : > { %v2319_v27 = vpop.f32.mrf.mxu1 }
 0x17f   : > { %v2550_v54 = vadd.f32 %v2485_v53, %v2319_v27  ;;  %v1641_v55 = vpop.f32.mrf.mxu0  ;;  %9142 = vmatmul.mubr.msk.bf16.gmra.mxu0 %vm1359_vm3, %v9744_v31  ;;  %v2487_v4 = vld [vmem:[#allocation4 + $0x110] sm:$0xff] }
 0x180   : > { %1796 = vst.msk [vmem:[#allocation4 + $0x120] sm:$0xff] %vm1759_vm11, %v1641_v55  ;;  %v9037_v56 = vpop.f32.mrf.mxu1  ;;  %9145 = vmatprep.mubr.msk.bf16.mxu0 %vm10154_vm2, %v10153_v1  ;;  %v9749_v53 = vld [vmem:[#allocation2 + $0x90] sm:$0xff]  }
 0x181   : > { %2615 = vst.msk [vmem:[#allocation4 + $0x100] sm:$0xff] %vm1759_vm11, %v2550_v54  ;;  %v8911_v57 = vpop.f32.mrf.mxu0 }
 0x182   : > { %v2322_v58 = vpop.f32.mrf.mxu1 }
 0x183   : > { %v2551_v60 = vadd.f32 %v2486_v59, %v2322_v58  ;;  %v1644_v61 = vpop.f32.mrf.mxu0  ;;  %v2488_v10 = vld [vmem:[#allocation4 + $0x118] sm:$0xff] }
 0x184   : > { %1797 = vst.msk [vmem:[#allocation4 + $0x128] sm:$0xff] %vm1759_vm11, %v1644_v61  ;;  %v9038_v63 = vpop.f32.mrf.mxu1 }
 0x185   : > { %2616 = vst.msk [vmem:[#allocation4 + $0x108] sm:$0xff] %vm1759_vm11, %v2551_v60  ;;  %v8912_v0 = vpop.f32.mrf.mxu0 }
 0x186   : > { %v2327_v2 = vpop.f32.mrf.mxu1 }
 0x187   : > { %v2552_v5 = vadd.f32 %v2487_v4, %v2327_v2  ;;  %v1649_v6 = vpop.f32.mrf.mxu0  ;;  %9146 = vmatmul.mubr.msk.bf16.gmra.mxu0 %vm1359_vm3, %v9745_v62  ;;  %v2489_v17 = vld [vmem:[#allocation4 + $0x120] sm:$0xff]  ;;  %v9750_v4 = vld [vmem:[#allocation2 + $0x98] sm:$0xff]  }
 0x188   : > { %1798 = vst.msk [vmem:[#allocation4 + $0x130] sm:$0xff] %vm1759_vm11, %v1649_v6  ;;  %v9041_v7 = vpop.f32.mrf.mxu1  ;;  %9149 = vmatprep.mubr.msk.bf16.mxu0 %vm10154_vm2, %v10153_v1 }
 0x189   : > { %2617 = vst.msk [vmem:[#allocation4 + $0x110] sm:$0xff] %vm1759_vm11, %v2552_v5  ;;  %v8915_v8 = vpop.f32.mrf.mxu0 }
 0x18a   : > { %v2330_v9 = vpop.f32.mrf.mxu1 }
 0x18b   : > { %v2553_v11 = vadd.f32 %v2488_v10, %v2330_v9  ;;  %v1652_v12 = vpop.f32.mrf.mxu0  ;;  %v2490_v23 = vld [vmem:[#allocation4 + $0x128] sm:$0xff] }
 0x18c   : > { %1799 = vst.msk [vmem:[#allocation4 + $0x138] sm:$0xff] %vm1759_vm11, %v1652_v12  ;;  %v9042_v14 = vpop.f32.mrf.mxu1 }
 0x18d   : > { %2618 = vst.msk [vmem:[#allocation4 + $0x118] sm:$0xff] %vm1759_vm11, %v2553_v11  ;;  %v8916_v15 = vpop.f32.mrf.mxu0 }
 0x18e   : > { %v2335_v16 = vpop.f32.mrf.mxu1 }
 0x18f   : > { %v2554_v18 = vadd.f32 %v2489_v17, %v2335_v16  ;;  %v1657_v19 = vpop.f32.mrf.mxu0  ;;  %9150 = vmatmul.mubr.msk.bf16.gmra.mxu0 %vm1359_vm3, %v9746_v13  ;;  %v2491_v32 = vld [vmem:[#allocation4 + $0x130] sm:$0xff]  ;;  %v9751_v17 = vld [vmem:[#allocation2 + $0xa0] sm:$0xff]  }
 0x190   : > { %1800 = vst.msk [vmem:[#allocation4 + $0x140] sm:$0xff] %vm1759_vm11, %v1657_v19  ;;  %v9045_v20 = vpop.f32.mrf.mxu1  ;;  %9153 = vmatprep.mubr.msk.bf16.mxu0 %vm10154_vm2, %v10153_v1 }
 0x191   : > { %2619 = vst.msk [vmem:[#allocation4 + $0x120] sm:$0xff] %vm1759_vm11, %v2554_v18  ;;  %v8919_v21 = vpop.f32.mrf.mxu0 }
 0x192   : > { %v2338_v22 = vpop.f32.mrf.mxu1 }
 0x193   : > { %v2555_v24 = vadd.f32 %v2490_v23, %v2338_v22  ;;  %v1660_v25 = vpop.f32.mrf.mxu0  ;;  %v2492_v39 = vld [vmem:[#allocation4 + $0x138] sm:$0xff] }
 0x194   : > { %1801 = vst.msk [vmem:[#allocation4 + $0x148] sm:$0xff] %vm1759_vm11, %v1660_v25  ;;  %v9046_v28 = vpop.f32.mrf.mxu1 }
 0x195   : > { %2620 = vst.msk [vmem:[#allocation4 + $0x128] sm:$0xff] %vm1759_vm11, %v2555_v24  ;;  %v8920_v29 = vpop.f32.mrf.mxu0 }
 0x196   : > { %v2343_v30 = vpop.f32.mrf.mxu1 }
 0x197   : > { %v2556_v33 = vadd.f32 %v2491_v32, %v2343_v30  ;;  %v1665_v34 = vpop.f32.mrf.mxu0  ;;  %9154 = vmatmul.mubr.msk.bf16.gmra.mxu0 %vm1359_vm3, %v9747_v26  ;;  %v2493_v46 = vld [vmem:[#allocation4 + $0x140] sm:$0xff]  ;;  %v9752_v32 = vld [vmem:[#allocation2 + $0xa8] sm:$0xff]  }
 0x198   : > { %1802 = vst.msk [vmem:[#allocation4 + $0x150] sm:$0xff] %vm1759_vm11, %v1665_v34  ;;  %v9049_v35 = vpop.f32.mrf.mxu1  ;;  %9157 = vmatprep.mubr.msk.bf16.mxu0 %vm10154_vm2, %v10153_v1 }
 0x199   : > { %2621 = vst.msk [vmem:[#allocation4 + $0x130] sm:$0xff] %vm1759_vm11, %v2556_v33  ;;  %v8923_v37 = vpop.f32.mrf.mxu0 }
 0x19a   : > { %v2346_v38 = vpop.f32.mrf.mxu1 }
 0x19b   : > { %v2557_v40 = vadd.f32 %v2492_v39, %v2346_v38  ;;  %v1668_v41 = vpop.f32.mrf.mxu0  ;;  %v2494_v51 = vld [vmem:[#allocation4 + $0x148] sm:$0xff] }
 0x19c   : > { %1803 = vst.msk [vmem:[#allocation4 + $0x158] sm:$0xff] %vm1759_vm11, %v1668_v41  ;;  %v9050_v43 = vpop.f32.mrf.mxu1 }
 0x19d   : > { %2622 = vst.msk [vmem:[#allocation4 + $0x138] sm:$0xff] %vm1759_vm11, %v2557_v40  ;;  %v8924_v44 = vpop.f32.mrf.mxu0 }
 0x19e   : > { %v2351_v45 = vpop.f32.mrf.mxu1 }
 0x19f   : > { %v2558_v47 = vadd.f32 %v2493_v46, %v2351_v45  ;;  %v1673_v48 = vpop.f32.mrf.mxu0  ;;  %9158 = vmatmul.mubr.msk.bf16.gmra.mxu0 %vm1359_vm3, %v9748_v42  ;;  %v2495_v57 = vld [vmem:[#allocation4 + $0x150] sm:$0xff] }
 0x1a0   : > { %1804 = vst.msk [vmem:[#allocation4 + $0x160] sm:$0xff] %vm1759_vm11, %v1673_v48  ;;  %v9053_v49 = vpop.f32.mrf.mxu1  ;;  %9161 = vmatprep.mubr.msk.bf16.mxu0 %vm10154_vm2, %v10153_v1  ;;  %v9753_v46 = vld [vmem:[#allocation2 + $0xb0] sm:$0xff]  }
 0x1a1   : > { %2623 = vst.msk [vmem:[#allocation4 + $0x140] sm:$0xff] %vm1759_vm11, %v2558_v47  ;;  %v8927_v50 = vpop.f32.mrf.mxu0 }
 0x1a2   : > { %v2354_v31 = vpop.f32.mrf.mxu1 }
 0x1a3   : > { %v2559_v52 = vadd.f32 %v2494_v51, %v2354_v31  ;;  %v1676_v27 = vpop.f32.mrf.mxu0  ;;  %v2496_v63 = vld [vmem:[#allocation4 + $0x158] sm:$0xff] }
 0x1a4   : > { %1805 = vst.msk [vmem:[#allocation4 + $0x168] sm:$0xff] %vm1759_vm11, %v1676_v27  ;;  %v9054_v54 = vpop.f32.mrf.mxu1 }
 0x1a5   : > { %2624 = vst.msk [vmem:[#allocation4 + $0x148] sm:$0xff] %vm1759_vm11, %v2559_v52  ;;  %v8928_v55 = vpop.f32.mrf.mxu0 }
 0x1a6   : > { %v2359_v56 = vpop.f32.mrf.mxu1 }
 0x1a7   : > { %v2560_v58 = vadd.f32 %v2495_v57, %v2359_v56  ;;  %v1681_v59 = vpop.f32.mrf.mxu0  ;;  %9162 = vmatmul.mubr.msk.bf16.gmra.mxu0 %vm1359_vm3, %v9749_v53  ;;  %v2497_v8 = vld [vmem:[#allocation4 + $0x160] sm:$0xff]  ;;  %v9754_v57 = vld [vmem:[#allocation2 + $0xb8] sm:$0xff]  }
 0x1a8   : > { %1806 = vst.msk [vmem:[#allocation4 + $0x170] sm:$0xff] %vm1759_vm11, %v1681_v59  ;;  %v9057_v60 = vpop.f32.mrf.mxu1  ;;  %9165 = vmatprep.mubr.msk.bf16.mxu0 %vm10154_vm2, %v10153_v1 }
 0x1a9   : > { %2625 = vst.msk [vmem:[#allocation4 + $0x150] sm:$0xff] %vm1759_vm11, %v2560_v58  ;;  %v8931_v61 = vpop.f32.mrf.mxu0 }
 0x1aa   : > { %v2362_v62 = vpop.f32.mrf.mxu1 }
 0x1ab   : > { %v2561_v0 = vadd.f32 %v2496_v63, %v2362_v62  ;;  %v1684_v2 = vpop.f32.mrf.mxu0  ;;  %v2498_v14 = vld [vmem:[#allocation4 + $0x168] sm:$0xff] }
 0x1ac   : > { %1807 = vst.msk [vmem:[#allocation4 + $0x178] sm:$0xff] %vm1759_vm11, %v1684_v2  ;;  %v9058_v5 = vpop.f32.mrf.mxu1 }
 0x1ad   : > { %2626 = vst.msk [vmem:[#allocation4 + $0x158] sm:$0xff] %vm1759_vm11, %v2561_v0  ;;  %v8932_v6 = vpop.f32.mrf.mxu0 }
 0x1ae   : > { %v2367_v7 = vpop.f32.mrf.mxu1 }
 0x1af   : > { %v2562_v9 = vadd.f32 %v2497_v8, %v2367_v7  ;;  %v1689_v10 = vpop.f32.mrf.mxu0  ;;  %9166 = vmatmul.mubr.msk.bf16.gmra.mxu0 %vm1359_vm3, %v9750_v4  ;;  %v2499_v21 = vld [vmem:[#allocation4 + $0x170] sm:$0xff]  ;;  %v9755_v8 = vld [vmem:[#allocation2 + $0xc0] sm:$0xff]  }
 0x1b0   : > { %1808 = vst.msk [vmem:[#allocation4 + $0x180] sm:$0xff] %vm1759_vm11, %v1689_v10  ;;  %v9061_v11 = vpop.f32.mrf.mxu1  ;;  %9169 = vmatprep.mubr.msk.bf16.mxu0 %vm10154_vm2, %v10153_v1 }
 0x1b1   : > { %2627 = vst.msk [vmem:[#allocation4 + $0x160] sm:$0xff] %vm1759_vm11, %v2562_v9  ;;  %v8935_v12 = vpop.f32.mrf.mxu0 }
 0x1b2   : > { %v2370_v13 = vpop.f32.mrf.mxu1 }
 0x1b3   : > { %v2563_v15 = vadd.f32 %v2498_v14, %v2370_v13  ;;  %v1692_v16 = vpop.f32.mrf.mxu0  ;;  %v2500_v28 = vld [vmem:[#allocation4 + $0x178] sm:$0xff] }
 0x1b4   : > { %1809 = vst.msk [vmem:[#allocation4 + $0x188] sm:$0xff] %vm1759_vm11, %v1692_v16  ;;  %v9062_v18 = vpop.f32.mrf.mxu1 }
 0x1b5   : > { %2628 = vst.msk [vmem:[#allocation4 + $0x168] sm:$0xff] %vm1759_vm11, %v2563_v15  ;;  %v8936_v19 = vpop.f32.mrf.mxu0 }
 0x1b6   : > { %v2375_v20 = vpop.f32.mrf.mxu1 }
 0x1b7   : > { %v2564_v22 = vadd.f32 %v2499_v21, %v2375_v20  ;;  %v1697_v23 = vpop.f32.mrf.mxu0  ;;  %9170 = vmatmul.mubr.msk.bf16.gmra.mxu0 %vm1359_vm3, %v9751_v17  ;;  %v2501_v37 = vld [vmem:[#allocation4 + $0x180] sm:$0xff]  ;;  %v9756_v21 = vld [vmem:[#allocation2 + $0xc8] sm:$0xff]  }
 0x1b8   : > { %1810 = vst.msk [vmem:[#allocation4 + $0x190] sm:$0xff] %vm1759_vm11, %v1697_v23  ;;  %v9065_v24 = vpop.f32.mrf.mxu1  ;;  %9173 = vmatprep.mubr.msk.bf16.mxu0 %vm10154_vm2, %v10153_v1 }
 0x1b9   : > { %2629 = vst.msk [vmem:[#allocation4 + $0x170] sm:$0xff] %vm1759_vm11, %v2564_v22  ;;  %v8939_v25 = vpop.f32.mrf.mxu0 }
 0x1ba   : > { %v2378_v26 = vpop.f32.mrf.mxu1 }
 0x1bb   : > { %v2565_v29 = vadd.f32 %v2500_v28, %v2378_v26  ;;  %v1700_v30 = vpop.f32.mrf.mxu0  ;;  %v2502_v43 = vld [vmem:[#allocation4 + $0x188] sm:$0xff] }
 0x1bc   : > { %1811 = vst.msk [vmem:[#allocation4 + $0x198] sm:$0xff] %vm1759_vm11, %v1700_v30  ;;  %v9066_v33 = vpop.f32.mrf.mxu1 }
 0x1bd   : > { %2630 = vst.msk [vmem:[#allocation4 + $0x178] sm:$0xff] %vm1759_vm11, %v2565_v29  ;;  %v8940_v34 = vpop.f32.mrf.mxu0 }
 0x1be   : > { %v2383_v35 = vpop.f32.mrf.mxu1 }
 0x1bf   : > { %v2566_v38 = vadd.f32 %v2501_v37, %v2383_v35  ;;  %v1705_v39 = vpop.f32.mrf.mxu0  ;;  %9174 = vmatmul.mubr.msk.bf16.gmra.mxu0 %vm1359_vm3, %v9752_v32  ;;  %v2503_v50 = vld [vmem:[#allocation4 + $0x190] sm:$0xff] }
 0x1c0   : > { %1812 = vst.msk [vmem:[#allocation4 + $0x1a0] sm:$0xff] %vm1759_vm11, %v1705_v39  ;;  %v9069_v40 = vpop.f32.mrf.mxu1  ;;  %9177 = vmatprep.mubr.msk.bf16.mxu0 %vm10154_vm2, %v10153_v1  ;;  %v9757_v37 = vld [vmem:[#allocation2 + $0xd0] sm:$0xff]  }
 0x1c1   : > { %2631 = vst.msk [vmem:[#allocation4 + $0x180] sm:$0xff] %vm1759_vm11, %v2566_v38  ;;  %v8943_v41 = vpop.f32.mrf.mxu0 }
 0x1c2   : > { %v2386_v42 = vpop.f32.mrf.mxu1 }
 0x1c3   : > { %v2567_v44 = vadd.f32 %v2502_v43, %v2386_v42  ;;  %v1708_v45 = vpop.f32.mrf.mxu0  ;;  %v2504_v54 = vld [vmem:[#allocation4 + $0x198] sm:$0xff] }
 0x1c4   : > { %1813 = vst.msk [vmem:[#allocation4 + $0x1a8] sm:$0xff] %vm1759_vm11, %v1708_v45  ;;  %v9070_v47 = vpop.f32.mrf.mxu1 }
 0x1c5   : > { %2632 = vst.msk [vmem:[#allocation4 + $0x188] sm:$0xff] %vm1759_vm11, %v2567_v44  ;;  %v8944_v48 = vpop.f32.mrf.mxu0 }
 0x1c6   : > { %v2391_v49 = vpop.f32.mrf.mxu1 }
 0x1c7   : > { %v2568_v31 = vadd.f32 %v2503_v50, %v2391_v49  ;;  %v1713_v51 = vpop.f32.mrf.mxu0  ;;  %9178 = vmatmul.mubr.msk.bf16.gmra.mxu0 %vm1359_vm3, %v9753_v46  ;;  %v2505_v61 = vld [vmem:[#allocation4 + $0x1a0] sm:$0xff]  ;;  %v9758_v50 = vld [vmem:[#allocation2 + $0xd8] sm:$0xff]  }
 0x1c8   : > { %1814 = vst.msk [vmem:[#allocation4 + $0x1b0] sm:$0xff] %vm1759_vm11, %v1713_v51  ;;  %v9073_v52 = vpop.f32.mrf.mxu1  ;;  %9181 = vmatprep.mubr.msk.bf16.mxu0 %vm10154_vm2, %v10153_v1 }
 0x1c9   : > { %2633 = vst.msk [vmem:[#allocation4 + $0x190] sm:$0xff] %vm1759_vm11, %v2568_v31  ;;  %v8947_v27 = vpop.f32.mrf.mxu0 }
 0x1ca   : > { %v2394_v53 = vpop.f32.mrf.mxu1 }
 0x1cb   : > { %v2569_v55 = vadd.f32 %v2504_v54, %v2394_v53  ;;  %v1716_v56 = vpop.f32.mrf.mxu0  ;;  %v2506_v5 = vld [vmem:[#allocation4 + $0x1a8] sm:$0xff] }
 0x1cc   : > { %1815 = vst.msk [vmem:[#allocation4 + $0x1b8] sm:$0xff] %vm1759_vm11, %v1716_v56  ;;  %v9074_v58 = vpop.f32.mrf.mxu1 }
 0x1cd   : > { %2634 = vst.msk [vmem:[#allocation4 + $0x198] sm:$0xff] %vm1759_vm11, %v2569_v55  ;;  %v8948_v59 = vpop.f32.mrf.mxu0 }
 0x1ce   : > { %v2399_v60 = vpop.f32.mrf.mxu1 }
 0x1cf   : > { %v2570_v62 = vadd.f32 %v2505_v61, %v2399_v60  ;;  %v1721_v63 = vpop.f32.mrf.mxu0  ;;  %9182 = vmatmul.mubr.msk.bf16.gmra.mxu0 %vm1359_vm3, %v9754_v57  ;;  %v2507_v12 = vld [vmem:[#allocation4 + $0x1b0] sm:$0xff]  ;;  %v9759_v61 = vld [vmem:[#allocation2 + $0xe0] sm:$0xff]  }
 0x1d0   : > { %1816 = vst.msk [vmem:[#allocation4 + $0x1c0] sm:$0xff] %vm1759_vm11, %v1721_v63  ;;  %v9077_v0 = vpop.f32.mrf.mxu1  ;;  %9185 = vmatprep.mubr.msk.bf16.mxu0 %vm10154_vm2, %v10153_v1 }
 0x1d1   : > { %2635 = vst.msk [vmem:[#allocation4 + $0x1a0] sm:$0xff] %vm1759_vm11, %v2570_v62  ;;  %v8951_v2 = vpop.f32.mrf.mxu0 }
 0x1d2   : > { %v2402_v4 = vpop.f32.mrf.mxu1 }
 0x1d3   : > { %v2571_v6 = vadd.f32 %v2506_v5, %v2402_v4  ;;  %v1724_v7 = vpop.f32.mrf.mxu0  ;;  %v2508_v18 = vld [vmem:[#allocation4 + $0x1b8] sm:$0xff] }
 0x1d4   : > { %1817 = vst.msk [vmem:[#allocation4 + $0x1c8] sm:$0xff] %vm1759_vm11, %v1724_v7  ;;  %v9078_v9 = vpop.f32.mrf.mxu1 }
 0x1d5   : > { %2636 = vst.msk [vmem:[#allocation4 + $0x1a8] sm:$0xff] %vm1759_vm11, %v2571_v6  ;;  %v8952_v10 = vpop.f32.mrf.mxu0  ;;  %v3277_v6 = vld [vmem:[#allocation4] sm:$0xff] }
 0x1d6   : > { %v2407_v11 = vpop.f32.mrf.mxu1 }
 0x1d7   : > { %v2572_v13 = vadd.f32 %v2507_v12, %v2407_v11  ;;  %v1729_v14 = vpop.f32.mrf.mxu0  ;;  %9186 = vmatmul.mubr.msk.bf16.gmra.mxu0 %vm1359_vm3, %v9755_v8  ;;  %v2509_v25 = vld [vmem:[#allocation4 + $0x1c0] sm:$0xff] }
 0x1d8   : > { %1818 = vst.msk [vmem:[#allocation4 + $0x1d0] sm:$0xff] %vm1759_vm11, %v1729_v14  ;;  %v9081_v15 = vpop.f32.mrf.mxu1  ;;  %9189 = vmatprep.mubr.msk.bf16.mxu0 %vm10154_vm2, %v10153_v1  ;;  %v10975_v14 = vld [vmem:[#allocation4 + $0x8] sm:$0xff] }
 0x1d9   : > { %2637 = vst.msk [vmem:[#allocation4 + $0x1b0] sm:$0xff] %vm1759_vm11, %v2572_v13  ;;  %v8955_v16 = vpop.f32.mrf.mxu0  ;;  %v10977_v15 = vld [vmem:[#allocation2 + $0xe8] sm:$0xff]  }
 0x1da   : > { %v2410_v17 = vpop.f32.mrf.mxu1 }
 0x1db   : > { %v2573_v19 = vadd.f32 %v2508_v18, %v2410_v17  ;;  %v1732_v20 = vpop.f32.mrf.mxu0  ;;  %v2510_v33 = vld [vmem:[#allocation4 + $0x1c8] sm:$0xff] }
 0x1dc   : > { %1819 = vst.msk [vmem:[#allocation4 + $0x1d8] sm:$0xff] %vm1759_vm11, %v1732_v20  ;;  %v9082_v22 = vpop.f32.mrf.mxu1 }
 0x1dd   : > { %2638 = vst.msk [vmem:[#allocation4 + $0x1b8] sm:$0xff] %vm1759_vm11, %v2573_v19  ;;  %v8956_v23 = vpop.f32.mrf.mxu0 }
 0x1de   : > { %v2415_v24 = vpop.f32.mrf.mxu1  ;;  %v3279_v23 = vld [vmem:[#allocation4 + $0x10] sm:$0xff] }
 0x1df   : > { %v2574_v26 = vadd.f32 %v2509_v25, %v2415_v24  ;;  %v1737_v28 = vpop.f32.mrf.mxu0  ;;  %9190 = vmatmul.mubr.msk.bf16.gmra.mxu0 %vm1359_vm3, %v9756_v21  ;;  %v2511_v41 = vld [vmem:[#allocation4 + $0x1d0] sm:$0xff] }
 0x1e0   : > { %1820 = vst.msk [vmem:[#allocation4 + $0x1e0] sm:$0xff] %vm1759_vm11, %v1737_v28  ;;  %v9085_v29 = vpop.f32.mrf.mxu1  ;;  %9193 = vmatprep.mubr.msk.bf16.mxu0 %vm10154_vm2, %v10153_v1  ;;  %v9761_v28 = vld [vmem:[#allocation2 + $0xf0] sm:$0xff]  }
 0x1e1   : > { %2639 = vst.msk [vmem:[#allocation4 + $0x1c0] sm:$0xff] %vm1759_vm11, %v2574_v26  ;;  %v8959_v30 = vpop.f32.mrf.mxu0  ;;  %v3280_v26 = vld [vmem:[#allocation4 + $0x18] sm:$0xff] }
 0x1e2   : > { %v2418_v32 = vpop.f32.mrf.mxu1 }
 0x1e3   : > { %v2575_v34 = vadd.f32 %v2510_v33, %v2418_v32  ;;  %v1740_v35 = vpop.f32.mrf.mxu0  ;;  %v2512_v47 = vld [vmem:[#allocation4 + $0x1d8] sm:$0xff] }
 0x1e4   : > { %1821 = vst.msk [vmem:[#allocation4 + $0x1e8] sm:$0xff] %vm1759_vm11, %v1740_v35  ;;  %v9086_v38 = vpop.f32.mrf.mxu1 }
 0x1e5   : > { %2640 = vst.msk [vmem:[#allocation4 + $0x1c8] sm:$0xff] %vm1759_vm11, %v2575_v34  ;;  %v8960_v39 = vpop.f32.mrf.mxu0  ;;  %v3281_v38 = vld [vmem:[#allocation4 + $0x20] sm:$0xff] }
 0x1e6   : > { %v2423_v40 = vpop.f32.mrf.mxu1 }
 0x1e7   : > { %v2576_v42 = vadd.f32 %v2511_v41, %v2423_v40  ;;  %v1745_v43 = vpop.f32.mrf.mxu0  ;;  %9194 = vmatmul.mubr.msk.bf16.gmra.mxu0 %vm1359_vm3, %v9757_v37  ;;  %v2513_v27 = vld [vmem:[#allocation4 + $0x1e0] sm:$0xff] }
 0x1e8   : > { %1822 = vst.msk [vmem:[#allocation4 + $0x1f0] sm:$0xff] %vm1759_vm11, %v1745_v43  ;;  %v9089_v44 = vpop.f32.mrf.mxu1  ;;  %9197 = vmatprep.mubr.msk.bf16.mxu0 %vm10154_vm2, %v10153_v1 }
 0x1e9   : > { %2641 = vst.msk [vmem:[#allocation4 + $0x1d0] sm:$0xff] %vm1759_vm11, %v2576_v42  ;;  %v8963_v45 = vpop.f32.mrf.mxu0  ;;  %v3282_v44 = vld [vmem:[#allocation4 + $0x28] sm:$0xff] }
 0x1ea   : > { %v2426_v46 = vpop.f32.mrf.mxu1  ;;  %v9762_v45 = vld [vmem:[#allocation2 + $0xf8] sm:$0xff]  }
 0x1eb   : > { %v2577_v48 = vadd.f32 %v2512_v47, %v2426_v46  ;;  %v1748_v49 = vpop.f32.mrf.mxu0  ;;  %v2514_v58 = vld [vmem:[#allocation4 + $0x1e8] sm:$0xff] }
 0x1ec   : > { %1823 = vst.msk [vmem:[#allocation4 + $0x1f8] sm:$0xff] %vm1759_vm11, %v1748_v49  ;;  %v9090_v31 = vpop.f32.mrf.mxu1  ;;  %v3283_v49 = vld [vmem:[#allocation4 + $0x30] sm:$0xff] }
 0x1ed   : > { %2642 = vst.msk [vmem:[#allocation4 + $0x1d8] sm:$0xff] %vm1759_vm11, %v2577_v48  ;;  %v8964_v51 = vpop.f32.mrf.mxu0 }
 0x1ee   : > { %v2431_v52 = vpop.f32.mrf.mxu1 }
 0x1ef   : > { %v2578_v53 = vadd.f32 %v2513_v27, %v2431_v52  ;;  %v1753_v54 = vpop.f32.mrf.mxu0  ;;  %9198 = vmatmul.mubr.msk.bf16.gmra.mxu0 %vm1359_vm3, %v9758_v50  ;;  %v2515_v2 = vld [vmem:[#allocation4 + $0x1f0] sm:$0xff]  ;;  %v3284_v52 = vld [vmem:[#allocation4 + $0x38] sm:$0xff]  ;;  %v9763_v27 = vld [vmem:[#allocation2 + $0x100] sm:$0xff]  }
 0x1f0   : > { %1824 = vst.msk [vmem:[#allocation4 + $0x200] sm:$0xff] %vm1759_vm11, %v1753_v54  ;;  %v9093_v55 = vpop.f32.mrf.mxu1  ;;  %9201 = vmatprep.mubr.msk.bf16.mxu0 %vm10154_vm2, %v10153_v1 }
 0x1f1   : > { %2643 = vst.msk [vmem:[#allocation4 + $0x1e0] sm:$0xff] %vm1759_vm11, %v2578_v53  ;;  %v8967_v56 = vpop.f32.mrf.mxu0 }
 0x1f2   : > { %v2434_v57 = vpop.f32.mrf.mxu1 }
 0x1f3   : > { %v2579_v59 = vadd.f32 %v2514_v58, %v2434_v57  ;;  %v1756_v60 = vpop.f32.mrf.mxu0  ;;  %v2516_v11 = vld [vmem:[#allocation4 + $0x1f8] sm:$0xff]  ;;  %v3285_v57 = vld [vmem:[#allocation4 + $0x40] sm:$0xff] }
 0x1f4   : > { %v9094_v62 = vpop.f32.mrf.mxu1 }
 0x1f5   : > { %2644 = vst.msk [vmem:[#allocation4 + $0x1e8] sm:$0xff] %vm1759_vm11, %v2579_v59  ;;  %v8968_v63 = vpop.f32.mrf.mxu0 }
 0x1f6   : > { %v2439_v0 = vpop.f32.mrf.mxu1 }
 0x1f7   : > { %v2580_v4 = vadd.f32 %v2515_v2, %v2439_v0  ;;  %v3015_v5 = vpop.f32.mrf.mxu0  ;;  %9202 = vmatmul.mubr.msk.bf16.gmra.mxu0 %vm1359_vm3, %v9759_v61  ;;  %v2517_v20 = vld [vmem:[#allocation4 + $0x200] sm:$0xff]  ;;  %v3286_v0 = vld [vmem:[#allocation4 + $0x48] sm:$0xff] }
 0x1f8   : > { %v3342_v7 = vadd.f32 %v3277_v6, %v3015_v5  ;;  %v9097_v8 = vpop.f32.mrf.mxu1  ;;  %9205 = vmatprep.mubr.msk.bf16.mxu0 %vm10154_vm2, %v10153_v1  ;;  %v9764_v2 = vld [vmem:[#allocation2 + $0x108] sm:$0xff]  }
 0x1f9   : > { %2645 = vst.msk [vmem:[#allocation4 + $0x1f0] sm:$0xff] %vm1759_vm11, %v2580_v4  ;;  %v9107_v9 = vpop.f32.mrf.mxu0  ;;  %v3287_v8 = vld [vmem:[#allocation4 + $0x50] sm:$0xff] }
 0x1fa   : > { %3407 = vst.msk [vmem:[#allocation4] sm:$0xff] %vm1759_vm11, %v3342_v7  ;;  %v2442_v10 = vpop.f32.mrf.mxu1 }
 0x1fb   : > { %v10971_v12 = vadd.f32 %v2516_v11, %v2442_v10  ;;  %v10973_v13 = vpop.f32.mrf.mxu0 }
 0x1fc   : > { %v3343_v16 = vadd.f32 %v10975_v14, %v10973_v13  ;;  %v9098_v17 = vpop.f32.mrf.mxu1  ;;  %v9765_v13 = vld [vmem:[#allocation2 + $0x110] sm:$0xff]  }
 0x1fd   : > { %2646 = vst.msk [vmem:[#allocation4 + $0x1f8] sm:$0xff] %vm1759_vm11, %v10971_v12  ;;  %v9108_v18 = vpop.f32.mrf.mxu0  ;;  %v3288_v12 = vld [vmem:[#allocation4 + $0x58] sm:$0xff]  ;;  %v9768_v17 = vld [vmem:[#allocation3] sm:$0xff]  }
 0x1fe   : > { %3408 = vst.msk [vmem:[#allocation4 + $0x8] sm:$0xff] %vm1759_vm11, %v3343_v16  ;;  %v2447_v19 = vpop.f32.mrf.mxu1  ;;  %9240 = vmatmul.mubr.msk.bf16.vlgmr.msra.gmra.mxu1 %vm4952_vm14, %v9768_v17  ;;  %v3300_v17 = vld [vmem:[#allocation4 + $0xb8] sm:$0xff] }
 0x1ff   : > { %v2582_v21 = vadd.f32 %v2517_v20, %v2447_v19  ;;  %v3023_v22 = vpop.f32.mrf.mxu0  ;;  %9206 = vmatmul.mubr.msk.bf16.gmra.mxu0 %vm1359_vm3, %v10977_v15  ;;  %v3289_v19 = vld [vmem:[#allocation4 + $0x60] sm:$0xff]  ;;  %9243 = vmatprep.mubr.msk.bf16.mxu1 %vm10154_vm2, %v10153_v1 }
 0x200   : > { %v3344_v24 = vadd.f32 %v3279_v23, %v3023_v22  ;;  %9209 = vmatprep.mubr.msk.bf16.mxu0 %vm10154_vm2, %v10153_v1  ;;  %v9101_v3 = vpop.f32.mrf.mxu1 }
 0x201   : > { %2647 = vst.msk [vmem:[#allocation4 + $0x200] sm:$0xff] %vm1759_vm11, %v2582_v21  ;;  %v9111_v25 = vpop.f32.mrf.mxu0  ;;  %v3290_v3 = vld [vmem:[#allocation4 + $0x68] sm:$0xff] }
 0x202   : > { %3409 = vst.msk [vmem:[#allocation4 + $0x10] sm:$0xff] %vm1759_vm11, %v3344_v24  ;;  %v2450_v29 = vpop.f32.mrf.mxu1  ;;  %v9766_v25 = vld [vmem:[#allocation2 + $0x118] sm:$0xff]  }
 0x203   : > { %v3026_v30 = vpop.f32.mrf.mxu0 }
 0x204   : > { %v3345_v32 = vadd.f32 %v3280_v26, %v3026_v30  ;;  %v9102_v33 = vpop.f32.mrf.mxu1  ;;  %v9769_v30 = vld [vmem:[#allocation3 + $0x8] sm:$0xff]  }
 0x205   : > { %v9112_v34 = vpop.f32.mrf.mxu0  ;;  %v3696_v35 = vld [vmem:[#allocation4 + $0x2] sm:$0xff]  ;;  %v3291_v33 = vld [vmem:[#allocation4 + $0x70] sm:$0xff] }
 0x206   : > { %v3504_v37 = vld [vmem:[#allocation4 + $0x1] sm:$0xff]  ;;  %3410 = vst.msk [vmem:[#allocation4 + $0x18] sm:$0xff] %vm1759_vm11, %v3345_v32  ;;  %3760 = vrot.lane.b32.xlu1 %v3696_v35, %s10156_s21  ;;  %9244 = vmatmul.mubr.msk.bf16.gmra.mxu1 %vm4952_vm14, %v9769_v30 }
 0x207   : > { %3568 = vrot.lane.b32.xlu0 %v3504_v37, %s10157_s22  ;;  %v3031_v39 = vpop.f32.mrf.mxu0  ;;  %9210 = vmatmul.mubr.msk.bf16.gmra.mxu0 %vm1359_vm3, %v9761_v28  ;;  %v3302_v30 = vld [vmem:[#allocation4 + $0xc8] sm:$0xff] }
 0x208   : > { %v3346_v40 = vadd.f32 %v3281_v38, %v3031_v39  ;;  %9213 = vmatprep.mubr.msk.bf16.mxu0 %vm10154_vm2, %v10153_v1  ;;  %9247 = vmatprep.mubr.msk.bf16.mxu1 %vm10154_vm2, %v10153_v1  ;;  %v3292_v38 = vld [vmem:[#allocation4 + $0x78] sm:$0xff]  ;;  %v9767_v39 = vld [vmem:[#allocation2 + $0x120] ss:$0 sps:$4 sm:$0xff]  }
 0x209   : > { %v9115_v41 = vpop.f32.mrf.mxu0  ;;  %v3697_v42 = vld [vmem:[#allocation4 + $0xa] sm:$0xff] }
 0x20a   : > { %v3505_v43 = vld [vmem:[#allocation4 + $0x9] sm:$0xff]  ;;  %3411 = vst.msk [vmem:[#allocation4 + $0x20] sm:$0xff] %vm1759_vm11, %v3346_v40  ;;  %3762 = vrot.lane.b32.xlu1 %v3697_v42, %s10156_s21 }
 0x20b   : > { %3570 = vrot.lane.b32.xlu0 %v3505_v43, %s10157_s22  ;;  %v3034_v46 = vpop.f32.mrf.mxu0  ;;  %v8394_v43 = vld [vmem:[%s12501_s4 + $0x1] sm:$0x1] }
 0x20c   : > { %v3347_v47 = vadd.f32 %v3282_v44, %v3034_v46  ;;  %v5749_v46 = vsel %vm5052_vm12, %v8394_v43, 0 }
 0x20d   : > { %v9116_v48 = vpop.f32.mrf.mxu0  ;;  %9372 = vmatpush3.bf16.msra.mxu0 %v5749_v46  ;;  %v3305_v46 = vld [vmem:[#allocation4 + $0xe0] sm:$0xff] }
 0x20e   : > { %3412 = vst.msk [vmem:[#allocation4 + $0x28] sm:$0xff] %vm1759_vm11, %v3347_v47 }
 0x20f   : > { %v3039_v50 = vpop.f32.mrf.mxu0  ;;  %9214 = vmatmul.mubr.msk.bf16.gmra.mxu0 %vm1359_vm3, %v9762_v45  ;;  %v3293_v45 = vld [vmem:[#allocation4 + $0x80] sm:$0xff] }
 0x210   : > { %v3348_v31 = vadd.f32 %v3283_v49, %v3039_v50  ;;  %9217 = vmatprep.mubr.msk.bf16.mxu0 %vm10154_vm2, %v10153_v1 }
 0x211   : > { %v9119_v51 = vpop.f32.mrf.mxu0 }
 0x212   : > { %3413 = vst.msk [vmem:[#allocation4 + $0x30] sm:$0xff] %vm1759_vm11, %v3348_v31  ;;  %v3294_v51 = vld [vmem:[#allocation4 + $0x88] sm:$0xff] }
 0x213   : > { %v3042_v53 = vpop.f32.mrf.mxu0 }
 0x214   : > { %v3349_v54 = vadd.f32 %v3284_v52, %v3042_v53 }
 0x215   : > { %v9120_v55 = vpop.f32.mrf.mxu0  ;;  %v3506_v56 = vld [vmem:[#allocation4 + $0x21] sm:$0xff] }
 0x216   : > { %3414 = vst.msk [vmem:[#allocation4 + $0x38] sm:$0xff] %vm1759_vm11, %v3349_v54  ;;  %3572 = vrot.lane.b32.xlu0 %v3506_v56, %s10157_s22  ;;  %v3698_v61 = vld [vmem:[#allocation4 + $0x22] sm:$0xff]  ;;  %v3295_v55 = vld [vmem:[#allocation4 + $0x90] sm:$0xff] }
 0x217   : > { %v3047_v58 = vpop.f32.mrf.mxu0  ;;  %9218 = vmatmul.mubr.msk.bf16.gmra.mxu0 %vm1359_vm3, %v9763_v27 }
 0x218   : > { %v3350_v59 = vadd.f32 %v3285_v57, %v3047_v58  ;;  %9221 = vmatprep.mubr.msk.bf16.mxu0 %vm10154_vm2, %v10153_v1 }
 0x219   : > { %v9123_v60 = vpop.f32.mrf.mxu0  ;;  %v3507_v62 = vld [vmem:[#allocation4 + $0x29] sm:$0xff] }
 0x21a   : > { %3415 = vst.msk [vmem:[#allocation4 + $0x40] sm:$0xff] %vm1759_vm11, %v3350_v59  ;;  %3764 = vrot.lane.b32.xlu0 %v3698_v61, %s10156_s21  ;;  %3574 = vrot.lane.b32.xlu1 %v3507_v62, %s10157_s22  ;;  %v3699_v6 = vld [vmem:[#allocation4 + $0x2a] sm:$0xff]  ;;  %v3296_v59 = vld [vmem:[#allocation4 + $0x98] sm:$0xff] }
 0x21b   : > { %v3050_v63 = vpop.f32.mrf.mxu0 }
 0x21c   : > { %v3351_v4 = vadd.f32 %v3286_v0, %v3050_v63  ;;  %v3297_v0 = vld [vmem:[#allocation4 + $0xa0] sm:$0xff] }
 0x21d   : > { %v9124_v5 = vpop.f32.mrf.mxu0 }
 0x21e   : > { %3416 = vst.msk [vmem:[#allocation4 + $0x48] sm:$0xff] %vm1759_vm11, %v3351_v4  ;;  %3766 = vrot.lane.b32.xlu1 %v3699_v6, %s10156_s21 }
 0x21f   : > { %v3055_v7 = vpop.f32.mrf.mxu0  ;;  %9222 = vmatmul.mubr.msk.bf16.gmra.mxu0 %vm1359_vm3, %v9764_v2 }
 0x220   : > { %v3352_v9 = vadd.f32 %v3287_v8, %v3055_v7  ;;  %9225 = vmatprep.mubr.msk.bf16.mxu0 %vm10154_vm2, %v10153_v1  ;;  %v3298_v8 = vld [vmem:[#allocation4 + $0xa8] sm:$0xff] }
 0x221   : > { %v9127_v10 = vpop.f32.mrf.mxu0 }
 0x222   : > { %3417 = vst.msk [vmem:[#allocation4 + $0x50] sm:$0xff] %vm1759_vm11, %v3352_v9 }
 0x223   : > { %v3058_v11 = vpop.f32.mrf.mxu0 }
 0x224   : > { %v3353_v14 = vadd.f32 %v3288_v12, %v3058_v11 }
 0x225   : > { %v9128_v15 = vpop.f32.mrf.mxu0  ;;  %v3508_v16 = vld [vmem:[#allocation4 + $0x41] sm:$0xff] }
 0x226   : > { %3418 = vst.msk [vmem:[#allocation4 + $0x58] sm:$0xff] %vm1759_vm11, %v3353_v14  ;;  %3576 = vrot.lane.b32.xlu0 %v3508_v16, %s10157_s22  ;;  %v3700_v22 = vld [vmem:[#allocation4 + $0x42] sm:$0xff] }
 0x227   : > { %v3063_v18 = vpop.f32.mrf.mxu0  ;;  %9226 = vmatmul.mubr.msk.bf16.gmra.mxu0 %vm1359_vm3, %v9765_v13  ;;  %v3299_v13 = vld [vmem:[#allocation4 + $0xb0] sm:$0xff] }
 0x228   : > { %v3354_v20 = vadd.f32 %v3289_v19, %v3063_v18  ;;  %9229 = vmatprep.mubr.msk.bf16.mxu0 %vm10154_vm2, %v10153_v1  ;;  %v8461_v19 = vld [vmem:[%s12501_s4 + $0x2] sm:$0x1] }
 0x229   : > { %v9131_v21 = vpop.f32.mrf.mxu0  ;;  %v3509_v23 = vld [vmem:[#allocation4 + $0x49] sm:$0xff] }
 0x22a   : > { %3419 = vst.msk [vmem:[#allocation4 + $0x60] sm:$0xff] %vm1759_vm11, %v3354_v20  ;;  %3768 = vrot.lane.b32.xlu0 %v3700_v22, %s10156_s21  ;;  %3578 = vrot.lane.b32.xlu1 %v3509_v23, %s10157_s22  ;;  %v3701_v29 = vld [vmem:[#allocation4 + $0x4a] sm:$0xff]  ;;  %v6573_v22 = vsel %vm5052_vm12, %v8461_v19, 0 }
 0x22b   : > { %v3066_v24 = vpop.f32.mrf.mxu0  ;;  %9506 = vmatpush3.bf16.msra.mxu1 %v6573_v22 }
 0x22c   : > { %v3355_v26 = vadd.f32 %v3290_v3, %v3066_v24  ;;  %v3301_v24 = vld [vmem:[#allocation4 + $0xc0] sm:$0xff] }
 0x22d   : > { %v9132_v28 = vpop.f32.mrf.mxu0 }
 0x22e   : > { %3420 = vst.msk [vmem:[#allocation4 + $0x68] sm:$0xff] %vm1759_vm11, %v3355_v26  ;;  %3770 = vrot.lane.b32.xlu1 %v3701_v29, %s10156_s21 }
 0x22f   : > { %v3071_v32 = vpop.f32.mrf.mxu0  ;;  %9230 = vmatmul.mubr.msk.bf16.gmra.mxu0 %vm1359_vm3, %v9766_v25 }
 0x230   : > { %v3356_v34 = vadd.f32 %v3291_v33, %v3071_v32  ;;  %9233 = vmatprep.mubr.msk.bf16.mxu0 %vm10154_vm2, %v10153_v1 }
 0x231   : > { %v9135_v35 = vpop.f32.mrf.mxu0 }
 0x232   : > { %3421 = vst.msk [vmem:[#allocation4 + $0x70] sm:$0xff] %vm1759_vm11, %v3356_v34 }
 0x233   : > { %v3074_v37 = vpop.f32.mrf.mxu0 }
 0x234   : > { %v3357_v40 = vadd.f32 %v3292_v38, %v3074_v37  ;;  %v3303_v37 = vld [vmem:[#allocation4 + $0xd0] sm:$0xff] }
 0x235   : > { %v9136_v41 = vpop.f32.mrf.mxu0  ;;  %v3510_v42 = vld [vmem:[#allocation4 + $0x61] sm:$0xff] }
 0x236   : > { %3422 = vst.msk [vmem:[#allocation4 + $0x78] sm:$0xff] %vm1759_vm11, %v3357_v40  ;;  %3580 = vrot.lane.b32.xlu0 %v3510_v42, %s10157_s22  ;;  %v3702_v49 = vld [vmem:[#allocation4 + $0x62] sm:$0xff]  ;;  %v3304_v41 = vld [vmem:[#allocation4 + $0xd8] sm:$0xff] }
 0x237   : > { %v3079_v44 = vpop.f32.mrf.mxu0  ;;  %9234 = vmatmul.mubr.msk.bf16.gmra.mxu0 %vm1359_vm3, %v9767_v39 }
 0x238   : > { %v3358_v47 = vadd.f32 %v3293_v45, %v3079_v44  ;;  %9373 = vmatprep.mubr.msk.bf16.mxu0 %vm10154_vm2, %v10153_v1 }
 0x239   : > { %v9139_v48 = vpop.f32.mrf.mxu0  ;;  %v3511_v50 = vld [vmem:[#allocation4 + $0x69] sm:$0xff] }
 0x23a   : > { %3423 = vst.msk [vmem:[#allocation4 + $0x80] sm:$0xff] %vm1759_vm11, %v3358_v47  ;;  %3772 = vrot.lane.b32.xlu0 %v3702_v49, %s10156_s21  ;;  %3582 = vrot.lane.b32.xlu1 %v3511_v50, %s10157_s22  ;;  %v3703_v53 = vld [vmem:[#allocation4 + $0x6a] sm:$0xff] }
 0x23b   : > { %v3082_v31 = vpop.f32.mrf.mxu0 }
 0x23c   : > { %v3359_v52 = vadd.f32 %v3294_v51, %v3082_v31  ;;  %v3306_v51 = vld [vmem:[#allocation4 + $0xe8] sm:$0xff] }
 0x23d   : > { %v9140_v27 = vpop.f32.mrf.mxu0 }
 0x23e   : > { %3424 = vst.msk [vmem:[#allocation4 + $0x88] sm:$0xff] %vm1759_vm11, %v3359_v52  ;;  %3774 = vrot.lane.b32.xlu1 %v3703_v53, %s10156_s21 }
 0x23f   : > { %v3087_v54 = vpop.f32.mrf.mxu0 }
 0x240   : > { %v3360_v56 = vadd.f32 %v3295_v55, %v3087_v54  ;;  %v3307_v55 = vld [vmem:[#allocation4 + $0xf0] sm:$0xff] }
 0x241   : > { %v9143_v57 = vpop.f32.mrf.mxu0 }
 0x242   : > { %3425 = vst.msk [vmem:[#allocation4 + $0x90] sm:$0xff] %vm1759_vm11, %v3360_v56 }
 0x243   : > { %v3090_v58 = vpop.f32.mrf.mxu0 }
 0x244   : > { %v3361_v60 = vadd.f32 %v3296_v59, %v3090_v58  ;;  %v3308_v59 = vld [vmem:[#allocation4 + $0xf8] sm:$0xff] }
 0x245   : > { %v9144_v61 = vpop.f32.mrf.mxu0  ;;  %v3512_v62 = vld [vmem:[#allocation4 + $0x81] sm:$0xff] }
 0x246   : > { %3426 = vst.msk [vmem:[#allocation4 + $0x98] sm:$0xff] %vm1759_vm11, %v3361_v60  ;;  %3584 = vrot.lane.b32.xlu0 %v3512_v62, %s10157_s22  ;;  %v3704_v5 = vld [vmem:[#allocation4 + $0x82] sm:$0xff] }
 0x247   : > { %v3095_v63 = vpop.f32.mrf.mxu0 }
 0x248   : > { %v3362_v2 = vadd.f32 %v3297_v0, %v3095_v63  ;;  %v3309_v0 = vld [vmem:[#allocation4 + $0x100] sm:$0xff] }
 0x249   : > { %v9147_v4 = vpop.f32.mrf.mxu0  ;;  %v3513_v6 = vld [vmem:[#allocation4 + $0x89] sm:$0xff] }
 0x24a   : > { %3427 = vst.msk [vmem:[#allocation4 + $0xa0] sm:$0xff] %vm1759_vm11, %v3362_v2  ;;  %3776 = vrot.lane.b32.xlu0 %v3704_v5, %s10156_s21  ;;  %3586 = vrot.lane.b32.xlu1 %v3513_v6, %s10157_s22  ;;  %v3705_v11 = vld [vmem:[#allocation4 + $0x8a] sm:$0xff]  ;;  %v3472_v5 = vld [vmem:[#allocation4] sm:$0xff] }
 0x24b   : > { %v3098_v7 = vpop.f32.mrf.mxu0 }
 0x24c   : > { %v3363_v9 = vadd.f32 %v3298_v8, %v3098_v7 }
 0x24d   : > { %v9148_v10 = vpop.f32.mrf.mxu0 }
 0x24e   : > { %3428 = vst.msk [vmem:[#allocation4 + $0xa8] sm:$0xff] %vm1759_vm11, %v3363_v9  ;;  %3778 = vrot.lane.b32.xlu1 %v3705_v11, %s10156_s21  ;;  %v11233_v11 = vld [vmem:[%s12499_s2] ss:$0 sm:$0xff] }
 0x24f   : > { %v3103_v12 = vpop.f32.mrf.mxu0 }
 0x250   : > { %v3364_v14 = vadd.f32 %v3299_v13, %v3103_v12 }
 0x251   : > { %v9151_v15 = vpop.f32.mrf.mxu0 }
 0x252   : > { %3429 = vst.msk [vmem:[#allocation4 + $0xb0] sm:$0xff] %vm1759_vm11, %v3364_v14  ;;  %v3310_v14 = vld [vmem:[#allocation4 + $0x108] sm:$0xff]  ;;  %v11240_v15 = vld [vmem:[%s12500_s3] ss:$0 sm:$0xff] }
 0x253   : > { %v3106_v16 = vpop.f32.mrf.mxu0 }
 0x254   : > { %v3365_v18 = vadd.f32 %v3300_v17, %v3106_v16  ;;  %v3473_v17 = vld [vmem:[#allocation4 + $0x8] sm:$0xff] }
 0x255   : > { %v9152_v20 = vpop.f32.mrf.mxu0  ;;  %v3514_v21 = vld [vmem:[#allocation4 + $0xa1] sm:$0xff] }
 0x256   : > { %3430 = vst.msk [vmem:[#allocation4 + $0xb8] sm:$0xff] %vm1759_vm11, %v3365_v18  ;;  %3588 = vrot.lane.b32.xlu0 %v3514_v21, %s10157_s22  ;;  %v3706_v26 = vld [vmem:[#allocation4 + $0xa2] sm:$0xff] }
 0x257   : > { %v3111_v23 = vpop.f32.mrf.mxu0 }
 0x258   : > { %v3366_v3 = vadd.f32 %v3301_v24, %v3111_v23 }
 0x259   : > { %v9155_v25 = vpop.f32.mrf.mxu0  ;;  %v3515_v28 = vld [vmem:[#allocation4 + $0xa9] sm:$0xff] }
 0x25a   : > { %3431 = vst.msk [vmem:[#allocation4 + $0xc0] sm:$0xff] %vm1759_vm11, %v3366_v3  ;;  %3780 = vrot.lane.b32.xlu0 %v3706_v26, %s10156_s21  ;;  %3590 = vrot.lane.b32.xlu1 %v3515_v28, %s10157_s22  ;;  %v3707_v34 = vld [vmem:[#allocation4 + $0xaa] sm:$0xff] }
 0x25b   : > { %v3114_v29 = vpop.f32.mrf.mxu0  ;;  %v3311_v26 = vld [vmem:[#allocation4 + $0x110] sm:$0xff] }
 0x25c   : > { %v3367_v32 = vadd.f32 %v3302_v30, %v3114_v29 }
 0x25d   : > { %v9156_v33 = vpop.f32.mrf.mxu0 }
 0x25e   : > { %3432 = vst.msk [vmem:[#allocation4 + $0xc8] sm:$0xff] %vm1759_vm11, %v3367_v32  ;;  %3782 = vrot.lane.b32.xlu1 %v3707_v34, %s10156_s21 }
 0x25f   : > { %v3119_v35 = vpop.f32.mrf.mxu0 }
 0x260   : > { %v3368_v38 = vadd.f32 %v3303_v37, %v3119_v35  ;;  %v3312_v35 = vld [vmem:[#allocation4 + $0x118] sm:$0xff] }
 0x261   : > { %v9159_v39 = vpop.f32.mrf.mxu0 }
 0x262   : > { %3433 = vst.msk [vmem:[#allocation4 + $0xd0] sm:$0xff] %vm1759_vm11, %v3368_v38 }
 0x263   : > { %v3122_v40 = vpop.f32.mrf.mxu0 }
 0x264   : > { %v3369_v42 = vadd.f32 %v3304_v41, %v3122_v40 }
 0x265   : > { %v9160_v43 = vpop.f32.mrf.mxu0  ;;  %v3516_v44 = vld [vmem:[#allocation4 + $0xc1] sm:$0xff] }
 0x266   : > { %3434 = vst.msk [vmem:[#allocation4 + $0xd8] sm:$0xff] %vm1759_vm11, %v3369_v42  ;;  %3592 = vrot.lane.b32.xlu0 %v3516_v44, %s10157_s22  ;;  %v3708_v49 = vld [vmem:[#allocation4 + $0xc2] sm:$0xff] }
 0x267   : > { %v3127_v45 = vpop.f32.mrf.mxu0  ;;  %v3313_v42 = vld [vmem:[#allocation4 + $0x120] sm:$0xff] }
 0x268   : > { %v3370_v47 = vadd.f32 %v3305_v46, %v3127_v45 }
 0x269   : > { %v9163_v48 = vpop.f32.mrf.mxu0  ;;  %v3517_v50 = vld [vmem:[#allocation4 + $0xc9] sm:$0xff] }
 0x26a   : > { %3435 = vst.msk [vmem:[#allocation4 + $0xe0] sm:$0xff] %vm1759_vm11, %v3370_v47  ;;  %3784 = vrot.lane.b32.xlu0 %v3708_v49, %s10156_s21  ;;  %3594 = vrot.lane.b32.xlu1 %v3517_v50, %s10157_s22  ;;  %v3709_v53 = vld [vmem:[#allocation4 + $0xca] sm:$0xff]  ;;  %v3474_v48 = vld [vmem:[#allocation4 + $0x20] sm:$0xff] }
 0x26b   : > { %v3130_v31 = vpop.f32.mrf.mxu0 }
 0x26c   : > { %v3371_v52 = vadd.f32 %v3306_v51, %v3130_v31  ;;  %v3314_v31 = vld [vmem:[#allocation4 + $0x128] sm:$0xff] }
 0x26d   : > { %v9164_v27 = vpop.f32.mrf.mxu0 }
 0x26e   : > { %3436 = vst.msk [vmem:[#allocation4 + $0xe8] sm:$0xff] %vm1759_vm11, %v3371_v52  ;;  %3786 = vrot.lane.b32.xlu1 %v3709_v53, %s10156_s21 }
 0x26f   : > { %v3135_v54 = vpop.f32.mrf.mxu0 }
 0x270   : > { %v3372_v56 = vadd.f32 %v3307_v55, %v3135_v54 }
 0x271   : > { %v9167_v57 = vpop.f32.mrf.mxu0 }
 0x272   : > { %3437 = vst.msk [vmem:[#allocation4 + $0xf0] sm:$0xff] %vm1759_vm11, %v3372_v56  ;;  %v3475_v56 = vld [vmem:[#allocation4 + $0x28] sm:$0xff] }
 0x273   : > { %v3138_v58 = vpop.f32.mrf.mxu0 }
 0x274   : > { %v3373_v60 = vadd.f32 %v3308_v59, %v3138_v58 }
 0x275   : > { %v9168_v61 = vpop.f32.mrf.mxu0  ;;  %v3518_v62 = vld [vmem:[#allocation4 + $0xe1] sm:$0xff] }
 0x276   : > { %3438 = vst.msk [vmem:[#allocation4 + $0xf8] sm:$0xff] %vm1759_vm11, %v3373_v60  ;;  %3596 = vrot.lane.b32.xlu0 %v3518_v62, %s10157_s22  ;;  %v3710_v9 = vld [vmem:[#allocation4 + $0xe2] sm:$0xff]  ;;  %v3315_v60 = vld [vmem:[#allocation4 + $0x130] sm:$0xff] }
 0x277   : > { %v3143_v63 = vpop.f32.mrf.mxu0 }
 0x278   : > { %v3374_v2 = vadd.f32 %v3309_v0, %v3143_v63  ;;  %v3761_v4 = vpop.permute.xlu1 %3760 }
 0x279   : > { %v3569_v6 = vpop.permute.xlu0 %3568  ;;  %v9171_v8 = vpop.f32.mrf.mxu0  ;;  %v3519_v10 = vld [vmem:[#allocation4 + $0xe9] sm:$0xff] }
 0x27a   : > { %v3664_v7 = vadd.f32 %v3569_v6, %v3472_v5  ;;  %3439 = vst.msk [vmem:[#allocation4 + $0x100] sm:$0xff] %vm1759_vm11, %v3374_v2  ;;  %3788 = vrot.lane.b32.xlu0 %v3710_v9, %s10156_s21  ;;  %3598 = vrot.lane.b32.xlu1 %v3519_v10, %s10157_s22  ;;  %v3711_v22 = vld [vmem:[#allocation4 + $0xea] sm:$0xff]  ;;  %v3316_v9 = vld [vmem:[#allocation4 + $0x138] sm:$0xff] }
 0x27b   : > { %v3146_v13 = vpop.f32.mrf.mxu0 }
 0x27c   : > { %v3856_v12 = vadd.f32 %v3761_v4, %v3664_v7  ;;  %v3375_v16 = vadd.f32 %v3310_v14, %v3146_v13  ;;  %v3763_v23 = vpop.permute.xlu1 %3762 }
 0x27d   : > { %v3571_v18 = vpop.permute.xlu0 %3570  ;;  %v9172_v21 = vpop.f32.mrf.mxu0 }
 0x27e   : > { %v3895_v19 = vmul.f32 %v11233_v11, %v3856_v12  ;;  %v3665_v20 = vadd.f32 %v3571_v18, %v3473_v17  ;;  %3440 = vst.msk [vmem:[#allocation4 + $0x108] sm:$0xff] %vm1759_vm11, %v3375_v16  ;;  %3790 = vrot.lane.b32.xlu1 %v3711_v22, %s10156_s21 }
 0x27f   : > { %v3151_v25 = vpop.f32.mrf.mxu0 }
 0x280   : > { %v11246_v24 = vadd.f32 %v11240_v15, %v3895_v19  ;;  %v3857_v3 = vadd.f32 %v3763_v23, %v3665_v20  ;;  %v3376_v28 = vadd.f32 %v3311_v26, %v3151_v25  ;;  %v3317_v20 = vld [vmem:[#allocation4 + $0x140] sm:$0xff] }
 0x281   : > { %v9175_v32 = vpop.f32.mrf.mxu0  ;;  %v3476_v26 = vld [vmem:[#allocation4 + $0x40] sm:$0xff] }
 0x282   : > { %v8264_v29 = vmul.f32 -1.442695, %v11246_v24  ;;  %v3896_v30 = vmul.f32 %v11233_v11, %v3857_v3  ;;  %3441 = vst.msk [vmem:[#allocation4 + $0x110] sm:$0xff] %vm1759_vm11, %v3376_v28 }
 0x283   : > { %v3154_v34 = vpop.f32.mrf.mxu0 }
 0x284   : > { %9867 = vpow2.f32 %v8264_v29  ;;  %v11252_v33 = vadd.f32 %v11240_v15, %v3896_v30  ;;  %v3377_v37 = vadd.f32 %v3312_v35, %v3154_v34  ;;  %v3318_v30 = vld [vmem:[#allocation4 + $0x148] sm:$0xff] }
 0x285   : > { %v9176_v39 = vpop.f32.mrf.mxu0  ;;  %v3520_v40 = vld [vmem:[#allocation4 + $0x101] sm:$0xff] }
 0x286   : > { %v8265_v38 = vmul.f32 -1.442695, %v11252_v33  ;;  %3442 = vst.msk [vmem:[#allocation4 + $0x118] sm:$0xff] %vm1759_vm11, %v3377_v37  ;;  %3600 = vrot.lane.b32.xlu0 %v3520_v40, %s10157_s22  ;;  %v3712_v46 = vld [vmem:[#allocation4 + $0x102] sm:$0xff] }
 0x287   : > { %v3159_v41 = vpop.f32.mrf.mxu0  ;;  %v3477_v40 = vld [vmem:[#allocation4 + $0x48] sm:$0xff] }
 0x288   : > { %9869 = vpow2.f32 %v8265_v38  ;;  %v3378_v43 = vadd.f32 %v3313_v42, %v3159_v41  ;;  %v3573_v44 = vpop.permute.xlu0 %3572 }
 0x289   : > { %v9179_v45 = vpop.f32.mrf.mxu0  ;;  %v3521_v47 = vld [vmem:[#allocation4 + $0x109] sm:$0xff]  ;;  %v3666_v49 = vadd.f32 %v3573_v44, %v3474_v48 }
 0x28a   : > { %3443 = vst.msk [vmem:[#allocation4 + $0x120] sm:$0xff] %vm1759_vm11, %v3378_v43  ;;  %3792 = vrot.lane.b32.xlu0 %v3712_v46, %s10156_s21  ;;  %3602 = vrot.lane.b32.xlu1 %v3521_v47, %s10157_s22  ;;  %v3713_v55 = vld [vmem:[#allocation4 + $0x10a] sm:$0xff] }
 0x28b   : > { %v3162_v50 = vpop.f32.mrf.mxu0  ;;  %v3319_v44 = vld [vmem:[#allocation4 + $0x150] sm:$0xff] }
 0x28c   : > { %v3379_v51 = vadd.f32 %v3314_v31, %v3162_v50  ;;  %v3765_v52 = vpop.permute.xlu0 %3764  ;;  %v3575_v27 = vpop.permute.xlu1 %3574 }
 0x28d   : > { %v3858_v53 = vadd.f32 %v3765_v52, %v3666_v49  ;;  %v9180_v54 = vpop.f32.mrf.mxu0  ;;  %v3667_v58 = vadd.f32 %v3575_v27, %v3475_v56  ;;  %v3320_v56 = vld [vmem:[#allocation4 + $0x158] sm:$0xff] }
 0x28e   : > { %3444 = vst.msk [vmem:[#allocation4 + $0x128] sm:$0xff] %vm1759_vm11, %v3379_v51  ;;  %3794 = vrot.lane.b32.xlu1 %v3713_v55, %s10156_s21 }
 0x28f   : > { %v3897_v57 = vmul.f32 %v11233_v11, %v3858_v53  ;;  %v3167_v59 = vpop.f32.mrf.mxu0 }
 0x290   : > { %v3380_v62 = vadd.f32 %v3315_v60, %v3167_v59  ;;  %v3767_v63 = vpop.permute.xlu1 %3766 }
 0x291   : > { %v9868_v61 = vpop.eup %9867  ;;  %v11264_v2 = vadd.f32 %v11240_v15, %v3897_v57  ;;  %v3859_v4 = vadd.f32 %v3767_v63, %v3667_v58  ;;  %v9183_v5 = vpop.f32.mrf.mxu0 }
 0x292   : > { %v4062_v0 = vadd.f32 1.0, %v9868_v61  ;;  %3445 = vst.msk [vmem:[#allocation4 + $0x130] sm:$0xff] %vm1759_vm11, %v3380_v62 }
 0x293   : > { %v8266_v6 = vmul.f32 -1.442695, %v11264_v2  ;;  %v3898_v7 = vmul.f32 %v11233_v11, %v3859_v4  ;;  %v3170_v8 = vpop.f32.mrf.mxu0 }
 0x294   : > { %9871 = vrcp.f32 %v4062_v0  ;;  %v3381_v12 = vadd.f32 %v3316_v9, %v3170_v8  ;;  %v3321_v8 = vld [vmem:[#allocation4 + $0x160] sm:$0xff] }
 0x295   : > { %v9870_v10 = vpop.eup %9869  ;;  %9873 = vpow2.f32 %v8266_v6  ;;  %v11270_v14 = vadd.f32 %v11240_v15, %v3898_v7  ;;  %v9184_v16 = vpop.f32.mrf.mxu0  ;;  %v3522_v17 = vld [vmem:[#allocation4 + $0x121] sm:$0xff] }
 0x296   : > { %v4063_v13 = vadd.f32 1.0, %v9870_v10  ;;  %3446 = vst.msk [vmem:[#allocation4 + $0x138] sm:$0xff] %vm1759_vm11, %v3381_v12  ;;  %3604 = vrot.lane.b32.xlu0 %v3522_v17, %s10157_s22  ;;  %v3714_v3 = vld [vmem:[#allocation4 + $0x122] sm:$0xff] }
 0x297   : > { %v8267_v18 = vmul.f32 -1.442695, %v11270_v14  ;;  %v3175_v19 = vpop.f32.mrf.mxu0  ;;  %v4609_v9 = vld [vmem:[#allocation3 + $0x10] sm:$0xf] }
 0x298   : > { %9875 = vrcp.f32 %v4063_v13  ;;  %v3382_v21 = vadd.f32 %v3317_v20, %v3175_v19  ;;  %v3577_v22 = vpop.permute.xlu0 %3576 }
 0x299   : > { %9877 = vpow2.f32 %v8267_v18  ;;  %v9187_v23 = vpop.f32.mrf.mxu0  ;;  %v3523_v25 = vld [vmem:[#allocation4 + $0x129] sm:$0xff]  ;;  %v3668_v28 = vadd.f32 %v3577_v22, %v3476_v26  ;;  %v3478_v22 = vld [vmem:[#allocation4 + $0x60] sm:$0xff] }
 0x29a   : > { %3447 = vst.msk [vmem:[#allocation4 + $0x140] sm:$0xff] %vm1759_vm11, %v3382_v21  ;;  %3796 = vrot.lane.b32.xlu0 %v3714_v3, %s10156_s21  ;;  %3606 = vrot.lane.b32.xlu1 %v3523_v25, %s10157_s22  ;;  %v3715_v39 = vld [vmem:[#allocation4 + $0x12a] sm:$0xff] }
 0x29b   : > { %v3178_v29 = vpop.f32.mrf.mxu0 }
 0x29c   : > { %v3383_v32 = vadd.f32 %v3318_v30, %v3178_v29  ;;  %v3769_v34 = vpop.permute.xlu0 %3768  ;;  %v3579_v35 = vpop.permute.xlu1 %3578  ;;  %v4615_v30 = vld [vmem:[#allocation3 + $0x18] sm:$0x1] }
 0x29d   : > { %v3860_v37 = vadd.f32 %v3769_v34, %v3668_v28  ;;  %v9188_v38 = vpop.f32.mrf.mxu0  ;;  %v3669_v42 = vadd.f32 %v3579_v35, %v3477_v40  ;;  %v3322_v28 = vld [vmem:[#allocation4 + $0x168] sm:$0xff] }
 0x29e   : > { %3448 = vst.msk [vmem:[#allocation4 + $0x148] sm:$0xff] %vm1759_vm11, %v3383_v32  ;;  %3798 = vrot.lane.b32.xlu1 %v3715_v39, %s10156_s21 }
 0x29f   : > { %v3899_v41 = vmul.f32 %v11233_v11, %v3860_v37  ;;  %v3183_v43 = vpop.f32.mrf.mxu0 }
 0x2a0   : > { %v3384_v46 = vadd.f32 %v3319_v44, %v3183_v43  ;;  %v3771_v47 = vpop.permute.xlu1 %3770  ;;  %v3479_v43 = vld [vmem:[#allocation4 + $0x68] sm:$0xff] }
 0x2a1   : > { %v9872_v45 = vpop.eup %9871  ;;  %v11283_v49 = vadd.f32 %v11240_v15, %v3899_v41  ;;  %v3861_v50 = vadd.f32 %v3771_v47, %v3669_v42  ;;  %v9191_v31 = vpop.f32.mrf.mxu0 }
 0x2a2   : > { %v4158_v48 = vmul.f32 %v9872_v45, %v11246_v24  ;;  %v9874_v51 = vpop.eup %9873  ;;  %3449 = vst.msk [vmem:[#allocation4 + $0x150] sm:$0xff] %vm1759_vm11, %v3384_v46 }
 0x2a3   : > { %v4064_v27 = vadd.f32 1.0, %v9874_v51  ;;  %v8268_v53 = vmul.f32 -1.442695, %v11283_v49  ;;  %v3900_v54 = vmul.f32 %v11233_v11, %v3861_v50  ;;  %v3186_v55 = vpop.f32.mrf.mxu0  ;;  %v3323_v50 = vld [vmem:[#allocation4 + $0x170] sm:$0xff] }
 0x2a4   : > { %v8599_v52 = vpack.c.bf16 %v4158_v48, %v4158_v48  ;;  %v3385_v58 = vadd.f32 %v3320_v56, %v3186_v55  ;;  %v3324_v55 = vld [vmem:[#allocation4 + $0x178] sm:$0xff] }
 0x2a5   : > { %v9876_v57 = vpop.eup %9875  ;;  %9879 = vrcp.f32 %v4064_v27  ;;  %v9192_v60 = vpop.f32.mrf.mxu0  ;;  %v3524_v61 = vld [vmem:[#allocation4 + $0x141] sm:$0xff]  ;;  %v11290_v63 = vadd.f32 %v11240_v15, %v3900_v54 }
 0x2a6   : > { %v4287_v59 = vshrl.u32 %v8599_v52, 16  ;;  %v4159_v24 = vmul.f32 %v9876_v57, %v11252_v33  ;;  %v9878_v62 = vpop.eup %9877  ;;  %9881 = vpow2.f32 %v8268_v53  ;;  %3450 = vst.msk [vmem:[#allocation4 + $0x158] sm:$0xff] %vm1759_vm11, %v3385_v58  ;;  %3608 = vrot.lane.b32.xlu0 %v3524_v61, %s10157_s22  ;;  %v4290_v4 = vshll.u32 %v8599_v52, 16  ;;  %v3716_v19 = vld [vmem:[#allocation4 + $0x142] sm:$0xff] }
 0x2a7   : > { %v4065_v6 = vadd.f32 1.0, %v9878_v62  ;;  %v3191_v7 = vpop.f32.mrf.mxu0  ;;  %v8269_v10 = vmul.f32 -1.442695, %v11290_v63 }
 0x2a8   : > { %v4289_v0 = vrot.slane %v4287_v59, 7  ;;  %v8600_v5 = vpack.c.bf16 %v4159_v24, %v4159_v24  ;;  %v3386_v12 = vadd.f32 %v3321_v8, %v3191_v7  ;;  %v3581_v13 = vpop.permute.xlu0 %3580 }
 0x2a9   : > { %v9195_v18 = vpop.f32.mrf.mxu0  ;;  %v3525_v20 = vld [vmem:[#allocation4 + $0x149] sm:$0xff]  ;;  %9883 = vrcp.f32 %v4065_v6  ;;  %v3670_v25 = vadd.f32 %v3581_v13, %v3478_v22 }
 0x2aa   : > { %v4292_v16 = vor.u32 %v4290_v4, %v4289_v0  ;;  %v4295_v17 = vshrl.u32 %v8600_v5, 16  ;;  %v4298_v21 = vshll.u32 %v8600_v5, 16  ;;  %3451 = vst.msk [vmem:[#allocation4 + $0x160] sm:$0xff] %vm1759_vm11, %v3386_v12  ;;  %3800 = vrot.lane.b32.xlu0 %v3716_v19, %s10156_s21  ;;  %3610 = vrot.lane.b32.xlu1 %v3525_v20, %s10157_s22  ;;  %9885 = vpow2.f32 %v8269_v10  ;;  %v3717_v42 = vld [vmem:[#allocation4 + $0x14a] sm:$0xff] }
 0x2ab   : > { %v3194_v26 = vpop.f32.mrf.mxu0  ;;  %v4293_v37 = vrot.slane %v4289_v0, 4  ;;  %v4618_v12 = vld [vmem:[#allocation3 + $0x20] sm:$0xf] }
 0x2ac   : > { %v4610_v23 = vsel %vm11296_vm15, %v4292_v16, %v4609_v9  ;;  %v4297_v3 = vrot.slane %v4295_v17, 7  ;;  %v3387_v32 = vadd.f32 %v3322_v28, %v3194_v26  ;;  %v3773_v34 = vpop.permute.xlu0 %3772  ;;  %v3583_v35 = vpop.permute.xlu1 %3582  ;;  %v3325_v9 = vld [vmem:[#allocation4 + $0x180] sm:$0xff] }
 0x2ad   : > { %4611 = vst [vmem:[#allocation3 + $0x10] sm:$0xf] %v4610_v23  ;;  %v3862_v40 = vadd.f32 %v3773_v34, %v3670_v25  ;;  %v9196_v41 = vpop.f32.mrf.mxu0  ;;  %v3671_v47 = vadd.f32 %v3583_v35, %v3479_v43  ;;  %v3480_v26 = vld [vmem:[#allocation4 + $0x80] sm:$0xff]  ;;  %v3326_v34 = vld [vmem:[#allocation4 + $0x188] sm:$0xff] }
 0x2ae   : > { %v4300_v38 = vor.u32 %v4298_v21, %v4297_v3  ;;  %v4302_v39 = vrot.slane %v4297_v3, 4  ;;  %3452 = vst.msk [vmem:[#allocation4 + $0x168] sm:$0xff] %vm1759_vm11, %v3387_v32  ;;  %3802 = vrot.lane.b32.xlu1 %v3717_v42, %s10156_s21 }
 0x2af   : > { %v3901_v46 = vmul.f32 %v11233_v11, %v3862_v40  ;;  %v3199_v48 = vpop.f32.mrf.mxu0 }
 0x2b0   : > { %v4301_v44 = vsel %vm10425_vm10, %v4293_v37, %v4300_v38  ;;  %v4616_v45 = vsel %vm11308_vm1, %v4302_v39, %v4615_v30  ;;  %v3388_v31 = vadd.f32 %v3323_v50, %v3199_v48  ;;  %v3775_v51 = vpop.permute.xlu1 %3774 }
 0x2b1   : > { %4612 = vst.msk [vmem:[#allocation3 + $0x14] sm:$0xf] %vm484_vm13, %v4301_v44  ;;  %4617 = vst [vmem:[#allocation3 + $0x18] sm:$0x1] %v4616_v45  ;;  %v11321_v52 = vadd.f32 %v11240_v15, %v3901_v46  ;;  %v3863_v27 = vadd.f32 %v3775_v51, %v3671_v47  ;;  %v9199_v53 = vpop.f32.mrf.mxu0  ;;  %v3481_v45 = vld [vmem:[#allocation4 + $0x88] sm:$0xff]  ;;  %v3327_v51 = vld [vmem:[#allocation4 + $0x190] sm:$0xff] }
 0x2b2   : > { %v9880_v54 = vpop.eup %9879  ;;  %3453 = vst.msk [vmem:[#allocation4 + $0x170] sm:$0xff] %vm1759_vm11, %v3388_v31  ;;  %v4622_v47 = vld [vmem:[#allocation3 + $0x28] sm:$0x1] }
 0x2b3   : > { %v9882_v56 = vpop.eup %9881  ;;  %v4160_v57 = vmul.f32 %v9880_v54, %v11264_v2  ;;  %v8270_v58 = vmul.f32 -1.442695, %v11321_v52  ;;  %v3902_v59 = vmul.f32 %v11233_v11, %v3863_v27  ;;  %v3202_v24 = vpop.f32.mrf.mxu0 }
 0x2b4   : > { %v4066_v60 = vadd.f32 1.0, %v9882_v56  ;;  %v3389_v61 = vadd.f32 %v3324_v55, %v3202_v24 }
 0x2b5   : > { %v8601_v62 = vpack.c.bf16 %v4160_v57, %v4160_v57  ;;  %9887 = vpow2.f32 %v8270_v58  ;;  %v11328_v0 = vadd.f32 %v11240_v15, %v3902_v59  ;;  %v9200_v4 = vpop.f32.mrf.mxu0  ;;  %v3526_v5 = vld [vmem:[#allocation4 + $0x161] sm:$0xff] }
 0x2b6   : > { %9889 = vrcp.f32 %v4066_v60  ;;  %3454 = vst.msk [vmem:[#allocation4 + $0x178] sm:$0xff] %vm1759_vm11, %v3389_v61  ;;  %3612 = vrot.lane.b32.xlu0 %v3526_v5, %s10157_s22  ;;  %v9884_v2 = vpop.eup %9883  ;;  %v3718_v28 = vld [vmem:[#allocation4 + $0x162] sm:$0xff] }
 0x2b7   : > { %v4304_v6 = vshrl.u32 %v8601_v62, 16  ;;  %v8271_v7 = vmul.f32 -1.442695, %v11328_v0  ;;  %v3207_v8 = vpop.f32.mrf.mxu0  ;;  %v9886_v10 = vpop.eup %9885  ;;  %v4161_v13 = vmul.f32 %v9884_v2, %v11270_v14  ;;  %v4307_v21 = vshll.u32 %v8601_v62, 16 }
 0x2b8   : > { %v3390_v16 = vadd.f32 %v3325_v9, %v3207_v8  ;;  %v3585_v17 = vpop.permute.xlu0 %3584  ;;  %v9770_v18 = vld [vmem:[#allocation3 + $0x10] sm:$0xff]   ;;  %v4067_v22 = vadd.f32 1.0, %v9886_v10  ;;  %v9772_v57 = vld [vmem:[#allocation3 + $0x18] sm:$0xff]   ;;  %v3328_v9 = vld [vmem:[#allocation4 + $0x198] sm:$0xff] }
 0x2b9   : > { %v9771_v19 = vld [vmem:[#allocation3 + $0x10] sm:$0xff]   ;;  %v4306_v20 = vrot.slane %v4304_v6, 7  ;;  %9891 = vpow2.f32 %v8271_v7  ;;  %v9203_v23 = vpop.f32.mrf.mxu0  ;;  %v3527_v3 = vld [vmem:[#allocation4 + $0x169] sm:$0xff]  ;;  %v8602_v25 = vpack.c.bf16 %v4161_v13, %v4161_v13  ;;  %9248 = vmatmul.mubr.msk.bf16.gmra.mxu1 %vm4952_vm14, %v9770_v18  ;;  %v3672_v30 = vadd.f32 %v3585_v17, %v3480_v26 }
 0x2ba   : > { %3455 = vst.msk [vmem:[#allocation4 + $0x180] sm:$0xff] %vm1759_vm11, %v3390_v16  ;;  %9374 = vmatmul.mubr.msk.bf16.vlgmr.msra.gmra.mxu0 %vm4952_vm14, %v9771_v19  ;;  %9893 = vrcp.f32 %v4067_v22  ;;  %3804 = vrot.lane.b32.xlu0 %v3718_v28, %s10156_s21  ;;  %v3719_v46 = vld [vmem:[#allocation4 + $0x16a] sm:$0xff]  ;;  %v3329_v23 = vld [vmem:[#allocation4 + $0x1a0] sm:$0xff] }
 0x2bb   : > { %v4309_v14 = vor.u32 %v4307_v21, %v4306_v20  ;;  %3614 = vrot.lane.b32.xlu1 %v3527_v3, %s10157_s22  ;;  %v3210_v32 = vpop.f32.mrf.mxu0  ;;  %v4312_v35 = vshrl.u32 %v8602_v25, 16  ;;  %9251 = vmatprep.mubr.msk.bf16.mxu1 %vm10154_vm2, %v10153_v1  ;;  %v4315_v44 = vshll.u32 %v8602_v25, 16  ;;  %v4310_v27 = vrot.slane %v4306_v20, 4  ;;  %v9773_v58 = vld [vmem:[#allocation3 + $0x18] sm:$0xff]  }
 0x2bc   : > { %v3391_v37 = vadd.f32 %v3326_v34, %v3210_v32  ;;  %v3777_v38 = vpop.permute.xlu0 %3776  ;;  %v3587_v39 = vpop.permute.xlu1 %3586  ;;  %9377 = vmatprep.mubr.msk.bf16.mxu0 %vm10154_vm2, %v10153_v1 }
 0x2bd   : > { %v4619_v40 = vsel %vm11296_vm15, %v4309_v14, %v4618_v12  ;;  %v3864_v41 = vadd.f32 %v3777_v38, %v3672_v30  ;;  %v9204_v42 = vpop.f32.mrf.mxu0  ;;  %v4314_v43 = vrot.slane %v4312_v35, 7  ;;  %v3673_v50 = vadd.f32 %v3587_v39, %v3481_v45  ;;  %v3482_v30 = vld [vmem:[#allocation4 + $0xa0] sm:$0xff] }
 0x2be   : > { %4620 = vst [vmem:[#allocation3 + $0x20] sm:$0xf] %v4619_v40  ;;  %3456 = vst.msk [vmem:[#allocation4 + $0x188] sm:$0xff] %vm1759_vm11, %v3391_v37  ;;  %v3330_v37 = vld [vmem:[#allocation4 + $0x1a8] sm:$0xff]  ;;  %v4625_v40 = vld [vmem:[#allocation3 + $0x30] sm:$0xf] }
 0x2bf   : > { %v3903_v48 = vmul.f32 %v11233_v11, %v3864_v41  ;;  %3806 = vrot.lane.b32.xlu1 %v3719_v46, %s10156_s21  ;;  %v3215_v31 = vpop.f32.mrf.mxu0  ;;  %v4317_v53 = vor.u32 %v4315_v44, %v4314_v43  ;;  %v4319_v54 = vrot.slane %v4314_v43, 4 }
 0x2c0   : > { %v3392_v55 = vadd.f32 %v3327_v51, %v3215_v31  ;;  %v3779_v56 = vpop.permute.xlu1 %3778 }
 0x2c1   : > { %v11349_v59 = vadd.f32 %v11240_v15, %v3903_v48  ;;  %v3865_v24 = vadd.f32 %v3779_v56, %v3673_v50  ;;  %v9207_v60 = vpop.f32.mrf.mxu0  ;;  %v4318_v62 = vsel %vm10425_vm10, %v4310_v27, %v4317_v53  ;;  %v4623_v4 = vsel %vm11308_vm1, %v4319_v54, %v4622_v47  ;;  %9252 = vmatmul.mubr.msk.bf16.gmra.mxu1 %vm4952_vm14, %v9772_v57  ;;  %v3483_v53 = vld [vmem:[#allocation4 + $0xa8] sm:$0xff] }
 0x2c2   : > { %v9888_v61 = vpop.eup %9887  ;;  %3457 = vst.msk [vmem:[#allocation4 + $0x190] sm:$0xff] %vm1759_vm11, %v3392_v55  ;;  %9378 = vmatmul.mubr.msk.bf16.gmra.mxu0 %vm4952_vm14, %v9773_v58  ;;  %4624 = vst [vmem:[#allocation3 + $0x28] sm:$0x1] %v4623_v4  ;;  %9255 = vmatprep.mubr.msk.bf16.mxu1 %vm10154_vm2, %v10153_v1 }
 0x2c3   : > { %v9890_v5 = vpop.eup %9889  ;;  %4621 = vst.msk [vmem:[#allocation3 + $0x24] sm:$0xf] %vm484_vm13, %v4318_v62  ;;  %v4068_v2 = vadd.f32 1.0, %v9888_v61  ;;  %v8272_v6 = vmul.f32 -1.442695, %v11349_v59  ;;  %v3904_v7 = vmul.f32 %v11233_v11, %v3865_v24  ;;  %v3218_v8 = vpop.f32.mrf.mxu0  ;;  %9381 = vmatprep.mubr.msk.bf16.mxu0 %vm10154_vm2, %v10153_v1  ;;  %v3331_v24 = vld [vmem:[#allocation4 + $0x1b0] sm:$0xff] }
 0x2c4   : > { %v4162_v10 = vmul.f32 %v9890_v5, %v11283_v49  ;;  %v3393_v12 = vadd.f32 %v3328_v9, %v3218_v8  ;;  %v4629_v61 = vld [vmem:[#allocation3 + $0x38] sm:$0x1] }
 0x2c5   : > { %9895 = vrcp.f32 %v4068_v2  ;;  %v11367_v13 = vadd.f32 %v11240_v15, %v3904_v7  ;;  %v9208_v16 = vpop.f32.mrf.mxu0  ;;  %v3528_v17 = vld [vmem:[#allocation4 + $0x181] sm:$0xff] }
 0x2c6   : > { %v9892_v18 = vpop.eup %9891  ;;  %v8603_v19 = vpack.c.bf16 %v4162_v10, %v4162_v10  ;;  %9897 = vpow2.f32 %v8272_v6  ;;  %3458 = vst.msk [vmem:[#allocation4 + $0x198] sm:$0xff] %vm1759_vm11, %v3393_v12  ;;  %3616 = vrot.lane.b32.xlu0 %v3528_v17, %s10157_s22  ;;  %v3720_v34 = vld [vmem:[#allocation4 + $0x182] sm:$0xff] }
 0x2c7   : > { %v4069_v20 = vadd.f32 1.0, %v9892_v18  ;;  %v8273_v21 = vmul.f32 -1.442695, %v11367_v13  ;;  %v3223_v22 = vpop.f32.mrf.mxu0  ;;  %v9894_v49 = vpop.eup %9893 }
 0x2c8   : > { %v4321_v3 = vshrl.u32 %v8603_v19, 16  ;;  %v3394_v25 = vadd.f32 %v3329_v23, %v3223_v22  ;;  %v3589_v26 = vpop.permute.xlu0 %3588  ;;  %v4324_v28 = vshll.u32 %v8603_v19, 16  ;;  %v4163_v14 = vmul.f32 %v9894_v49, %v11290_v63 }
 0x2c9   : > { %9899 = vrcp.f32 %v4069_v20  ;;  %v9211_v32 = vpop.f32.mrf.mxu0  ;;  %v3529_v35 = vld [vmem:[#allocation4 + $0x189] sm:$0xff]  ;;  %v3674_v42 = vadd.f32 %v3589_v26, %v3482_v30  ;;  %v9776_v10 = vld [vmem:[#allocation3 + $0x28] sm:$0xff]  }
 0x2ca   : > { %v4323_v38 = vrot.slane %v4321_v3, 7  ;;  %9901 = vpow2.f32 %v8273_v21  ;;  %3459 = vst.msk [vmem:[#allocation4 + $0x1a0] sm:$0xff] %vm1759_vm11, %v3394_v25  ;;  %3808 = vrot.lane.b32.xlu0 %v3720_v34, %s10156_s21  ;;  %3618 = vrot.lane.b32.xlu1 %v3529_v35, %s10157_s22  ;;  %v9774_v39 = vld [vmem:[#allocation3 + $0x20] sm:$0xff]   ;;  %v8604_v41 = vpack.c.bf16 %v4163_v14, %v4163_v14  ;;  %v3332_v21 = vld [vmem:[#allocation4 + $0x1b8] sm:$0xff] }
 0x2cb   : > { %v3226_v43 = vpop.f32.mrf.mxu0  ;;  %v9775_v63 = vld [vmem:[#allocation3 + $0x20] sm:$0xff]   ;;  %9256 = vmatmul.mubr.msk.bf16.gmra.mxu1 %vm4952_vm14, %v9774_v39  ;;  %v9777_v22 = vld [vmem:[#allocation3 + $0x28] sm:$0xff]  }
 0x2cc   : > { %v4326_v44 = vor.u32 %v4324_v28, %v4323_v38  ;;  %v3395_v45 = vadd.f32 %v3330_v37, %v3226_v43  ;;  %v3781_v46 = vpop.permute.xlu0 %3780  ;;  %v3591_v47 = vpop.permute.xlu1 %3590  ;;  %v4329_v48 = vshrl.u32 %v8604_v41, 16  ;;  %9382 = vmatmul.mubr.msk.bf16.gmra.mxu0 %vm4952_vm14, %v9775_v63  ;;  %v3721_v51 = vld [vmem:[#allocation4 + $0x18a] sm:$0xff]  ;;  %9259 = vmatprep.mubr.msk.bf16.mxu1 %vm10154_vm2, %v10153_v1  ;;  %v4332_v55 = vshll.u32 %v8604_v41, 16  ;;  %v3333_v37 = vld [vmem:[#allocation4 + $0x1c0] sm:$0xff] }
 0x2cd   : > { %v3866_v50 = vadd.f32 %v3781_v46, %v3674_v42  ;;  %v9212_v31 = vpop.f32.mrf.mxu0  ;;  %9385 = vmatprep.mubr.msk.bf16.mxu0 %vm10154_vm2, %v10153_v1  ;;  %v3675_v57 = vadd.f32 %v3591_v47, %v3483_v53  ;;  %v4327_v60 = vrot.slane %v4323_v38, 4  ;;  %v4632_v47 = vld [vmem:[#allocation3 + $0x40] sm:$0xf] }
 0x2ce   : > { %v4626_v27 = vsel %vm11296_vm15, %v4326_v44, %v4625_v40  ;;  %3460 = vst.msk [vmem:[#allocation4 + $0x1a8] sm:$0xff] %vm1759_vm11, %v3395_v45  ;;  %3810 = vrot.lane.b32.xlu1 %v3721_v51, %s10156_s21  ;;  %v4331_v54 = vrot.slane %v4329_v48, 7  ;;  %v3484_v48 = vld [vmem:[#allocation4 + $0xc0] sm:$0xff] }
 0x2cf   : > { %4627 = vst [vmem:[#allocation3 + $0x30] sm:$0xf] %v4626_v27  ;;  %v3905_v56 = vmul.f32 %v11233_v11, %v3866_v50  ;;  %v3231_v58 = vpop.f32.mrf.mxu0  ;;  %v3334_v27 = vld [vmem:[#allocation4 + $0x1c8] sm:$0xff] }
 0x2d0   : > { %v3396_v62 = vadd.f32 %v3331_v24, %v3231_v58  ;;  %v3783_v4 = vpop.permute.xlu1 %3782  ;;  %v4334_v5 = vor.u32 %v4332_v55, %v4331_v54  ;;  %v4336_v2 = vrot.slane %v4331_v54, 4  ;;  %v4636_v54 = vld [vmem:[#allocation3 + $0x48] sm:$0x1] }
 0x2d1   : > { %v11388_v6 = vadd.f32 %v11240_v15, %v3905_v56  ;;  %v3867_v7 = vadd.f32 %v3783_v4, %v3675_v57  ;;  %v9215_v8 = vpop.f32.mrf.mxu0 }
 0x2d2   : > { %v9896_v9 = vpop.eup %9895  ;;  %3461 = vst.msk [vmem:[#allocation4 + $0x1b0] sm:$0xff] %vm1759_vm11, %v3396_v62  ;;  %v4335_v16 = vsel %vm10425_vm10, %v4327_v60, %v4334_v5  ;;  %v4630_v17 = vsel %vm11308_vm1, %v4336_v2, %v4629_v61 }
 0x2d3   : > { %v9898_v12 = vpop.eup %9897  ;;  %v4164_v18 = vmul.f32 %v9896_v9, %v11321_v52  ;;  %v8274_v19 = vmul.f32 -1.442695, %v11388_v6  ;;  %v3234_v20 = vpop.f32.mrf.mxu0  ;;  %4628 = vst.msk [vmem:[#allocation3 + $0x34] sm:$0xf] %vm484_vm13, %v4335_v16  ;;  %4631 = vst [vmem:[#allocation3 + $0x38] sm:$0x1] %v4630_v17  ;;  %v3906_v49 = vmul.f32 %v11233_v11, %v3867_v7  ;;  %9260 = vmatmul.mubr.msk.bf16.gmra.mxu1 %vm4952_vm14, %v9776_v10 }
 0x2d4   : > { %v4070_v23 = vadd.f32 1.0, %v9898_v12  ;;  %v3397_v3 = vadd.f32 %v3332_v21, %v3234_v20  ;;  %9386 = vmatmul.mubr.msk.bf16.gmra.mxu0 %vm4952_vm14, %v9777_v22  ;;  %9263 = vmatprep.mubr.msk.bf16.mxu1 %vm10154_vm2, %v10153_v1  ;;  %v3485_v7 = vld [vmem:[#allocation4 + $0xc8] sm:$0xff]  ;;  %v3335_v17 = vld [vmem:[#allocation4 + $0x1d0] sm:$0xff] }
 0x2d5   : > { %v8605_v25 = vpack.c.bf16 %v4164_v18, %v4164_v18  ;;  %9903 = vpow2.f32 %v8274_v19  ;;  %v9216_v26 = vpop.f32.mrf.mxu0  ;;  %v3530_v52 = vld [vmem:[#allocation4 + $0x1a1] sm:$0xff]  ;;  %v11404_v14 = vadd.f32 %v11240_v15, %v3906_v49  ;;  %9389 = vmatprep.mubr.msk.bf16.mxu0 %vm10154_vm2, %v10153_v1 }
 0x2d6   : > { %v9900_v28 = vpop.eup %9899  ;;  %9905 = vrcp.f32 %v4070_v23  ;;  %3462 = vst.msk [vmem:[#allocation4 + $0x1b8] sm:$0xff] %vm1759_vm11, %v3397_v3  ;;  %3620 = vrot.lane.b32.xlu0 %v3530_v52, %s10157_s22  ;;  %v3722_v45 = vld [vmem:[#allocation4 + $0x1a2] sm:$0xff] }
 0x2d7   : > { %v9902_v30 = vpop.eup %9901  ;;  %v4338_v32 = vshrl.u32 %v8605_v25, 16  ;;  %v4165_v34 = vmul.f32 %v9900_v28, %v11328_v0  ;;  %v3239_v35 = vpop.f32.mrf.mxu0  ;;  %v8275_v39 = vmul.f32 -1.442695, %v11404_v14  ;;  %v4341_v43 = vshll.u32 %v8605_v25, 16 }
 0x2d8   : > { %v4071_v38 = vadd.f32 1.0, %v9902_v30  ;;  %v3398_v40 = vadd.f32 %v3333_v37, %v3239_v35  ;;  %v3593_v41 = vpop.permute.xlu0 %3592 }
 0x2d9   : > { %v4340_v42 = vrot.slane %v4338_v32, 7  ;;  %v8606_v63 = vpack.c.bf16 %v4165_v34, %v4165_v34  ;;  %v9219_v44 = vpop.f32.mrf.mxu0  ;;  %v3531_v46 = vld [vmem:[#allocation4 + $0x1a9] sm:$0xff]  ;;  %v3676_v31 = vadd.f32 %v3593_v41, %v3484_v48  ;;  %v3336_v32 = vld [vmem:[#allocation4 + $0x1d8] sm:$0xff] }
 0x2da   : > { %9907 = vrcp.f32 %v4071_v38  ;;  %3463 = vst.msk [vmem:[#allocation4 + $0x1c0] sm:$0xff] %vm1759_vm11, %v3398_v40  ;;  %3812 = vrot.lane.b32.xlu0 %v3722_v45, %s10156_s21  ;;  %3622 = vrot.lane.b32.xlu1 %v3531_v46, %s10157_s22  ;;  %v9778_v53 = vld [vmem:[#allocation3 + $0x30] sm:$0xff]   ;;  %v3723_v5 = vld [vmem:[#allocation4 + $0x1aa] sm:$0xff] }
 0x2db   : > { %v4343_v0 = vor.u32 %v4341_v43, %v4340_v42  ;;  %v4346_v50 = vshrl.u32 %v8606_v63, 16  ;;  %v3242_v51 = vpop.f32.mrf.mxu0  ;;  %9909 = vpow2.f32 %v8275_v39  ;;  %v9779_v56 = vld [vmem:[#allocation3 + $0x30] sm:$0xff]   ;;  %v4349_v61 = vshll.u32 %v8606_v63, 16  ;;  %9264 = vmatmul.mubr.msk.bf16.gmra.mxu1 %vm4952_vm14, %v9778_v53  ;;  %v9780_v34 = vld [vmem:[#allocation3 + $0x38] sm:$0xff]  }
 0x2dc   : > { %v3399_v55 = vadd.f32 %v3334_v27, %v3242_v51  ;;  %v3785_v57 = vpop.permute.xlu0 %3784  ;;  %v3595_v58 = vpop.permute.xlu1 %3594  ;;  %v4344_v2 = vrot.slane %v4340_v42, 4  ;;  %9390 = vmatmul.mubr.msk.bf16.gmra.mxu0 %vm4952_vm14, %v9779_v56  ;;  %9267 = vmatprep.mubr.msk.bf16.mxu1 %vm10154_vm2, %v10153_v1  ;;  %v9781_v38 = vld [vmem:[#allocation3 + $0x38] sm:$0xff]   ;;  %v3337_v63 = vld [vmem:[#allocation4 + $0x1e0] sm:$0xff] }
 0x2dd   : > { %v4633_v24 = vsel %vm11296_vm15, %v4343_v0, %v4632_v47  ;;  %v4348_v60 = vrot.slane %v4346_v50, 7  ;;  %v3868_v62 = vadd.f32 %v3785_v57, %v3676_v31  ;;  %v9220_v4 = vpop.f32.mrf.mxu0  ;;  %v3677_v12 = vadd.f32 %v3595_v58, %v3485_v7  ;;  %9393 = vmatprep.mubr.msk.bf16.mxu0 %vm10154_vm2, %v10153_v1  ;;  %v3486_v46 = vld [vmem:[#allocation4 + $0xe0] sm:$0xff] }
 0x2de   : > { %4634 = vst [vmem:[#allocation3 + $0x40] sm:$0xf] %v4633_v24  ;;  %3464 = vst.msk [vmem:[#allocation4 + $0x1c8] sm:$0xff] %vm1759_vm11, %v3399_v55  ;;  %3814 = vrot.lane.b32.xlu1 %v3723_v5, %s10156_s21  ;;  %v4639_v56 = vld [vmem:[#allocation3 + $0x50] sm:$0xf]  ;;  %v5090_v24 = vpop.f32.mrf.mxu1 }
 0x2df   : > { %v4351_v8 = vor.u32 %v4349_v61, %v4348_v60  ;;  %v4353_v9 = vrot.slane %v4348_v60, 4  ;;  %v3907_v10 = vmul.f32 %v11233_v11, %v3868_v62  ;;  %v3247_v16 = vpop.f32.mrf.mxu0  ;;  %v3338_v62 = vld [vmem:[#allocation4 + $0x1e8] sm:$0xff]  ;;  %5353 = vst.msk [vmem:[#allocation5] sm:$0xff] %vm5352_vm4, %v5090_v24  ;;  %v3341_v24 = vld [vmem:[#allocation4 + $0x200] sm:$0xff] }
 0x2e0   : > { %v3400_v18 = vadd.f32 %v3335_v17, %v3247_v16  ;;  %v3787_v19 = vpop.permute.xlu1 %3786 }
 0x2e1   : > { %v4352_v20 = vsel %vm10425_vm10, %v4344_v2, %v4351_v8  ;;  %v4637_v21 = vsel %vm11308_vm1, %v4353_v9, %v4636_v54  ;;  %v11431_v22 = vadd.f32 %v11240_v15, %v3907_v10  ;;  %v3869_v23 = vadd.f32 %v3787_v19, %v3677_v12  ;;  %v9223_v49 = vpop.f32.mrf.mxu0  ;;  %v9241_v10 = vpop.f32.mrf.mxu1  ;;  %v4643_v19 = vld [vmem:[#allocation3 + $0x58] sm:$0x1] }
 0x2e2   : > { %v9904_v3 = vpop.eup %9903  ;;  %4635 = vst.msk [vmem:[#allocation3 + $0x44] sm:$0xf] %vm484_vm13, %v4352_v20  ;;  %4638 = vst [vmem:[#allocation3 + $0x48] sm:$0x1] %v4637_v21  ;;  %v11463_v20 = vld [vmem:[%s12499_s2] ss:$0 sm:$0xff] }
 0x2e3   : > { %3465 = vst.msk [vmem:[#allocation4 + $0x1d0] sm:$0xff] %vm1759_vm11, %v3400_v18  ;;  %v9906_v25 = vpop.eup %9905  ;;  %v4072_v26 = vadd.f32 1.0, %v9904_v3  ;;  %v8276_v52 = vmul.f32 -1.442695, %v11431_v22  ;;  %v3908_v28 = vmul.f32 %v11233_v11, %v3869_v23  ;;  %v3250_v30 = vpop.f32.mrf.mxu0  ;;  %9268 = vmatmul.mubr.msk.bf16.gmra.mxu1 %vm4952_vm14, %v9780_v34  ;;  %v3487_v18 = vld [vmem:[#allocation4 + $0xe8] sm:$0xff]  ;;  %v3339_v3 = vld [vmem:[#allocation4 + $0x1f0] sm:$0xff] }
 0x2e4   : > { %v4166_v35 = vmul.f32 %v9906_v25, %v11349_v59  ;;  %v3401_v37 = vadd.f32 %v3336_v32, %v3250_v30  ;;  %9394 = vmatmul.mubr.msk.bf16.gmra.mxu0 %vm4952_vm14, %v9781_v38  ;;  %9271 = vmatprep.mubr.msk.bf16.mxu1 %vm10154_vm2, %v10153_v1  ;;  %v5093_v25 = vpop.f32.mrf.mxu1  ;;  %v11473_v34 = vld [vmem:[%s12500_s3] ss:$0 sm:$0xff] }
 0x2e5   : > { %9911 = vrcp.f32 %v4072_v26  ;;  %v11439_v39 = vadd.f32 %v11240_v15, %v3908_v28  ;;  %v9224_v40 = vpop.f32.mrf.mxu0  ;;  %v3532_v41 = vld [vmem:[#allocation4 + $0x1c1] sm:$0xff]  ;;  %9397 = vmatprep.mubr.msk.bf16.mxu0 %vm10154_vm2, %v10153_v1  ;;  %5354 = vst.msk [vmem:[#allocation5 + $0x8] sm:$0xff] %vm5352_vm4, %v5093_v25 }
 0x2e6   : > { %v8607_v42 = vpack.c.bf16 %v4166_v35, %v4166_v35  ;;  %9913 = vpow2.f32 %v8276_v52  ;;  %3466 = vst.msk [vmem:[#allocation4 + $0x1d8] sm:$0xff] %vm1759_vm11, %v3401_v37  ;;  %3624 = vrot.lane.b32.xlu0 %v3532_v41, %s10157_s22  ;;  %v3724_v48 = vld [vmem:[#allocation4 + $0x1c2] sm:$0xff]  ;;  %v9242_v40 = vpop.f32.mrf.mxu1 }
 0x2e7   : > { %v9908_v11 = vpop.eup %9907  ;;  %v8277_v59 = vmul.f32 -1.442695, %v11439_v39  ;;  %v3255_v43 = vpop.f32.mrf.mxu0 }
 0x2e8   : > { %v4355_v15 = vshrl.u32 %v8607_v42, 16  ;;  %v4167_v44 = vmul.f32 %v9908_v11, %v11367_v13  ;;  %v3402_v45 = vadd.f32 %v3337_v63, %v3255_v43  ;;  %v3597_v47 = vpop.permute.xlu0 %3596  ;;  %v9910_v0 = vpop.eup %9909  ;;  %v4358_v53 = vshll.u32 %v8607_v42, 16 }
 0x2e9   : > { %9915 = vpow2.f32 %v8277_v59  ;;  %v9227_v50 = vpop.f32.mrf.mxu0  ;;  %v9782_v51 = vld [vmem:[#allocation3 + $0x40] sm:$0xff]   ;;  %v4073_v55 = vadd.f32 1.0, %v9910_v0  ;;  %v3678_v57 = vadd.f32 %v3597_v47, %v3486_v46  ;;  %v9784_v46 = vld [vmem:[#allocation3 + $0x48] sm:$0xff]   ;;  %v5098_v47 = vpop.f32.mrf.mxu1 }
 0x2ea   : > { %v3533_v31 = vld [vmem:[#allocation4 + $0x1c9] sm:$0xff]  ;;  %v4357_v27 = vrot.slane %v4355_v15, 7  ;;  %v8608_v54 = vpack.c.bf16 %v4167_v44, %v4167_v44  ;;  %3467 = vst.msk [vmem:[#allocation4 + $0x1e0] sm:$0xff] %vm1759_vm11, %v3402_v45  ;;  %3816 = vrot.lane.b32.xlu0 %v3724_v48, %s10156_s21  ;;  %v3340_v45 = vld [vmem:[#allocation4 + $0x1f8] sm:$0xff] }
 0x2eb   : > { %3626 = vrot.lane.b32.xlu1 %v3533_v31, %s10157_s22  ;;  %v9783_v13 = vld [vmem:[#allocation3 + $0x40] sm:$0xff]   ;;  %v3258_v58 = vpop.f32.mrf.mxu0  ;;  %9917 = vrcp.f32 %v4073_v55  ;;  %9272 = vmatmul.mubr.msk.bf16.gmra.mxu1 %vm4952_vm14, %v9782_v51  ;;  %v9785_v50 = vld [vmem:[#allocation3 + $0x48] sm:$0xff]   ;;  %5355 = vst.msk [vmem:[#allocation5 + $0x10] sm:$0xff] %vm5352_vm4, %v5098_v47 }
 0x2ec   : > { %v4360_v60 = vor.u32 %v4358_v53, %v4357_v27  ;;  %v4363_v61 = vshrl.u32 %v8608_v54, 16  ;;  %v3789_v4 = vpop.permute.xlu0 %3788  ;;  %v3599_v5 = vpop.permute.xlu1 %3598  ;;  %v3403_v2 = vadd.f32 %v3338_v62, %v3258_v58  ;;  %v3725_v9 = vld [vmem:[#allocation4 + $0x1ca] sm:$0xff]  ;;  %v4366_v17 = vshll.u32 %v8608_v54, 16  ;;  %9398 = vmatmul.mubr.msk.bf16.gmra.mxu0 %vm4952_vm14, %v9783_v13  ;;  %9275 = vmatprep.mubr.msk.bf16.mxu1 %vm10154_vm2, %v10153_v1 }
 0x2ed   : > { %v3870_v7 = vadd.f32 %v3789_v4, %v3678_v57  ;;  %v9228_v8 = vpop.f32.mrf.mxu0  ;;  %v3679_v23 = vadd.f32 %v3599_v5, %v3487_v18  ;;  %9401 = vmatprep.mubr.msk.bf16.mxu0 %vm10154_vm2, %v10153_v1  ;;  %v4361_v26 = vrot.slane %v4357_v27, 4  ;;  %v9245_v27 = vpop.f32.mrf.mxu1 }
 0x2ee   : > { %v4640_v12 = vsel %vm11296_vm15, %v4360_v60, %v4639_v56  ;;  %v4365_v16 = vrot.slane %v4363_v61, 7  ;;  %3468 = vst.msk [vmem:[#allocation4 + $0x1e8] sm:$0xff] %vm1759_vm11, %v3403_v2  ;;  %v4646_v61 = vld [vmem:[#allocation3 + $0x60] sm:$0xf] }
 0x2ef   : > { %3818 = vrot.lane.b32.xlu1 %v3725_v9, %s10156_s21  ;;  %4641 = vst [vmem:[#allocation3 + $0x50] sm:$0xf] %v4640_v12  ;;  %v3909_v21 = vmul.f32 %v11463_v20, %v3870_v7  ;;  %v3263_v49 = vpop.f32.mrf.mxu0  ;;  %v5101_v60 = vpop.f32.mrf.mxu1  ;;  %v3488_v7 = vld [vmem:[#allocation4 + $0x100] sm:$0xff] }
 0x2f0   : > { %v4368_v52 = vor.u32 %v4366_v17, %v4365_v16  ;;  %v4370_v28 = vrot.slane %v4365_v16, 4  ;;  %v3404_v30 = vadd.f32 %v3339_v3, %v3263_v49  ;;  %v3791_v32 = vpop.permute.xlu1 %3790  ;;  %5356 = vst.msk [vmem:[#allocation5 + $0x18] sm:$0xff] %vm5352_vm4, %v5101_v60 }
 0x2f1   : > { %v11476_v35 = vadd.f32 %v11473_v34, %v3909_v21  ;;  %v3871_v37 = vadd.f32 %v3791_v32, %v3679_v23  ;;  %v9231_v38 = vpop.f32.mrf.mxu0  ;;  %v9246_v12 = vpop.f32.mrf.mxu1 }
 0x2f2   : > { %v9912_v41 = vpop.eup %9911  ;;  %v4369_v42 = vsel %vm10425_vm10, %v4361_v26, %v4368_v52  ;;  %v4644_v11 = vsel %vm11308_vm1, %v4370_v28, %v4643_v19  ;;  %3469 = vst.msk [vmem:[#allocation4 + $0x1f0] sm:$0xff] %vm1759_vm11, %v3404_v30 }
 0x2f3   : > { %v9914_v59 = vpop.eup %9913  ;;  %4642 = vst.msk [vmem:[#allocation3 + $0x54] sm:$0xf] %vm484_vm13, %v4369_v42  ;;  %4645 = vst [vmem:[#allocation3 + $0x58] sm:$0x1] %v4644_v11  ;;  %v4168_v43 = vmul.f32 %v9912_v41, %v11388_v6  ;;  %v8278_v63 = vmul.f32 -1.442695, %v11476_v35  ;;  %v3910_v15 = vmul.f32 %v11463_v20, %v3871_v37  ;;  %v3266_v44 = vpop.f32.mrf.mxu0  ;;  %9276 = vmatmul.mubr.msk.bf16.gmra.mxu1 %vm4952_vm14, %v9784_v46 }
 0x2f4   : > { %v4074_v48 = vadd.f32 1.0, %v9914_v59  ;;  %v3405_v0 = vadd.f32 %v3340_v45, %v3266_v44  ;;  %9402 = vmatmul.mubr.msk.bf16.gmra.mxu0 %vm4952_vm14, %v9785_v50  ;;  %9279 = vmatprep.mubr.msk.bf16.mxu1 %vm10154_vm2, %v10153_v1 }
 0x2f5   : > { %v8609_v31 = vpack.c.bf16 %v4168_v43, %v4168_v43  ;;  %9919 = vpow2.f32 %v8278_v63  ;;  %v11491_v51 = vadd.f32 %v11473_v34, %v3910_v15  ;;  %v9232_v6 = vpop.f32.mrf.mxu0  ;;  %v3726_v54 = vld [vmem:[#allocation4 + $0x1e2] sm:$0xff]  ;;  %9405 = vmatprep.mubr.msk.bf16.mxu0 %vm10154_vm2, %v10153_v1  ;;  %v4650_v15 = vld [vmem:[#allocation3 + $0x68] sm:$0x1] }
 0x2f6   : > { %v9916_v53 = vpop.eup %9915  ;;  %9921 = vrcp.f32 %v4074_v48  ;;  %3470 = vst.msk [vmem:[#allocation4 + $0x1f8] sm:$0xff] %vm1759_vm11, %v3405_v0  ;;  %v3534_v55 = vld [vmem:[#allocation4 + $0x1e1] sm:$0xff]  ;;  %3820 = vrot.lane.b32.xlu1 %v3726_v54, %s10156_s21 }
 0x2f7   : > { %v4372_v13 = vshrl.u32 %v8609_v31, 16  ;;  %v4075_v56 = vadd.f32 1.0, %v9916_v53  ;;  %v8279_v57 = vmul.f32 -1.442695, %v11491_v51  ;;  %3628 = vrot.lane.b32.xlu0 %v3534_v55, %s10157_s22  ;;  %v3271_v58 = vpop.f32.mrf.mxu0  ;;  %v4375_v2 = vshll.u32 %v8609_v31, 16 }
 0x2f8   : > { %v3406_v62 = vadd.f32 %v3341_v24, %v3271_v58  ;;  %v3601_v4 = vpop.permute.xlu0 %3600  ;;  %v9918_v16 = vpop.eup %9917 }
 0x2f9   : > { %v4374_v5 = vrot.slane %v4372_v13, 7  ;;  %9923 = vrcp.f32 %v4075_v56  ;;  %v3727_v8 = vld [vmem:[#allocation4 + $0x1ea] sm:$0xff]  ;;  %v9235_v10 = vpop.f32.mrf.mxu0  ;;  %v4169_v19 = vmul.f32 %v9918_v16, %v11404_v14  ;;  %v3680_v21 = vadd.f32 %v3601_v4, %v3488_v7 }
 0x2fa   : > { %v3535_v9 = vld [vmem:[#allocation4 + $0x1e9] sm:$0xff]  ;;  %9925 = vpow2.f32 %v8279_v57  ;;  %3471 = vst.msk [vmem:[#allocation4 + $0x200] sm:$0xff] %vm1759_vm11, %v3406_v62  ;;  %v9786_v17 = vld [vmem:[#allocation3 + $0x50] sm:$0xff]   ;;  %3822 = vrot.lane.b32.xlu1 %v3727_v8, %s10156_s21  ;;  %v4657_v10 = vld [vmem:[#allocation3 + $0x78] sm:$0x1] }
 0x2fb   : > { %v4377_v18 = vor.u32 %v4375_v2, %v4374_v5  ;;  %3630 = vrot.lane.b32.xlu0 %v3535_v9, %s10157_s22  ;;  %v9787_v23 = vld [vmem:[#allocation3 + $0x50] sm:$0xff]   ;;  %v3274_v49 = vpop.f32.mrf.mxu0  ;;  %v8610_v52 = vpack.c.bf16 %v4169_v19, %v4169_v19  ;;  %9280 = vmatmul.mubr.msk.bf16.gmra.mxu1 %vm4952_vm14, %v9786_v17  ;;  %v3489_v14 = vld [vmem:[#allocation4 + $0x108] sm:$0xff]  ;;  %v4378_v63 = vrot.slane %v4374_v5, 4  ;;  %s10158_s22 = smov 120  }
 0x2fc   : > { %v3793_v3 = vpop.permute.xlu0 %3792  ;;  %v3603_v25 = vpop.permute.xlu1 %3602  ;;  %9406 = vmatmul.mubr.msk.bf16.gmra.mxu0 %vm4952_vm14, %v9787_v23  ;;  %9283 = vmatprep.mubr.msk.bf16.mxu1 %vm10154_vm2, %v10153_v1  ;;  %v9788_v0 = vld [vmem:[#allocation3 + $0x58] sm:$0xff]   ;;  %v3490_v5 = vld [vmem:[#allocation4 + $0x120] sm:$0xff] }
 0x2fd   : > { %v4647_v26 = vsel %vm11296_vm15, %v4377_v18, %v4646_v61  ;;  %v3872_v28 = vadd.f32 %v3793_v3, %v3680_v21  ;;  %v9236_v30 = vpop.f32.mrf.mxu0  ;;  %v4380_v32 = vshrl.u32 %v8610_v52, 16  ;;  %v3681_v38 = vadd.f32 %v3603_v25, %v3489_v14  ;;  %9409 = vmatprep.mubr.msk.bf16.mxu0 %vm10154_vm2, %v10153_v1  ;;  %v9789_v6 = vld [vmem:[#allocation3 + $0x58] sm:$0xff]   ;;  %v4653_v2 = vld [vmem:[#allocation3 + $0x70] sm:$0xf] }
 0x2fe   : > { %4648 = vst [vmem:[#allocation3 + $0x60] sm:$0xf] %v4647_v26  ;;  %v4383_v42 = vshll.u32 %v8610_v52, 16  ;;  %v3491_v3 = vld [vmem:[#allocation4 + $0x128] sm:$0xff] }
 0x2ff   : > { %v3911_v37 = vmul.f32 %v11463_v20, %v3872_v28  ;;  %v4382_v41 = vrot.slane %v4380_v32, 7 }
 0x300   : > { %v3795_v40 = vpop.permute.xlu1 %3794 }
 0x301   : > { %v11518_v11 = vadd.f32 %v11473_v34, %v3911_v37  ;;  %v3873_v59 = vadd.f32 %v3795_v40, %v3681_v38  ;;  %v4385_v45 = vor.u32 %v4383_v42, %v4382_v41  ;;  %v4387_v46 = vrot.slane %v4382_v41, 4 }
 0x302   : > { %v9920_v43 = vpop.eup %9919 }
 0x303   : > { %v9922_v44 = vpop.eup %9921  ;;  %v4076_v47 = vadd.f32 1.0, %v9920_v43  ;;  %v8280_v48 = vmul.f32 -1.442695, %v11518_v11  ;;  %v3912_v31 = vmul.f32 %v11463_v20, %v3873_v59  ;;  %v4386_v27 = vsel %vm10425_vm10, %v4378_v63, %v4385_v45  ;;  %9284 = vmatmul.mubr.msk.bf16.gmra.mxu1 %vm4952_vm14, %v9788_v0 }
 0x304   : > { %v4170_v50 = vmul.f32 %v9922_v44, %v11431_v22  ;;  %v4651_v53 = vsel %vm11308_vm1, %v4387_v46, %v4650_v15  ;;  %4649 = vst.msk [vmem:[#allocation3 + $0x64] sm:$0xf] %vm484_vm13, %v4386_v27  ;;  %9410 = vmatmul.mubr.msk.bf16.gmra.mxu0 %vm4952_vm14, %v9789_v6  ;;  %9287 = vmatprep.mubr.msk.bf16.mxu1 %vm10154_vm2, %v10153_v1 }
 0x305   : > { %9927 = vrcp.f32 %v4076_v47  ;;  %4652 = vst [vmem:[#allocation3 + $0x68] sm:$0x1] %v4651_v53  ;;  %v11530_v22 = vadd.f32 %v11473_v34, %v3912_v31  ;;  %9413 = vmatprep.mubr.msk.bf16.mxu0 %vm10154_vm2, %v10153_v1 }
 0x306   : > { %v9924_v54 = vpop.eup %9923  ;;  %v8611_v55 = vpack.c.bf16 %v4170_v50, %v4170_v50  ;;  %9929 = vpow2.f32 %v8280_v48  ;;  %v4660_v50 = vld [vmem:[#allocation3 + $0x80] sm:$0xf] }
 0x307   : > { %v9926_v13 = vpop.eup %9925  ;;  %v4171_v56 = vmul.f32 %v9924_v54, %v11439_v39  ;;  %v8281_v24 = vmul.f32 -1.442695, %v11530_v22 }
 0x308   : > { %v4389_v57 = vshrl.u32 %v8611_v55, 16  ;;  %v4077_v58 = vadd.f32 1.0, %v9926_v13  ;;  %v3605_v60 = vpop.permute.xlu0 %3604  ;;  %v4392_v4 = vshll.u32 %v8611_v55, 16  ;;  %v3492_v13 = vld [vmem:[#allocation4 + $0x140] sm:$0xff] }
 0x309   : > { %v8612_v61 = vpack.c.bf16 %v4171_v56, %v4171_v56  ;;  %v3682_v8 = vadd.f32 %v3605_v60, %v3490_v5 }
 0x30a   : > { %v4391_v62 = vrot.slane %v4389_v57, 7  ;;  %9931 = vrcp.f32 %v4077_v58 }
 0x30b   : > { %v4397_v7 = vshrl.u32 %v8612_v61, 16  ;;  %9933 = vpow2.f32 %v8281_v24  ;;  %v4400_v39 = vshll.u32 %v8612_v61, 16  ;;  %v9790_v18 = vld [vmem:[#allocation3 + $0x60] sm:$0xff]  }
 0x30c   : > { %v4394_v9 = vor.u32 %v4392_v4, %v4391_v62  ;;  %v3797_v12 = vpop.permute.xlu0 %3796  ;;  %v3607_v16 = vpop.permute.xlu1 %3606  ;;  %v4395_v21 = vrot.slane %v4391_v62, 4  ;;  %v9791_v49 = vld [vmem:[#allocation3 + $0x60] sm:$0xff]   ;;  %9288 = vmatmul.mubr.msk.bf16.gmra.mxu1 %vm4952_vm14, %v9790_v18  ;;  %v9792_v45 = vld [vmem:[#allocation3 + $0x68] sm:$0xff]  }
 0x30d   : > { %v4399_v17 = vrot.slane %v4397_v7, 7  ;;  %v3874_v19 = vadd.f32 %v3797_v12, %v3682_v8  ;;  %v3683_v28 = vadd.f32 %v3607_v16, %v3491_v3  ;;  %9414 = vmatmul.mubr.msk.bf16.gmra.mxu0 %vm4952_vm14, %v9791_v49  ;;  %9291 = vmatprep.mubr.msk.bf16.mxu1 %vm10154_vm2, %v10153_v1  ;;  %v9793_v46 = vld [vmem:[#allocation3 + $0x68] sm:$0xff]   ;;  %v3493_v7 = vld [vmem:[#allocation4 + $0x148] sm:$0xff] }
 0x30e   : > { %v4654_v23 = vsel %vm11296_vm15, %v4394_v9, %v4653_v2  ;;  %9417 = vmatprep.mubr.msk.bf16.mxu0 %vm10154_vm2, %v10153_v1  ;;  %v4664_v8 = vld [vmem:[#allocation3 + $0x88] sm:$0x1] }
 0x30f   : > { %4655 = vst [vmem:[#allocation3 + $0x70] sm:$0xf] %v4654_v23  ;;  %v4402_v25 = vor.u32 %v4400_v39, %v4399_v17  ;;  %v4404_v26 = vrot.slane %v4399_v17, 4  ;;  %v3913_v52 = vmul.f32 %v11463_v20, %v3874_v19 }
 0x310   : > { %v3799_v30 = vpop.permute.xlu1 %3798 }
 0x311   : > { %v4403_v14 = vsel %vm10425_vm10, %v4395_v21, %v4402_v25  ;;  %v4658_v32 = vsel %vm11308_vm1, %v4404_v26, %v4657_v10  ;;  %v11551_v37 = vadd.f32 %v11473_v34, %v3913_v52  ;;  %v3875_v38 = vadd.f32 %v3799_v30, %v3683_v28 }
 0x312   : > { %v9928_v40 = vpop.eup %9927  ;;  %4656 = vst.msk [vmem:[#allocation3 + $0x74] sm:$0xf] %vm484_vm13, %v4403_v14  ;;  %4659 = vst [vmem:[#allocation3 + $0x78] sm:$0x1] %v4658_v32 }
 0x313   : > { %v9930_v41 = vpop.eup %9929  ;;  %v4172_v42 = vmul.f32 %v9928_v40, %v11476_v35  ;;  %v8282_v59 = vmul.f32 -1.442695, %v11551_v37  ;;  %v3914_v43 = vmul.f32 %v11463_v20, %v3875_v38 }
 0x314   : > { %v4078_v63 = vadd.f32 1.0, %v9930_v41  ;;  %9292 = vmatmul.mubr.msk.bf16.gmra.mxu1 %vm4952_vm14, %v9792_v45 }
 0x315   : > { %v8613_v15 = vpack.c.bf16 %v4172_v42, %v4172_v42  ;;  %9935 = vpow2.f32 %v8282_v59  ;;  %v11560_v44 = vadd.f32 %v11473_v34, %v3914_v43  ;;  %9418 = vmatmul.mubr.msk.bf16.gmra.mxu0 %vm4952_vm14, %v9793_v46  ;;  %9295 = vmatprep.mubr.msk.bf16.mxu1 %vm10154_vm2, %v10153_v1 }
 0x316   : > { %9937 = vrcp.f32 %v4078_v63  ;;  %9421 = vmatprep.mubr.msk.bf16.mxu0 %vm10154_vm2, %v10153_v1 }
 0x317   : > { %v9932_v47 = vpop.eup %9931  ;;  %v4406_v48 = vshrl.u32 %v8613_v15, 16  ;;  %v8283_v0 = vmul.f32 -1.442695, %v11560_v44  ;;  %v4409_v53 = vshll.u32 %v8613_v15, 16 }
 0x318   : > { %v9934_v35 = vpop.eup %9933  ;;  %v4173_v31 = vmul.f32 %v9932_v47, %v11491_v51  ;;  %v3609_v6 = vpop.permute.xlu0 %3608 }
 0x319   : > { %v4408_v27 = vrot.slane %v4406_v48, 7  ;;  %v4079_v54 = vadd.f32 1.0, %v9934_v35  ;;  %9939 = vpow2.f32 %v8283_v0  ;;  %v3684_v57 = vadd.f32 %v3609_v6, %v3492_v13  ;;  %v9794_v58 = vld [vmem:[#allocation3 + $0x70] sm:$0xff]   ;;  %v9796_v30 = vld [vmem:[#allocation3 + $0x78] sm:$0xff]  }
 0x31a   : > { %v8614_v55 = vpack.c.bf16 %v4173_v31, %v4173_v31  ;;  %v9795_v24 = vld [vmem:[#allocation3 + $0x70] sm:$0xff]   ;;  %v9797_v40 = vld [vmem:[#allocation3 + $0x78] sm:$0xff]  }
 0x31b   : > { %v4411_v56 = vor.u32 %v4409_v53, %v4408_v27  ;;  %9941 = vrcp.f32 %v4079_v54  ;;  %v4412_v39 = vrot.slane %v4408_v27, 4  ;;  %v3494_v48 = vld [vmem:[#allocation4 + $0x160] sm:$0xff] }
 0x31c   : > { %v4414_v51 = vshrl.u32 %v8614_v55, 16  ;;  %v3801_v60 = vpop.permute.xlu0 %3800  ;;  %v3611_v61 = vpop.permute.xlu1 %3610  ;;  %v4417_v2 = vshll.u32 %v8614_v55, 16  ;;  %9296 = vmatmul.mubr.msk.bf16.gmra.mxu1 %vm4952_vm14, %v9794_v58 }
 0x31d   : > { %v4661_v62 = vsel %vm11296_vm15, %v4411_v56, %v4660_v50  ;;  %v3876_v4 = vadd.f32 %v3801_v60, %v3684_v57  ;;  %v3685_v10 = vadd.f32 %v3611_v61, %v3493_v7  ;;  %9422 = vmatmul.mubr.msk.bf16.gmra.mxu0 %vm4952_vm14, %v9795_v24  ;;  %9299 = vmatprep.mubr.msk.bf16.mxu1 %vm10154_vm2, %v10153_v1  ;;  %v3495_v56 = vld [vmem:[#allocation4 + $0x168] sm:$0xff] }
 0x31e   : > { %4662 = vst [vmem:[#allocation3 + $0x80] sm:$0xf] %v4661_v62  ;;  %v4416_v5 = vrot.slane %v4414_v51, 7  ;;  %9425 = vmatprep.mubr.msk.bf16.mxu0 %vm10154_vm2, %v10153_v1  ;;  %v4671_v57 = vld [vmem:[#allocation3 + $0x98] sm:$0x1] }
 0x31f   : > { %v3915_v9 = vmul.f32 %v11463_v20, %v3876_v4 }
 0x320   : > { %v4419_v12 = vor.u32 %v4417_v2, %v4416_v5  ;;  %v4421_v16 = vrot.slane %v4416_v5, 4  ;;  %v3803_v17 = vpop.permute.xlu1 %3802 }
 0x321   : > { %v11578_v18 = vadd.f32 %v11473_v34, %v3915_v9  ;;  %v3877_v19 = vadd.f32 %v3803_v17, %v3685_v10 }
 0x322   : > { %v9936_v21 = vpop.eup %9935  ;;  %v4420_v23 = vsel %vm10425_vm10, %v4412_v39, %v4419_v12  ;;  %v4665_v49 = vsel %vm11308_vm1, %v4421_v16, %v4664_v8 }
 0x323   : > { %v9938_v3 = vpop.eup %9937  ;;  %4663 = vst.msk [vmem:[#allocation3 + $0x84] sm:$0xf] %vm484_vm13, %v4420_v23  ;;  %4666 = vst [vmem:[#allocation3 + $0x88] sm:$0x1] %v4665_v49  ;;  %v4080_v25 = vadd.f32 1.0, %v9936_v21  ;;  %v3916_v52 = vmul.f32 %v11463_v20, %v3877_v19 }
 0x324   : > { %v8284_v26 = vmul.f32 -1.442695, %v11578_v18  ;;  %v4174_v28 = vmul.f32 %v9938_v3, %v11518_v11  ;;  %9300 = vmatmul.mubr.msk.bf16.gmra.mxu1 %vm4952_vm14, %v9796_v30  ;;  %v4667_v11 = vld [vmem:[#allocation3 + $0x90] sm:$0xf] }
 0x325   : > { %9943 = vrcp.f32 %v4080_v25  ;;  %v11591_v14 = vadd.f32 %v11473_v34, %v3916_v52  ;;  %9426 = vmatmul.mubr.msk.bf16.gmra.mxu0 %vm4952_vm14, %v9797_v40  ;;  %9303 = vmatprep.mubr.msk.bf16.mxu1 %vm10154_vm2, %v10153_v1  ;;  %v4674_v40 = vld [vmem:[#allocation3 + $0xa0] sm:$0xf] }
 0x326   : > { %v9940_v32 = vpop.eup %9939  ;;  %v8615_v38 = vpack.c.bf16 %v4174_v28, %v4174_v28  ;;  %9945 = vpow2.f32 %v8284_v26  ;;  %9429 = vmatprep.mubr.msk.bf16.mxu0 %vm10154_vm2, %v10153_v1 }
 0x327   : > { %v4081_v41 = vadd.f32 1.0, %v9940_v32  ;;  %v8285_v42 = vmul.f32 -1.442695, %v11591_v14 }
 0x328   : > { %v9942_v59 = vpop.eup %9941  ;;  %v4423_v43 = vshrl.u32 %v8615_v38, 16  ;;  %v3613_v63 = vpop.permute.xlu0 %3612  ;;  %v4426_v46 = vshll.u32 %v8615_v38, 16 }
 0x329   : > { %v4175_v15 = vmul.f32 %v9942_v59, %v11530_v22  ;;  %9947 = vrcp.f32 %v4081_v41  ;;  %v3686_v50 = vadd.f32 %v3613_v63, %v3494_v48 }
 0x32a   : > { %v4425_v45 = vrot.slane %v4423_v43, 7  ;;  %9949 = vpow2.f32 %v8285_v42  ;;  %v9798_v0 = vld [vmem:[#allocation3 + $0x80] sm:$0xff]   ;;  %v9800_v19 = vld [vmem:[#allocation3 + $0x88] sm:$0xff]  }
 0x32b   : > { %v8616_v47 = vpack.c.bf16 %v4175_v15, %v4175_v15  ;;  %v9799_v31 = vld [vmem:[#allocation3 + $0x80] sm:$0xff]   ;;  %v9801_v21 = vld [vmem:[#allocation3 + $0x88] sm:$0xff]  }
 0x32c   : > { %v4428_v35 = vor.u32 %v4426_v46, %v4425_v45  ;;  %v3805_v27 = vpop.permute.xlu0 %3804  ;;  %9304 = vmatmul.mubr.msk.bf16.gmra.mxu1 %vm4952_vm14, %v9798_v0  ;;  %v4429_v24 = vrot.slane %v4425_v45, 4  ;;  %v4678_v46 = vld [vmem:[#allocation3 + $0xa8] sm:$0x1] }
 0x32d   : > { %v4431_v6 = vshrl.u32 %v8616_v47, 16  ;;  %v3615_v53 = vpop.permute.xlu1 %3614  ;;  %v3878_v22 = vadd.f32 %v3805_v27, %v3686_v50  ;;  %v4434_v13 = vshll.u32 %v8616_v47, 16  ;;  %9430 = vmatmul.mubr.msk.bf16.gmra.mxu0 %vm4952_vm14, %v9799_v31  ;;  %9307 = vmatprep.mubr.msk.bf16.mxu1 %vm10154_vm2, %v10153_v1  ;;  %v3497_v50 = vld [vmem:[#allocation4 + $0x188] sm:$0xff] }
 0x32e   : > { %v4668_v54 = vsel %vm11296_vm15, %v4428_v35, %v4667_v11  ;;  %v3687_v51 = vadd.f32 %v3615_v53, %v3495_v56  ;;  %9433 = vmatprep.mubr.msk.bf16.mxu0 %vm10154_vm2, %v10153_v1 }
 0x32f   : > { %4669 = vst [vmem:[#allocation3 + $0x90] sm:$0xf] %v4668_v54  ;;  %v4433_v55 = vrot.slane %v4431_v6, 7  ;;  %v3917_v58 = vmul.f32 %v11463_v20, %v3878_v22 }
 0x331   : > { %v4436_v60 = vor.u32 %v4434_v13, %v4433_v55  ;;  %v4438_v61 = vrot.slane %v4433_v55, 4  ;;  %v3807_v62 = vpop.permute.xlu1 %3806  ;;  %v11611_v5 = vadd.f32 %v11473_v34, %v3917_v58 }
 0x332   : > { %v9944_v4 = vpop.eup %9943  ;;  %v3879_v2 = vadd.f32 %v3807_v62, %v3687_v51 }
 0x333   : > { %v9946_v7 = vpop.eup %9945  ;;  %v4437_v8 = vsel %vm10425_vm10, %v4429_v24, %v4436_v60  ;;  %v4672_v9 = vsel %vm11308_vm1, %v4438_v61, %v4671_v57  ;;  %v4176_v10 = vmul.f32 %v9944_v4, %v11551_v37  ;;  %v8286_v12 = vmul.f32 -1.442695, %v11611_v5 }
 0x334   : > { %4670 = vst.msk [vmem:[#allocation3 + $0x94] sm:$0xf] %vm484_vm13, %v4437_v8  ;;  %4673 = vst [vmem:[#allocation3 + $0x98] sm:$0x1] %v4672_v9  ;;  %v4082_v39 = vadd.f32 1.0, %v9946_v7  ;;  %v3918_v16 = vmul.f32 %v11463_v20, %v3879_v2  ;;  %9308 = vmatmul.mubr.msk.bf16.gmra.mxu1 %vm4952_vm14, %v9800_v19 }
 0x335   : > { %v8617_v17 = vpack.c.bf16 %v4176_v10, %v4176_v10  ;;  %9434 = vmatmul.mubr.msk.bf16.gmra.mxu0 %vm4952_vm14, %v9801_v21  ;;  %9311 = vmatprep.mubr.msk.bf16.mxu1 %vm10154_vm2, %v10153_v1 }
 0x336   : > { %v9948_v23 = vpop.eup %9947  ;;  %9951 = vrcp.f32 %v4082_v39  ;;  %v11622_v49 = vadd.f32 %v11473_v34, %v3918_v16  ;;  %9437 = vmatprep.mubr.msk.bf16.mxu0 %vm10154_vm2, %v10153_v1  ;;  %v4681_v16 = vld [vmem:[#allocation3 + $0xb0] sm:$0xf] }
 0x337   : > { %v9950_v3 = vpop.eup %9949  ;;  %v4440_v25 = vshrl.u32 %v8617_v17, 16  ;;  %v4177_v37 = vmul.f32 %v9948_v23, %v11560_v44  ;;  %9953 = vpow2.f32 %v8286_v12  ;;  %v4443_v32 = vshll.u32 %v8617_v17, 16  ;;  %v3496_v44 = vld [vmem:[#allocation4 + $0x180] sm:$0xff] }
 0x338   : > { %v4083_v26 = vadd.f32 1.0, %v9950_v3  ;;  %v8287_v52 = vmul.f32 -1.442695, %v11622_v49  ;;  %v3617_v28 = vpop.permute.xlu0 %3616  ;;  %v3498_v3 = vld [vmem:[#allocation4 + $0x1a0] sm:$0xff] }
 0x339   : > { %v4442_v30 = vrot.slane %v4440_v25, 7  ;;  %v8618_v38 = vpack.c.bf16 %v4177_v37, %v4177_v37  ;;  %v3688_v59 = vadd.f32 %v3617_v28, %v3496_v44 }
 0x33a   : > { %9955 = vrcp.f32 %v4083_v26 }
 0x33b   : > { %v4445_v41 = vor.u32 %v4443_v32, %v4442_v30  ;;  %v4448_v42 = vshrl.u32 %v8618_v38, 16  ;;  %v9802_v43 = vld [vmem:[#allocation3 + $0x90] sm:$0xff]   ;;  %9957 = vpow2.f32 %v8287_v52  ;;  %v4451_v48 = vshll.u32 %v8618_v38, 16  ;;  %v9804_v4 = vld [vmem:[#allocation3 + $0x98] sm:$0xff]  }
 0x33c   : > { %v9803_v63 = vld [vmem:[#allocation3 + $0x90] sm:$0xff]   ;;  %v3809_v11 = vpop.permute.xlu0 %3808  ;;  %v3619_v15 = vpop.permute.xlu1 %3618  ;;  %v4446_v35 = vrot.slane %v4442_v30, 4  ;;  %9312 = vmatmul.mubr.msk.bf16.gmra.mxu1 %vm4952_vm14, %v9802_v43  ;;  %v9805_v7 = vld [vmem:[#allocation3 + $0x98] sm:$0xff]  }
 0x33d   : > { %v4675_v45 = vsel %vm11296_vm15, %v4445_v41, %v4674_v40  ;;  %v4450_v47 = vrot.slane %v4448_v42, 7  ;;  %v3880_v0 = vadd.f32 %v3809_v11, %v3688_v59  ;;  %v3689_v53 = vadd.f32 %v3619_v15, %v3497_v50  ;;  %9438 = vmatmul.mubr.msk.bf16.gmra.mxu0 %vm4952_vm14, %v9803_v63  ;;  %9315 = vmatprep.mubr.msk.bf16.mxu1 %vm10154_vm2, %v10153_v1  ;;  %v3499_v41 = vld [vmem:[#allocation4 + $0x1a8] sm:$0xff] }
 0x33e   : > { %4676 = vst [vmem:[#allocation3 + $0xa0] sm:$0xf] %v4675_v45  ;;  %9441 = vmatprep.mubr.msk.bf16.mxu0 %vm10154_vm2, %v10153_v1  ;;  %v4685_v42 = vld [vmem:[#allocation3 + $0xb8] sm:$0x1] }
 0x33f   : > { %v4453_v31 = vor.u32 %v4451_v48, %v4450_v47  ;;  %v4455_v6 = vrot.slane %v4450_v47, 4  ;;  %v3919_v27 = vmul.f32 %v11463_v20, %v3880_v0 }
 0x340   : > { %v3811_v54 = vpop.permute.xlu1 %3810 }
 0x341   : > { %v4454_v22 = vsel %vm10425_vm10, %v4446_v35, %v4453_v31  ;;  %v4679_v55 = vsel %vm11308_vm1, %v4455_v6, %v4678_v46  ;;  %v11644_v13 = vadd.f32 %v11473_v34, %v3919_v27  ;;  %v3881_v56 = vadd.f32 %v3811_v54, %v3689_v53 }
 0x342   : > { %4677 = vst.msk [vmem:[#allocation3 + $0xa4] sm:$0xf] %vm484_vm13, %v4454_v22  ;;  %4680 = vst [vmem:[#allocation3 + $0xa8] sm:$0x1] %v4679_v55 }
 0x343   : > { %v9952_v57 = vpop.eup %9951  ;;  %v8288_v58 = vmul.f32 -1.442695, %v11644_v13  ;;  %v3920_v51 = vmul.f32 %v11463_v20, %v3881_v56 }
 0x344   : > { %v9954_v24 = vpop.eup %9953  ;;  %v4178_v60 = vmul.f32 %v9952_v57, %v11578_v18  ;;  %9316 = vmatmul.mubr.msk.bf16.gmra.mxu1 %vm4952_vm14, %v9804_v4 }
 0x345   : > { %v4084_v61 = vadd.f32 1.0, %v9954_v24  ;;  %9959 = vpow2.f32 %v8288_v58  ;;  %v11653_v62 = vadd.f32 %v11473_v34, %v3920_v51  ;;  %9442 = vmatmul.mubr.msk.bf16.gmra.mxu0 %vm4952_vm14, %v9805_v7  ;;  %9319 = vmatprep.mubr.msk.bf16.mxu1 %vm10154_vm2, %v10153_v1 }
 0x346   : > { %v8619_v2 = vpack.c.bf16 %v4178_v60, %v4178_v60  ;;  %9445 = vmatprep.mubr.msk.bf16.mxu0 %vm10154_vm2, %v10153_v1  ;;  %v4688_v60 = vld [vmem:[#allocation3 + $0xc0] sm:$0xf] }
 0x347   : > { %v9956_v8 = vpop.eup %9955  ;;  %9961 = vrcp.f32 %v4084_v61  ;;  %v8289_v9 = vmul.f32 -1.442695, %v11653_v62  ;;  %v3500_v61 = vld [vmem:[#allocation4 + $0x1c0] sm:$0xff] }
 0x348   : > { %v4457_v10 = vshrl.u32 %v8619_v2, 16  ;;  %v4179_v39 = vmul.f32 %v9956_v8, %v11591_v14  ;;  %v3621_v18 = vpop.permute.xlu0 %3620  ;;  %v9958_v12 = vpop.eup %9957  ;;  %v4460_v19 = vshll.u32 %v8619_v2, 16 }
 0x349   : > { %9963 = vpow2.f32 %v8289_v9  ;;  %v4085_v23 = vadd.f32 1.0, %v9958_v12  ;;  %v3690_v25 = vadd.f32 %v3621_v18, %v3498_v3  ;;  %v9806_v37 = vld [vmem:[#allocation3 + $0xa0] sm:$0xff]   ;;  %v9808_v22 = vld [vmem:[#allocation3 + $0xa8] sm:$0xff]   ;;  %v11700_v3 = vld [vmem:[%s12499_s2] ss:$0 sm:$0xff] }
 0x34a   : > { %v4459_v17 = vrot.slane %v4457_v10, 7  ;;  %v8620_v21 = vpack.c.bf16 %v4179_v39, %v4179_v39  ;;  %v9807_v52 = vld [vmem:[#allocation3 + $0xa0] sm:$0xff]   ;;  %v9809_v55 = vld [vmem:[#allocation3 + $0xa8] sm:$0xff]  }
 0x34b   : > { %9965 = vrcp.f32 %v4085_v23 }
 0x34c   : > { %v4462_v14 = vor.u32 %v4460_v19, %v4459_v17  ;;  %v4465_v26 = vshrl.u32 %v8620_v21, 16  ;;  %v3813_v28 = vpop.permute.xlu0 %3812  ;;  %v3623_v30 = vpop.permute.xlu1 %3622  ;;  %v4468_v44 = vshll.u32 %v8620_v21, 16  ;;  %9320 = vmatmul.mubr.msk.bf16.gmra.mxu1 %vm4952_vm14, %v9806_v37  ;;  %v4463_v63 = vrot.slane %v4459_v17, 4  ;;  %v3501_v19 = vld [vmem:[#allocation4 + $0x1c8] sm:$0xff] }
 0x34d   : > { %v3882_v32 = vadd.f32 %v3813_v28, %v3690_v25  ;;  %v3691_v43 = vadd.f32 %v3623_v30, %v3499_v41  ;;  %9446 = vmatmul.mubr.msk.bf16.gmra.mxu0 %vm4952_vm14, %v9807_v52  ;;  %9323 = vmatprep.mubr.msk.bf16.mxu1 %vm10154_vm2, %v10153_v1 }
 0x34e   : > { %v4682_v38 = vsel %vm11296_vm15, %v4462_v14, %v4681_v16  ;;  %v4467_v40 = vrot.slane %v4465_v26, 7  ;;  %9449 = vmatprep.mubr.msk.bf16.mxu0 %vm10154_vm2, %v10153_v1 }
 0x34f   : > { %4683 = vst [vmem:[#allocation3 + $0xb0] sm:$0xf] %v4682_v38  ;;  %v3921_v59 = vmul.f32 %v11463_v20, %v3882_v32  ;;  %v4692_v38 = vld [vmem:[#allocation3 + $0xc8] sm:$0x1] }
 0x350   : > { %v4470_v11 = vor.u32 %v4468_v44, %v4467_v40  ;;  %v4472_v15 = vrot.slane %v4467_v40, 4  ;;  %v3815_v45 = vpop.permute.xlu1 %3814 }
 0x351   : > { %v11671_v46 = vadd.f32 %v11473_v34, %v3921_v59  ;;  %v3883_v47 = vadd.f32 %v3815_v45, %v3691_v43 }
 0x352   : > { %v9960_v48 = vpop.eup %9959  ;;  %v4471_v0 = vsel %vm10425_vm10, %v4463_v63, %v4470_v11  ;;  %v4686_v35 = vsel %vm11308_vm1, %v4472_v15, %v4685_v42 }
 0x353   : > { %4684 = vst.msk [vmem:[#allocation3 + $0xb4] sm:$0xf] %vm484_vm13, %v4471_v0  ;;  %4687 = vst [vmem:[#allocation3 + $0xb8] sm:$0x1] %v4686_v35  ;;  %v4086_v50 = vadd.f32 1.0, %v9960_v48  ;;  %v3922_v6 = vmul.f32 %v11463_v20, %v3883_v47 }
 0x354   : > { %v8290_v31 = vmul.f32 -1.442695, %v11671_v46  ;;  %v9962_v27 = vpop.eup %9961  ;;  %9324 = vmatmul.mubr.msk.bf16.gmra.mxu1 %vm4952_vm14, %v9808_v22 }
 0x355   : > { %v4180_v53 = vmul.f32 %v9962_v27, %v11611_v5  ;;  %9967 = vrcp.f32 %v4086_v50  ;;  %v11684_v54 = vadd.f32 %v11473_v34, %v3922_v6  ;;  %9450 = vmatmul.mubr.msk.bf16.gmra.mxu0 %vm4952_vm14, %v9809_v55  ;;  %9327 = vmatprep.mubr.msk.bf16.mxu1 %vm10154_vm2, %v10153_v1 }
 0x356   : > { %v9964_v56 = vpop.eup %9963  ;;  %9969 = vpow2.f32 %v8290_v31  ;;  %9453 = vmatprep.mubr.msk.bf16.mxu0 %vm10154_vm2, %v10153_v1 }
 0x357   : > { %v8621_v57 = vpack.c.bf16 %v4180_v53, %v4180_v53  ;;  %v4087_v58 = vadd.f32 1.0, %v9964_v56  ;;  %v8291_v51 = vmul.f32 -1.442695, %v11684_v54 }
 0x358   : > { %v3625_v20 = vpop.permute.xlu0 %3624  ;;  %v9966_v24 = vpop.eup %9965 }
 0x359   : > { %v4474_v5 = vshrl.u32 %v8621_v57, 16  ;;  %9971 = vrcp.f32 %v4087_v58  ;;  %v4477_v2 = vshll.u32 %v8621_v57, 16  ;;  %v4181_v7 = vmul.f32 %v9966_v24, %v11622_v49  ;;  %v3502_v57 = vld [vmem:[#allocation4 + $0x1e0] sm:$0xff] }
 0x35a   : > { %9973 = vpow2.f32 %v8291_v51  ;;  %v3692_v8 = vadd.f32 %v3625_v20, %v3500_v61  ;;  %v9810_v9 = vld [vmem:[#allocation3 + $0xb0] sm:$0xff]   ;;  %v9812_v45 = vld [vmem:[#allocation3 + $0xb8] sm:$0xff]  }
 0x35b   : > { %v4476_v4 = vrot.slane %v4474_v5, 7  ;;  %v9811_v10 = vld [vmem:[#allocation3 + $0xb0] sm:$0xff]   ;;  %v8622_v16 = vpack.c.bf16 %v4181_v7, %v4181_v7  ;;  %v9813_v0 = vld [vmem:[#allocation3 + $0xb8] sm:$0xff]  }
 0x35c   : > { %v3817_v39 = vpop.permute.xlu0 %3816  ;;  %9328 = vmatmul.mubr.msk.bf16.gmra.mxu1 %vm4952_vm14, %v9810_v9  ;;  %v3503_v61 = vld [vmem:[#allocation4 + $0x1e8] sm:$0xff] }
 0x35d   : > { %v3627_v18 = vpop.permute.xlu1 %3626  ;;  %v4479_v12 = vor.u32 %v4477_v2, %v4476_v4  ;;  %v3884_v17 = vadd.f32 %v3817_v39, %v3692_v8  ;;  %v4482_v23 = vshrl.u32 %v8622_v16, 16  ;;  %9454 = vmatmul.mubr.msk.bf16.gmra.mxu0 %vm4952_vm14, %v9811_v10  ;;  %9331 = vmatprep.mubr.msk.bf16.mxu1 %vm10154_vm2, %v10153_v1  ;;  %v4485_v26 = vshll.u32 %v8622_v16, 16  ;;  %v4699_v9 = vld [vmem:[#allocation3 + $0xd8] sm:$0x1] }
 0x35e   : > { %v3693_v25 = vadd.f32 %v3627_v18, %v3501_v19  ;;  %9457 = vmatprep.mubr.msk.bf16.mxu0 %vm10154_vm2, %v10153_v1  ;;  %v4480_v32 = vrot.slane %v4476_v4, 4 }
 0x35f   : > { %v4689_v21 = vsel %vm11296_vm15, %v4479_v12, %v4688_v60  ;;  %v3923_v49 = vmul.f32 %v11700_v3, %v3884_v17  ;;  %v4484_v14 = vrot.slane %v4482_v23, 7 }
 0x360   : > { %4690 = vst [vmem:[#allocation3 + $0xc0] sm:$0xf] %v4689_v21 }
 0x361   : > { %v3819_v37 = vpop.permute.xlu1 %3818  ;;  %v11707_v52 = vadd.f32 %v11473_v34, %v3923_v49  ;;  %v4487_v44 = vor.u32 %v4485_v26, %v4484_v14  ;;  %v4489_v41 = vrot.slane %v4484_v14, 4 }
 0x362   : > { %v3885_v28 = vadd.f32 %v3819_v37, %v3693_v25  ;;  %v9968_v30 = vpop.eup %9967 }
 0x363   : > { %v9970_v40 = vpop.eup %9969  ;;  %v4182_v42 = vmul.f32 %v9968_v30, %v11644_v13  ;;  %v8292_v59 = vmul.f32 -1.442695, %v11707_v52  ;;  %v4488_v34 = vsel %vm10425_vm10, %v4480_v32, %v4487_v44  ;;  %v4693_v11 = vsel %vm11308_vm1, %v4489_v41, %v4692_v38  ;;  %v10126_v13 = vld [vmem:[%s12500_s3] ss:$0 sm:$0xff] }
 0x364   : > { %v4088_v43 = vadd.f32 1.0, %v9970_v40  ;;  %v3924_v63 = vmul.f32 %v11700_v3, %v3885_v28  ;;  %4691 = vst.msk [vmem:[#allocation3 + $0xc4] sm:$0xf] %vm484_vm13, %v4488_v34  ;;  %4694 = vst [vmem:[#allocation3 + $0xc8] sm:$0x1] %v4693_v11  ;;  %9332 = vmatmul.mubr.msk.bf16.gmra.mxu1 %vm4952_vm14, %v9812_v45 }
 0x365   : > { %v8623_v15 = vpack.c.bf16 %v4182_v42, %v4182_v42  ;;  %9975 = vpow2.f32 %v8292_v59  ;;  %9458 = vmatmul.mubr.msk.bf16.gmra.mxu0 %vm4952_vm14, %v9813_v0  ;;  %9335 = vmatprep.mubr.msk.bf16.mxu1 %vm10154_vm2, %v10153_v1  ;;  %v6047_v0 = vld [vmem:[#allocation5] sm:$0xff] }
 0x366   : > { %v9972_v47 = vpop.eup %9971  ;;  %9977 = vrcp.f32 %v4088_v43  ;;  %v11722_v48 = vadd.f32 %v10126_v13, %v3924_v63  ;;  %9461 = vmatprep.mubr.msk.bf16.mxu0 %vm10154_vm2, %v10153_v1 }
 0x367   : > { %v9974_v35 = vpop.eup %9973  ;;  %v4491_v50 = vshrl.u32 %v8623_v15, 16  ;;  %v4183_v31 = vmul.f32 %v9972_v47, %v11653_v62  ;;  %v4494_v22 = vshll.u32 %v8623_v15, 16  ;;  %v4695_v62 = vld [vmem:[#allocation3 + $0xd0] sm:$0xf] }
 0x368   : > { %v4089_v6 = vadd.f32 1.0, %v9974_v35  ;;  %v8293_v27 = vmul.f32 -1.442695, %v11722_v48  ;;  %v3821_v56 = vpop.permute.xlu1 %3820 }
 0x369   : > { %v4493_v53 = vrot.slane %v4491_v50, 7  ;;  %v8624_v55 = vpack.c.bf16 %v4183_v31, %v4183_v31  ;;  %v3629_v58 = vpop.permute.xlu0 %3628 }
 0x36a   : > { %9979 = vrcp.f32 %v4089_v6  ;;  %v3694_v51 = vadd.f32 %v3629_v58, %v3502_v57 }
 0x36b   : > { %v4496_v20 = vor.u32 %v4494_v22, %v4493_v53  ;;  %v4499_v5 = vshrl.u32 %v8624_v55, 16  ;;  %v4502_v24 = vshll.u32 %v8624_v55, 16  ;;  %9981 = vpow2.f32 %v8293_v27  ;;  %v9814_v7 = vld [vmem:[#allocation3 + $0xc0] sm:$0xff]   ;;  %v9816_v40 = vld [vmem:[#allocation3 + $0xc8] sm:$0xff]  }
 0x36c   : > { %v3886_v60 = vadd.f32 %v3821_v56, %v3694_v51  ;;  %v9815_v39 = vld [vmem:[#allocation3 + $0xc0] sm:$0xff]   ;;  %v4497_v12 = vrot.slane %v4493_v53, 4  ;;  %9336 = vmatmul.mubr.msk.bf16.gmra.mxu1 %vm4952_vm14, %v9814_v7  ;;  %v3823_v19 = vpop.permute.xlu1 %3822  ;;  %v9817_v42 = vld [vmem:[#allocation3 + $0xc8] sm:$0xff]  }
 0x36d   : > { %v4696_v4 = vsel %vm11296_vm15, %v4496_v20, %v4695_v62  ;;  %v4501_v2 = vrot.slane %v4499_v5, 7  ;;  %v3631_v8 = vpop.permute.xlu0 %3630  ;;  %9462 = vmatmul.mubr.msk.bf16.gmra.mxu0 %vm4952_vm14, %v9815_v39  ;;  %9339 = vmatprep.mubr.msk.bf16.mxu1 %vm10154_vm2, %v10153_v1  ;;  %v6048_v62 = vld [vmem:[#allocation5 + $0x8] sm:$0xff]  ;;  %v4706_v51 = vld [vmem:[#allocation3 + $0xe8] sm:$0x1] }
 0x36e   : > { %4697 = vst [vmem:[#allocation3 + $0xd0] sm:$0xf] %v4696_v4  ;;  %v3925_v10 = vmul.f32 %v11700_v3, %v3886_v60  ;;  %v3695_v18 = vadd.f32 %v3631_v8, %v3503_v61  ;;  %9465 = vmatprep.mubr.msk.bf16.mxu0 %vm10154_vm2, %v10153_v1 }
 0x36f   : > { %v4504_v16 = vor.u32 %v4502_v24, %v4501_v2  ;;  %v4506_v17 = vrot.slane %v4501_v2, 4 }
 0x370   : > { %v11736_v21 = vadd.f32 %v10126_v13, %v3925_v10  ;;  %v3887_v23 = vadd.f32 %v3823_v19, %v3695_v18 }
 0x371   : > { %v4505_v49 = vsel %vm10425_vm10, %v4497_v12, %v4504_v16  ;;  %v4700_v25 = vsel %vm11308_vm1, %v4506_v17, %v4699_v9  ;;  %v6049_v12 = vld [vmem:[#allocation5 + $0x10] sm:$0xff] }
 0x372   : > { %v9976_v37 = vpop.eup %9975  ;;  %4698 = vst.msk [vmem:[#allocation3 + $0xd4] sm:$0xf] %vm484_vm13, %v4505_v49  ;;  %4701 = vst [vmem:[#allocation3 + $0xd8] sm:$0x1] %v4700_v25  ;;  %v8294_v14 = vmul.f32 -1.442695, %v11736_v21  ;;  %v3926_v26 = vmul.f32 %v11700_v3, %v3887_v23 }
 0x373   : > { %v9978_v28 = vpop.eup %9977  ;;  %v4090_v30 = vadd.f32 1.0, %v9976_v37  ;;  %v4702_v3 = vld [vmem:[#allocation3 + $0xe0] sm:$0xf] }
 0x374   : > { %v4184_v32 = vmul.f32 %v9978_v28, %v11671_v46  ;;  %9983 = vpow2.f32 %v8294_v14  ;;  %v11751_v38 = vadd.f32 %v10126_v13, %v3926_v26  ;;  %9340 = vmatmul.mubr.msk.bf16.gmra.mxu1 %vm4952_vm14, %v9816_v40  ;;  %v6050_v14 = vld [vmem:[#allocation5 + $0x18] sm:$0xff] }
 0x375   : > { %9985 = vrcp.f32 %v4090_v30  ;;  %9466 = vmatmul.mubr.msk.bf16.gmra.mxu0 %vm4952_vm14, %v9817_v42  ;;  %9343 = vmatprep.mubr.msk.bf16.mxu1 %vm10154_vm2, %v10153_v1 }
 0x376   : > { %v8625_v44 = vpack.c.bf16 %v4184_v32, %v4184_v32  ;;  %v8295_v41 = vmul.f32 -1.442695, %v11751_v38  ;;  %9469 = vmatprep.mubr.msk.bf16.mxu0 %vm10154_vm2, %v10153_v1 }
 0x377   : > { %v9980_v59 = vpop.eup %9979 }
 0x378   : > { %v4508_v43 = vshrl.u32 %v8625_v44, 16  ;;  %v4185_v63 = vmul.f32 %v9980_v59, %v11684_v54  ;;  %9987 = vpow2.f32 %v8295_v41  ;;  %v9982_v46 = vpop.eup %9981  ;;  %v4511_v11 = vshll.u32 %v8625_v44, 16 }
 0x379   : > { %v4091_v45 = vadd.f32 1.0, %v9982_v46  ;;  %v5106_v47 = vpop.f32.mrf.mxu1  ;;  %v9818_v35 = vld [vmem:[#allocation3 + $0xd0] sm:$0xff]   ;;  %v9820_v37 = vld [vmem:[#allocation3 + $0xd8] sm:$0xff]  }
 0x37a   : > { %v4510_v34 = vrot.slane %v4508_v43, 7  ;;  %v8626_v15 = vpack.c.bf16 %v4185_v63, %v4185_v63  ;;  %v5785_v13 = vpop.f32.mrf.mxu0  ;;  %5357 = vst.msk [vmem:[#allocation5 + $0x20] sm:$0xff] %vm5352_vm4, %v5106_v47  ;;  %v9819_v53 = vld [vmem:[#allocation3 + $0xd0] sm:$0xff]   ;;  %v9821_v28 = vld [vmem:[#allocation3 + $0xd8] sm:$0xff]  }
 0x37b   : > { %v6112_v54 = vadd.f32 %v6047_v0, %v5785_v13  ;;  %v9249_v6 = vpop.f32.mrf.mxu1  ;;  %9989 = vrcp.f32 %v4091_v45  ;;  %v4709_v63 = vld [vmem:[#allocation3 + $0xf0] sm:$0xf] }
 0x37c   : > { %v4513_v50 = vor.u32 %v4511_v11, %v4510_v34  ;;  %v4516_v31 = vshrl.u32 %v8626_v15, 16  ;;  %v9375_v27 = vpop.f32.mrf.mxu0  ;;  %v4519_v56 = vshll.u32 %v8626_v15, 16  ;;  %9344 = vmatmul.mubr.msk.bf16.gmra.mxu1 %vm4952_vm14, %v9818_v35  ;;  %v4514_v5 = vrot.slane %v4510_v34, 4 }
 0x37d   : > { %6177 = vst.msk [vmem:[#allocation5] sm:$0xff] %vm5352_vm4, %v6112_v54  ;;  %v5109_v57 = vpop.f32.mrf.mxu1  ;;  %9470 = vmatmul.mubr.msk.bf16.gmra.mxu0 %vm4952_vm14, %v9819_v53  ;;  %9347 = vmatprep.mubr.msk.bf16.mxu1 %vm10154_vm2, %v10153_v1 }
 0x37e   : > { %v4703_v22 = vsel %vm11296_vm15, %v4513_v50, %v4702_v3  ;;  %v4518_v55 = vrot.slane %v4516_v31, 7  ;;  %v5788_v58 = vpop.f32.mrf.mxu0  ;;  %5358 = vst.msk [vmem:[#allocation5 + $0x28] sm:$0xff] %vm5352_vm4, %v5109_v57  ;;  %9473 = vmatprep.mubr.msk.bf16.mxu0 %vm10154_vm2, %v10153_v1 }
 0x37f   : > { %4704 = vst [vmem:[#allocation3 + $0xe0] sm:$0xf] %v4703_v22  ;;  %v6113_v20 = vadd.f32 %v6048_v62, %v5788_v58  ;;  %v9250_v61 = vpop.f32.mrf.mxu1 }
 0x380   : > { %v4521_v24 = vor.u32 %v4519_v56, %v4518_v55  ;;  %v4523_v60 = vrot.slane %v4518_v55, 4  ;;  %v9376_v4 = vpop.f32.mrf.mxu0  ;;  %v4713_v56 = vld [vmem:[#allocation3 + $0xf8] sm:$0x1] }
 0x381   : > { %v9984_v2 = vpop.eup %9983  ;;  %6178 = vst.msk [vmem:[#allocation5 + $0x8] sm:$0xff] %vm5352_vm4, %v6113_v20  ;;  %v5114_v39 = vpop.f32.mrf.mxu1  ;;  %v6051_v0 = vld [vmem:[#allocation5 + $0x20] sm:$0xff] }
 0x382   : > { %v9986_v7 = vpop.eup %9985  ;;  %v4522_v8 = vsel %vm10425_vm10, %v4514_v5, %v4521_v24  ;;  %v4707_v9 = vsel %vm11308_vm1, %v4523_v60, %v4706_v51  ;;  %v4092_v10 = vadd.f32 1.0, %v9984_v2  ;;  %v5793_v18 = vpop.f32.mrf.mxu0  ;;  %5359 = vst.msk [vmem:[#allocation5 + $0x30] sm:$0xff] %vm5352_vm4, %v5114_v39 }
 0x383   : > { %4705 = vst.msk [vmem:[#allocation3 + $0xe4] sm:$0xf] %vm484_vm13, %v4522_v8  ;;  %4708 = vst [vmem:[#allocation3 + $0xe8] sm:$0x1] %v4707_v9  ;;  %v4186_v16 = vmul.f32 %v9986_v7, %v11707_v52  ;;  %v6114_v17 = vadd.f32 %v6049_v12, %v5793_v18  ;;  %v9253_v19 = vpop.f32.mrf.mxu1 }
 0x384   : > { %9991 = vrcp.f32 %v4092_v10  ;;  %v9379_v23 = vpop.f32.mrf.mxu0  ;;  %9348 = vmatmul.mubr.msk.bf16.gmra.mxu1 %vm4952_vm14, %v9820_v37  ;;  %v4716_v37 = vld [vmem:[#allocation3 + $0x100] sm:$0xf] }
 0x385   : > { %v9988_v49 = vpop.eup %9987  ;;  %v8627_v25 = vpack.c.bf16 %v4186_v16, %v4186_v16  ;;  %6179 = vst.msk [vmem:[#allocation5 + $0x10] sm:$0xff] %vm5352_vm4, %v6114_v17  ;;  %v5117_v30 = vpop.f32.mrf.mxu1  ;;  %9474 = vmatmul.mubr.msk.bf16.gmra.mxu0 %vm4952_vm14, %v9821_v28  ;;  %9351 = vmatprep.mubr.msk.bf16.mxu1 %vm10154_vm2, %v10153_v1  ;;  %v6052_v55 = vld [vmem:[#allocation5 + $0x28] sm:$0xff] }
 0x386   : > { %v4093_v26 = vadd.f32 1.0, %v9988_v49  ;;  %v5796_v32 = vpop.f32.mrf.mxu0  ;;  %5360 = vst.msk [vmem:[#allocation5 + $0x38] sm:$0xff] %vm5352_vm4, %v5117_v30  ;;  %9477 = vmatprep.mubr.msk.bf16.mxu0 %vm10154_vm2, %v10153_v1 }
 0x387   : > { %v4525_v40 = vshrl.u32 %v8627_v25, 16  ;;  %v6115_v52 = vadd.f32 %v6050_v14, %v5796_v32  ;;  %v9254_v44 = vpop.f32.mrf.mxu1  ;;  %v4528_v59 = vshll.u32 %v8627_v25, 16 }
 0x388   : > { %9993 = vrcp.f32 %v4093_v26  ;;  %v9380_v41 = vpop.f32.mrf.mxu0  ;;  %v9990_v43 = vpop.eup %9989  ;;  %v4720_v44 = vld [vmem:[#allocation3 + $0x108] sm:$0x1] }
 0x389   : > { %v4527_v42 = vrot.slane %v4525_v40, 7  ;;  %6180 = vst.msk [vmem:[#allocation5 + $0x18] sm:$0xff] %vm5352_vm4, %v6115_v52  ;;  %v4187_v3 = vmul.f32 %v9990_v43, %v11722_v48  ;;  %v6053_v2 = vld [vmem:[#allocation5 + $0x30] sm:$0xff] }
 0x38a   : > { %v9822_v34 = vld [vmem:[#allocation3 + $0xe0] sm:$0xff]   ;;  %v9824_v4 = vld [vmem:[#allocation3 + $0xe8] sm:$0xff]  }
 0x38b   : > { %v4530_v46 = vor.u32 %v4528_v59, %v4527_v42  ;;  %v5122_v11 = vpop.f32.mrf.mxu1  ;;  %v9823_v15 = vld [vmem:[#allocation3 + $0xe0] sm:$0xff]   ;;  %v8628_v47 = vpack.c.bf16 %v4187_v3, %v4187_v3  ;;  %v4531_v51 = vrot.slane %v4527_v42, 4  ;;  %v9825_v12 = vld [vmem:[#allocation3 + $0xe8] sm:$0xff]  }
 0x38c   : > { %5361 = vst.msk [vmem:[#allocation5 + $0x40] sm:$0xff] %vm5352_vm4, %v5122_v11  ;;  %v5801_v13 = vpop.f32.mrf.mxu0  ;;  %9352 = vmatmul.mubr.msk.bf16.gmra.mxu1 %vm4952_vm14, %v9822_v34 }
 0x38d   : > { %v4710_v45 = vsel %vm11296_vm15, %v4530_v46, %v4709_v63  ;;  %v6116_v54 = vadd.f32 %v6051_v0, %v5801_v13  ;;  %v9257_v35 = vpop.f32.mrf.mxu1  ;;  %v4533_v50 = vshrl.u32 %v8628_v47, 16  ;;  %9478 = vmatmul.mubr.msk.bf16.gmra.mxu0 %vm4952_vm14, %v9823_v15  ;;  %9355 = vmatprep.mubr.msk.bf16.mxu1 %vm10154_vm2, %v10153_v1  ;;  %v4536_v53 = vshll.u32 %v8628_v47, 16  ;;  %v6054_v28 = vld [vmem:[#allocation5 + $0x38] sm:$0xff] }
 0x38e   : > { %4711 = vst [vmem:[#allocation3 + $0xf0] sm:$0xf] %v4710_v45  ;;  %v9383_v31 = vpop.f32.mrf.mxu0  ;;  %9481 = vmatprep.mubr.msk.bf16.mxu0 %vm10154_vm2, %v10153_v1 }
 0x38f   : > { %6181 = vst.msk [vmem:[#allocation5 + $0x20] sm:$0xff] %vm5352_vm4, %v6116_v54  ;;  %v5125_v48 = vpop.f32.mrf.mxu1  ;;  %v4535_v27 = vrot.slane %v4533_v50, 7 }
 0x390   : > { %5362 = vst.msk [vmem:[#allocation5 + $0x48] sm:$0xff] %vm5352_vm4, %v5125_v48  ;;  %v5804_v22 = vpop.f32.mrf.mxu0 }
 0x391   : > { %v9992_v6 = vpop.eup %9991  ;;  %v6117_v58 = vadd.f32 %v6052_v55, %v5804_v22  ;;  %v9258_v62 = vpop.f32.mrf.mxu1  ;;  %v4538_v20 = vor.u32 %v4536_v53, %v4535_v27  ;;  %v4540_v5 = vrot.slane %v4535_v27, 4 }
 0x392   : > { %v4188_v57 = vmul.f32 %v9992_v6, %v11736_v21  ;;  %v9384_v24 = vpop.f32.mrf.mxu0 }
 0x393   : > { %6182 = vst.msk [vmem:[#allocation5 + $0x28] sm:$0xff] %vm5352_vm4, %v6117_v58  ;;  %v5130_v61 = vpop.f32.mrf.mxu1  ;;  %v4539_v8 = vsel %vm10425_vm10, %v4531_v51, %v4538_v20  ;;  %v4714_v9 = vsel %vm11308_vm1, %v4540_v5, %v4713_v56  ;;  %v6055_v11 = vld [vmem:[#allocation5 + $0x40] sm:$0xff] }
 0x394   : > { %v8629_v60 = vpack.c.bf16 %v4188_v57, %v4188_v57  ;;  %5363 = vst.msk [vmem:[#allocation5 + $0x50] sm:$0xff] %vm5352_vm4, %v5130_v61  ;;  %v5809_v21 = vpop.f32.mrf.mxu0  ;;  %4715 = vst [vmem:[#allocation3 + $0xf8] sm:$0x1] %v4714_v9  ;;  %9356 = vmatmul.mubr.msk.bf16.gmra.mxu1 %vm4952_vm14, %v9824_v4 }
 0x395   : > { %v9994_v7 = vpop.eup %9993  ;;  %4712 = vst.msk [vmem:[#allocation3 + $0xf4] sm:$0xf] %vm484_vm13, %v4539_v8  ;;  %v6118_v18 = vadd.f32 %v6053_v2, %v5809_v21  ;;  %v9261_v16 = vpop.f32.mrf.mxu1  ;;  %9482 = vmatmul.mubr.msk.bf16.gmra.mxu0 %vm4952_vm14, %v9825_v12  ;;  %9359 = vmatprep.mubr.msk.bf16.mxu1 %vm10154_vm2, %v10153_v1 }
 0x396   : > { %v4542_v10 = vshrl.u32 %v8629_v60, 16  ;;  %v4189_v39 = vmul.f32 %v9994_v7, %v11751_v38  ;;  %v9387_v17 = vpop.f32.mrf.mxu0  ;;  %v4545_v23 = vshll.u32 %v8629_v60, 16  ;;  %9485 = vmatprep.mubr.msk.bf16.mxu0 %vm10154_vm2, %v10153_v1 }
 0x397   : > { %6183 = vst.msk [vmem:[#allocation5 + $0x30] sm:$0xff] %vm5352_vm4, %v6118_v18  ;;  %v5133_v25 = vpop.f32.mrf.mxu1  ;;  %v6056_v29 = vld [vmem:[#allocation5 + $0x48] sm:$0xff] }
 0x398   : > { %v4544_v19 = vrot.slane %v4542_v10, 7  ;;  %v8630_v49 = vpack.c.bf16 %v4189_v39, %v4189_v39  ;;  %5364 = vst.msk [vmem:[#allocation5 + $0x58] sm:$0xff] %vm5352_vm4, %v5133_v25  ;;  %v5812_v38 = vpop.f32.mrf.mxu0 }
 0x399   : > { %v9262_v30 = vpop.f32.mrf.mxu1  ;;  %v6119_v32 = vadd.f32 %v6054_v28, %v5812_v38 }
 0x39a   : > { %v4547_v14 = vor.u32 %v4545_v23, %v4544_v19  ;;  %v4550_v26 = vshrl.u32 %v8630_v49, 16  ;;  %v9388_v40 = vpop.f32.mrf.mxu0  ;;  %v4553_v42 = vshll.u32 %v8630_v49, 16  ;;  %v4548_v63 = vrot.slane %v4544_v19, 4  ;;  %v9833_v23 = vld [vmem:[#allocation3 + $0x20] sm:$0xff]  }
 0x39b   : > { %6184 = vst.msk [vmem:[#allocation5 + $0x38] sm:$0xff] %vm5352_vm4, %v6119_v32  ;;  %v5138_v59 = vpop.f32.mrf.mxu1  ;;  %v9828_v6 = vld [vmem:[#allocation3 + $0xf8] sm:$0xff]   ;;  %v6057_v53 = vld [vmem:[#allocation5 + $0x50] sm:$0xff] }
 0x39c   : > { %v4717_v52 = vsel %vm11296_vm15, %v4547_v14, %v4716_v37  ;;  %v4552_v41 = vrot.slane %v4550_v26, 7  ;;  %v9826_v43 = vld [vmem:[#allocation3 + $0xf0] sm:$0xff]   ;;  %5365 = vst.msk [vmem:[#allocation5 + $0x60] sm:$0xff] %vm5352_vm4, %v5138_v59  ;;  %v5817_v34 = vpop.f32.mrf.mxu0  ;;  %v9829_v22 = vld [vmem:[#allocation3 + $0xf8] sm:$0xff]   ;;  %v9835_v59 = vld [vmem:[#allocation3 + $0x28] sm:$0xff]  }
 0x39d   : > { %4718 = vst [vmem:[#allocation3 + $0x100] sm:$0xf] %v4717_v52  ;;  %v9827_v15 = vld [vmem:[#allocation3 + $0xf0] sm:$0xff]   ;;  %9360 = vmatmul.mubr.msk.bf16.gmra.mxu1 %vm4952_vm14, %v9826_v43  ;;  %v6120_v33 = vadd.f32 %v6055_v11, %v5817_v34  ;;  %v9265_v45 = vpop.f32.mrf.mxu1 }
 0x39e   : > { %v4555_v46 = vor.u32 %v4553_v42, %v4552_v41  ;;  %v4557_v3 = vrot.slane %v4552_v41, 4  ;;  %9486 = vmatmul.mubr.msk.bf16.gmra.mxu0 %vm4952_vm14, %v9827_v15  ;;  %v9391_v0 = vpop.f32.mrf.mxu0  ;;  %9363 = vmatprep.mubr.msk.bf16.mxu1 %vm10154_vm2, %v10153_v1  ;;  %v9834_v41 = vld [vmem:[#allocation3 + $0x110] ss:$0 sps:$4 sm:$0xff]  }
 0x39f   : > { %6185 = vst.msk [vmem:[#allocation5 + $0x40] sm:$0xff] %vm5352_vm4, %v6120_v33  ;;  %v5141_v54 = vpop.f32.mrf.mxu1  ;;  %9489 = vmatprep.mubr.msk.bf16.mxu0 %vm10154_vm2, %v10153_v1  ;;  %v6058_v51 = vld [vmem:[#allocation5 + $0x58] sm:$0xff] }
 0x3a0   : > { %v4556_v47 = vsel %vm10425_vm10, %v4548_v63, %v4555_v46  ;;  %v4721_v13 = vsel %vm11308_vm1, %v4557_v3, %v4720_v44  ;;  %5366 = vst.msk [vmem:[#allocation5 + $0x68] sm:$0xff] %vm5352_vm4, %v5141_v54  ;;  %v5820_v36 = vpop.f32.mrf.mxu0  ;;  %v9836_v54 = vld [vmem:[#allocation3 + $0x30] sm:$0xff]  }
 0x3a1   : > { %4719 = vst.msk [vmem:[#allocation3 + $0x104] sm:$0xf] %vm484_vm13, %v4556_v47  ;;  %4722 = vst [vmem:[#allocation3 + $0x108] sm:$0x1] %v4721_v13  ;;  %v6121_v35 = vadd.f32 %v6056_v29, %v5820_v36  ;;  %v9266_v50 = vpop.f32.mrf.mxu1 }
 0x3a2   : > { %v9392_v31 = vpop.f32.mrf.mxu0 }
 0x3a3   : > { %6186 = vst.msk [vmem:[#allocation5 + $0x48] sm:$0xff] %vm5352_vm4, %v6121_v35  ;;  %v5146_v48 = vpop.f32.mrf.mxu1  ;;  %v6059_v2 = vld [vmem:[#allocation5 + $0x60] sm:$0xff] }
 0x3a4   : > { %5367 = vst.msk [vmem:[#allocation5 + $0x70] sm:$0xff] %vm5352_vm4, %v5146_v48  ;;  %v5825_v27 = vpop.f32.mrf.mxu0  ;;  %v9830_v61 = vld [vmem:[#allocation3 + $0x100] ss:$0 sps:$4 sm:$0xff]  }
 0x3a5   : > { %9364 = vmatmul.mubr.msk.bf16.gmra.mxu1 %vm4952_vm14, %v9828_v6  ;;  %v6122_v55 = vadd.f32 %v6057_v53, %v5825_v27  ;;  %v9269_v56 = vpop.f32.mrf.mxu1 }
 0x3a6   : > { %9490 = vmatmul.mubr.msk.bf16.gmra.mxu0 %vm4952_vm14, %v9829_v22  ;;  %v9395_v57 = vpop.f32.mrf.mxu0  ;;  %9367 = vmatprep.mubr.msk.bf16.mxu1 %vm10154_vm2, %v10153_v1  ;;  %v9837_v56 = vld [vmem:[#allocation3 + $0x38] sm:$0xff]  }
 0x3a7   : > { %6187 = vst.msk [vmem:[#allocation5 + $0x50] sm:$0xff] %vm5352_vm4, %v6122_v55  ;;  %v5149_v58 = vpop.f32.mrf.mxu1  ;;  %9493 = vmatprep.mubr.msk.bf16.mxu0 %vm10154_vm2, %v10153_v1  ;;  %v6060_v18 = vld [vmem:[#allocation5 + $0x68] sm:$0xff] }
 0x3a8   : > { %5368 = vst.msk [vmem:[#allocation5 + $0x78] sm:$0xff] %vm5352_vm4, %v5149_v58  ;;  %v5828_v62 = vpop.f32.mrf.mxu0  ;;  %v9831_v7 = vld [vmem:[#allocation3 + $0x100] sm:$0xff]   ;;  %v9832_v37 = vld [vmem:[#allocation3 + $0x108] sm:$0xff]  }
 0x3a9   : > { %v6123_v20 = vadd.f32 %v6058_v51, %v5828_v62  ;;  %v9270_v5 = vpop.f32.mrf.mxu1 }
 0x3aa   : > { %v9396_v24 = vpop.f32.mrf.mxu0 }
 0x3ab   : > { %6188 = vst.msk [vmem:[#allocation5 + $0x58] sm:$0xff] %vm5352_vm4, %v6123_v20  ;;  %v5154_v60 = vpop.f32.mrf.mxu1  ;;  %v6061_v25 = vld [vmem:[#allocation5 + $0x70] sm:$0xff] }
 0x3ac   : > { %5369 = vst.msk [vmem:[#allocation5 + $0x80] sm:$0xff] %vm5352_vm4, %v5154_v60  ;;  %v5833_v4 = vpop.f32.mrf.mxu0 }
 0x3ad   : > { %9368 = vmatmul.mubr.msk.bf16.gmra.mxu1 %vm4952_vm14, %v9830_v61  ;;  %v6124_v8 = vadd.f32 %v6059_v2, %v5833_v4  ;;  %v9273_v9 = vpop.f32.mrf.mxu1 }
 0x3ae   : > { %9494 = vmatmul.mubr.msk.bf16.gmra.mxu0 %vm4952_vm14, %v9831_v7  ;;  %v9399_v21 = vpop.f32.mrf.mxu0  ;;  %9507 = vmatprep.mubr.msk.bf16.mxu1 %vm10154_vm2, %v10153_v1  ;;  %v9838_v7 = vld [vmem:[#allocation3 + $0x40] sm:$0xff]  }
 0x3af   : > { %6189 = vst.msk [vmem:[#allocation5 + $0x60] sm:$0xff] %vm5352_vm4, %v6124_v8  ;;  %v5157_v10 = vpop.f32.mrf.mxu1  ;;  %9497 = vmatprep.mubr.msk.bf16.mxu0 %vm10154_vm2, %v10153_v1  ;;  %v6062_v32 = vld [vmem:[#allocation5 + $0x78] sm:$0xff] }
 0x3b0   : > { %5370 = vst.msk [vmem:[#allocation5 + $0x88] sm:$0xff] %vm5352_vm4, %v5157_v10  ;;  %v5836_v39 = vpop.f32.mrf.mxu0 }
 0x3b1   : > { %v6125_v12 = vadd.f32 %v6060_v18, %v5836_v39  ;;  %v9274_v16 = vpop.f32.mrf.mxu1 }
 0x3b2   : > { %v9400_v17 = vpop.f32.mrf.mxu0 }
 0x3b3   : > { %6190 = vst.msk [vmem:[#allocation5 + $0x68] sm:$0xff] %vm5352_vm4, %v6125_v12  ;;  %v5162_v19 = vpop.f32.mrf.mxu1  ;;  %v6063_v63 = vld [vmem:[#allocation5 + $0x80] sm:$0xff] }
 0x3b4   : > { %5371 = vst.msk [vmem:[#allocation5 + $0x90] sm:$0xff] %vm5352_vm4, %v5162_v19  ;;  %v5841_v49 = vpop.f32.mrf.mxu0 }
 0x3b5   : > { %v6126_v38 = vadd.f32 %v6061_v25, %v5841_v49  ;;  %9508 = vmatmul.mubr.msk.bf16.vlgmr.msra.gmra.mxu1 %vm4952_vm14, %v9833_v23  ;;  %v9277_v14 = vpop.f32.mrf.mxu1  ;;  %v9839_v25 = vld [vmem:[#allocation3 + $0x48] sm:$0xff]  }
 0x3b6   : > { %9498 = vmatmul.mubr.msk.bf16.gmra.mxu0 %vm4952_vm14, %v9832_v37  ;;  %v9403_v26 = vpop.f32.mrf.mxu0  ;;  %9511 = vmatprep.mubr.msk.bf16.mxu1 %vm10154_vm2, %v10153_v1 }
 0x3b7   : > { %6191 = vst.msk [vmem:[#allocation5 + $0x70] sm:$0xff] %vm5352_vm4, %v6126_v38  ;;  %v5165_v28 = vpop.f32.mrf.mxu1  ;;  %9501 = vmatprep.mubr.msk.bf16.mxu0 %vm10154_vm2, %v10153_v1  ;;  %v6064_v33 = vld [vmem:[#allocation5 + $0x88] sm:$0xff] }
 0x3b8   : > { %5372 = vst.msk [vmem:[#allocation5 + $0x98] sm:$0xff] %vm5352_vm4, %v5165_v28  ;;  %v5844_v30 = vpop.f32.mrf.mxu0 }
 0x3b9   : > { %v6127_v40 = vadd.f32 %v6062_v32, %v5844_v30  ;;  %v9278_v52 = vpop.f32.mrf.mxu1 }
 0x3ba   : > { %v9404_v44 = vpop.f32.mrf.mxu0 }
 0x3bb   : > { %6192 = vst.msk [vmem:[#allocation5 + $0x78] sm:$0xff] %vm5352_vm4, %v6127_v40  ;;  %v5170_v42 = vpop.f32.mrf.mxu1  ;;  %v6065_v29 = vld [vmem:[#allocation5 + $0x90] sm:$0xff] }
 0x3bc   : > { %5373 = vst.msk [vmem:[#allocation5 + $0xa0] sm:$0xff] %vm5352_vm4, %v5170_v42  ;;  %v5849_v43 = vpop.f32.mrf.mxu0 }
 0x3bd   : > { %v6128_v46 = vadd.f32 %v6063_v63, %v5849_v43  ;;  %9512 = vmatmul.mubr.msk.bf16.gmra.mxu1 %vm4952_vm14, %v9835_v59  ;;  %v9281_v3 = vpop.f32.mrf.mxu1  ;;  %v9840_v59 = vld [vmem:[#allocation3 + $0x50] sm:$0xff]  }
 0x3be   : > { %9502 = vmatmul.mubr.msk.bf16.gmra.mxu0 %vm4952_vm14, %v9834_v41  ;;  %v9407_v34 = vpop.f32.mrf.mxu0  ;;  %9515 = vmatprep.mubr.msk.bf16.mxu1 %vm10154_vm2, %v10153_v1 }
 0x3bf   : > { %6193 = vst.msk [vmem:[#allocation5 + $0x80] sm:$0xff] %vm5352_vm4, %v6128_v46  ;;  %v5173_v11 = vpop.f32.mrf.mxu1  ;;  %v6066_v27 = vld [vmem:[#allocation5 + $0x98] sm:$0xff] }
 0x3c0   : > { %5374 = vst.msk [vmem:[#allocation5 + $0xa8] sm:$0xff] %vm5352_vm4, %v5173_v11  ;;  %v5852_v15 = vpop.f32.mrf.mxu0 }
 0x3c1   : > { %v6129_v45 = vadd.f32 %v6064_v33, %v5852_v15  ;;  %v9282_v47 = vpop.f32.mrf.mxu1 }
 0x3c2   : > { %v9408_v13 = vpop.f32.mrf.mxu0 }
 0x3c3   : > { %6194 = vst.msk [vmem:[#allocation5 + $0x88] sm:$0xff] %vm5352_vm4, %v6129_v45  ;;  %v5178_v0 = vpop.f32.mrf.mxu1  ;;  %v6067_v62 = vld [vmem:[#allocation5 + $0xa0] sm:$0xff] }
 0x3c4   : > { %5375 = vst.msk [vmem:[#allocation5 + $0xb0] sm:$0xff] %vm5352_vm4, %v5178_v0  ;;  %v5857_v36 = vpop.f32.mrf.mxu0 }
 0x3c5   : > { %v6130_v35 = vadd.f32 %v6065_v29, %v5857_v36  ;;  %9516 = vmatmul.mubr.msk.bf16.gmra.mxu1 %vm4952_vm14, %v9836_v54  ;;  %v9285_v50 = vpop.f32.mrf.mxu1  ;;  %v9841_v54 = vld [vmem:[#allocation3 + $0x58] sm:$0xff]  }
 0x3c6   : > { %v9411_v31 = vpop.f32.mrf.mxu0  ;;  %9519 = vmatprep.mubr.msk.bf16.mxu1 %vm10154_vm2, %v10153_v1 }
 0x3c7   : > { %6195 = vst.msk [vmem:[#allocation5 + $0x90] sm:$0xff] %vm5352_vm4, %v6130_v35  ;;  %v5181_v48 = vpop.f32.mrf.mxu1  ;;  %v6068_v61 = vld [vmem:[#allocation5 + $0xa8] sm:$0xff] }
 0x3c8   : > { %5376 = vst.msk [vmem:[#allocation5 + $0xb8] sm:$0xff] %vm5352_vm4, %v5181_v48  ;;  %v5860_v6 = vpop.f32.mrf.mxu0 }
 0x3c9   : > { %v6131_v53 = vadd.f32 %v6066_v27, %v5860_v6  ;;  %v9286_v22 = vpop.f32.mrf.mxu1 }
 0x3ca   : > { %v9412_v55 = vpop.f32.mrf.mxu0 }
 0x3cb   : > { %6196 = vst.msk [vmem:[#allocation5 + $0x98] sm:$0xff] %vm5352_vm4, %v6131_v53  ;;  %v6069_v10 = vld [vmem:[#allocation5 + $0xb0] sm:$0xff] }
 0x3cc   : > { %v5186_v57 = vpop.f32.mrf.mxu1 }
 0x3cd   : > { %9520 = vmatmul.mubr.msk.bf16.gmra.mxu1 %vm4952_vm14, %v9837_v56  ;;  %5377 = vst.msk [vmem:[#allocation5 + $0xc0] sm:$0xff] %vm5352_vm4, %v5186_v57  ;;  %v5865_v58 = vpop.f32.mrf.mxu0  ;;  %v9842_v57 = vld [vmem:[#allocation3 + $0x60] sm:$0xff]  }
 0x3ce   : > { %9523 = vmatprep.mubr.msk.bf16.mxu1 %vm10154_vm2, %v10153_v1  ;;  %v6132_v51 = vadd.f32 %v6067_v62, %v5865_v58  ;;  %v9289_v20 = vpop.f32.mrf.mxu1 }
 0x3cf   : > { %v9415_v5 = vpop.f32.mrf.mxu0  ;;  %v6070_v19 = vld [vmem:[#allocation5 + $0xb8] sm:$0xff] }
 0x3d0   : > { %6197 = vst.msk [vmem:[#allocation5 + $0xa0] sm:$0xff] %vm5352_vm4, %v6132_v51  ;;  %v5189_v24 = vpop.f32.mrf.mxu1 }
 0x3d1   : > { %5378 = vst.msk [vmem:[#allocation5 + $0xc8] sm:$0xff] %vm5352_vm4, %v5189_v24  ;;  %v5868_v60 = vpop.f32.mrf.mxu0 }
 0x3d2   : > { %v6133_v4 = vadd.f32 %v6068_v61, %v5868_v60  ;;  %v9290_v2 = vpop.f32.mrf.mxu1 }
 0x3d3   : > { %v9416_v8 = vpop.f32.mrf.mxu0 }
 0x3d4   : > { %6198 = vst.msk [vmem:[#allocation5 + $0xa8] sm:$0xff] %vm5352_vm4, %v6133_v4  ;;  %v5194_v9 = vpop.f32.mrf.mxu1  ;;  %v6071_v26 = vld [vmem:[#allocation5 + $0xc0] sm:$0xff] }
 0x3d5   : > { %9524 = vmatmul.mubr.msk.bf16.gmra.mxu1 %vm4952_vm14, %v9838_v7  ;;  %5379 = vst.msk [vmem:[#allocation5 + $0xd0] sm:$0xff] %vm5352_vm4, %v5194_v9  ;;  %v5873_v21 = vpop.f32.mrf.mxu0  ;;  %v9843_v9 = vld [vmem:[#allocation3 + $0x68] sm:$0xff]  }
 0x3d6   : > { %9527 = vmatprep.mubr.msk.bf16.mxu1 %vm10154_vm2, %v10153_v1  ;;  %v6134_v39 = vadd.f32 %v6069_v10, %v5873_v21  ;;  %v9293_v18 = vpop.f32.mrf.mxu1 }
 0x3d7   : > { %v9419_v12 = vpop.f32.mrf.mxu0 }
 0x3d8   : > { %6199 = vst.msk [vmem:[#allocation5 + $0xb0] sm:$0xff] %vm5352_vm4, %v6134_v39  ;;  %v5197_v16 = vpop.f32.mrf.mxu1  ;;  %v6072_v44 = vld [vmem:[#allocation5 + $0xc8] sm:$0xff] }
 0x3d9   : > { %5380 = vst.msk [vmem:[#allocation5 + $0xd8] sm:$0xff] %vm5352_vm4, %v5197_v16  ;;  %v5876_v17 = vpop.f32.mrf.mxu0 }
 0x3da   : > { %v6135_v23 = vadd.f32 %v6070_v19, %v5876_v17  ;;  %v9294_v49 = vpop.f32.mrf.mxu1 }
 0x3db   : > { %v9420_v37 = vpop.f32.mrf.mxu0 }
 0x3dc   : > { %6200 = vst.msk [vmem:[#allocation5 + $0xb8] sm:$0xff] %vm5352_vm4, %v6135_v23  ;;  %v5202_v38 = vpop.f32.mrf.mxu1  ;;  %v6073_v3 = vld [vmem:[#allocation5 + $0xd0] sm:$0xff] }
 0x3dd   : > { %9528 = vmatmul.mubr.msk.bf16.gmra.mxu1 %vm4952_vm14, %v9839_v25  ;;  %5381 = vst.msk [vmem:[#allocation5 + $0xe0] sm:$0xff] %vm5352_vm4, %v5202_v38  ;;  %v5881_v14 = vpop.f32.mrf.mxu0  ;;  %v9844_v38 = vld [vmem:[#allocation3 + $0x70] sm:$0xff]  }
 0x3de   : > { %9531 = vmatprep.mubr.msk.bf16.mxu1 %vm10154_vm2, %v10153_v1  ;;  %v6136_v28 = vadd.f32 %v6071_v26, %v5881_v14  ;;  %v9297_v30 = vpop.f32.mrf.mxu1 }
 0x3df   : > { %v9423_v32 = vpop.f32.mrf.mxu0 }
 0x3e0   : > { %6201 = vst.msk [vmem:[#allocation5 + $0xc0] sm:$0xff] %vm5352_vm4, %v6136_v28  ;;  %v5205_v40 = vpop.f32.mrf.mxu1  ;;  %v6074_v47 = vld [vmem:[#allocation5 + $0xd8] sm:$0xff] }
 0x3e1   : > { %5382 = vst.msk [vmem:[#allocation5 + $0xe8] sm:$0xff] %vm5352_vm4, %v5205_v40  ;;  %v5884_v52 = vpop.f32.mrf.mxu0 }
 0x3e2   : > { %v6137_v41 = vadd.f32 %v6072_v44, %v5884_v52  ;;  %v9298_v42 = vpop.f32.mrf.mxu1 }
 0x3e3   : > { %v9424_v43 = vpop.f32.mrf.mxu0 }
 0x3e4   : > { %6202 = vst.msk [vmem:[#allocation5 + $0xc8] sm:$0xff] %vm5352_vm4, %v6137_v41  ;;  %v5210_v63 = vpop.f32.mrf.mxu1  ;;  %v6075_v50 = vld [vmem:[#allocation5 + $0xe0] sm:$0xff] }
 0x3e5   : > { %9532 = vmatmul.mubr.msk.bf16.gmra.mxu1 %vm4952_vm14, %v9840_v59  ;;  %5383 = vst.msk [vmem:[#allocation5 + $0xf0] sm:$0xff] %vm5352_vm4, %v5210_v63  ;;  %v5889_v46 = vpop.f32.mrf.mxu0  ;;  %v9845_v63 = vld [vmem:[#allocation3 + $0x78] sm:$0xff]  }
 0x3e6   : > { %9535 = vmatprep.mubr.msk.bf16.mxu1 %vm10154_vm2, %v10153_v1  ;;  %v6138_v34 = vadd.f32 %v6073_v3, %v5889_v46  ;;  %v9301_v11 = vpop.f32.mrf.mxu1 }
 0x3e7   : > { %v9427_v15 = vpop.f32.mrf.mxu0 }
 0x3e8   : > { %6203 = vst.msk [vmem:[#allocation5 + $0xd0] sm:$0xff] %vm5352_vm4, %v6138_v34  ;;  %v5213_v33 = vpop.f32.mrf.mxu1  ;;  %v6076_v22 = vld [vmem:[#allocation5 + $0xe8] sm:$0xff] }
 0x3e9   : > { %5384 = vst.msk [vmem:[#allocation5 + $0xf8] sm:$0xff] %vm5352_vm4, %v5213_v33  ;;  %v5892_v45 = vpop.f32.mrf.mxu0 }
 0x3ea   : > { %v6139_v13 = vadd.f32 %v6074_v47, %v5892_v45  ;;  %v9302_v0 = vpop.f32.mrf.mxu1 }
 0x3eb   : > { %v9428_v36 = vpop.f32.mrf.mxu0 }
 0x3ec   : > { %6204 = vst.msk [vmem:[#allocation5 + $0xd8] sm:$0xff] %vm5352_vm4, %v6139_v13  ;;  %v5218_v29 = vpop.f32.mrf.mxu1  ;;  %v6077_v20 = vld [vmem:[#allocation5 + $0xf0] sm:$0xff] }
 0x3ed   : > { %9536 = vmatmul.mubr.msk.bf16.gmra.mxu1 %vm4952_vm14, %v9841_v54  ;;  %5385 = vst.msk [vmem:[#allocation5 + $0x100] sm:$0xff] %vm5352_vm4, %v5218_v29  ;;  %v5897_v35 = vpop.f32.mrf.mxu0  ;;  %v9846_v29 = vld [vmem:[#allocation3 + $0x80] sm:$0xff]  }
 0x3ee   : > { %9539 = vmatprep.mubr.msk.bf16.mxu1 %vm10154_vm2, %v10153_v1  ;;  %v6140_v31 = vadd.f32 %v6075_v50, %v5897_v35  ;;  %v9305_v48 = vpop.f32.mrf.mxu1 }
 0x3ef   : > { %v9431_v6 = vpop.f32.mrf.mxu0 }
 0x3f0   : > { %6205 = vst.msk [vmem:[#allocation5 + $0xe0] sm:$0xff] %vm5352_vm4, %v6140_v31  ;;  %v5221_v27 = vpop.f32.mrf.mxu1  ;;  %v6078_v2 = vld [vmem:[#allocation5 + $0xf8] sm:$0xff] }
 0x3f1   : > { %5386 = vst.msk [vmem:[#allocation5 + $0x108] sm:$0xff] %vm5352_vm4, %v5221_v27  ;;  %v5900_v53 = vpop.f32.mrf.mxu0 }
 0x3f2   : > { %v6141_v55 = vadd.f32 %v6076_v22, %v5900_v53  ;;  %v9306_v56 = vpop.f32.mrf.mxu1 }
 0x3f3   : > { %v9432_v58 = vpop.f32.mrf.mxu0 }
 0x3f4   : > { %6206 = vst.msk [vmem:[#allocation5 + $0xe8] sm:$0xff] %vm5352_vm4, %v6141_v55  ;;  %v5226_v62 = vpop.f32.mrf.mxu1  ;;  %v6079_v18 = vld [vmem:[#allocation5 + $0x100] sm:$0xff] }
 0x3f5   : > { %9540 = vmatmul.mubr.msk.bf16.gmra.mxu1 %vm4952_vm14, %v9842_v57  ;;  %5387 = vst.msk [vmem:[#allocation5 + $0x110] sm:$0xff] %vm5352_vm4, %v5226_v62  ;;  %v5905_v51 = vpop.f32.mrf.mxu0  ;;  %v9847_v62 = vld [vmem:[#allocation3 + $0x88] sm:$0xff]  }
 0x3f6   : > { %9543 = vmatprep.mubr.msk.bf16.mxu1 %vm10154_vm2, %v10153_v1  ;;  %v6142_v5 = vadd.f32 %v6077_v20, %v5905_v51  ;;  %v9309_v24 = vpop.f32.mrf.mxu1 }
 0x3f7   : > { %v9435_v60 = vpop.f32.mrf.mxu0 }
 0x3f8   : > { %6207 = vst.msk [vmem:[#allocation5 + $0xf0] sm:$0xff] %vm5352_vm4, %v6142_v5  ;;  %v5229_v61 = vpop.f32.mrf.mxu1  ;;  %v6080_v49 = vld [vmem:[#allocation5 + $0x108] sm:$0xff] }
 0x3f9   : > { %5388 = vst.msk [vmem:[#allocation5 + $0x118] sm:$0xff] %vm5352_vm4, %v5229_v61  ;;  %v5908_v4 = vpop.f32.mrf.mxu0 }
 0x3fa   : > { %v6143_v7 = vadd.f32 %v6078_v2, %v5908_v4  ;;  %v9310_v8 = vpop.f32.mrf.mxu1 }
 0x3fb   : > { %v9436_v21 = vpop.f32.mrf.mxu0 }
 0x3fc   : > { %6208 = vst.msk [vmem:[#allocation5 + $0xf8] sm:$0xff] %vm5352_vm4, %v6143_v7  ;;  %v5234_v10 = vpop.f32.mrf.mxu1  ;;  %v6081_v30 = vld [vmem:[#allocation5 + $0x110] sm:$0xff] }
 0x3fd   : > { %9544 = vmatmul.mubr.msk.bf16.gmra.mxu1 %vm4952_vm14, %v9843_v9  ;;  %5389 = vst.msk [vmem:[#allocation5 + $0x120] sm:$0xff] %vm5352_vm4, %v5234_v10  ;;  %v5913_v39 = vpop.f32.mrf.mxu0  ;;  %v9848_v10 = vld [vmem:[#allocation3 + $0x90] sm:$0xff]  }
 0x3fe   : > { %9547 = vmatprep.mubr.msk.bf16.mxu1 %vm10154_vm2, %v10153_v1  ;;  %v6144_v12 = vadd.f32 %v6079_v18, %v5913_v39  ;;  %v9313_v16 = vpop.f32.mrf.mxu1 }
 0x3ff   : > { %v9439_v17 = vpop.f32.mrf.mxu0 }
 0x400   : > { %6209 = vst.msk [vmem:[#allocation5 + $0x100] sm:$0xff] %vm5352_vm4, %v6144_v12  ;;  %v5237_v19 = vpop.f32.mrf.mxu1  ;;  %v6082_v42 = vld [vmem:[#allocation5 + $0x118] sm:$0xff] }
 0x401   : > { %5390 = vst.msk [vmem:[#allocation5 + $0x128] sm:$0xff] %vm5352_vm4, %v5237_v19  ;;  %v5916_v23 = vpop.f32.mrf.mxu0 }
 0x402   : > { %v6145_v25 = vadd.f32 %v6080_v49, %v5916_v23  ;;  %v9314_v37 = vpop.f32.mrf.mxu1 }
 0x403   : > { %v9440_v14 = vpop.f32.mrf.mxu0 }
 0x404   : > { %6210 = vst.msk [vmem:[#allocation5 + $0x108] sm:$0xff] %vm5352_vm4, %v6145_v25  ;;  %v5242_v26 = vpop.f32.mrf.mxu1  ;;  %v6083_v11 = vld [vmem:[#allocation5 + $0x120] sm:$0xff] }
 0x405   : > { %9548 = vmatmul.mubr.msk.bf16.gmra.mxu1 %vm4952_vm14, %v9844_v38  ;;  %5391 = vst.msk [vmem:[#allocation5 + $0x130] sm:$0xff] %vm5352_vm4, %v5242_v26  ;;  %v5921_v28 = vpop.f32.mrf.mxu0  ;;  %v9849_v26 = vld [vmem:[#allocation3 + $0x98] sm:$0xff]  }
 0x406   : > { %9551 = vmatprep.mubr.msk.bf16.mxu1 %vm10154_vm2, %v10153_v1  ;;  %v6146_v32 = vadd.f32 %v6081_v30, %v5921_v28  ;;  %v9317_v40 = vpop.f32.mrf.mxu1 }
 0x407   : > { %v9443_v52 = vpop.f32.mrf.mxu0 }
 0x408   : > { %6211 = vst.msk [vmem:[#allocation5 + $0x110] sm:$0xff] %vm5352_vm4, %v6146_v32  ;;  %v5245_v44 = vpop.f32.mrf.mxu1  ;;  %v6084_v0 = vld [vmem:[#allocation5 + $0x128] sm:$0xff] }
 0x409   : > { %5392 = vst.msk [vmem:[#allocation5 + $0x138] sm:$0xff] %vm5352_vm4, %v5245_v44  ;;  %v5924_v41 = vpop.f32.mrf.mxu0 }
 0x40a   : > { %v6147_v59 = vadd.f32 %v6082_v42, %v5924_v41  ;;  %v9318_v43 = vpop.f32.mrf.mxu1 }
 0x40b   : > { %v9444_v46 = vpop.f32.mrf.mxu0 }
 0x40c   : > { %6212 = vst.msk [vmem:[#allocation5 + $0x118] sm:$0xff] %vm5352_vm4, %v6147_v59  ;;  %v5250_v3 = vpop.f32.mrf.mxu1  ;;  %v6085_v48 = vld [vmem:[#allocation5 + $0x130] sm:$0xff] }
 0x40d   : > { %9552 = vmatmul.mubr.msk.bf16.gmra.mxu1 %vm4952_vm14, %v9845_v63  ;;  %5393 = vst.msk [vmem:[#allocation5 + $0x140] sm:$0xff] %vm5352_vm4, %v5250_v3  ;;  %v5929_v34 = vpop.f32.mrf.mxu0  ;;  %v9850_v3 = vld [vmem:[#allocation3 + $0xa0] sm:$0xff]  }
 0x40e   : > { %9555 = vmatprep.mubr.msk.bf16.mxu1 %vm10154_vm2, %v10153_v1  ;;  %v6148_v15 = vadd.f32 %v6083_v11, %v5929_v34  ;;  %v9321_v33 = vpop.f32.mrf.mxu1 }
 0x40f   : > { %v9447_v45 = vpop.f32.mrf.mxu0 }
 0x410   : > { %6213 = vst.msk [vmem:[#allocation5 + $0x120] sm:$0xff] %vm5352_vm4, %v6148_v15  ;;  %v5253_v47 = vpop.f32.mrf.mxu1  ;;  %v6086_v56 = vld [vmem:[#allocation5 + $0x138] sm:$0xff] }
 0x411   : > { %5394 = vst.msk [vmem:[#allocation5 + $0x148] sm:$0xff] %vm5352_vm4, %v5253_v47  ;;  %v5932_v13 = vpop.f32.mrf.mxu0 }
 0x412   : > { %v6149_v54 = vadd.f32 %v6084_v0, %v5932_v13  ;;  %v9322_v36 = vpop.f32.mrf.mxu1 }
 0x413   : > { %v9448_v35 = vpop.f32.mrf.mxu0 }
 0x414   : > { %6214 = vst.msk [vmem:[#allocation5 + $0x128] sm:$0xff] %vm5352_vm4, %v6149_v54  ;;  %v5258_v50 = vpop.f32.mrf.mxu1  ;;  %v6087_v24 = vld [vmem:[#allocation5 + $0x140] sm:$0xff] }
 0x415   : > { %9556 = vmatmul.mubr.msk.bf16.gmra.mxu1 %vm4952_vm14, %v9846_v29  ;;  %5395 = vst.msk [vmem:[#allocation5 + $0x150] sm:$0xff] %vm5352_vm4, %v5258_v50  ;;  %v5937_v31 = vpop.f32.mrf.mxu0  ;;  %v9851_v50 = vld [vmem:[#allocation3 + $0xa8] sm:$0xff]  }
 0x416   : > { %9559 = vmatprep.mubr.msk.bf16.mxu1 %vm10154_vm2, %v10153_v1  ;;  %v6150_v6 = vadd.f32 %v6085_v48, %v5937_v31  ;;  %v9325_v27 = vpop.f32.mrf.mxu1 }
 0x417   : > { %v9451_v53 = vpop.f32.mrf.mxu0 }
 0x418   : > { %6215 = vst.msk [vmem:[#allocation5 + $0x130] sm:$0xff] %vm5352_vm4, %v6150_v6  ;;  %v5261_v22 = vpop.f32.mrf.mxu1  ;;  %v6088_v8 = vld [vmem:[#allocation5 + $0x148] sm:$0xff] }
 0x419   : > { %5396 = vst.msk [vmem:[#allocation5 + $0x158] sm:$0xff] %vm5352_vm4, %v5261_v22  ;;  %v5940_v55 = vpop.f32.mrf.mxu0 }
 0x41a   : > { %v6151_v57 = vadd.f32 %v6086_v56, %v5940_v55  ;;  %v9326_v58 = vpop.f32.mrf.mxu1 }
 0x41b   : > { %v9452_v51 = vpop.f32.mrf.mxu0 }
 0x41c   : > { %6216 = vst.msk [vmem:[#allocation5 + $0x138] sm:$0xff] %vm5352_vm4, %v6151_v57  ;;  %v5266_v20 = vpop.f32.mrf.mxu1  ;;  %v6089_v16 = vld [vmem:[#allocation5 + $0x150] sm:$0xff] }
 0x41d   : > { %9560 = vmatmul.mubr.msk.bf16.gmra.mxu1 %vm4952_vm14, %v9847_v62  ;;  %5397 = vst.msk [vmem:[#allocation5 + $0x160] sm:$0xff] %vm5352_vm4, %v5266_v20  ;;  %v5945_v5 = vpop.f32.mrf.mxu0  ;;  %v9852_v20 = vld [vmem:[#allocation3 + $0xb0] sm:$0xff]  }
 0x41e   : > { %9563 = vmatprep.mubr.msk.bf16.mxu1 %vm10154_vm2, %v10153_v1  ;;  %v6152_v60 = vadd.f32 %v6087_v24, %v5945_v5  ;;  %v9329_v61 = vpop.f32.mrf.mxu1 }
 0x41f   : > { %v9455_v4 = vpop.f32.mrf.mxu0 }
 0x420   : > { %6217 = vst.msk [vmem:[#allocation5 + $0x140] sm:$0xff] %vm5352_vm4, %v6152_v60  ;;  %v5269_v2 = vpop.f32.mrf.mxu1  ;;  %v6090_v37 = vld [vmem:[#allocation5 + $0x158] sm:$0xff] }
 0x421   : > { %5398 = vst.msk [vmem:[#allocation5 + $0x168] sm:$0xff] %vm5352_vm4, %v5269_v2  ;;  %v5948_v7 = vpop.f32.mrf.mxu0 }
 0x422   : > { %v6153_v9 = vadd.f32 %v6088_v8, %v5948_v7  ;;  %v9330_v21 = vpop.f32.mrf.mxu1 }
 0x423   : > { %v9456_v39 = vpop.f32.mrf.mxu0 }
 0x424   : > { %6218 = vst.msk [vmem:[#allocation5 + $0x148] sm:$0xff] %vm5352_vm4, %v6153_v9  ;;  %v5274_v18 = vpop.f32.mrf.mxu1  ;;  %v6091_v40 = vld [vmem:[#allocation5 + $0x160] sm:$0xff] }
 0x425   : > { %9564 = vmatmul.mubr.msk.bf16.gmra.mxu1 %vm4952_vm14, %v9848_v10  ;;  %5399 = vst.msk [vmem:[#allocation5 + $0x170] sm:$0xff] %vm5352_vm4, %v5274_v18  ;;  %v5953_v12 = vpop.f32.mrf.mxu0  ;;  %v9853_v18 = vld [vmem:[#allocation3 + $0xb8] sm:$0xff]  }
 0x426   : > { %9567 = vmatprep.mubr.msk.bf16.mxu1 %vm10154_vm2, %v10153_v1  ;;  %v6154_v17 = vadd.f32 %v6089_v16, %v5953_v12  ;;  %v9333_v19 = vpop.f32.mrf.mxu1 }
 0x427   : > { %v9459_v23 = vpop.f32.mrf.mxu0 }
 0x428   : > { %6219 = vst.msk [vmem:[#allocation5 + $0x150] sm:$0xff] %vm5352_vm4, %v6154_v17  ;;  %v5277_v49 = vpop.f32.mrf.mxu1  ;;  %v6092_v43 = vld [vmem:[#allocation5 + $0x168] sm:$0xff] }
 0x429   : > { %5400 = vst.msk [vmem:[#allocation5 + $0x178] sm:$0xff] %vm5352_vm4, %v5277_v49  ;;  %v5956_v25 = vpop.f32.mrf.mxu0 }
 0x42a   : > { %v6155_v38 = vadd.f32 %v6090_v37, %v5956_v25  ;;  %v9334_v14 = vpop.f32.mrf.mxu1 }
 0x42b   : > { %v9460_v28 = vpop.f32.mrf.mxu0 }
 0x42c   : > { %6220 = vst.msk [vmem:[#allocation5 + $0x158] sm:$0xff] %vm5352_vm4, %v6155_v38  ;;  %v5282_v30 = vpop.f32.mrf.mxu1  ;;  %v6093_v33 = vld [vmem:[#allocation5 + $0x170] sm:$0xff] }
 0x42d   : > { %9568 = vmatmul.mubr.msk.bf16.gmra.mxu1 %vm4952_vm14, %v9849_v26  ;;  %5401 = vst.msk [vmem:[#allocation5 + $0x180] sm:$0xff] %vm5352_vm4, %v5282_v30  ;;  %v5961_v32 = vpop.f32.mrf.mxu0  ;;  %v9854_v30 = vld [vmem:[#allocation3 + $0xc0] sm:$0xff]  }
 0x42e   : > { %9571 = vmatprep.mubr.msk.bf16.mxu1 %vm10154_vm2, %v10153_v1  ;;  %v6156_v52 = vadd.f32 %v6091_v40, %v5961_v32  ;;  %v9337_v44 = vpop.f32.mrf.mxu1 }
 0x42f   : > { %v9463_v41 = vpop.f32.mrf.mxu0 }
 0x430   : > { %6221 = vst.msk [vmem:[#allocation5 + $0x160] sm:$0xff] %vm5352_vm4, %v6156_v52  ;;  %v5285_v42 = vpop.f32.mrf.mxu1  ;;  %v6094_v36 = vld [vmem:[#allocation5 + $0x178] sm:$0xff] }
 0x431   : > { %5402 = vst.msk [vmem:[#allocation5 + $0x188] sm:$0xff] %vm5352_vm4, %v5285_v42  ;;  %v5964_v59 = vpop.f32.mrf.mxu0 }
 0x432   : > { %v6157_v63 = vadd.f32 %v6092_v43, %v5964_v59  ;;  %v9338_v46 = vpop.f32.mrf.mxu1 }
 0x433   : > { %v9464_v34 = vpop.f32.mrf.mxu0 }
 0x434   : > { %6222 = vst.msk [vmem:[#allocation5 + $0x168] sm:$0xff] %vm5352_vm4, %v6157_v63  ;;  %v5290_v11 = vpop.f32.mrf.mxu1  ;;  %v6095_v27 = vld [vmem:[#allocation5 + $0x180] sm:$0xff] }
 0x435   : > { %9572 = vmatmul.mubr.msk.bf16.gmra.mxu1 %vm4952_vm14, %v9850_v3  ;;  %5403 = vst.msk [vmem:[#allocation5 + $0x190] sm:$0xff] %vm5352_vm4, %v5290_v11  ;;  %v5969_v15 = vpop.f32.mrf.mxu0  ;;  %v9855_v11 = vld [vmem:[#allocation3 + $0xc8] sm:$0xff]  }
 0x436   : > { %9575 = vmatprep.mubr.msk.bf16.mxu1 %vm10154_vm2, %v10153_v1  ;;  %v6158_v45 = vadd.f32 %v6093_v33, %v5969_v15  ;;  %v9341_v47 = vpop.f32.mrf.mxu1 }
 0x437   : > { %v9467_v13 = vpop.f32.mrf.mxu0 }
 0x438   : > { %6223 = vst.msk [vmem:[#allocation5 + $0x170] sm:$0xff] %vm5352_vm4, %v6158_v45  ;;  %v5293_v0 = vpop.f32.mrf.mxu1  ;;  %v6096_v58 = vld [vmem:[#allocation5 + $0x188] sm:$0xff] }
 0x439   : > { %5404 = vst.msk [vmem:[#allocation5 + $0x198] sm:$0xff] %vm5352_vm4, %v5293_v0  ;;  %v5972_v54 = vpop.f32.mrf.mxu0 }
 0x43a   : > { %v6159_v29 = vadd.f32 %v6094_v36, %v5972_v54  ;;  %v9342_v35 = vpop.f32.mrf.mxu1 }
 0x43b   : > { %v9468_v31 = vpop.f32.mrf.mxu0 }
 0x43c   : > { %6224 = vst.msk [vmem:[#allocation5 + $0x178] sm:$0xff] %vm5352_vm4, %v6159_v29  ;;  %v5298_v48 = vpop.f32.mrf.mxu1  ;;  %v6097_v61 = vld [vmem:[#allocation5 + $0x190] sm:$0xff] }
 0x43d   : > { %9576 = vmatmul.mubr.msk.bf16.gmra.mxu1 %vm4952_vm14, %v9851_v50  ;;  %5405 = vst.msk [vmem:[#allocation5 + $0x1a0] sm:$0xff] %vm5352_vm4, %v5298_v48  ;;  %v5977_v6 = vpop.f32.mrf.mxu0  ;;  %v9856_v48 = vld [vmem:[#allocation3 + $0xd0] sm:$0xff]  }
 0x43e   : > { %9579 = vmatprep.mubr.msk.bf16.mxu1 %vm10154_vm2, %v10153_v1  ;;  %v6160_v53 = vadd.f32 %v6095_v27, %v5977_v6  ;;  %v9345_v22 = vpop.f32.mrf.mxu1 }
 0x43f   : > { %v9471_v55 = vpop.f32.mrf.mxu0 }
 0x440   : > { %6225 = vst.msk [vmem:[#allocation5 + $0x180] sm:$0xff] %vm5352_vm4, %v6160_v53  ;;  %v5301_v56 = vpop.f32.mrf.mxu1  ;;  %v6098_v21 = vld [vmem:[#allocation5 + $0x198] sm:$0xff] }
 0x441   : > { %5406 = vst.msk [vmem:[#allocation5 + $0x1a8] sm:$0xff] %vm5352_vm4, %v5301_v56  ;;  %v5980_v57 = vpop.f32.mrf.mxu0 }
 0x442   : > { %v6161_v62 = vadd.f32 %v6096_v58, %v5980_v57  ;;  %v9346_v51 = vpop.f32.mrf.mxu1 }
 0x443   : > { %v9472_v5 = vpop.f32.mrf.mxu0 }
 0x444   : > { %6226 = vst.msk [vmem:[#allocation5 + $0x188] sm:$0xff] %vm5352_vm4, %v6161_v62  ;;  %v5306_v24 = vpop.f32.mrf.mxu1  ;;  %v6099_v19 = vld [vmem:[#allocation5 + $0x1a0] sm:$0xff] }
 0x445   : > { %9580 = vmatmul.mubr.msk.bf16.gmra.mxu1 %vm4952_vm14, %v9852_v20  ;;  %5407 = vst.msk [vmem:[#allocation5 + $0x1b0] sm:$0xff] %vm5352_vm4, %v5306_v24  ;;  %v5985_v60 = vpop.f32.mrf.mxu0  ;;  %v9857_v24 = vld [vmem:[#allocation3 + $0xd8] sm:$0xff]  }
 0x446   : > { %9583 = vmatprep.mubr.msk.bf16.mxu1 %vm10154_vm2, %v10153_v1  ;;  %v6162_v4 = vadd.f32 %v6097_v61, %v5985_v60  ;;  %v9349_v2 = vpop.f32.mrf.mxu1 }
 0x447   : > { %v9475_v7 = vpop.f32.mrf.mxu0 }
 0x448   : > { %6227 = vst.msk [vmem:[#allocation5 + $0x190] sm:$0xff] %vm5352_vm4, %v6162_v4  ;;  %v5309_v8 = vpop.f32.mrf.mxu1  ;;  %v6100_v14 = vld [vmem:[#allocation5 + $0x1a8] sm:$0xff] }
 0x449   : > { %5408 = vst.msk [vmem:[#allocation5 + $0x1b8] sm:$0xff] %vm5352_vm4, %v5309_v8  ;;  %v5988_v9 = vpop.f32.mrf.mxu0 }
 0x44a   : > { %v6163_v10 = vadd.f32 %v6098_v21, %v5988_v9  ;;  %v9350_v39 = vpop.f32.mrf.mxu1 }
 0x44b   : > { %v9476_v12 = vpop.f32.mrf.mxu0 }
 0x44c   : > { %6228 = vst.msk [vmem:[#allocation5 + $0x198] sm:$0xff] %vm5352_vm4, %v6163_v10  ;;  %v5314_v16 = vpop.f32.mrf.mxu1  ;;  %v6101_v44 = vld [vmem:[#allocation5 + $0x1b0] sm:$0xff] }
 0x44d   : > { %9584 = vmatmul.mubr.msk.bf16.gmra.mxu1 %vm4952_vm14, %v9853_v18  ;;  %5409 = vst.msk [vmem:[#allocation5 + $0x1c0] sm:$0xff] %vm5352_vm4, %v5314_v16  ;;  %v5993_v17 = vpop.f32.mrf.mxu0  ;;  %v9858_v16 = vld [vmem:[#allocation3 + $0xe0] sm:$0xff]  }
 0x44e   : > { %9587 = vmatprep.mubr.msk.bf16.mxu1 %vm10154_vm2, %v10153_v1  ;;  %v6164_v23 = vadd.f32 %v6099_v19, %v5993_v17  ;;  %v9353_v49 = vpop.f32.mrf.mxu1 }
 0x44f   : > { %v9479_v25 = vpop.f32.mrf.mxu0 }
 0x450   : > { %6229 = vst.msk [vmem:[#allocation5 + $0x1a0] sm:$0xff] %vm5352_vm4, %v6164_v23  ;;  %v5317_v37 = vpop.f32.mrf.mxu1  ;;  %v6102_v46 = vld [vmem:[#allocation5 + $0x1b8] sm:$0xff]  ;;  %v6871_v23 = vld [vmem:[#allocation5] sm:$0xff] }
 0x451   : > { %5410 = vst.msk [vmem:[#allocation5 + $0x1c8] sm:$0xff] %vm5352_vm4, %v5317_v37  ;;  %v5996_v38 = vpop.f32.mrf.mxu0 }
 0x452   : > { %v6165_v26 = vadd.f32 %v6100_v14, %v5996_v38  ;;  %v9354_v28 = vpop.f32.mrf.mxu1 }
 0x453   : > { %v9480_v32 = vpop.f32.mrf.mxu0 }
 0x454   : > { %6230 = vst.msk [vmem:[#allocation5 + $0x1a8] sm:$0xff] %vm5352_vm4, %v6165_v26  ;;  %v5322_v40 = vpop.f32.mrf.mxu1  ;;  %v6103_v47 = vld [vmem:[#allocation5 + $0x1c0] sm:$0xff] }
 0x455   : > { %9588 = vmatmul.mubr.msk.bf16.gmra.mxu1 %vm4952_vm14, %v9854_v30  ;;  %5411 = vst.msk [vmem:[#allocation5 + $0x1d0] sm:$0xff] %vm5352_vm4, %v5322_v40  ;;  %v6001_v52 = vpop.f32.mrf.mxu0  ;;  %v6872_v30 = vld [vmem:[#allocation5 + $0x8] sm:$0xff] }
 0x456   : > { %9591 = vmatprep.mubr.msk.bf16.mxu1 %vm10154_vm2, %v10153_v1  ;;  %v6166_v41 = vadd.f32 %v6101_v44, %v6001_v52  ;;  %v9357_v42 = vpop.f32.mrf.mxu1 }
 0x457   : > { %v9483_v59 = vpop.f32.mrf.mxu0  ;;  %v9859_v42 = vld [vmem:[#allocation3 + $0xe8] sm:$0xff]  }
 0x458   : > { %6231 = vst.msk [vmem:[#allocation5 + $0x1b0] sm:$0xff] %vm5352_vm4, %v6166_v41  ;;  %v5325_v43 = vpop.f32.mrf.mxu1  ;;  %v6104_v35 = vld [vmem:[#allocation5 + $0x1c8] sm:$0xff] }
 0x459   : > { %5412 = vst.msk [vmem:[#allocation5 + $0x1d8] sm:$0xff] %vm5352_vm4, %v5325_v43  ;;  %v6004_v63 = vpop.f32.mrf.mxu0 }
 0x45a   : > { %v6167_v3 = vadd.f32 %v6102_v46, %v6004_v63  ;;  %v9358_v34 = vpop.f32.mrf.mxu1  ;;  %v6873_v63 = vld [vmem:[#allocation5 + $0x10] sm:$0xff] }
 0x45b   : > { %v9484_v15 = vpop.f32.mrf.mxu0 }
 0x45c   : > { %6232 = vst.msk [vmem:[#allocation5 + $0x1b8] sm:$0xff] %vm5352_vm4, %v6167_v3  ;;  %v6105_v22 = vld [vmem:[#allocation5 + $0x1d0] sm:$0xff] }
 0x45d   : > { %v5330_v33 = vpop.f32.mrf.mxu1  ;;  %9592 = vmatmul.mubr.msk.bf16.gmra.mxu1 %vm4952_vm14, %v9855_v11 }
 0x45e   : > { %5413 = vst.msk [vmem:[#allocation5 + $0x1e0] sm:$0xff] %vm5352_vm4, %v5330_v33  ;;  %v6009_v45 = vpop.f32.mrf.mxu0  ;;  %9595 = vmatprep.mubr.msk.bf16.mxu1 %vm10154_vm2, %v10153_v1 }
 0x45f   : > { %v6168_v13 = vadd.f32 %v6103_v47, %v6009_v45  ;;  %v9361_v0 = vpop.f32.mrf.mxu1  ;;  %v6874_v47 = vld [vmem:[#allocation5 + $0x18] sm:$0xff] }
 0x460   : > { %v9487_v54 = vpop.f32.mrf.mxu0  ;;  %v6106_v51 = vld [vmem:[#allocation5 + $0x1d8] sm:$0xff] }
 0x461   : > { %6233 = vst.msk [vmem:[#allocation5 + $0x1c0] sm:$0xff] %vm5352_vm4, %v6168_v13  ;;  %v5333_v36 = vpop.f32.mrf.mxu1 }
 0x462   : > { %5414 = vst.msk [vmem:[#allocation5 + $0x1e8] sm:$0xff] %vm5352_vm4, %v5333_v36  ;;  %v6012_v29 = vpop.f32.mrf.mxu0 }
 0x463   : > { %v6169_v50 = vadd.f32 %v6104_v35, %v6012_v29  ;;  %v9362_v31 = vpop.f32.mrf.mxu1  ;;  %v9860_v29 = vld [vmem:[#allocation3 + $0xf0] sm:$0xff]  }
 0x464   : > { %v9488_v6 = vpop.f32.mrf.mxu0  ;;  %v6875_v31 = vld [vmem:[#allocation5 + $0x20] sm:$0xff] }
 0x465   : > { %6234 = vst.msk [vmem:[#allocation5 + $0x1c8] sm:$0xff] %vm5352_vm4, %v6169_v50  ;;  %v5338_v27 = vpop.f32.mrf.mxu1  ;;  %9596 = vmatmul.mubr.msk.bf16.gmra.mxu1 %vm4952_vm14, %v9856_v48  ;;  %v6107_v2 = vld [vmem:[#allocation5 + $0x1e0] sm:$0xff] }
 0x466   : > { %5415 = vst.msk [vmem:[#allocation5 + $0x1f0] sm:$0xff] %vm5352_vm4, %v5338_v27  ;;  %v6017_v53 = vpop.f32.mrf.mxu0  ;;  %9599 = vmatprep.mubr.msk.bf16.mxu1 %vm10154_vm2, %v10153_v1 }
 0x467   : > { %v6170_v55 = vadd.f32 %v6105_v22, %v6017_v53  ;;  %v9365_v56 = vpop.f32.mrf.mxu1 }
 0x468   : > { %v9491_v57 = vpop.f32.mrf.mxu0 }
 0x469   : > { %6235 = vst.msk [vmem:[#allocation5 + $0x1d0] sm:$0xff] %vm5352_vm4, %v6170_v55  ;;  %v5341_v58 = vpop.f32.mrf.mxu1  ;;  %v6108_v39 = vld [vmem:[#allocation5 + $0x1e8] sm:$0xff] }
 0x46a   : > { %5416 = vst.msk [vmem:[#allocation5 + $0x1f8] sm:$0xff] %vm5352_vm4, %v5341_v58  ;;  %v6020_v62 = vpop.f32.mrf.mxu0  ;;  %v6876_v55 = vld [vmem:[#allocation5 + $0x28] sm:$0xff] }
 0x46b   : > { %v6171_v20 = vadd.f32 %v6106_v51, %v6020_v62  ;;  %v9366_v5 = vpop.f32.mrf.mxu1  ;;  %v9861_v62 = vld [vmem:[#allocation3 + $0xf8] sm:$0xff]  }
 0x46c   : > { %v9492_v60 = vpop.f32.mrf.mxu0 }
 0x46d   : > { %6236 = vst.msk [vmem:[#allocation5 + $0x1d8] sm:$0xff] %vm5352_vm4, %v6171_v20  ;;  %v5346_v61 = vpop.f32.mrf.mxu1  ;;  %9600 = vmatmul.mubr.msk.bf16.gmra.mxu1 %vm4952_vm14, %v9857_v24  ;;  %v6109_v25 = vld [vmem:[#allocation5 + $0x1f0] sm:$0xff] }
 0x46e   : > { %5417 = vst.msk [vmem:[#allocation5 + $0x200] sm:$0xff] %vm5352_vm4, %v5346_v61  ;;  %v6025_v4 = vpop.f32.mrf.mxu0  ;;  %9603 = vmatprep.mubr.msk.bf16.mxu1 %vm10154_vm2, %v10153_v1  ;;  %v6877_v20 = vld [vmem:[#allocation5 + $0x30] sm:$0xff]  ;;  %v6878_v61 = vld [vmem:[#allocation5 + $0x38] sm:$0xff] }
 0x46f   : > { %v6172_v7 = vadd.f32 %v6107_v2, %v6025_v4  ;;  %v9369_v8 = vpop.f32.mrf.mxu1 }
 0x470   : > { %v9495_v9 = vpop.f32.mrf.mxu0  ;;  %v9862_v8 = vld [vmem:[#allocation3 + $0x100] sm:$0xff]  }
 0x471   : > { %6237 = vst.msk [vmem:[#allocation5 + $0x1e0] sm:$0xff] %vm5352_vm4, %v6172_v7  ;;  %v5349_v21 = vpop.f32.mrf.mxu1  ;;  %v6110_v40 = vld [vmem:[#allocation5 + $0x1f8] sm:$0xff] }
 0x472   : > { %v6028_v10 = vpop.f32.mrf.mxu0  ;;  %v6879_v21 = vld [vmem:[#allocation5 + $0x40] sm:$0xff] }
 0x473   : > { %v6173_v18 = vadd.f32 %v6108_v39, %v6028_v10  ;;  %v9370_v12 = vpop.f32.mrf.mxu1 }
 0x474   : > { %v9496_v17 = vpop.f32.mrf.mxu0 }
 0x475   : > { %6238 = vst.msk [vmem:[#allocation5 + $0x1e8] sm:$0xff] %vm5352_vm4, %v6173_v18  ;;  %v6609_v19 = vpop.f32.mrf.mxu1  ;;  %9604 = vmatmul.mubr.msk.bf16.gmra.mxu1 %vm4952_vm14, %v9858_v16  ;;  %v6111_v3 = vld [vmem:[#allocation5 + $0x200] sm:$0xff]  ;;  %v6880_v17 = vld [vmem:[#allocation5 + $0x48] sm:$0xff] }
 0x476   : > { %v6033_v49 = vpop.f32.mrf.mxu0  ;;  %v6936_v37 = vadd.f32 %v6871_v23, %v6609_v19  ;;  %9607 = vmatprep.mubr.msk.bf16.mxu1 %vm10154_vm2, %v10153_v1 }
 0x477   : > { %v6174_v38 = vadd.f32 %v6109_v25, %v6033_v49  ;;  %v9509_v14 = vpop.f32.mrf.mxu1  ;;  %v9863_v25 = vld [vmem:[#allocation3 + $0x108] sm:$0xff]  }
 0x478   : > { %7001 = vst.msk [vmem:[#allocation5] sm:$0xff] %vm5352_vm4, %v6936_v37  ;;  %v9499_v26 = vpop.f32.mrf.mxu0 }
 0x479   : > { %6239 = vst.msk [vmem:[#allocation5 + $0x1f0] sm:$0xff] %vm5352_vm4, %v6174_v38  ;;  %v6612_v28 = vpop.f32.mrf.mxu1  ;;  %v6881_v38 = vld [vmem:[#allocation5 + $0x50] sm:$0xff] }
 0x47a   : > { %v6036_v32 = vpop.f32.mrf.mxu0  ;;  %v6937_v52 = vadd.f32 %v6872_v30, %v6612_v28  ;;  %v6882_v30 = vld [vmem:[#allocation5 + $0x58] sm:$0xff] }
 0x47b   : > { %v6175_v44 = vadd.f32 %v6110_v40, %v6036_v32  ;;  %v9510_v41 = vpop.f32.mrf.mxu1  ;;  %v9864_v32 = vld [vmem:[#allocation3 + $0x110] sm:$0xff]  }
 0x47c   : > { %7002 = vst.msk [vmem:[#allocation5 + $0x8] sm:$0xff] %vm5352_vm4, %v6937_v52  ;;  %v9500_v59 = vpop.f32.mrf.mxu0 }
 0x47d   : > { %6240 = vst.msk [vmem:[#allocation5 + $0x1f8] sm:$0xff] %vm5352_vm4, %v6175_v44  ;;  %v6617_v43 = vpop.f32.mrf.mxu1  ;;  %9608 = vmatmul.mubr.msk.bf16.gmra.mxu1 %vm4952_vm14, %v9859_v42  ;;  %v6883_v42 = vld [vmem:[#allocation5 + $0x60] sm:$0xff] }
 0x47e   : > { %v6041_v46 = vpop.f32.mrf.mxu0  ;;  %v6938_v34 = vadd.f32 %v6873_v63, %v6617_v43  ;;  %9611 = vmatprep.mubr.msk.bf16.mxu1 %vm10154_vm2, %v10153_v1 }
 0x47f   : > { %v6176_v11 = vadd.f32 %v6111_v3, %v6041_v46  ;;  %v9513_v15 = vpop.f32.mrf.mxu1 }
 0x480   : > { %7003 = vst.msk [vmem:[#allocation5 + $0x10] sm:$0xff] %vm5352_vm4, %v6938_v34  ;;  %v9503_v33 = vpop.f32.mrf.mxu0  ;;  %v6884_v34 = vld [vmem:[#allocation5 + $0x68] sm:$0xff] }
 0x481   : > { %6241 = vst.msk [vmem:[#allocation5 + $0x200] sm:$0xff] %vm5352_vm4, %v6176_v11  ;;  %v6620_v45 = vpop.f32.mrf.mxu1  ;;  %v9865_v11 = vld [vmem:[#allocation3 + $0x118] sm:$0xff]  }
 0x482   : > { %v6939_v13 = vadd.f32 %v6874_v47, %v6620_v45  ;;  %v6044_v0 = vpop.f32.mrf.mxu0 }
 0x483   : > { %v9514_v54 = vpop.f32.mrf.mxu1  ;;  %v7098_v36 = vld [vmem:[#allocation5 + $0x1] sm:$0xff] }
 0x484   : > { %7004 = vst.msk [vmem:[#allocation5 + $0x18] sm:$0xff] %vm5352_vm4, %v6939_v13  ;;  %7162 = vrot.lane.b32.xlu0 %v7098_v36, %s10156_s21  ;;  %v9504_v35 = vpop.f32.mrf.mxu0  ;;  %v7290_v27 = vld [vmem:[#allocation5 + $0x2] sm:$0xff]  ;;  %v6885_v13 = vld [vmem:[#allocation5 + $0x70] sm:$0xff] }
 0x485   : > { %v6625_v50 = vpop.f32.mrf.mxu1  ;;  %9612 = vmatmul.mubr.msk.bf16.gmra.mxu1 %vm4952_vm14, %v9860_v29  ;;  %v6886_v29 = vld [vmem:[#allocation5 + $0x78] sm:$0xff]  ;;  %v9866_v35 = vld [vmem:[#allocation3 + $0x120] ss:$0 sps:$4 sm:$0xff]  }
 0x486   : > { %v6940_v48 = vadd.f32 %v6875_v31, %v6625_v50  ;;  %9615 = vmatprep.mubr.msk.bf16.mxu1 %vm10154_vm2, %v10153_v1 }
 0x487   : > { %v9517_v6 = vpop.f32.mrf.mxu1  ;;  %v7099_v53 = vld [vmem:[#allocation5 + $0x9] sm:$0xff] }
 0x488   : > { %7005 = vst.msk [vmem:[#allocation5 + $0x20] sm:$0xff] %vm5352_vm4, %v6940_v48  ;;  %7354 = vrot.lane.b32.xlu0 %v7290_v27, %s10158_s22  ;;  %7164 = vrot.lane.b32.xlu1 %v7099_v53, %s10156_s21  ;;  %v7291_v58 = vld [vmem:[#allocation5 + $0xa] sm:$0xff]  ;;  %v6887_v27 = vld [vmem:[#allocation5 + $0x80] sm:$0xff] }
 0x489   : > { %v6628_v22 = vpop.f32.mrf.mxu1 }
 0x48a   : > { %v6941_v56 = vadd.f32 %v6876_v55, %v6628_v22 }
 0x48b   : > { %v9518_v57 = vpop.f32.mrf.mxu1 }
 0x48c   : > { %7006 = vst.msk [vmem:[#allocation5 + $0x28] sm:$0xff] %vm5352_vm4, %v6941_v56  ;;  %7356 = vrot.lane.b32.xlu1 %v7291_v58, %s10158_s22  ;;  %v6888_v57 = vld [vmem:[#allocation5 + $0x88] sm:$0xff] }
 0x48d   : > { %v6633_v51 = vpop.f32.mrf.mxu1  ;;  %9616 = vmatmul.mubr.msk.bf16.gmra.mxu1 %vm4952_vm14, %v9861_v62 }
 0x48e   : > { %v6942_v5 = vadd.f32 %v6877_v20, %v6633_v51  ;;  %9619 = vmatprep.mubr.msk.bf16.mxu1 %vm10154_vm2, %v10153_v1 }
 0x48f   : > { %v9521_v24 = vpop.f32.mrf.mxu1 }
 0x490   : > { %7007 = vst.msk [vmem:[#allocation5 + $0x30] sm:$0xff] %vm5352_vm4, %v6942_v5  ;;  %v6889_v5 = vld [vmem:[#allocation5 + $0x90] sm:$0xff] }
 0x491   : > { %v6636_v60 = vpop.f32.mrf.mxu1 }
 0x492   : > { %v6943_v4 = vadd.f32 %v6878_v61, %v6636_v60 }
 0x493   : > { %v9522_v2 = vpop.f32.mrf.mxu1  ;;  %v7100_v7 = vld [vmem:[#allocation5 + $0x21] sm:$0xff] }
 0x494   : > { %7008 = vst.msk [vmem:[#allocation5 + $0x38] sm:$0xff] %vm5352_vm4, %v6943_v4  ;;  %7166 = vrot.lane.b32.xlu0 %v7100_v7, %s10156_s21  ;;  %v7292_v18 = vld [vmem:[#allocation5 + $0x22] sm:$0xff]  ;;  %v6890_v4 = vld [vmem:[#allocation5 + $0x98] sm:$0xff] }
 0x495   : > { %v6641_v9 = vpop.f32.mrf.mxu1  ;;  %9620 = vmatmul.mubr.msk.bf16.gmra.mxu1 %vm4952_vm14, %v9862_v8 }
 0x496   : > { %v6944_v10 = vadd.f32 %v6879_v21, %v6641_v9  ;;  %9623 = vmatprep.mubr.msk.bf16.mxu1 %vm10154_vm2, %v10153_v1  ;;  %v6891_v21 = vld [vmem:[#allocation5 + $0xa0] sm:$0xff] }
 0x497   : > { %v9525_v39 = vpop.f32.mrf.mxu1  ;;  %v7101_v12 = vld [vmem:[#allocation5 + $0x29] sm:$0xff] }
 0x498   : > { %7009 = vst.msk [vmem:[#allocation5 + $0x40] sm:$0xff] %vm5352_vm4, %v6944_v10  ;;  %7358 = vrot.lane.b32.xlu0 %v7292_v18, %s10158_s22  ;;  %7168 = vrot.lane.b32.xlu1 %v7101_v12, %s10156_s21  ;;  %v7293_v49 = vld [vmem:[#allocation5 + $0x2a] sm:$0xff] }
 0x499   : > { %v6644_v16 = vpop.f32.mrf.mxu1 }
 0x49a   : > { %v6945_v19 = vadd.f32 %v6880_v17, %v6644_v16  ;;  %v6892_v17 = vld [vmem:[#allocation5 + $0xa8] sm:$0xff] }
 0x49b   : > { %v9526_v23 = vpop.f32.mrf.mxu1 }
 0x49c   : > { %7010 = vst.msk [vmem:[#allocation5 + $0x48] sm:$0xff] %vm5352_vm4, %v6945_v19  ;;  %7360 = vrot.lane.b32.xlu1 %v7293_v49, %s10158_s22 }
 0x49d   : > { %v6649_v37 = vpop.f32.mrf.mxu1  ;;  %9624 = vmatmul.mubr.msk.bf16.gmra.mxu1 %vm4952_vm14, %v9863_v25 }
 0x49e   : > { %v6946_v14 = vadd.f32 %v6881_v38, %v6649_v37  ;;  %9627 = vmatprep.mubr.msk.bf16.mxu1 %vm10154_vm2, %v10153_v1  ;;  %v6893_v37 = vld [vmem:[#allocation5 + $0xb0] sm:$0xff] }
 0x49f   : > { %v9529_v26 = vpop.f32.mrf.mxu1 }
 0x4a0   : > { %7011 = vst.msk [vmem:[#allocation5 + $0x50] sm:$0xff] %vm5352_vm4, %v6946_v14 }
 0x4a1   : > { %v6652_v28 = vpop.f32.mrf.mxu1 }
 0x4a2   : > { %v6947_v40 = vadd.f32 %v6882_v30, %v6652_v28  ;;  %v6894_v28 = vld [vmem:[#allocation5 + $0xb8] sm:$0xff] }
 0x4a3   : > { %v9530_v52 = vpop.f32.mrf.mxu1  ;;  %v7102_v44 = vld [vmem:[#allocation5 + $0x41] sm:$0xff] }
 0x4a4   : > { %7012 = vst.msk [vmem:[#allocation5 + $0x58] sm:$0xff] %vm5352_vm4, %v6947_v40  ;;  %7170 = vrot.lane.b32.xlu0 %v7102_v44, %s10156_s21  ;;  %v7294_v63 = vld [vmem:[#allocation5 + $0x42] sm:$0xff] }
 0x4a5   : > { %v6657_v41 = vpop.f32.mrf.mxu1  ;;  %9628 = vmatmul.mubr.msk.bf16.gmra.mxu1 %vm4952_vm14, %v9864_v32  ;;  %v6895_v44 = vld [vmem:[#allocation5 + $0xc0] sm:$0xff] }
 0x4a6   : > { %v6948_v59 = vadd.f32 %v6883_v42, %v6657_v41  ;;  %9631 = vmatprep.mubr.msk.bf16.mxu1 %vm10154_vm2, %v10153_v1 }
 0x4a7   : > { %v9533_v43 = vpop.f32.mrf.mxu1  ;;  %v7103_v46 = vld [vmem:[#allocation5 + $0x49] sm:$0xff] }
 0x4a8   : > { %7013 = vst.msk [vmem:[#allocation5 + $0x60] sm:$0xff] %vm5352_vm4, %v6948_v59  ;;  %7362 = vrot.lane.b32.xlu0 %v7294_v63, %s10158_s22  ;;  %7172 = vrot.lane.b32.xlu1 %v7103_v46, %s10156_s21  ;;  %v7295_v45 = vld [vmem:[#allocation5 + $0x4a] sm:$0xff] }
 0x4a9   : > { %v6660_v3 = vpop.f32.mrf.mxu1  ;;  %v6896_v46 = vld [vmem:[#allocation5 + $0xc8] sm:$0xff] }
 0x4aa   : > { %v6949_v15 = vadd.f32 %v6884_v34, %v6660_v3 }
 0x4ab   : > { %v9534_v33 = vpop.f32.mrf.mxu1 }
 0x4ac   : > { %7014 = vst.msk [vmem:[#allocation5 + $0x68] sm:$0xff] %vm5352_vm4, %v6949_v15  ;;  %7364 = vrot.lane.b32.xlu1 %v7295_v45, %s10158_s22  ;;  %v6897_v33 = vld [vmem:[#allocation5 + $0xd0] sm:$0xff] }
 0x4ad   : > { %v6665_v47 = vpop.f32.mrf.mxu1  ;;  %9632 = vmatmul.mubr.msk.bf16.gmra.mxu1 %vm4952_vm14, %v9865_v11 }
 0x4ae   : > { %v6950_v0 = vadd.f32 %v6885_v13, %v6665_v47  ;;  %9635 = vmatprep.mubr.msk.bf16.mxu1 %vm10154_vm2, %v10153_v1 }
 0x4af   : > { %v9537_v54 = vpop.f32.mrf.mxu1 }
 0x4b0   : > { %7015 = vst.msk [vmem:[#allocation5 + $0x70] sm:$0xff] %vm5352_vm4, %v6950_v0  ;;  %v6898_v0 = vld [vmem:[#allocation5 + $0xd8] sm:$0xff] }
 0x4b1   : > { %v6668_v36 = vpop.f32.mrf.mxu1 }
 0x4b2   : > { %v6951_v50 = vadd.f32 %v6886_v29, %v6668_v36 }
 0x4b3   : > { %v9538_v31 = vpop.f32.mrf.mxu1  ;;  %v7104_v48 = vld [vmem:[#allocation5 + $0x61] sm:$0xff] }
 0x4b4   : > { %7016 = vst.msk [vmem:[#allocation5 + $0x78] sm:$0xff] %vm5352_vm4, %v6951_v50  ;;  %7174 = vrot.lane.b32.xlu0 %v7104_v48, %s10156_s21  ;;  %v7296_v1 = vld [vmem:[#allocation5 + $0x62] sm:$0xff] }
 0x4b5   : > { %v6673_v6 = vpop.f32.mrf.mxu1  ;;  %9636 = vmatmul.mubr.msk.bf16.gmra.mxu1 %vm4952_vm14, %v9866_v35  ;;  %v6899_v50 = vld [vmem:[#allocation5 + $0xe0] sm:$0xff] }
 0x4b6   : > { %v6952_v53 = vadd.f32 %v6887_v27, %v6673_v6 }
 0x4b7   : > { %v9541_v22 = vpop.f32.mrf.mxu1  ;;  %v7105_v55 = vld [vmem:[#allocation5 + $0x69] sm:$0xff] }
 0x4b8   : > { %7017 = vst.msk [vmem:[#allocation5 + $0x80] sm:$0xff] %vm5352_vm4, %v6952_v53  ;;  %7366 = vrot.lane.b32.xlu0 %v7296_v1, %s10158_s22  ;;  %7176 = vrot.lane.b32.xlu1 %v7105_v55, %s10156_s21  ;;  %v7297_v51 = vld [vmem:[#allocation5 + $0x6a] sm:$0xff] }
 0x4b9   : > { %v6676_v56 = vpop.f32.mrf.mxu1  ;;  %v6900_v22 = vld [vmem:[#allocation5 + $0xe8] sm:$0xff] }
 0x4ba   : > { %v6953_v58 = vadd.f32 %v6888_v57, %v6676_v56 }
 0x4bb   : > { %v9542_v62 = vpop.f32.mrf.mxu1 }
 0x4bc   : > { %7018 = vst.msk [vmem:[#allocation5 + $0x88] sm:$0xff] %vm5352_vm4, %v6953_v58  ;;  %7368 = vrot.lane.b32.xlu1 %v7297_v51, %s10158_s22  ;;  %v6901_v58 = vld [vmem:[#allocation5 + $0xf0] sm:$0xff] }
 0x4bd   : > { %v6681_v20 = vpop.f32.mrf.mxu1 }
 0x4be   : > { %v6954_v24 = vadd.f32 %v6889_v5, %v6681_v20  ;;  %v6902_v5 = vld [vmem:[#allocation5 + $0xf8] sm:$0xff] }
 0x4bf   : > { %v9545_v60 = vpop.f32.mrf.mxu1 }
 0x4c0   : > { %7019 = vst.msk [vmem:[#allocation5 + $0x90] sm:$0xff] %vm5352_vm4, %v6954_v24 }
 0x4c1   : > { %v6684_v61 = vpop.f32.mrf.mxu1 }
 0x4c2   : > { %v6955_v2 = vadd.f32 %v6890_v4, %v6684_v61 }
 0x4c3   : > { %v9546_v7 = vpop.f32.mrf.mxu1  ;;  %v7106_v8 = vld [vmem:[#allocation5 + $0x81] sm:$0xff] }
 0x4c4   : > { %7020 = vst.msk [vmem:[#allocation5 + $0x98] sm:$0xff] %vm5352_vm4, %v6955_v2  ;;  %7178 = vrot.lane.b32.xlu0 %v7106_v8, %s10156_s21  ;;  %v7298_v18 = vld [vmem:[#allocation5 + $0x82] sm:$0xff] }
 0x4c5   : > { %v6689_v9 = vpop.f32.mrf.mxu1  ;;  %v6903_v2 = vld [vmem:[#allocation5 + $0x100] sm:$0xff] }
 0x4c6   : > { %v6956_v10 = vadd.f32 %v6891_v21, %v6689_v9 }
 0x4c7   : > { %v9549_v39 = vpop.f32.mrf.mxu1  ;;  %v7107_v12 = vld [vmem:[#allocation5 + $0x89] sm:$0xff] }
 0x4c8   : > { %7021 = vst.msk [vmem:[#allocation5 + $0xa0] sm:$0xff] %vm5352_vm4, %v6956_v10  ;;  %7370 = vrot.lane.b32.xlu0 %v7298_v18, %s10158_s22  ;;  %7180 = vrot.lane.b32.xlu1 %v7107_v12, %s10156_s21  ;;  %v7299_v49 = vld [vmem:[#allocation5 + $0x8a] sm:$0xff]  ;;  %v7066_v39 = vld [vmem:[#allocation5] sm:$0xff] }
 0x4c9   : > { %v6692_v16 = vpop.f32.mrf.mxu1 }
 0x4ca   : > { %v6957_v19 = vadd.f32 %v6892_v17, %v6692_v16  ;;  %v6904_v16 = vld [vmem:[#allocation5 + $0x108] sm:$0xff] }
 0x4cb   : > { %v9550_v23 = vpop.f32.mrf.mxu1 }
 0x4cc   : > { %7022 = vst.msk [vmem:[#allocation5 + $0xa8] sm:$0xff] %vm5352_vm4, %v6957_v19  ;;  %7372 = vrot.lane.b32.xlu1 %v7299_v49, %s10158_s22  ;;  %v12122_v19 = vld [vmem:[%s12502_s5] ss:$0 sm:$0xff] }
 0x4cd   : > { %v6697_v25 = vpop.f32.mrf.mxu1 }
 0x4ce   : > { %v6958_v38 = vadd.f32 %v6893_v37, %v6697_v25 }
 0x4cf   : > { %v9553_v14 = vpop.f32.mrf.mxu1 }
 0x4d0   : > { %7023 = vst.msk [vmem:[#allocation5 + $0xb0] sm:$0xff] %vm5352_vm4, %v6958_v38  ;;  %v12128_v14 = vld [vmem:[%s12503_s6] ss:$0 sm:$0xff] }
 0x4d1   : > { %v6700_v26 = vpop.f32.mrf.mxu1 }
 0x4d2   : > { %v6959_v30 = vadd.f32 %v6894_v28, %v6700_v26  ;;  %v7067_v26 = vld [vmem:[#allocation5 + $0x8] sm:$0xff] }
 0x4d3   : > { %v9554_v32 = vpop.f32.mrf.mxu1  ;;  %v7108_v40 = vld [vmem:[#allocation5 + $0xa1] sm:$0xff] }
 0x4d4   : > { %7024 = vst.msk [vmem:[#allocation5 + $0xb8] sm:$0xff] %vm5352_vm4, %v6959_v30  ;;  %7182 = vrot.lane.b32.xlu0 %v7108_v40, %s10156_s21  ;;  %v7300_v59 = vld [vmem:[#allocation5 + $0xa2] sm:$0xff]  ;;  %v6905_v40 = vld [vmem:[#allocation5 + $0x110] sm:$0xff] }
 0x4d5   : > { %v6705_v52 = vpop.f32.mrf.mxu1 }
 0x4d6   : > { %v6960_v41 = vadd.f32 %v6895_v44, %v6705_v52 }
 0x4d7   : > { %v9557_v42 = vpop.f32.mrf.mxu1  ;;  %v7109_v43 = vld [vmem:[#allocation5 + $0xa9] sm:$0xff] }
 0x4d8   : > { %7025 = vst.msk [vmem:[#allocation5 + $0xc0] sm:$0xff] %vm5352_vm4, %v6960_v41  ;;  %7374 = vrot.lane.b32.xlu0 %v7300_v59, %s10158_s22  ;;  %7184 = vrot.lane.b32.xlu1 %v7109_v43, %s10156_s21  ;;  %v7301_v11 = vld [vmem:[#allocation5 + $0xaa] sm:$0xff] }
 0x4d9   : > { %v6708_v63 = vpop.f32.mrf.mxu1 }
 0x4da   : > { %v6961_v3 = vadd.f32 %v6896_v46, %v6708_v63 }
 0x4db   : > { %v9558_v34 = vpop.f32.mrf.mxu1 }
 0x4dc   : > { %7026 = vst.msk [vmem:[#allocation5 + $0xc8] sm:$0xff] %vm5352_vm4, %v6961_v3  ;;  %7376 = vrot.lane.b32.xlu1 %v7301_v11, %s10158_s22  ;;  %v6906_v3 = vld [vmem:[#allocation5 + $0x118] sm:$0xff] }
 0x4dd   : > { %v6713_v15 = vpop.f32.mrf.mxu1 }
 0x4de   : > { %v6962_v45 = vadd.f32 %v6897_v33, %v6713_v15 }
 0x4df   : > { %v9561_v47 = vpop.f32.mrf.mxu1 }
 0x4e0   : > { %7027 = vst.msk [vmem:[#allocation5 + $0xd0] sm:$0xff] %vm5352_vm4, %v6962_v45 }
 0x4e1   : > { %v6716_v13 = vpop.f32.mrf.mxu1 }
 0x4e2   : > { %v6963_v54 = vadd.f32 %v6898_v0, %v6716_v13  ;;  %v6907_v13 = vld [vmem:[#allocation5 + $0x120] sm:$0xff] }
 0x4e3   : > { %v9562_v36 = vpop.f32.mrf.mxu1  ;;  %v7110_v29 = vld [vmem:[#allocation5 + $0xc1] sm:$0xff] }
 0x4e4   : > { %7028 = vst.msk [vmem:[#allocation5 + $0xd8] sm:$0xff] %vm5352_vm4, %v6963_v54  ;;  %7186 = vrot.lane.b32.xlu0 %v7110_v29, %s10156_s21  ;;  %v7302_v6 = vld [vmem:[#allocation5 + $0xc2] sm:$0xff] }
 0x4e5   : > { %v6721_v35 = vpop.f32.mrf.mxu1 }
 0x4e6   : > { %v6964_v31 = vadd.f32 %v6899_v50, %v6721_v35  ;;  %v7068_v50 = vld [vmem:[#allocation5 + $0x20] sm:$0xff] }
 0x4e7   : > { %v9565_v48 = vpop.f32.mrf.mxu1  ;;  %v7111_v27 = vld [vmem:[#allocation5 + $0xc9] sm:$0xff] }
 0x4e8   : > { %7029 = vst.msk [vmem:[#allocation5 + $0xe0] sm:$0xff] %vm5352_vm4, %v6964_v31  ;;  %7378 = vrot.lane.b32.xlu0 %v7302_v6, %s10158_s22  ;;  %7188 = vrot.lane.b32.xlu1 %v7111_v27, %s10156_s21  ;;  %v7303_v56 = vld [vmem:[#allocation5 + $0xca] sm:$0xff] }
 0x4e9   : > { %v6724_v53 = vpop.f32.mrf.mxu1  ;;  %v6908_v6 = vld [vmem:[#allocation5 + $0x128] sm:$0xff] }
 0x4ea   : > { %v6965_v1 = vadd.f32 %v6900_v22, %v6724_v53 }
 0x4eb   : > { %v9566_v55 = vpop.f32.mrf.mxu1 }
 0x4ec   : > { %7030 = vst.msk [vmem:[#allocation5 + $0xe8] sm:$0xff] %vm5352_vm4, %v6965_v1  ;;  %7380 = vrot.lane.b32.xlu1 %v7303_v56, %s10158_s22 }
 0x4ed   : > { %v6729_v57 = vpop.f32.mrf.mxu1 }
 0x4ee   : > { %v6966_v62 = vadd.f32 %v6901_v58, %v6729_v57  ;;  %v7069_v57 = vld [vmem:[#allocation5 + $0x28] sm:$0xff] }
 0x4ef   : > { %v9569_v51 = vpop.f32.mrf.mxu1 }
 0x4f0   : > { %7031 = vst.msk [vmem:[#allocation5 + $0xf0] sm:$0xff] %vm5352_vm4, %v6966_v62 }
 0x4f1   : > { %v6732_v20 = vpop.f32.mrf.mxu1 }
 0x4f2   : > { %v6967_v24 = vadd.f32 %v6902_v5, %v6732_v20  ;;  %v6909_v20 = vld [vmem:[#allocation5 + $0x130] sm:$0xff] }
 0x4f3   : > { %v9570_v60 = vpop.f32.mrf.mxu1  ;;  %v7112_v61 = vld [vmem:[#allocation5 + $0xe1] sm:$0xff] }
 0x4f4   : > { %7032 = vst.msk [vmem:[#allocation5 + $0xf8] sm:$0xff] %vm5352_vm4, %v6967_v24  ;;  %7190 = vrot.lane.b32.xlu0 %v7112_v61, %s10156_s21  ;;  %v7304_v21 = vld [vmem:[#allocation5 + $0xe2] sm:$0xff] }
 0x4f5   : > { %v6737_v4 = vpop.f32.mrf.mxu1 }
 0x4f6   : > { %v6968_v7 = vadd.f32 %v6903_v2, %v6737_v4  ;;  %v7163_v8 = vpop.permute.xlu0 %7162 }
 0x4f7   : > { %v9573_v9 = vpop.f32.mrf.mxu1  ;;  %v7113_v10 = vld [vmem:[#allocation5 + $0xe9] sm:$0xff]  ;;  %v7258_v18 = vadd.f32 %v7163_v8, %v7066_v39 }
 0x4f8   : > { %7033 = vst.msk [vmem:[#allocation5 + $0x100] sm:$0xff] %vm5352_vm4, %v6968_v7  ;;  %7382 = vrot.lane.b32.xlu0 %v7304_v21, %s10158_s22  ;;  %7192 = vrot.lane.b32.xlu1 %v7113_v10, %s10156_s21  ;;  %v7305_v38 = vld [vmem:[#allocation5 + $0xea] sm:$0xff]  ;;  %v6910_v10 = vld [vmem:[#allocation5 + $0x138] sm:$0xff] }
 0x4f9   : > { %v6740_v12 = vpop.f32.mrf.mxu1 }
 0x4fa   : > { %v6969_v17 = vadd.f32 %v6904_v16, %v6740_v12  ;;  %v7355_v23 = vpop.permute.xlu0 %7354  ;;  %v7165_v49 = vpop.permute.xlu1 %7164 }
 0x4fb   : > { %v7450_v25 = vadd.f32 %v7355_v23, %v7258_v18  ;;  %v9574_v37 = vpop.f32.mrf.mxu1  ;;  %v7259_v30 = vadd.f32 %v7165_v49, %v7067_v26 }
 0x4fc   : > { %7034 = vst.msk [vmem:[#allocation5 + $0x108] sm:$0xff] %vm5352_vm4, %v6969_v17  ;;  %7384 = vrot.lane.b32.xlu1 %v7305_v38, %s10158_s22  ;;  %v6911_v37 = vld [vmem:[#allocation5 + $0x140] sm:$0xff] }
 0x4fd   : > { %v7489_v28 = vmul.f32 %v12122_v19, %v7450_v25  ;;  %v6745_v32 = vpop.f32.mrf.mxu1 }
 0x4fe   : > { %v6970_v52 = vadd.f32 %v6905_v40, %v6745_v32  ;;  %v7357_v44 = vpop.permute.xlu1 %7356  ;;  %v7070_v40 = vld [vmem:[#allocation5 + $0x40] sm:$0xff] }
 0x4ff   : > { %v12133_v41 = vadd.f32 %v12128_v14, %v7489_v28  ;;  %v7451_v42 = vadd.f32 %v7357_v44, %v7259_v30  ;;  %v9577_v59 = vpop.f32.mrf.mxu1 }
 0x500   : > { %7035 = vst.msk [vmem:[#allocation5 + $0x110] sm:$0xff] %vm5352_vm4, %v6970_v52 }
 0x501   : > { %v8530_v43 = vmul.f32 -1.442695, %v12133_v41  ;;  %v7490_v63 = vmul.f32 %v12122_v19, %v7451_v42  ;;  %v6748_v46 = vpop.f32.mrf.mxu1  ;;  %v6912_v42 = vld [vmem:[#allocation5 + $0x148] sm:$0xff] }
 0x502   : > { %v6971_v34 = vadd.f32 %v6906_v3, %v6748_v46 }
 0x503   : > { %9995 = vpow2.f32 %v8530_v43  ;;  %v12139_v11 = vadd.f32 %v12128_v14, %v7490_v63  ;;  %v9578_v15 = vpop.f32.mrf.mxu1  ;;  %v7114_v33 = vld [vmem:[#allocation5 + $0x101] sm:$0xff] }
 0x504   : > { %7036 = vst.msk [vmem:[#allocation5 + $0x118] sm:$0xff] %vm5352_vm4, %v6971_v34  ;;  %7194 = vrot.lane.b32.xlu0 %v7114_v33, %s10156_s21  ;;  %v7306_v29 = vld [vmem:[#allocation5 + $0x102] sm:$0xff] }
 0x505   : > { %v8531_v45 = vmul.f32 -1.442695, %v12139_v11  ;;  %v6753_v47 = vpop.f32.mrf.mxu1  ;;  %v7071_v15 = vld [vmem:[#allocation5 + $0x48] sm:$0xff] }
 0x506   : > { %v6972_v0 = vadd.f32 %v6907_v13, %v6753_v47  ;;  %v7167_v54 = vpop.permute.xlu0 %7166  ;;  %v6913_v13 = vld [vmem:[#allocation5 + $0x150] sm:$0xff] }
 0x507   : > { %9997 = vpow2.f32 %v8531_v45  ;;  %v9581_v36 = vpop.f32.mrf.mxu1  ;;  %v7115_v35 = vld [vmem:[#allocation5 + $0x109] sm:$0xff]  ;;  %v7260_v31 = vadd.f32 %v7167_v54, %v7068_v50 }
 0x508   : > { %7037 = vst.msk [vmem:[#allocation5 + $0x120] sm:$0xff] %vm5352_vm4, %v6972_v0  ;;  %7386 = vrot.lane.b32.xlu0 %v7306_v29, %s10158_s22  ;;  %7196 = vrot.lane.b32.xlu1 %v7115_v35, %s10156_s21  ;;  %v7307_v56 = vld [vmem:[#allocation5 + $0x10a] sm:$0xff] }
 0x509   : > { %v6756_v48 = vpop.f32.mrf.mxu1 }
 0x50a   : > { %v6973_v27 = vadd.f32 %v6908_v6, %v6756_v48  ;;  %v7359_v53 = vpop.permute.xlu0 %7358  ;;  %v7169_v22 = vpop.permute.xlu1 %7168 }
 0x50b   : > { %v7452_v1 = vadd.f32 %v7359_v53, %v7260_v31  ;;  %v9582_v55 = vpop.f32.mrf.mxu1  ;;  %v7261_v62 = vadd.f32 %v7169_v22, %v7069_v57  ;;  %v7784_v31 = vld [vmem:[%s12171_s10] sm:$0xff] }
 0x50c   : > { %7038 = vst.msk [vmem:[#allocation5 + $0x128] sm:$0xff] %vm5352_vm4, %v6973_v27  ;;  %7388 = vrot.lane.b32.xlu1 %v7307_v56, %s10158_s22 }
 0x50d   : > { %v7491_v58 = vmul.f32 %v12122_v19, %v7452_v1  ;;  %v6761_v51 = vpop.f32.mrf.mxu1  ;;  %v6914_v1 = vld [vmem:[#allocation5 + $0x158] sm:$0xff] }
 0x50e   : > { %v6974_v5 = vadd.f32 %v6909_v20, %v6761_v51  ;;  %v7361_v24 = vpop.permute.xlu1 %7360  ;;  %v7785_v20 = vld [vmem:[%s12171_s10 + $0x8] sm:$0xff] }
 0x50f   : > { %v12151_v60 = vadd.f32 %v12128_v14, %v7491_v58  ;;  %v7453_v61 = vadd.f32 %v7361_v24, %v7261_v62  ;;  %v9585_v4 = vpop.f32.mrf.mxu1 }
 0x510   : > { %v9996_v2 = vpop.eup %9995  ;;  %7039 = vst.msk [vmem:[#allocation5 + $0x130] sm:$0xff] %vm5352_vm4, %v6974_v5 }
 0x511   : > { %v7656_v7 = vadd.f32 1.0, %v9996_v2  ;;  %v8532_v8 = vmul.f32 -1.442695, %v12151_v60  ;;  %v7492_v9 = vmul.f32 %v12122_v19, %v7453_v61  ;;  %v6764_v21 = vpop.f32.mrf.mxu1  ;;  %v6915_v2 = vld [vmem:[#allocation5 + $0x160] sm:$0xff] }
 0x512   : > { %v6975_v39 = vadd.f32 %v6910_v10, %v6764_v21 }
 0x513   : > { %9999 = vrcp.f32 %v7656_v7  ;;  %v12157_v18 = vadd.f32 %v12128_v14, %v7492_v9  ;;  %v9586_v12 = vpop.f32.mrf.mxu1  ;;  %v7116_v16 = vld [vmem:[#allocation5 + $0x121] sm:$0xff] }
 0x514   : > { %v9998_v17 = vpop.eup %9997  ;;  %10001 = vpow2.f32 %v8532_v8  ;;  %7040 = vst.msk [vmem:[#allocation5 + $0x138] sm:$0xff] %vm5352_vm4, %v6975_v39  ;;  %7198 = vrot.lane.b32.xlu0 %v7116_v16, %s10156_s21  ;;  %v7308_v30 = vld [vmem:[#allocation5 + $0x122] sm:$0xff] }
 0x515   : > { %v7657_v23 = vadd.f32 1.0, %v9998_v17  ;;  %v8533_v49 = vmul.f32 -1.442695, %v12157_v18  ;;  %v6769_v25 = vpop.f32.mrf.mxu1  ;;  %v7072_v16 = vld [vmem:[#allocation5 + $0x60] sm:$0xff] }
 0x516   : > { %v6976_v38 = vadd.f32 %v6911_v37, %v6769_v25  ;;  %v7171_v26 = vpop.permute.xlu0 %7170 }
 0x517   : > { %10003 = vrcp.f32 %v7657_v23  ;;  %v9589_v28 = vpop.f32.mrf.mxu1  ;;  %v7117_v32 = vld [vmem:[#allocation5 + $0x129] sm:$0xff]  ;;  %v7262_v52 = vadd.f32 %v7171_v26, %v7070_v40 }
 0x518   : > { %10005 = vpow2.f32 %v8533_v49  ;;  %7041 = vst.msk [vmem:[#allocation5 + $0x140] sm:$0xff] %vm5352_vm4, %v6976_v38  ;;  %7390 = vrot.lane.b32.xlu0 %v7308_v30, %s10158_s22  ;;  %7200 = vrot.lane.b32.xlu1 %v7117_v32, %s10156_s21  ;;  %v7309_v34 = vld [vmem:[#allocation5 + $0x12a] sm:$0xff] }
 0x519   : > { %v6772_v44 = vpop.f32.mrf.mxu1  ;;  %v6916_v23 = vld [vmem:[#allocation5 + $0x168] sm:$0xff] }
 0x51a   : > { %v6977_v59 = vadd.f32 %v6912_v42, %v6772_v44  ;;  %v7363_v43 = vpop.permute.xlu0 %7362  ;;  %v7173_v63 = vpop.permute.xlu1 %7172  ;;  %v7073_v30 = vld [vmem:[#allocation5 + $0x68] sm:$0xff]  ;;  %v6917_v44 = vld [vmem:[#allocation5 + $0x170] sm:$0xff] }
 0x51b   : > { %v7454_v46 = vadd.f32 %v7363_v43, %v7262_v52  ;;  %v9590_v3 = vpop.f32.mrf.mxu1  ;;  %v7263_v45 = vadd.f32 %v7173_v63, %v7071_v15  ;;  %v7786_v15 = vld [vmem:[%s12171_s10 + $0x10] sm:$0xff] }
 0x51c   : > { %7042 = vst.msk [vmem:[#allocation5 + $0x148] sm:$0xff] %vm5352_vm4, %v6977_v59  ;;  %7392 = vrot.lane.b32.xlu1 %v7309_v34, %s10158_s22 }
 0x51d   : > { %v7493_v33 = vmul.f32 %v12122_v19, %v7454_v46  ;;  %v6777_v47 = vpop.f32.mrf.mxu1 }
 0x51e   : > { %v6978_v0 = vadd.f32 %v6913_v13, %v6777_v47  ;;  %v7365_v54 = vpop.permute.xlu1 %7364 }
 0x51f   : > { %v12175_v36 = vadd.f32 %v12128_v14, %v7493_v33  ;;  %v7455_v29 = vadd.f32 %v7365_v54, %v7263_v45  ;;  %v9593_v35 = vpop.f32.mrf.mxu1 }
 0x520   : > { %v10000_v50 = vpop.eup %9999  ;;  %7043 = vst.msk [vmem:[#allocation5 + $0x150] sm:$0xff] %vm5352_vm4, %v6978_v0  ;;  %v6918_v0 = vld [vmem:[#allocation5 + $0x178] sm:$0xff] }
 0x521   : > { %v10002_v48 = vpop.eup %10001  ;;  %v7752_v6 = vmul.f32 %v10000_v50, %v12133_v41  ;;  %v8534_v27 = vmul.f32 -1.442695, %v12175_v36  ;;  %v7494_v53 = vmul.f32 %v12122_v19, %v7455_v29  ;;  %v6780_v22 = vpop.f32.mrf.mxu1 }
 0x522   : > { %v7658_v55 = vadd.f32 1.0, %v10002_v48  ;;  %v6979_v56 = vadd.f32 %v6914_v1, %v6780_v22 }
 0x523   : > { %v7816_v57 = vadd.f32 %v7784_v31, %v7752_v6  ;;  %10007 = vpow2.f32 %v8534_v27  ;;  %v12189_v58 = vadd.f32 %v12128_v14, %v7494_v53  ;;  %v9594_v41 = vpop.f32.mrf.mxu1  ;;  %v7118_v62 = vld [vmem:[#allocation5 + $0x141] sm:$0xff]  ;;  %v7787_v53 = vld [vmem:[%s12171_s10 + $0x18] sm:$0xff] }
 0x524   : > { %v10004_v51 = vpop.eup %10003  ;;  %10009 = vrcp.f32 %v7658_v55  ;;  %7044 = vst.msk [vmem:[#allocation5 + $0x158] sm:$0xff] %vm5352_vm4, %v6979_v56  ;;  %7202 = vrot.lane.b32.xlu0 %v7118_v62, %s10156_s21  ;;  %v7310_v39 = vld [vmem:[#allocation5 + $0x142] sm:$0xff] }
 0x525   : > { %v10006_v5 = vpop.eup %10005  ;;  %7849 = vst.msk [vmem:[%s12186_s13] sm:$0xff] %vm1359_vm3, %v7816_v57  ;;  %v7753_v24 = vmul.f32 %v10004_v51, %v12139_v11  ;;  %v8535_v61 = vmul.f32 -1.442695, %v12189_v58  ;;  %v6785_v4 = vpop.f32.mrf.mxu1  ;;  %v6919_v55 = vld [vmem:[#allocation5 + $0x180] sm:$0xff] }
 0x526   : > { %v7659_v7 = vadd.f32 1.0, %v10006_v5  ;;  %v6980_v8 = vadd.f32 %v6915_v2, %v6785_v4  ;;  %v7175_v9 = vpop.permute.xlu0 %7174  ;;  %v6920_v2 = vld [vmem:[#allocation5 + $0x188] sm:$0xff] }
 0x527   : > { %v7817_v21 = vadd.f32 %v7785_v20, %v7753_v24  ;;  %10011 = vpow2.f32 %v8535_v61  ;;  %v9597_v10 = vpop.f32.mrf.mxu1  ;;  %v7119_v12 = vld [vmem:[#allocation5 + $0x149] sm:$0xff]  ;;  %v7264_v11 = vadd.f32 %v7175_v9, %v7072_v16  ;;  %v7074_v24 = vld [vmem:[#allocation5 + $0x80] sm:$0xff] }
 0x528   : > { %10013 = vrcp.f32 %v7659_v7  ;;  %7045 = vst.msk [vmem:[#allocation5 + $0x160] sm:$0xff] %vm5352_vm4, %v6980_v8  ;;  %7394 = vrot.lane.b32.xlu0 %v7310_v39, %s10158_s22  ;;  %7204 = vrot.lane.b32.xlu1 %v7119_v12, %s10156_s21  ;;  %v7311_v28 = vld [vmem:[#allocation5 + $0x14a] sm:$0xff] }
 0x529   : > { %7850 = vst.msk [vmem:[%s12186_s13 + $0x8] sm:$0xff] %vm1359_vm3, %v7817_v21  ;;  %v6788_v17 = vpop.f32.mrf.mxu1  ;;  %v7075_v39 = vld [vmem:[#allocation5 + $0x88] sm:$0xff] }
 0x52a   : > { %v6981_v49 = vadd.f32 %v6916_v23, %v6788_v17  ;;  %v7367_v25 = vpop.permute.xlu0 %7366  ;;  %v7177_v37 = vpop.permute.xlu1 %7176  ;;  %v6921_v17 = vld [vmem:[#allocation5 + $0x190] sm:$0xff] }
 0x52b   : > { %v7456_v38 = vadd.f32 %v7367_v25, %v7264_v11  ;;  %v9598_v26 = vpop.f32.mrf.mxu1  ;;  %v7265_v40 = vadd.f32 %v7177_v37, %v7073_v30 }
 0x52c   : > { %7046 = vst.msk [vmem:[#allocation5 + $0x168] sm:$0xff] %vm5352_vm4, %v6981_v49  ;;  %7396 = vrot.lane.b32.xlu1 %v7311_v28, %s10158_s22  ;;  %v7788_v28 = vld [vmem:[%s12171_s10 + $0x20] sm:$0xff] }
 0x52d   : > { %v7495_v32 = vmul.f32 %v12122_v19, %v7456_v38  ;;  %v6793_v52 = vpop.f32.mrf.mxu1 }
 0x52e   : > { %v6982_v42 = vadd.f32 %v6917_v44, %v6793_v52  ;;  %v7369_v59 = vpop.permute.xlu1 %7368 }
 0x52f   : > { %v12207_v43 = vadd.f32 %v12128_v14, %v7495_v32  ;;  %v7457_v63 = vadd.f32 %v7369_v59, %v7265_v40  ;;  %v9601_v46 = vpop.f32.mrf.mxu1 }
 0x530   : > { %v10008_v3 = vpop.eup %10007  ;;  %7047 = vst.msk [vmem:[#allocation5 + $0x170] sm:$0xff] %vm5352_vm4, %v6982_v42  ;;  %v6922_v42 = vld [vmem:[#allocation5 + $0x198] sm:$0xff] }
 0x531   : > { %v10010_v34 = vpop.eup %10009  ;;  %v7660_v33 = vadd.f32 1.0, %v10008_v3  ;;  %v8536_v45 = vmul.f32 -1.442695, %v12207_v43  ;;  %v7496_v47 = vmul.f32 %v12122_v19, %v7457_v63  ;;  %v6796_v13 = vpop.f32.mrf.mxu1 }
 0x532   : > { %v7754_v54 = vmul.f32 %v10010_v34, %v12151_v60  ;;  %v6983_v29 = vadd.f32 %v6918_v0, %v6796_v13 }
 0x533   : > { %10015 = vrcp.f32 %v7660_v33  ;;  %v12215_v35 = vadd.f32 %v12128_v14, %v7496_v47  ;;  %v9602_v50 = vpop.f32.mrf.mxu1  ;;  %v7120_v31 = vld [vmem:[#allocation5 + $0x161] sm:$0xff] }
 0x534   : > { %v10012_v48 = vpop.eup %10011  ;;  %v7818_v6 = vadd.f32 %v7786_v15, %v7754_v54  ;;  %10017 = vpow2.f32 %v8536_v45  ;;  %7048 = vst.msk [vmem:[#allocation5 + $0x178] sm:$0xff] %vm5352_vm4, %v6983_v29  ;;  %7206 = vrot.lane.b32.xlu0 %v7120_v31, %s10156_s21  ;;  %v7312_v51 = vld [vmem:[#allocation5 + $0x162] sm:$0xff] }
 0x535   : > { %v10014_v27 = vpop.eup %10013  ;;  %v7661_v22 = vadd.f32 1.0, %v10012_v48  ;;  %v8537_v60 = vmul.f32 -1.442695, %v12215_v35  ;;  %v6801_v1 = vpop.f32.mrf.mxu1  ;;  %v7789_v45 = vld [vmem:[%s12171_s10 + $0x28] sm:$0xff] }
 0x536   : > { %7851 = vst.msk [vmem:[%s12186_s13 + $0x10] sm:$0xff] %vm1359_vm3, %v7818_v6  ;;  %v7755_v56 = vmul.f32 %v10014_v27, %v12157_v18  ;;  %v6984_v57 = vadd.f32 %v6919_v55, %v6801_v1  ;;  %v7179_v41 = vpop.permute.xlu0 %7178  ;;  %v6923_v54 = vld [vmem:[#allocation5 + $0x1a0] sm:$0xff]  ;;  %v6924_v1 = vld [vmem:[#allocation5 + $0x1a8] sm:$0xff] }
 0x537   : > { %10019 = vrcp.f32 %v7661_v22  ;;  %v9605_v62 = vpop.f32.mrf.mxu1  ;;  %v7121_v20 = vld [vmem:[#allocation5 + $0x169] sm:$0xff]  ;;  %v7266_v61 = vadd.f32 %v7179_v41, %v7074_v24  ;;  %v7076_v22 = vld [vmem:[#allocation5 + $0xa0] sm:$0xff] }
 0x538   : > { %v7819_v5 = vadd.f32 %v7787_v53, %v7755_v56  ;;  %10021 = vpow2.f32 %v8537_v60  ;;  %7049 = vst.msk [vmem:[#allocation5 + $0x180] sm:$0xff] %vm5352_vm4, %v6984_v57  ;;  %7398 = vrot.lane.b32.xlu0 %v7312_v51, %s10158_s22  ;;  %7208 = vrot.lane.b32.xlu1 %v7121_v20, %s10156_s21  ;;  %v7313_v10 = vld [vmem:[#allocation5 + $0x16a] sm:$0xff] }
 0x539   : > { %v6804_v4 = vpop.f32.mrf.mxu1  ;;  %v7077_v20 = vld [vmem:[#allocation5 + $0xa8] sm:$0xff] }
 0x53a   : > { %7852 = vst.msk [vmem:[%s12186_s13 + $0x18] sm:$0xff] %vm1359_vm3, %v7819_v5  ;;  %v6985_v18 = vadd.f32 %v6920_v2, %v6804_v4  ;;  %v7371_v7 = vpop.permute.xlu0 %7370  ;;  %v7181_v8 = vpop.permute.xlu1 %7180  ;;  %v6925_v4 = vld [vmem:[#allocation5 + $0x1b0] sm:$0xff] }
 0x53b   : > { %v7458_v9 = vadd.f32 %v7371_v7, %v7266_v61  ;;  %v9606_v21 = vpop.f32.mrf.mxu1  ;;  %v7267_v16 = vadd.f32 %v7181_v8, %v7075_v39  ;;  %v7790_v39 = vld [vmem:[%s12171_s10 + $0x30] sm:$0xff] }
 0x53c   : > { %7050 = vst.msk [vmem:[#allocation5 + $0x188] sm:$0xff] %vm5352_vm4, %v6985_v18  ;;  %7400 = vrot.lane.b32.xlu1 %v7313_v10, %s10158_s22 }
 0x53d   : > { %v7497_v12 = vmul.f32 %v12122_v19, %v7458_v9  ;;  %v6809_v11 = vpop.f32.mrf.mxu1 }
 0x53e   : > { %v6986_v23 = vadd.f32 %v6921_v17, %v6809_v11  ;;  %v7373_v49 = vpop.permute.xlu1 %7372 }
 0x53f   : > { %v12233_v25 = vadd.f32 %v12128_v14, %v7497_v12  ;;  %v7459_v37 = vadd.f32 %v7373_v49, %v7267_v16  ;;  %v9609_v38 = vpop.f32.mrf.mxu1 }
 0x540   : > { %v10016_v26 = vpop.eup %10015  ;;  %7051 = vst.msk [vmem:[#allocation5 + $0x190] sm:$0xff] %vm5352_vm4, %v6986_v23  ;;  %v6926_v23 = vld [vmem:[#allocation5 + $0x1b8] sm:$0xff] }
 0x541   : > { %v10018_v30 = vpop.eup %10017  ;;  %v7756_v32 = vmul.f32 %v10016_v26, %v12175_v36  ;;  %v8538_v40 = vmul.f32 -1.442695, %v12233_v25  ;;  %v7498_v52 = vmul.f32 %v12122_v19, %v7459_v37  ;;  %v6812_v44 = vpop.f32.mrf.mxu1 }
 0x542   : > { %v7662_v59 = vadd.f32 1.0, %v10018_v30  ;;  %v6987_v63 = vadd.f32 %v6922_v42, %v6812_v44 }
 0x543   : > { %v7820_v46 = vadd.f32 %v7788_v28, %v7756_v32  ;;  %10023 = vpow2.f32 %v8538_v40  ;;  %v12241_v3 = vadd.f32 %v12128_v14, %v7498_v52  ;;  %v9610_v34 = vpop.f32.mrf.mxu1  ;;  %v7122_v15 = vld [vmem:[#allocation5 + $0x181] sm:$0xff]  ;;  %v7791_v52 = vld [vmem:[%s12171_s10 + $0x38] sm:$0xff] }
 0x544   : > { %v10020_v33 = vpop.eup %10019  ;;  %10025 = vrcp.f32 %v7662_v59  ;;  %7052 = vst.msk [vmem:[#allocation5 + $0x198] sm:$0xff] %vm5352_vm4, %v6987_v63  ;;  %7210 = vrot.lane.b32.xlu0 %v7122_v15, %s10156_s21  ;;  %v7314_v27 = vld [vmem:[#allocation5 + $0x182] sm:$0xff] }
 0x545   : > { %v10022_v36 = vpop.eup %10021  ;;  %7853 = vst.msk [vmem:[%s12186_s13 + $0x20] sm:$0xff] %vm1359_vm3, %v7820_v46  ;;  %v7757_v47 = vmul.f32 %v10020_v33, %v12189_v58  ;;  %v8539_v13 = vmul.f32 -1.442695, %v12241_v3  ;;  %v6817_v0 = vpop.f32.mrf.mxu1  ;;  %v6927_v59 = vld [vmem:[#allocation5 + $0x1c0] sm:$0xff] }
 0x546   : > { %v7663_v29 = vadd.f32 1.0, %v10022_v36  ;;  %v6988_v50 = vadd.f32 %v6923_v54, %v6817_v0  ;;  %v7183_v31 = vpop.permute.xlu0 %7182  ;;  %v6928_v54 = vld [vmem:[#allocation5 + $0x1c8] sm:$0xff] }
 0x547   : > { %v7821_v48 = vadd.f32 %v7789_v45, %v7757_v47  ;;  %10027 = vpow2.f32 %v8539_v13  ;;  %v9613_v6 = vpop.f32.mrf.mxu1  ;;  %v7123_v53 = vld [vmem:[#allocation5 + $0x189] sm:$0xff]  ;;  %v7268_v58 = vadd.f32 %v7183_v31, %v7076_v22  ;;  %v7078_v47 = vld [vmem:[#allocation5 + $0xc0] sm:$0xff] }
 0x548   : > { %10029 = vrcp.f32 %v7663_v29  ;;  %7053 = vst.msk [vmem:[#allocation5 + $0x1a0] sm:$0xff] %vm5352_vm4, %v6988_v50  ;;  %7402 = vrot.lane.b32.xlu0 %v7314_v27, %s10158_s22  ;;  %7212 = vrot.lane.b32.xlu1 %v7123_v53, %s10156_s21  ;;  %v7315_v51 = vld [vmem:[#allocation5 + $0x18a] sm:$0xff] }
 0x549   : > { %7854 = vst.msk [vmem:[%s12186_s13 + $0x28] sm:$0xff] %vm1359_vm3, %v7821_v48  ;;  %v6820_v60 = vpop.f32.mrf.mxu1  ;;  %v7079_v27 = vld [vmem:[#allocation5 + $0xc8] sm:$0xff] }
 0x54a   : > { %v6989_v55 = vadd.f32 %v6924_v1, %v6820_v60  ;;  %v7375_v56 = vpop.permute.xlu0 %7374  ;;  %v7185_v57 = vpop.permute.xlu1 %7184  ;;  %v6929_v60 = vld [vmem:[#allocation5 + $0x1d0] sm:$0xff] }
 0x54b   : > { %v7460_v41 = vadd.f32 %v7375_v56, %v7268_v58  ;;  %v9614_v62 = vpop.f32.mrf.mxu1  ;;  %v7269_v24 = vadd.f32 %v7185_v57, %v7077_v20 }
 0x54c   : > { %7054 = vst.msk [vmem:[#allocation5 + $0x1a8] sm:$0xff] %vm5352_vm4, %v6989_v55  ;;  %7404 = vrot.lane.b32.xlu1 %v7315_v51, %s10158_s22  ;;  %v7792_v51 = vld [vmem:[%s12171_s10 + $0x40] sm:$0xff] }
 0x54d   : > { %v7499_v5 = vmul.f32 %v12122_v19, %v7460_v41  ;;  %v6825_v61 = vpop.f32.mrf.mxu1 }
 0x54e   : > { %v6990_v2 = vadd.f32 %v6925_v4, %v6825_v61  ;;  %v7377_v18 = vpop.permute.xlu1 %7376 }
 0x54f   : > { %v12259_v7 = vadd.f32 %v12128_v14, %v7499_v5  ;;  %v7461_v8 = vadd.f32 %v7377_v18, %v7269_v24  ;;  %v9617_v9 = vpop.f32.mrf.mxu1 }
 0x550   : > { %v10024_v21 = vpop.eup %10023  ;;  %7055 = vst.msk [vmem:[#allocation5 + $0x1b0] sm:$0xff] %vm5352_vm4, %v6990_v2  ;;  %v6930_v2 = vld [vmem:[#allocation5 + $0x1d8] sm:$0xff] }
 0x551   : > { %v10026_v10 = vpop.eup %10025  ;;  %v7664_v12 = vadd.f32 1.0, %v10024_v21  ;;  %v8540_v16 = vmul.f32 -1.442695, %v12259_v7  ;;  %v7500_v11 = vmul.f32 %v12122_v19, %v7461_v8  ;;  %v6828_v17 = vpop.f32.mrf.mxu1 }
 0x552   : > { %v7758_v49 = vmul.f32 %v10026_v10, %v12207_v43  ;;  %v6991_v37 = vadd.f32 %v6926_v23, %v6828_v17 }
 0x553   : > { %10031 = vrcp.f32 %v7664_v12  ;;  %v12267_v38 = vadd.f32 %v12128_v14, %v7500_v11  ;;  %v9618_v26 = vpop.f32.mrf.mxu1  ;;  %v7124_v28 = vld [vmem:[#allocation5 + $0x1a1] sm:$0xff] }
 0x554   : > { %v10028_v30 = vpop.eup %10027  ;;  %v7822_v32 = vadd.f32 %v7790_v39, %v7758_v49  ;;  %10033 = vpow2.f32 %v8540_v16  ;;  %7056 = vst.msk [vmem:[#allocation5 + $0x1b8] sm:$0xff] %vm5352_vm4, %v6991_v37  ;;  %7214 = vrot.lane.b32.xlu0 %v7124_v28, %s10156_s21  ;;  %v7316_v33 = vld [vmem:[#allocation5 + $0x1a2] sm:$0xff] }
 0x555   : > { %v10030_v40 = vpop.eup %10029  ;;  %v7665_v44 = vadd.f32 1.0, %v10028_v30  ;;  %v8541_v43 = vmul.f32 -1.442695, %v12267_v38  ;;  %v6833_v42 = vpop.f32.mrf.mxu1  ;;  %v7793_v16 = vld [vmem:[%s12171_s10 + $0x48] sm:$0xff] }
 0x556   : > { %7855 = vst.msk [vmem:[%s12186_s13 + $0x30] sm:$0xff] %vm1359_vm3, %v7822_v32  ;;  %v7759_v63 = vmul.f32 %v10030_v40, %v12215_v35  ;;  %v6992_v46 = vadd.f32 %v6927_v59, %v6833_v42  ;;  %v7187_v34 = vpop.permute.xlu0 %7186  ;;  %v6931_v49 = vld [vmem:[#allocation5 + $0x1e0] sm:$0xff]  ;;  %v6932_v42 = vld [vmem:[#allocation5 + $0x1e8] sm:$0xff] }
 0x557   : > { %10035 = vrcp.f32 %v7665_v44  ;;  %v9621_v15 = vpop.f32.mrf.mxu1  ;;  %v7125_v45 = vld [vmem:[#allocation5 + $0x1a9] sm:$0xff]  ;;  %v7270_v13 = vadd.f32 %v7187_v34, %v7078_v47  ;;  %v7080_v44 = vld [vmem:[#allocation5 + $0xe0] sm:$0xff] }
 0x558   : > { %v7823_v36 = vadd.f32 %v7791_v52, %v7759_v63  ;;  %10037 = vpow2.f32 %v8541_v43  ;;  %7057 = vst.msk [vmem:[#allocation5 + $0x1c0] sm:$0xff] %vm5352_vm4, %v6992_v46  ;;  %7406 = vrot.lane.b32.xlu0 %v7316_v33, %s10158_s22  ;;  %7216 = vrot.lane.b32.xlu1 %v7125_v45, %s10156_s21  ;;  %v7317_v6 = vld [vmem:[#allocation5 + $0x1aa] sm:$0xff] }
 0x559   : > { %v6836_v0 = vpop.f32.mrf.mxu1  ;;  %v7081_v45 = vld [vmem:[#allocation5 + $0xe8] sm:$0xff] }
 0x55a   : > { %7856 = vst.msk [vmem:[%s12186_s13 + $0x38] sm:$0xff] %vm1359_vm3, %v7823_v36  ;;  %v6993_v35 = vadd.f32 %v6928_v54, %v6836_v0  ;;  %v7379_v29 = vpop.permute.xlu0 %7378  ;;  %v7189_v50 = vpop.permute.xlu1 %7188  ;;  %v6933_v0 = vld [vmem:[#allocation5 + $0x1f0] sm:$0xff] }
 0x55b   : > { %v7462_v31 = vadd.f32 %v7379_v29, %v7270_v13  ;;  %v9622_v48 = vpop.f32.mrf.mxu1  ;;  %v7271_v22 = vadd.f32 %v7189_v50, %v7079_v27  ;;  %v7794_v27 = vld [vmem:[%s12171_s10 + $0x50] sm:$0xff] }
 0x55c   : > { %7058 = vst.msk [vmem:[#allocation5 + $0x1c8] sm:$0xff] %vm5352_vm4, %v6993_v35  ;;  %7408 = vrot.lane.b32.xlu1 %v7317_v6, %s10158_s22 }
 0x55d   : > { %v7501_v53 = vmul.f32 %v12122_v19, %v7462_v31  ;;  %v6841_v58 = vpop.f32.mrf.mxu1 }
 0x55e   : > { %v6994_v1 = vadd.f32 %v6929_v60, %v6841_v58  ;;  %v7381_v55 = vpop.permute.xlu1 %7380 }
 0x55f   : > { %v12285_v56 = vadd.f32 %v12128_v14, %v7501_v53  ;;  %v7463_v57 = vadd.f32 %v7381_v55, %v7271_v22  ;;  %v9625_v41 = vpop.f32.mrf.mxu1 }
 0x560   : > { %v10032_v62 = vpop.eup %10031  ;;  %7059 = vst.msk [vmem:[#allocation5 + $0x1d0] sm:$0xff] %vm5352_vm4, %v6994_v1  ;;  %v6934_v1 = vld [vmem:[#allocation5 + $0x1f8] sm:$0xff] }
 0x561   : > { %v10034_v20 = vpop.eup %10033  ;;  %v7760_v5 = vmul.f32 %v10032_v62, %v12233_v25  ;;  %v8542_v24 = vmul.f32 -1.442695, %v12285_v56  ;;  %v7502_v61 = vmul.f32 %v12122_v19, %v7463_v57  ;;  %v6844_v4 = vpop.f32.mrf.mxu1 }
 0x562   : > { %v7666_v18 = vadd.f32 1.0, %v10034_v20  ;;  %v6995_v8 = vadd.f32 %v6930_v2, %v6844_v4 }
 0x563   : > { %v7824_v9 = vadd.f32 %v7792_v51, %v7760_v5  ;;  %10039 = vpow2.f32 %v8542_v24  ;;  %v12293_v21 = vadd.f32 %v12128_v14, %v7502_v61  ;;  %v9626_v10 = vpop.f32.mrf.mxu1  ;;  %v7126_v39 = vld [vmem:[#allocation5 + $0x1c1] sm:$0xff]  ;;  %v7795_v61 = vld [vmem:[%s12171_s10 + $0x58] sm:$0xff] }
 0x564   : > { %v10036_v12 = vpop.eup %10035  ;;  %10041 = vrcp.f32 %v7666_v18  ;;  %7060 = vst.msk [vmem:[#allocation5 + $0x1d8] sm:$0xff] %vm5352_vm4, %v6995_v8  ;;  %7218 = vrot.lane.b32.xlu0 %v7126_v39, %s10156_s21  ;;  %v7318_v40 = vld [vmem:[#allocation5 + $0x1c2] sm:$0xff] }
 0x565   : > { %v10038_v25 = vpop.eup %10037  ;;  %7857 = vst.msk [vmem:[%s12186_s13 + $0x40] sm:$0xff] %vm1359_vm3, %v7824_v9  ;;  %v7761_v11 = vmul.f32 %v10036_v12, %v12241_v3  ;;  %v8543_v17 = vmul.f32 -1.442695, %v12293_v21  ;;  %v6849_v23 = vpop.f32.mrf.mxu1  ;;  %v6935_v18 = vld [vmem:[#allocation5 + $0x200] sm:$0xff] }
 0x566   : > { %v7667_v37 = vadd.f32 1.0, %v10038_v25  ;;  %v6996_v26 = vadd.f32 %v6931_v49, %v6849_v23  ;;  %v7191_v28 = vpop.permute.xlu0 %7190 }
 0x567   : > { %v7825_v30 = vadd.f32 %v7793_v16, %v7761_v11  ;;  %10043 = vpow2.f32 %v8543_v17  ;;  %v9629_v32 = vpop.f32.mrf.mxu1  ;;  %v7127_v52 = vld [vmem:[#allocation5 + $0x1c9] sm:$0xff]  ;;  %v7272_v3 = vadd.f32 %v7191_v28, %v7080_v44  ;;  %v7082_v11 = vld [vmem:[#allocation5 + $0x100] sm:$0xff] }
 0x568   : > { %10045 = vrcp.f32 %v7667_v37  ;;  %7061 = vst.msk [vmem:[#allocation5 + $0x1e0] sm:$0xff] %vm5352_vm4, %v6996_v26  ;;  %7410 = vrot.lane.b32.xlu0 %v7318_v40, %s10158_s22  ;;  %7220 = vrot.lane.b32.xlu1 %v7127_v52, %s10156_s21  ;;  %v7319_v33 = vld [vmem:[#allocation5 + $0x1ca] sm:$0xff] }
 0x569   : > { %7858 = vst.msk [vmem:[%s12186_s13 + $0x48] sm:$0xff] %vm1359_vm3, %v7825_v30  ;;  %v6852_v43 = vpop.f32.mrf.mxu1  ;;  %v7083_v30 = vld [vmem:[#allocation5 + $0x108] sm:$0xff] }
 0x56a   : > { %v6997_v59 = vadd.f32 %v6932_v42, %v6852_v43  ;;  %v7383_v63 = vpop.permute.xlu0 %7382  ;;  %v7193_v46 = vpop.permute.xlu1 %7192  ;;  %v7796_v42 = vld [vmem:[%s12171_s10 + $0x60] sm:$0xff] }
 0x56b   : > { %v7464_v34 = vadd.f32 %v7383_v63, %v7272_v3  ;;  %v9630_v15 = vpop.f32.mrf.mxu1  ;;  %v7273_v47 = vadd.f32 %v7193_v46, %v7081_v45 }
 0x56c   : > { %7062 = vst.msk [vmem:[#allocation5 + $0x1e8] sm:$0xff] %vm5352_vm4, %v6997_v59  ;;  %7412 = vrot.lane.b32.xlu1 %v7319_v33, %s10158_s22 }
 0x56d   : > { %v7503_v36 = vmul.f32 %v12122_v19, %v7464_v34  ;;  %v6857_v13 = vpop.f32.mrf.mxu1 }
 0x56e   : > { %v6998_v54 = vadd.f32 %v6933_v0, %v6857_v13  ;;  %v7385_v35 = vpop.permute.xlu1 %7384 }
 0x56f   : > { %v12311_v29 = vadd.f32 %v12128_v14, %v7503_v36  ;;  %v7465_v50 = vadd.f32 %v7385_v35, %v7273_v47  ;;  %v9633_v31 = vpop.f32.mrf.mxu1  ;;  %v7797_v47 = vld [vmem:[%s12171_s10 + $0x68] sm:$0xff] }
 0x570   : > { %v10040_v48 = vpop.eup %10039  ;;  %7063 = vst.msk [vmem:[#allocation5 + $0x1f0] sm:$0xff] %vm5352_vm4, %v6998_v54 }
 0x571   : > { %v10042_v6 = vpop.eup %10041  ;;  %v7668_v53 = vadd.f32 1.0, %v10040_v48  ;;  %v8544_v22 = vmul.f32 -1.442695, %v12311_v29  ;;  %v7504_v58 = vmul.f32 %v12122_v19, %v7465_v50  ;;  %v6860_v60 = vpop.f32.mrf.mxu1  ;;  %v7084_v50 = vld [vmem:[#allocation5 + $0x120] sm:$0xff] }
 0x572   : > { %v7762_v55 = vmul.f32 %v10042_v6, %v12259_v7  ;;  %v6999_v57 = vadd.f32 %v6934_v1, %v6860_v60 }
 0x573   : > { %10047 = vrcp.f32 %v7668_v53  ;;  %v12319_v41 = vadd.f32 %v12128_v14, %v7504_v58  ;;  %v9634_v62 = vpop.f32.mrf.mxu1  ;;  %v7128_v51 = vld [vmem:[#allocation5 + $0x1e1] sm:$0xff] }
 0x574   : > { %v10044_v20 = vpop.eup %10043  ;;  %v7826_v5 = vadd.f32 %v7794_v27, %v7762_v55  ;;  %10049 = vpow2.f32 %v8544_v22  ;;  %7064 = vst.msk [vmem:[#allocation5 + $0x1f8] sm:$0xff] %vm5352_vm4, %v6999_v57  ;;  %7222 = vrot.lane.b32.xlu0 %v7128_v51, %s10156_s21  ;;  %v7320_v39 = vld [vmem:[#allocation5 + $0x1e2] sm:$0xff] }
 0x575   : > { %v10046_v24 = vpop.eup %10045  ;;  %v7669_v4 = vadd.f32 1.0, %v10044_v20  ;;  %v8545_v7 = vmul.f32 -1.442695, %v12319_v41  ;;  %v6865_v2 = vpop.f32.mrf.mxu1  ;;  %v7085_v53 = vld [vmem:[#allocation5 + $0x128] sm:$0xff] }
 0x576   : > { %7859 = vst.msk [vmem:[%s12186_s13 + $0x50] sm:$0xff] %vm1359_vm3, %v7826_v5  ;;  %v7763_v8 = vmul.f32 %v10046_v24, %v12267_v38  ;;  %v7000_v9 = vadd.f32 %v6935_v18, %v6865_v2  ;;  %v7195_v10 = vpop.permute.xlu0 %7194  ;;  %v7798_v51 = vld [vmem:[%s12171_s10 + $0x70] sm:$0xff] }
 0x577   : > { %10051 = vrcp.f32 %v7669_v4  ;;  %v7129_v12 = vld [vmem:[#allocation5 + $0x1e9] sm:$0xff]  ;;  %v9637_v16 = vpop.f32.mrf.mxu1  ;;  %v7274_v17 = vadd.f32 %v7195_v10, %v7082_v11  ;;  %v12368_v4 = vld [vmem:[%s12503_s6] ss:$0 sm:$0xff] }
 0x578   : > { %v7827_v25 = vadd.f32 %v7795_v61, %v7763_v8  ;;  %10053 = vpow2.f32 %v8545_v7  ;;  %7065 = vst.msk [vmem:[#allocation5 + $0x200] sm:$0xff] %vm5352_vm4, %v7000_v9  ;;  %7414 = vrot.lane.b32.xlu0 %v7320_v39, %s10158_s22  ;;  %7224 = vrot.lane.b32.xlu1 %v7129_v12, %s10156_s21  ;;  %v7321_v26 = vld [vmem:[#allocation5 + $0x1ea] sm:$0xff]  ;;  %v7086_v16 = vld [vmem:[#allocation5 + $0x140] sm:$0xff] }
 0x579   : > { %v6868_v23 = vpop.f32.mrf.mxu1  ;;  %v7799_v8 = vld [vmem:[%s12171_s10 + $0x78] sm:$0xff] }
 0x57a   : > { %7860 = vst.msk [vmem:[%s12186_s13 + $0x58] sm:$0xff] %vm1359_vm3, %v7827_v25  ;;  %v7387_v38 = vpop.permute.xlu0 %7386  ;;  %v7197_v49 = vpop.permute.xlu1 %7196 }
 0x57b   : > { %v7466_v37 = vadd.f32 %v7387_v38, %v7274_v17  ;;  %v9638_v28 = vpop.f32.mrf.mxu1  ;;  %v7275_v40 = vadd.f32 %v7197_v49, %v7083_v30  ;;  %v7087_v38 = vld [vmem:[#allocation5 + $0x148] sm:$0xff] }
 0x57c   : > { %7416 = vrot.lane.b32.xlu1 %v7321_v26, %s10158_s22 }
 0x57d   : > { %v7505_v32 = vmul.f32 %v12122_v19, %v7466_v37 }
 0x57e   : > { %v7389_v52 = vpop.permute.xlu1 %7388 }
 0x57f   : > { %v12336_v44 = vadd.f32 %v12128_v14, %v7505_v32  ;;  %v7467_v3 = vadd.f32 %v7389_v52, %v7275_v40  ;;  %v7800_v32 = vld [vmem:[%s12171_s10 + $0x80] sm:$0xff] }
 0x580   : > { %v10048_v43 = vpop.eup %10047 }
 0x581   : > { %v10050_v59 = vpop.eup %10049  ;;  %v7764_v63 = vmul.f32 %v10048_v43, %v12285_v56  ;;  %v8546_v46 = vmul.f32 -1.442695, %v12336_v44  ;;  %v7506_v34 = vmul.f32 %v12122_v19, %v7467_v3 }
 0x582   : > { %v7670_v15 = vadd.f32 1.0, %v10050_v59 }
 0x583   : > { %v7828_v33 = vadd.f32 %v7796_v42, %v7764_v63  ;;  %10055 = vpow2.f32 %v8546_v46  ;;  %v12343_v45 = vadd.f32 %v12128_v14, %v7506_v34  ;;  %v7801_v34 = vld [vmem:[%s12171_s10 + $0x88] sm:$0xff] }
 0x584   : > { %v10052_v36 = vpop.eup %10051  ;;  %10057 = vrcp.f32 %v7670_v15 }
 0x585   : > { %v10054_v13 = vpop.eup %10053  ;;  %7861 = vst.msk [vmem:[%s12186_s13 + $0x60] sm:$0xff] %vm1359_vm3, %v7828_v33  ;;  %v7765_v0 = vmul.f32 %v10052_v36, %v12293_v21  ;;  %v8547_v56 = vmul.f32 -1.442695, %v12343_v45  ;;  %v12355_v21 = vld [vmem:[%s12502_s5] ss:$0 sm:$0xff] }
 0x586   : > { %v7671_v54 = vadd.f32 1.0, %v10054_v13  ;;  %v7199_v35 = vpop.permute.xlu0 %7198 }
 0x587   : > { %v7829_v19 = vadd.f32 %v7797_v47, %v7765_v0  ;;  %10059 = vpow2.f32 %v8547_v56  ;;  %v7276_v31 = vadd.f32 %v7199_v35, %v7084_v50  ;;  %v7088_v0 = vld [vmem:[#allocation5 + $0x160] sm:$0xff]  ;;  %v7089_v50 = vld [vmem:[#allocation5 + $0x168] sm:$0xff] }
 0x588   : > { %10061 = vrcp.f32 %v7671_v54 }
 0x589   : > { %7862 = vst.msk [vmem:[%s12186_s13 + $0x68] sm:$0xff] %vm1359_vm3, %v7829_v19 }
 0x58a   : > { %v7391_v48 = vpop.permute.xlu0 %7390  ;;  %v7201_v6 = vpop.permute.xlu1 %7200 }
 0x58b   : > { %v7468_v27 = vadd.f32 %v7391_v48, %v7276_v31  ;;  %v7277_v58 = vadd.f32 %v7201_v6, %v7085_v53 }
 0x58d   : > { %v7507_v22 = vmul.f32 %v12355_v21, %v7468_v27 }
 0x58e   : > { %v7393_v60 = vpop.permute.xlu1 %7392 }
 0x58f   : > { %v12359_v1 = vadd.f32 %v12128_v14, %v7507_v22  ;;  %v7469_v55 = vadd.f32 %v7393_v60, %v7277_v58  ;;  %v7802_v58 = vld [vmem:[%s12171_s10 + $0x90] sm:$0xff] }
 0x590   : > { %v10056_v57 = vpop.eup %10055 }
 0x591   : > { %v10058_v62 = vpop.eup %10057  ;;  %v7672_v20 = vadd.f32 1.0, %v10056_v57  ;;  %v8548_v5 = vmul.f32 -1.442695, %v12359_v1  ;;  %v7508_v24 = vmul.f32 %v12355_v21, %v7469_v55 }
 0x592   : > { %v7766_v61 = vmul.f32 %v10058_v62, %v12311_v29 }
 0x593   : > { %10063 = vrcp.f32 %v7672_v20  ;;  %v12371_v14 = vadd.f32 %v12368_v4, %v7508_v24 }
 0x594   : > { %v10060_v7 = vpop.eup %10059  ;;  %v7830_v2 = vadd.f32 %v7798_v51, %v7766_v61  ;;  %10065 = vpow2.f32 %v8548_v5  ;;  %v7803_v61 = vld [vmem:[%s12171_s10 + $0x98] sm:$0xff] }
 0x595   : > { %v10062_v18 = vpop.eup %10061  ;;  %v7673_v9 = vadd.f32 1.0, %v10060_v7  ;;  %v8549_v10 = vmul.f32 -1.442695, %v12371_v14 }
 0x596   : > { %7863 = vst.msk [vmem:[%s12186_s13 + $0x70] sm:$0xff] %vm1359_vm3, %v7830_v2  ;;  %v7767_v29 = vmul.f32 %v10062_v18, %v12319_v41  ;;  %v7203_v39 = vpop.permute.xlu0 %7202 }
 0x597   : > { %10067 = vrcp.f32 %v7673_v9  ;;  %v7278_v25 = vadd.f32 %v7203_v39, %v7086_v16  ;;  %v7090_v9 = vld [vmem:[#allocation5 + $0x180] sm:$0xff]  ;;  %v7091_v16 = vld [vmem:[#allocation5 + $0x188] sm:$0xff] }
 0x598   : > { %v7831_v12 = vadd.f32 %v7799_v8, %v7767_v29  ;;  %10069 = vpow2.f32 %v8549_v10 }
 0x59a   : > { %7864 = vst.msk [vmem:[%s12186_s13 + $0x78] sm:$0xff] %vm1359_vm3, %v7831_v12  ;;  %v7395_v11 = vpop.permute.xlu0 %7394  ;;  %v7205_v17 = vpop.permute.xlu1 %7204 }
 0x59b   : > { %v7470_v23 = vadd.f32 %v7395_v11, %v7278_v25  ;;  %v7279_v37 = vadd.f32 %v7205_v17, %v7087_v38 }
 0x59d   : > { %v7509_v49 = vmul.f32 %v12355_v21, %v7470_v23 }
 0x59e   : > { %v7397_v26 = vpop.permute.xlu1 %7396 }
 0x59f   : > { %v12382_v41 = vadd.f32 %v12368_v4, %v7509_v49  ;;  %v7471_v28 = vadd.f32 %v7397_v26, %v7279_v37  ;;  %v7804_v49 = vld [vmem:[%s12171_s10 + $0xa0] sm:$0xff] }
 0x5a0   : > { %v10064_v30 = vpop.eup %10063 }
 0x5a1   : > { %v10066_v40 = vpop.eup %10065  ;;  %v7768_v52 = vmul.f32 %v10064_v30, %v12336_v44  ;;  %v8550_v3 = vmul.f32 -1.442695, %v12382_v41  ;;  %v7510_v43 = vmul.f32 %v12355_v21, %v7471_v28 }
 0x5a2   : > { %v7674_v42 = vadd.f32 1.0, %v10066_v40 }
 0x5a3   : > { %v7832_v59 = vadd.f32 %v7800_v32, %v7768_v52  ;;  %10071 = vpow2.f32 %v8550_v3  ;;  %v12389_v63 = vadd.f32 %v12368_v4, %v7510_v43  ;;  %v7805_v43 = vld [vmem:[%s12171_s10 + $0xa8] sm:$0xff] }
 0x5a4   : > { %v10068_v46 = vpop.eup %10067  ;;  %10073 = vrcp.f32 %v7674_v42 }
 0x5a5   : > { %v10070_v15 = vpop.eup %10069  ;;  %7865 = vst.msk [vmem:[%s12186_s13 + $0x80] sm:$0xff] %vm1359_vm3, %v7832_v59  ;;  %v7769_v33 = vmul.f32 %v10068_v46, %v12343_v45  ;;  %v8551_v44 = vmul.f32 -1.442695, %v12389_v63 }
 0x5a6   : > { %v7675_v36 = vadd.f32 1.0, %v10070_v15  ;;  %v7207_v47 = vpop.permute.xlu0 %7206 }
 0x5a7   : > { %v7833_v13 = vadd.f32 %v7801_v34, %v7769_v33  ;;  %10075 = vpow2.f32 %v8551_v44  ;;  %v7280_v56 = vadd.f32 %v7207_v47, %v7088_v0  ;;  %v7092_v33 = vld [vmem:[#allocation5 + $0x1a0] sm:$0xff]  ;;  %v7093_v0 = vld [vmem:[#allocation5 + $0x1a8] sm:$0xff] }
 0x5a8   : > { %10077 = vrcp.f32 %v7675_v36 }
 0x5a9   : > { %7866 = vst.msk [vmem:[%s12186_s13 + $0x88] sm:$0xff] %vm1359_vm3, %v7833_v13 }
 0x5aa   : > { %v7399_v54 = vpop.permute.xlu0 %7398  ;;  %v7209_v35 = vpop.permute.xlu1 %7208 }
 0x5ab   : > { %v7472_v19 = vadd.f32 %v7399_v54, %v7280_v56  ;;  %v7281_v48 = vadd.f32 %v7209_v35, %v7089_v50 }
 0x5ad   : > { %v7511_v31 = vmul.f32 %v12355_v21, %v7472_v19 }
 0x5ae   : > { %v7401_v45 = vpop.permute.xlu1 %7400 }
 0x5af   : > { %v12400_v6 = vadd.f32 %v12368_v4, %v7511_v31  ;;  %v7473_v27 = vadd.f32 %v7401_v45, %v7281_v48  ;;  %v7806_v48 = vld [vmem:[%s12171_s10 + $0xb0] sm:$0xff] }
 0x5b0   : > { %v10072_v53 = vpop.eup %10071 }
 0x5b1   : > { %v10074_v22 = vpop.eup %10073  ;;  %v7676_v60 = vadd.f32 1.0, %v10072_v53  ;;  %v8552_v55 = vmul.f32 -1.442695, %v12400_v6  ;;  %v7512_v57 = vmul.f32 %v12355_v21, %v7473_v27 }
 0x5b2   : > { %v7770_v62 = vmul.f32 %v10074_v22, %v12359_v1 }
 0x5b3   : > { %10079 = vrcp.f32 %v7676_v60  ;;  %v12407_v51 = vadd.f32 %v12368_v4, %v7512_v57 }
 0x5b4   : > { %v10076_v20 = vpop.eup %10075  ;;  %v7834_v5 = vadd.f32 %v7802_v58, %v7770_v62  ;;  %10081 = vpow2.f32 %v8552_v55  ;;  %v7807_v62 = vld [vmem:[%s12171_s10 + $0xb8] sm:$0xff] }
 0x5b5   : > { %v10078_v24 = vpop.eup %10077  ;;  %v7677_v7 = vadd.f32 1.0, %v10076_v20  ;;  %v8553_v2 = vmul.f32 -1.442695, %v12407_v51 }
 0x5b6   : > { %7867 = vst.msk [vmem:[%s12186_s13 + $0x90] sm:$0xff] %vm1359_vm3, %v7834_v5  ;;  %v7771_v18 = vmul.f32 %v10078_v24, %v12371_v14  ;;  %v7211_v8 = vpop.permute.xlu0 %7210 }
 0x5b7   : > { %10083 = vrcp.f32 %v7677_v7  ;;  %v7282_v10 = vadd.f32 %v7211_v8, %v7090_v9  ;;  %v7094_v7 = vld [vmem:[#allocation5 + $0x1c0] sm:$0xff]  ;;  %v7095_v9 = vld [vmem:[#allocation5 + $0x1c8] sm:$0xff] }
 0x5b8   : > { %v7835_v1 = vadd.f32 %v7803_v61, %v7771_v18  ;;  %10085 = vpow2.f32 %v8553_v2 }
 0x5ba   : > { %7868 = vst.msk [vmem:[%s12186_s13 + $0x98] sm:$0xff] %vm1359_vm3, %v7835_v1  ;;  %v7403_v29 = vpop.permute.xlu0 %7402  ;;  %v7213_v39 = vpop.permute.xlu1 %7212 }
 0x5bb   : > { %v7474_v12 = vadd.f32 %v7403_v29, %v7282_v10  ;;  %v7283_v11 = vadd.f32 %v7213_v39, %v7091_v16 }
 0x5bd   : > { %v7513_v25 = vmul.f32 %v12355_v21, %v7474_v12 }
 0x5be   : > { %v7405_v17 = vpop.permute.xlu1 %7404 }
 0x5bf   : > { %v12418_v14 = vadd.f32 %v12368_v4, %v7513_v25  ;;  %v7475_v23 = vadd.f32 %v7405_v17, %v7283_v11  ;;  %v7808_v25 = vld [vmem:[%s12171_s10 + $0xc0] sm:$0xff] }
 0x5c0   : > { %v10080_v38 = vpop.eup %10079 }
 0x5c1   : > { %v10082_v37 = vpop.eup %10081  ;;  %v7772_v26 = vmul.f32 %v10080_v38, %v12382_v41  ;;  %v8554_v28 = vmul.f32 -1.442695, %v12418_v14  ;;  %v7514_v30 = vmul.f32 %v12355_v21, %v7475_v23 }
 0x5c2   : > { %v7678_v32 = vadd.f32 1.0, %v10082_v37 }
 0x5c3   : > { %v7836_v40 = vadd.f32 %v7804_v49, %v7772_v26  ;;  %10087 = vpow2.f32 %v8554_v28  ;;  %v12425_v52 = vadd.f32 %v12368_v4, %v7514_v30  ;;  %v7809_v30 = vld [vmem:[%s12171_s10 + $0xc8] sm:$0xff] }
 0x5c4   : > { %v10084_v3 = vpop.eup %10083  ;;  %10089 = vrcp.f32 %v7678_v32 }
 0x5c5   : > { %v10086_v42 = vpop.eup %10085  ;;  %7869 = vst.msk [vmem:[%s12186_s13 + $0xa0] sm:$0xff] %vm1359_vm3, %v7836_v40  ;;  %v7773_v59 = vmul.f32 %v10084_v3, %v12389_v63  ;;  %v8555_v41 = vmul.f32 -1.442695, %v12425_v52 }
 0x5c6   : > { %v7679_v46 = vadd.f32 1.0, %v10086_v42  ;;  %v7215_v34 = vpop.permute.xlu0 %7214 }
 0x5c7   : > { %v7837_v15 = vadd.f32 %v7805_v43, %v7773_v59  ;;  %10091 = vpow2.f32 %v8555_v41  ;;  %v7284_v44 = vadd.f32 %v7215_v34, %v7092_v33  ;;  %v7096_v59 = vld [vmem:[#allocation5 + $0x1e0] sm:$0xff]  ;;  %v7097_v33 = vld [vmem:[#allocation5 + $0x1e8] sm:$0xff] }
 0x5c8   : > { %10093 = vrcp.f32 %v7679_v46 }
 0x5c9   : > { %7870 = vst.msk [vmem:[%s12186_s13 + $0xa8] sm:$0xff] %vm1359_vm3, %v7837_v15 }
 0x5ca   : > { %v7407_v36 = vpop.permute.xlu0 %7406  ;;  %v7217_v47 = vpop.permute.xlu1 %7216 }
 0x5cb   : > { %v7476_v13 = vadd.f32 %v7407_v36, %v7284_v44  ;;  %v7285_v54 = vadd.f32 %v7217_v47, %v7093_v0 }
 0x5cd   : > { %v7515_v56 = vmul.f32 %v12355_v21, %v7476_v13 }
 0x5ce   : > { %v7409_v63 = vpop.permute.xlu1 %7408 }
 0x5cf   : > { %v12436_v35 = vadd.f32 %v12368_v4, %v7515_v56  ;;  %v7477_v19 = vadd.f32 %v7409_v63, %v7285_v54  ;;  %v7810_v54 = vld [vmem:[%s12171_s10 + $0xd0] sm:$0xff] }
 0x5d0   : > { %v10088_v50 = vpop.eup %10087 }
 0x5d1   : > { %v10090_v31 = vpop.eup %10089  ;;  %v7680_v45 = vadd.f32 1.0, %v10088_v50  ;;  %v8556_v27 = vmul.f32 -1.442695, %v12436_v35  ;;  %v7516_v53 = vmul.f32 %v12355_v21, %v7477_v19 }
 0x5d2   : > { %v7774_v22 = vmul.f32 %v10090_v31, %v12400_v6 }
 0x5d3   : > { %10095 = vrcp.f32 %v7680_v45  ;;  %v12443_v58 = vadd.f32 %v12368_v4, %v7516_v53 }
 0x5d4   : > { %v10092_v60 = vpop.eup %10091  ;;  %v7838_v55 = vadd.f32 %v7806_v48, %v7774_v22  ;;  %10097 = vpow2.f32 %v8556_v27  ;;  %v7811_v22 = vld [vmem:[%s12171_s10 + $0xd8] sm:$0xff] }
 0x5d5   : > { %v10094_v57 = vpop.eup %10093  ;;  %v7681_v20 = vadd.f32 1.0, %v10092_v60  ;;  %v8557_v5 = vmul.f32 -1.442695, %v12443_v58 }
 0x5d6   : > { %7871 = vst.msk [vmem:[%s12186_s13 + $0xb0] sm:$0xff] %vm1359_vm3, %v7838_v55  ;;  %v7775_v24 = vmul.f32 %v10094_v57, %v12407_v51  ;;  %v7219_v61 = vpop.permute.xlu0 %7218 }
 0x5d7   : > { %10099 = vrcp.f32 %v7681_v20  ;;  %v7286_v2 = vadd.f32 %v7219_v61, %v7094_v7 }
 0x5d8   : > { %v7839_v6 = vadd.f32 %v7807_v62, %v7775_v24  ;;  %10101 = vpow2.f32 %v8557_v5 }
 0x5da   : > { %7872 = vst.msk [vmem:[%s12186_s13 + $0xb8] sm:$0xff] %vm1359_vm3, %v7839_v6  ;;  %v7411_v18 = vpop.permute.xlu0 %7410  ;;  %v7221_v8 = vpop.permute.xlu1 %7220  ;;  %v7813_v6 = vld [vmem:[%s12171_s10 + $0xe8] sm:$0xff] }
 0x5db   : > { %v7478_v1 = vadd.f32 %v7411_v18, %v7286_v2  ;;  %v7287_v29 = vadd.f32 %v7221_v8, %v7095_v9 }
 0x5dd   : > { %v7517_v10 = vmul.f32 %v12355_v21, %v7478_v1  ;;  %v7814_v1 = vld [vmem:[%s12171_s10 + $0xf0] sm:$0xff] }
 0x5de   : > { %v7413_v39 = vpop.permute.xlu1 %7412 }
 0x5df   : > { %v7556_v51 = vadd.f32 %v12368_v4, %v7517_v10  ;;  %v7479_v12 = vadd.f32 %v7413_v39, %v7287_v29  ;;  %v7815_v39 = vld [vmem:[%s12171_s10 + $0xf8] sm:$0xff] }
 0x5e0   : > { %v10096_v16 = vpop.eup %10095 }
 0x5e1   : > { %v10098_v11 = vpop.eup %10097  ;;  %v7776_v17 = vmul.f32 %v10096_v16, %v12418_v14  ;;  %v8558_v23 = vmul.f32 -1.442695, %v7556_v51  ;;  %v7518_v38 = vmul.f32 %v12355_v21, %v7479_v12 }
 0x5e2   : > { %v7682_v49 = vadd.f32 1.0, %v10098_v11 }
 0x5e3   : > { %v7840_v37 = vadd.f32 %v7808_v25, %v7776_v17  ;;  %10103 = vpow2.f32 %v8558_v23  ;;  %v7557_v26 = vadd.f32 %v12368_v4, %v7518_v38 }
 0x5e4   : > { %v10100_v28 = vpop.eup %10099  ;;  %10105 = vrcp.f32 %v7682_v49 }
 0x5e5   : > { %v10102_v32 = vpop.eup %10101  ;;  %7873 = vst.msk [vmem:[%s12186_s13 + $0xc0] sm:$0xff] %vm1359_vm3, %v7840_v37  ;;  %v7777_v40 = vmul.f32 %v10100_v28, %v12425_v52  ;;  %v8559_v3 = vmul.f32 -1.442695, %v7557_v26 }
 0x5e6   : > { %v7683_v43 = vadd.f32 1.0, %v10102_v32  ;;  %v7223_v14 = vpop.permute.xlu0 %7222 }
 0x5e7   : > { %v7841_v42 = vadd.f32 %v7809_v30, %v7777_v40  ;;  %10107 = vpow2.f32 %v8559_v3  ;;  %v7288_v41 = vadd.f32 %v7223_v14, %v7096_v59 }
 0x5e8   : > { %10109 = vrcp.f32 %v7683_v43 }
 0x5e9   : > { %7874 = vst.msk [vmem:[%s12186_s13 + $0xc8] sm:$0xff] %vm1359_vm3, %v7841_v42 }
 0x5ea   : > { %v7415_v46 = vpop.permute.xlu0 %7414  ;;  %v7225_v34 = vpop.permute.xlu1 %7224 }
 0x5eb   : > { %v7480_v15 = vadd.f32 %v7415_v46, %v7288_v41  ;;  %v7289_v36 = vadd.f32 %v7225_v34, %v7097_v33 }
 0x5ed   : > { %v7519_v44 = vmul.f32 %v12355_v21, %v7480_v15 }
 0x5ee   : > { %v7417_v47 = vpop.permute.xlu1 %7416 }
 0x5ef   : > { %v7558_v52 = vadd.f32 %v12368_v4, %v7519_v44  ;;  %v7481_v13 = vadd.f32 %v7417_v47, %v7289_v36 }
 0x5f0   : > { %v10104_v0 = vpop.eup %10103 }
 0x5f1   : > { %v10106_v56 = vpop.eup %10105  ;;  %v7684_v63 = vadd.f32 1.0, %v10104_v0  ;;  %v8560_v19 = vmul.f32 -1.442695, %v7558_v52  ;;  %v7520_v50 = vmul.f32 %v12355_v21, %v7481_v13 }
 0x5f2   : > { %v7778_v31 = vmul.f32 %v10106_v56, %v12436_v35  ;;  %v7812_v35 = vld [vmem:[%s12171_s10 + $0xe0] sm:$0xff] }
 0x5f3   : > { %10111 = vrcp.f32 %v7684_v63  ;;  %v7559_v48 = vadd.f32 %v12368_v4, %v7520_v50 }
 0x5f4   : > { %v10108_v45 = vpop.eup %10107  ;;  %v7842_v27 = vadd.f32 %v7810_v54, %v7778_v31  ;;  %10113 = vpow2.f32 %v8560_v19 }
 0x5f5   : > { %v10110_v53 = vpop.eup %10109  ;;  %v7685_v60 = vadd.f32 1.0, %v10108_v45  ;;  %v8561_v55 = vmul.f32 -1.442695, %v7559_v48 }
 0x5f6   : > { %7875 = vst.msk [vmem:[%s12186_s13 + $0xd0] sm:$0xff] %vm1359_vm3, %v7842_v27  ;;  %v7779_v21 = vmul.f32 %v10110_v53, %v12443_v58 }
 0x5f7   : > { %10115 = vrcp.f32 %v7685_v60 }
 0x5f8   : > { %v7843_v57 = vadd.f32 %v7811_v22, %v7779_v21  ;;  %10117 = vpow2.f32 %v8561_v55 }
 0x5fa   : > { %7876 = vst.msk [vmem:[%s12186_s13 + $0xd8] sm:$0xff] %vm1359_vm3, %v7843_v57 }
 0x600   : > { %v10112_v4 = vpop.eup %10111 }
 0x601   : > { %v10114_v62 = vpop.eup %10113  ;;  %v7780_v20 = vmul.f32 %v10112_v4, %v7556_v51 }
 0x602   : > { %v7686_v5 = vadd.f32 1.0, %v10114_v62 }
 0x603   : > { %v7844_v24 = vadd.f32 %v7812_v35, %v7780_v20 }
 0x604   : > { %v10116_v61 = vpop.eup %10115  ;;  %10119 = vrcp.f32 %v7686_v5 }
 0x605   : > { %v10118_v7 = vpop.eup %10117  ;;  %7877 = vst.msk [vmem:[%s12186_s13 + $0xe0] sm:$0xff] %vm1359_vm3, %v7844_v24  ;;  %v7781_v58 = vmul.f32 %v10116_v61, %v7557_v26 }
 0x606   : > { %v7687_v2 = vadd.f32 1.0, %v10118_v7 }
 0x607   : > { %v7845_v18 = vadd.f32 %v7813_v6, %v7781_v58 }
 0x608   : > { %10121 = vrcp.f32 %v7687_v2 }
 0x609   : > { %7878 = vst.msk [vmem:[%s12186_s13 + $0xe8] sm:$0xff] %vm1359_vm3, %v7845_v18 }
 0x611   : > { %v10120_v8 = vpop.eup %10119 }
 0x612   : > { %v7782_v9 = vmul.f32 %v10120_v8, %v7558_v52 }
 0x614   : > { %v7846_v10 = vadd.f32 %v7814_v1, %v7782_v9 }
 0x615   : > { %v10122_v29 = vpop.eup %10121 }
 0x616   : > { %7879 = vst.msk [vmem:[%s12186_s13 + $0xf0] sm:$0xff] %vm1359_vm3, %v7846_v10  ;;  %v7783_v51 = vmul.f32 %v10122_v29, %v7559_v48 }
 0x618   : > { %v7847_v12 = vadd.f32 %v7815_v39, %v7783_v51 }
 0x61a   : > { %7880 = vst.msk [vmem:[%s12186_s13 + $0xf8] sm:$0xff] %vm1359_vm3, %v7847_v12 }
 0x61b PF: > { %s18_s29 = sadd.s32 1, %s10151_s29   ;;  %s12516_s27 = smov %s10147_s28 }
 0x61c   : > { %p15_p5 = scmp.ge.s32.totalorder %s18_s29, 4   ;;  %s12517_s28 = smov %s12519_s30 }
 0x61e   :  { %17 = sbr.rel (!%p15_p5) target bundleno = 2 (0x2), region = 107 }

</bundles_post_ra>
